<compile_context>
chip_gen: v7x
topology: tpu7x:2x2x1
jax: 0.10.0
libtpu: 0.0.40
codegen_flags: <defaults>
</compile_context>

<pallas_src>
import functools

import jax
import jax.numpy as jnp
from jax.experimental import pallas as pl
from jax.experimental.pallas import tpu as pltpu


def _round_up(x, m):
    return (x + m - 1) // m * m


_VMEM_LIMIT = 32 * 1024 * 1024  # above v5e's 16 MiB scoped default, safe on v7x


# ----------------------------------------------------------------------------
# Fused conv-GEMM: tiled matmul + bias epilogue + InstanceNorm statistics
# ----------------------------------------------------------------------------
def _conv_gemm_in_kernel(a_ref, b_ref, bias_ref,
                         o_ref, mean_ref, rstd_ref,
                         acc_ref, sum_ref, sq_ref, *, eps, inv_n):
    """grid = (batch, Cout-tiles, spatial-tiles, K-tiles).

    a_ref   : (tm, tk)  weights (bf16)
    b_ref   : (tk, tn)  im2col patches for this sample (bf16, batch dim squeezed)
    bias_ref: (tm, 1)   f32
    o_ref   : (tm, tn)  conv output (+bias)
    mean_ref/rstd_ref: (tm, 1) per-(channel, sample) InstanceNorm statistics
    """
    j = pl.program_id(2)          # spatial-tile index
    k = pl.program_id(3)          # K-tile index
    nj = pl.num_programs(2)
    nk = pl.num_programs(3)

    @pl.when(k == 0)
    def _():
        acc_ref[...] = jnp.zeros_like(acc_ref)

    @pl.when(jnp.logical_and(j == 0, k == 0))
    def _():
        sum_ref[...] = jnp.zeros_like(sum_ref)
        sq_ref[...] = jnp.zeros_like(sq_ref)

    acc_ref[...] += jnp.dot(a_ref[...], b_ref[...],
                            preferred_element_type=jnp.float32)

    @pl.when(k == nk - 1)
    def _():
        acc = acc_ref[...]
        # Stats on the pre-bias accumulator: padded spatial columns are exactly 0
        # (B was zero-padded), so they contribute nothing; bias is folded into the
        # mean analytically below (variance is shift-invariant).
        sum_ref[...] += jnp.sum(acc, axis=-1, keepdims=True)
        sq_ref[...] += jnp.sum(acc * acc, axis=-1, keepdims=True)
        o_ref[...] = (acc + bias_ref[...]).astype(o_ref.dtype)

    @pl.when(jnp.logical_and(j == nj - 1, k == nk - 1))
    def _():
        mean_acc = sum_ref[...] * inv_n
        var = sq_ref[...] * inv_n - mean_acc * mean_acc   # biased (InstanceNorm3d)
        mean_ref[...] = mean_acc + bias_ref[...]
        rstd_ref[...] = jax.lax.rsqrt(var + eps)


def _inorm_apply_kernel(x_ref, mean_ref, rstd_ref, o_ref, *, relu):
    x = x_ref[...].astype(jnp.float32)                    # f32 VPU math (v5e-safe)
    y = (x - mean_ref[...]) * rstd_ref[...]
    if relu:
        y = jnp.maximum(y, 0.0)
    o_ref[...] = y.astype(o_ref.dtype)


# ----------------------------------------------------------------------------
# 3-D conv (+ optional InstanceNorm + ReLU) block, batch-major NCDHW layout
# ----------------------------------------------------------------------------
def conv3d_block(x, w, b, *, stride=1, pad=0, norm_relu=True,
                 out_dtype=jnp.bfloat16, eps=1e-5,
                 tm_max=128, tn_max=1024, tk_max=512):
    """x: (N, Cin, D, H, W), w: (Cout, Cin, k, k, k), b: (Cout,).

    Returns (N, Cout, Do, Ho, Wo).  If norm_relu, output is InstanceNorm+ReLU of
    the conv (bf16); otherwise the raw conv+bias output in `out_dtype`.
    """
    N, Cin, D, H, W = x.shape
    Cout, Cin2, ks, _, _ = w.shape
    assert Cin == Cin2
    Do = (D + 2 * pad - ks) // stride + 1
    Ho = (H + 2 * pad - ks) // stride + 1
    Wo = (W + 2 * pad - ks) // stride + 1
    S = Do * Ho * Wo
    K = Cin * ks ** 3

    # ---- im2col (per sample) -> B: (N, K, S), K ordering = (cin, kd, kh, kw) ----
    if ks == 1 and pad == 0 and stride == 1:
        B_mat = x.reshape(N, Cin, S)
    else:
        xp = jnp.pad(x, ((0, 0), (0, 0), (pad, pad), (pad, pad), (pad, pad)))
        cols = []
        for kd in range(ks):
            for kh in range(ks):
                for kw in range(ks):
                    cols.append(xp[:, :,
                                   kd:kd + Do * stride:stride,
                                   kh:kh + Ho * stride:stride,
                                   kw:kw + Wo * stride:stride])
        B_mat = jnp.stack(cols, axis=2).reshape(N, K, S)

    A_mat = w.reshape(Cout, K)

    # ---- tiling / padding (MXU-friendly, lane-dense stores) ----
    tm = min(tm_max, _round_up(Cout, 16))
    tn = min(tn_max, _round_up(S, 128))
    tk = min(tk_max, _round_up(K, 128))
    Mp, Kp, Sp = _round_up(Cout, tm), _round_up(K, tk), _round_up(S, tn)

    a_p = jnp.pad(A_mat.astype(jnp.bfloat16), ((0, Mp - Cout), (0, Kp - K)))
    b_p = jnp.pad(B_mat.astype(jnp.bfloat16), ((0, 0), (0, Kp - K), (0, Sp - S)))
    bias_p = jnp.pad(b.reshape(Cout, 1).astype(jnp.float32), ((0, Mp - Cout), (0, 0)))

    grid = (N, Mp // tm, Sp // tn, Kp // tk)

    out_p, mean_p, rstd_p = pl.pallas_call(
        functools.partial(_conv_gemm_in_kernel, eps=eps, inv_n=1.0 / S),
        out_shape=(jax.ShapeDtypeStruct((N, Mp, Sp), out_dtype),
                   jax.ShapeDtypeStruct((N, Mp, 1), jnp.float32),
                   jax.ShapeDtypeStruct((N, Mp, 1), jnp.float32)),
        grid_spec=pltpu.PrefetchScalarGridSpec(
            num_scalar_prefetch=0,
            grid=grid,
            in_specs=[
                pl.BlockSpec((tm, tk), lambda n, i, j, kb: (i, kb)),
                pl.BlockSpec((None, tk, tn), lambda n, i, j, kb: (n, kb, j)),
                pl.BlockSpec((tm, 1), lambda n, i, j, kb: (i, 0)),
            ],
            out_specs=[
                pl.BlockSpec((None, tm, tn), lambda n, i, j, kb: (n, i, j)),
                pl.BlockSpec((None, tm, 1), lambda n, i, j, kb: (n, i, 0)),
                pl.BlockSpec((None, tm, 1), lambda n, i, j, kb: (n, i, 0)),
            ],
            scratch_shapes=[pltpu.VMEM((tm, tn), jnp.float32),
                            pltpu.VMEM((tm, 1), jnp.float32),
                            pltpu.VMEM((tm, 1), jnp.float32)],
        ),
        compiler_params=pltpu.CompilerParams(
            dimension_semantics=("parallel", "parallel", "arbitrary", "arbitrary"),
            vmem_limit_bytes=_VMEM_LIMIT,
        ),
    )(a_p, b_p, bias_p)

    if norm_relu:
        y_p = pl.pallas_call(
            functools.partial(_inorm_apply_kernel, relu=True),
            out_shape=jax.ShapeDtypeStruct((N, Mp, Sp), jnp.bfloat16),
            grid_spec=pltpu.PrefetchScalarGridSpec(
                num_scalar_prefetch=0,
                grid=(N, Mp // tm, Sp // tn),
                in_specs=[
                    pl.BlockSpec((None, tm, tn), lambda n, i, j: (n, i, j)),
                    pl.BlockSpec((None, tm, 1), lambda n, i, j: (n, i, 0)),
                    pl.BlockSpec((None, tm, 1), lambda n, i, j: (n, i, 0)),
                ],
                out_specs=pl.BlockSpec((None, tm, tn), lambda n, i, j: (n, i, j)),
            ),
            compiler_params=pltpu.CompilerParams(
                dimension_semantics=("parallel", "parallel", "parallel"),
                vmem_limit_bytes=_VMEM_LIMIT,
            ),
        )(out_p, mean_p, rstd_p)
    else:
        y_p = out_p

    return y_p[:, :Cout, :S].reshape(N, Cout, Do, Ho, Wo)


# ----------------------------------------------------------------------------
# Glue: nearest upsample (broadcast+reshape, no repeats)
# ----------------------------------------------------------------------------
def upsample_nearest(x, factor=2):
    N, C, D, H, W = x.shape
    y = jnp.broadcast_to(
        x[:, :, :, None, :, None, :, None],
        (N, C, D, factor, H, factor, W, factor))
    return y.reshape(N, C, D * factor, H * factor, W * factor)


# ----------------------------------------------------------------------------
# Parameters & forward pass
# ----------------------------------------------------------------------------
def init_conv(key, cout, cin, k):
    fan_in = cin * k ** 3
    w = jax.random.normal(key, (cout, cin, k, k, k), jnp.float32) / jnp.sqrt(
        jnp.float32(fan_in))
    b = jnp.zeros((cout,), jnp.float32)
    return w, b


def make_params(key, in_ch=1, num_classes=3):
    filters = [32, 64, 128, 256, 512]
    keys = jax.random.split(key, 6)
    return {
        "enc1": init_conv(keys[0], filters[0], in_ch, 3),        # stride 2
        "enc2": init_conv(keys[1], filters[1], filters[0], 3),   # stride 2
        "enc3": init_conv(keys[2], filters[2], filters[1], 3),   # stride 1
        "low_proj": init_conv(keys[3], 48, filters[0], 1),
        "fuse": init_conv(keys[4], filters[1], filters[2] + 48, 3),
        "cls": init_conv(keys[5], num_classes, filters[1], 1),
    }


def gnet_forward(params, x):
    # activations stay batch-major (N, C, D, H, W), bf16 between Pallas kernels
    # ---- backbone (xception-style strided encoder) ----
    e1 = conv3d_block(x, *params["enc1"], stride=2, pad=1)    # low-level features
    e2 = conv3d_block(e1, *params["enc2"], stride=2, pad=1)
    e3 = conv3d_block(e2, *params["enc3"], stride=1, pad=1)   # high-level features

    # ---- decoder ----
    low = conv3d_block(e1, *params["low_proj"], stride=1, pad=0)
    hi = upsample_nearest(e3, 2)
    cat = jnp.concatenate([hi, low], axis=1)                  # channel axis
    fused = conv3d_block(cat, *params["fuse"], stride=1, pad=1)
    logits = conv3d_block(fused, *params["cls"], stride=1, pad=0,
                          norm_relu=False, out_dtype=jnp.float32)
    return upsample_nearest(logits, 2)                        # (N, num_classes, D, H, W)


if __name__ == "__main__":
    key = jax.random.PRNGKey(0)
    pkey, xkey = jax.random.split(key)
    params = make_params(pkey, in_ch=1, num_classes=3)
    x = jax.random.normal(xkey, (2, 1, 8, 8, 8), jnp.float32)   # (N, C, D, H, W)

    fwd = jax.jit(gnet_forward)
    y = jax.block_until_ready(fwd(params, x))
    assert y.shape == (2, 3, 8, 8, 8), y.shape
    assert jnp.isfinite(y).all()
    print("KERNEL_OK")
</pallas_src>

<mosaic_0001>
module attributes {stable_mosaic.version = 11 : i64} {
  func.func @_inorm_apply_kernel(%arg0: i32, %arg1: i32, %arg2: i32, %arg3: memref<1x32x128xbf16, #tpu.memory_space<vmem>>, %arg4: memref<1x32x1xf32, #tpu.memory_space<vmem>>, %arg5: memref<1x32x1xf32, #tpu.memory_space<vmem>>, %arg6: memref<1x32x128xbf16, #tpu.memory_space<vmem>>) attributes {dimension_semantics = [#tpu.dimension_semantics<parallel>, #tpu.dimension_semantics<parallel>, #tpu.dimension_semantics<parallel>], iteration_bounds = array<i64: 2, 1, 1>, scalar_prefetch = 0 : i64, scratch_operands = 0 : i64, tpu.core_type = #tpu.core_type<tc>, window_params = [{transform_indices = @transform_0, window_bounds = array<i64: 1, 32, 128>}, {transform_indices = @transform_1, window_bounds = array<i64: 1, 32, 1>}, {transform_indices = @transform_2, window_bounds = array<i64: 1, 32, 1>}, {transform_indices = @transform_3, window_bounds = array<i64: 1, 32, 128>}]} {
    %c0 = arith.constant 0 : index
    %c0_0 = arith.constant 0 : index
    %c0_1 = arith.constant 0 : index
    %0 = vector.load %arg3[%c0, %c0_0, %c0_1] : memref<1x32x128xbf16, #tpu.memory_space<vmem>>, vector<1x32x128xbf16>
    %1 = vector.shape_cast %0 : vector<1x32x128xbf16> to vector<32x128xbf16>
    %2 = arith.extf %1 : vector<32x128xbf16> to vector<32x128xf32>
    %c0_2 = arith.constant 0 : index
    %c0_3 = arith.constant 0 : index
    %c0_4 = arith.constant 0 : index
    %3 = vector.load %arg4[%c0_2, %c0_3, %c0_4] : memref<1x32x1xf32, #tpu.memory_space<vmem>>, vector<1x32x1xf32>
    %4 = vector.shape_cast %3 : vector<1x32x1xf32> to vector<32x1xf32>
    %5 = vector.broadcast %4 : vector<32x1xf32> to vector<32x128xf32>
    %6 = arith.subf %2, %5 : vector<32x128xf32>
    %c0_5 = arith.constant 0 : index
    %c0_6 = arith.constant 0 : index
    %c0_7 = arith.constant 0 : index
    %7 = vector.load %arg5[%c0_5, %c0_6, %c0_7] : memref<1x32x1xf32, #tpu.memory_space<vmem>>, vector<1x32x1xf32>
    %8 = vector.shape_cast %7 : vector<1x32x1xf32> to vector<32x1xf32>
    %9 = vector.broadcast %8 : vector<32x1xf32> to vector<32x128xf32>
    %10 = arith.mulf %6, %9 : vector<32x128xf32>
    %cst = arith.constant 0.000000e+00 : f32
    %11 = vector.broadcast %cst : f32 to vector<32x128xf32>
    %12 = arith.maximumf %10, %11 : vector<32x128xf32>
    %13 = arith.truncf %12 : vector<32x128xf32> to vector<32x128xbf16>
    %c0_8 = arith.constant 0 : index
    %c0_9 = arith.constant 0 : index
    %c0_10 = arith.constant 0 : index
    %14 = vector.load %arg6[%c0_8, %c0_9, %c0_10] : memref<1x32x128xbf16, #tpu.memory_space<vmem>>, vector<1x32x128xbf16>
    %15 = vector.shape_cast %14 : vector<1x32x128xbf16> to vector<32x128xbf16>
    %16 = vector.shape_cast %13 : vector<32x128xbf16> to vector<1x32x128xbf16>
    tpu.vector_store %arg6[%c0_8, %c0_9, %c0_10], %16 {strides = array<i32>} : memref<1x32x128xbf16, #tpu.memory_space<vmem>>, vector<1x32x128xbf16>,
    return
  }
  func.func @transform_0(%arg0: i32, %arg1: i32, %arg2: i32) -> (i32, i32, i32) {
    %c0_i32 = arith.constant 0 : i32
    return %arg0, %arg1, %arg2 : i32, i32, i32
  }
  func.func @transform_1(%arg0: i32, %arg1: i32, %arg2: i32) -> (i32, i32, i32) {
    %c0_i32 = arith.constant 0 : i32
    %c0_i32_0 = arith.constant 0 : i32
    return %arg0, %arg1, %c0_i32 : i32, i32, i32
  }
  func.func @transform_2(%arg0: i32, %arg1: i32, %arg2: i32) -> (i32, i32, i32) {
    %c0_i32 = arith.constant 0 : i32
    %c0_i32_0 = arith.constant 0 : i32
    return %arg0, %arg1, %c0_i32 : i32, i32, i32
  }
  func.func @transform_3(%arg0: i32, %arg1: i32, %arg2: i32) -> (i32, i32, i32) {
    %c0_i32 = arith.constant 0 : i32
    return %arg0, %arg1, %arg2 : i32, i32, i32
  }
}

module attributes {stable_mosaic.version = 11 : i64} {
  func.func @_conv_gemm_in_kernel(%arg0: i32, %arg1: i32, %arg2: i32, %arg3: i32, %arg4: memref<32x128xbf16, #tpu.memory_space<vmem>>, %arg5: memref<1x128x128xbf16, #tpu.memory_space<vmem>>, %arg6: memref<32x1xf32, #tpu.memory_space<vmem>>, %arg7: memref<1x32x128xbf16, #tpu.memory_space<vmem>>, %arg8: memref<1x32x1xf32, #tpu.memory_space<vmem>>, %arg9: memref<1x32x1xf32, #tpu.memory_space<vmem>>, %arg10: memref<32x128xf32, #tpu.memory_space<vmem>>, %arg11: memref<32x1xf32, #tpu.memory_space<vmem>>, %arg12: memref<32x1xf32, #tpu.memory_space<vmem>>) attributes {dimension_semantics = [#tpu.dimension_semantics<parallel>, #tpu.dimension_semantics<parallel>, #tpu.dimension_semantics<arbitrary>, #tpu.dimension_semantics<arbitrary>], iteration_bounds = array<i64: 2, 1, 1, 1>, scalar_prefetch = 0 : i64, scratch_operands = 3 : i64, tpu.core_type = #tpu.core_type<tc>, window_params = [{transform_indices = @transform_0, window_bounds = array<i64: 32, 128>}, {transform_indices = @transform_1, window_bounds = array<i64: 1, 128, 128>}, {transform_indices = @transform_2, window_bounds = array<i64: 32, 1>}, {transform_indices = @transform_3, window_bounds = array<i64: 1, 32, 128>}, {transform_indices = @transform_4, window_bounds = array<i64: 1, 32, 1>}, {transform_indices = @transform_5, window_bounds = array<i64: 1, 32, 1>}]} {
    %c0_i32 = arith.constant 0 : i32
    %0 = arith.cmpi eq, %arg3, %c0_i32 : i32
    %1 = arith.extui %0 : i1 to i32
    %c0_i32_0 = arith.constant 0 : i32
    %2 = arith.cmpi ne, %1, %c0_i32_0 : i32
    scf.if %2 {
      %cst_17 = arith.constant 0.000000e+00 : f32
      %23 = vector.broadcast %cst_17 : f32 to vector<32x128xf32>
      %c0_18 = arith.constant 0 : index
      %c0_19 = arith.constant 0 : index
      %24 = vector.load %arg10[%c0_18, %c0_19] : memref<32x128xf32, #tpu.memory_space<vmem>>, vector<32x128xf32>
      tpu.vector_store %arg10[%c0_18, %c0_19], %23 {strides = array<i32>} : memref<32x128xf32, #tpu.memory_space<vmem>>, vector<32x128xf32>,
    } else {
    }
    %c0_i32_1 = arith.constant 0 : i32
    %3 = arith.cmpi eq, %arg2, %c0_i32_1 : i32
    %c0_i32_2 = arith.constant 0 : i32
    %4 = arith.cmpi eq, %arg3, %c0_i32_2 : i32
    %5 = arith.andi %3, %4 : i1
    %6 = arith.extui %5 : i1 to i32
    %c0_i32_3 = arith.constant 0 : i32
    %7 = arith.cmpi ne, %6, %c0_i32_3 : i32
    scf.if %7 {
      %cst_17 = arith.constant 0.000000e+00 : f32
      %23 = vector.broadcast %cst_17 : f32 to vector<32x1xf32>
      %c0_18 = arith.constant 0 : index
      %c0_19 = arith.constant 0 : index
      %24 = vector.load %arg11[%c0_18, %c0_19] : memref<32x1xf32, #tpu.memory_space<vmem>>, vector<32x1xf32>
      tpu.vector_store %arg11[%c0_18, %c0_19], %23 {strides = array<i32>} : memref<32x1xf32, #tpu.memory_space<vmem>>, vector<32x1xf32>,
      %cst_20 = arith.constant 0.000000e+00 : f32
      %25 = vector.broadcast %cst_20 : f32 to vector<32x1xf32>
      %c0_21 = arith.constant 0 : index
      %c0_22 = arith.constant 0 : index
      %26 = vector.load %arg12[%c0_21, %c0_22] : memref<32x1xf32, #tpu.memory_space<vmem>>, vector<32x1xf32>
      tpu.vector_store %arg12[%c0_21, %c0_22], %25 {strides = array<i32>} : memref<32x1xf32, #tpu.memory_space<vmem>>, vector<32x1xf32>,
    } else {
    }
    %c0 = arith.constant 0 : index
    %c0_4 = arith.constant 0 : index
    %8 = vector.load %arg10[%c0, %c0_4] : memref<32x128xf32, #tpu.memory_space<vmem>>, vector<32x128xf32>
    %c0_5 = arith.constant 0 : index
    %c0_6 = arith.constant 0 : index
    %9 = vector.load %arg4[%c0_5, %c0_6] : memref<32x128xbf16, #tpu.memory_space<vmem>>, vector<32x128xbf16>
    %c0_7 = arith.constant 0 : index
    %c0_8 = arith.constant 0 : index
    %c0_9 = arith.constant 0 : index
    %10 = vector.load %arg5[%c0_7, %c0_8, %c0_9] : memref<1x128x128xbf16, #tpu.memory_space<vmem>>, vector<1x128x128xbf16>
    %11 = vector.shape_cast %10 : vector<1x128x128xbf16> to vector<128x128xbf16>
    %cst = arith.constant dense<0.000000e+00> : vector<32x128xf32>
    %12 = tpu.matmul %9, %11, %cst {dimension_numbers = #tpu.dot_dimension_numbers<[1], [0], [0], [1], [0, 0, 1, 1], [], []>} : vector<32x128xbf16>, vector<128x128xbf16>, vector<32x128xf32> -> vector<32x128xf32>
    %13 = arith.addf %8, %12 : vector<32x128xf32>
    %c0_10 = arith.constant 0 : index
    %c0_11 = arith.constant 0 : index
    %14 = vector.load %arg10[%c0_10, %c0_11] : memref<32x128xf32, #tpu.memory_space<vmem>>, vector<32x128xf32>
    tpu.vector_store %arg10[%c0_10, %c0_11], %13 {strides = array<i32>} : memref<32x128xf32, #tpu.memory_space<vmem>>, vector<32x128xf32>,
    %c0_i32_12 = arith.constant 0 : i32
    %15 = arith.cmpi eq, %arg3, %c0_i32_12 : i32
    %16 = arith.extui %15 : i1 to i32
    %c0_i32_13 = arith.constant 0 : i32
    %17 = arith.cmpi ne, %16, %c0_i32_13 : i32
    scf.if %17 {
      %c0_17 = arith.constant 0 : index
      %c0_18 = arith.constant 0 : index
      %23 = vector.load %arg10[%c0_17, %c0_18] : memref<32x128xf32, #tpu.memory_space<vmem>>, vector<32x128xf32>
      %c0_19 = arith.constant 0 : index
      %c0_20 = arith.constant 0 : index
      %24 = vector.load %arg11[%c0_19, %c0_20] : memref<32x1xf32, #tpu.memory_space<vmem>>, vector<32x1xf32>
      %cst_21 = arith.constant dense<0.000000e+00> : vector<32xf32>
      %25 = vector.multi_reduction <add>, %23, %cst_21 [1] : vector<32x128xf32> to vector<32xf32>
      %26 = vector.shape_cast %25 : vector<32xf32> to vector<32x1xf32>
      %27 = arith.addf %24, %26 : vector<32x1xf32>
      %c0_22 = arith.constant 0 : index
      %c0_23 = arith.constant 0 : index
      %28 = vector.load %arg11[%c0_22, %c0_23] : memref<32x1xf32, #tpu.memory_space<vmem>>, vector<32x1xf32>
      tpu.vector_store %arg11[%c0_22, %c0_23], %27 {strides = array<i32>} : memref<32x1xf32, #tpu.memory_space<vmem>>, vector<32x1xf32>,
      %c0_24 = arith.constant 0 : index
      %c0_25 = arith.constant 0 : index
      %29 = vector.load %arg12[%c0_24, %c0_25] : memref<32x1xf32, #tpu.memory_space<vmem>>, vector<32x1xf32>
      %30 = arith.mulf %23, %23 : vector<32x128xf32>
      %cst_26 = arith.constant dense<0.000000e+00> : vector<32xf32>
      %31 = vector.multi_reduction <add>, %30, %cst_26 [1] : vector<32x128xf32> to vector<32xf32>
      %32 = vector.shape_cast %31 : vector<32xf32> to vector<32x1xf32>
      %33 = arith.addf %29, %32 : vector<32x1xf32>
      %c0_27 = arith.constant 0 : index
      %c0_28 = arith.constant 0 : index
      %34 = vector.load %arg12[%c0_27, %c0_28] : memref<32x1xf32, #tpu.memory_space<vmem>>, vector<32x1xf32>
      tpu.vector_store %arg12[%c0_27, %c0_28], %33 {strides = array<i32>} : memref<32x1xf32, #tpu.memory_space<vmem>>, vector<32x1xf32>,
      %c0_29 = arith.constant 0 : index
      %c0_30 = arith.constant 0 : index
      %35 = vector.load %arg6[%c0_29, %c0_30] : memref<32x1xf32, #tpu.memory_space<vmem>>, vector<32x1xf32>
      %36 = vector.broadcast %35 : vector<32x1xf32> to vector<32x128xf32>
      %37 = arith.addf %23, %36 : vector<32x128xf32>
      %38 = arith.truncf %37 : vector<32x128xf32> to vector<32x128xbf16>
      %c0_31 = arith.constant 0 : index
      %c0_32 = arith.constant 0 : index
      %c0_33 = arith.constant 0 : index
      %39 = vector.load %arg7[%c0_31, %c0_32, %c0_33] : memref<1x32x128xbf16, #tpu.memory_space<vmem>>, vector<1x32x128xbf16>
      %40 = vector.shape_cast %39 : vector<1x32x128xbf16> to vector<32x128xbf16>
      %41 = vector.shape_cast %38 : vector<32x128xbf16> to vector<1x32x128xbf16>
      tpu.vector_store %arg7[%c0_31, %c0_32, %c0_33], %41 {strides = array<i32>} : memref<1x32x128xbf16, #tpu.memory_space<vmem>>, vector<1x32x128xbf16>,
    } else {
    }
    %c0_i32_14 = arith.constant 0 : i32
    %18 = arith.cmpi eq, %arg2, %c0_i32_14 : i32
    %c0_i32_15 = arith.constant 0 : i32
    %19 = arith.cmpi eq, %arg3, %c0_i32_15 : i32
    %20 = arith.andi %18, %19 : i1
    %21 = arith.extui %20 : i1 to i32
    %c0_i32_16 = arith.constant 0 : i32
    %22 = arith.cmpi ne, %21, %c0_i32_16 : i32
    scf.if %22 {
      %c0_17 = arith.constant 0 : index
      %c0_18 = arith.constant 0 : index
      %23 = vector.load %arg11[%c0_17, %c0_18] : memref<32x1xf32, #tpu.memory_space<vmem>>, vector<32x1xf32>
      %cst_19 = arith.constant 1.562500e-02 : f32
      %24 = vector.broadcast %cst_19 : f32 to vector<32x1xf32>
      %25 = arith.mulf %23, %24 : vector<32x1xf32>
      %c0_20 = arith.constant 0 : index
      %c0_21 = arith.constant 0 : index
      %26 = vector.load %arg12[%c0_20, %c0_21] : memref<32x1xf32, #tpu.memory_space<vmem>>, vector<32x1xf32>
      %cst_22 = arith.constant 1.562500e-02 : f32
      %27 = vector.broadcast %cst_22 : f32 to vector<32x1xf32>
      %28 = arith.mulf %26, %27 : vector<32x1xf32>
      %29 = arith.mulf %25, %25 : vector<32x1xf32>
      %30 = arith.subf %28, %29 : vector<32x1xf32>
      %c0_23 = arith.constant 0 : index
      %c0_24 = arith.constant 0 : index
      %31 = vector.load %arg6[%c0_23, %c0_24] : memref<32x1xf32, #tpu.memory_space<vmem>>, vector<32x1xf32>
      %32 = arith.addf %25, %31 : vector<32x1xf32>
      %c0_25 = arith.constant 0 : index
      %c0_26 = arith.constant 0 : index
      %c0_27 = arith.constant 0 : index
      %33 = vector.load %arg8[%c0_25, %c0_26, %c0_27] : memref<1x32x1xf32, #tpu.memory_space<vmem>>, vector<1x32x1xf32>
      %34 = vector.shape_cast %33 : vector<1x32x1xf32> to vector<32x1xf32>
      %35 = vector.shape_cast %32 : vector<32x1xf32> to vector<1x32x1xf32>
      tpu.vector_store %arg8[%c0_25, %c0_26, %c0_27], %35 {strides = array<i32>} : memref<1x32x1xf32, #tpu.memory_space<vmem>>, vector<1x32x1xf32>,
      %cst_28 = arith.constant 9.99999974E-6 : f32
      %36 = vector.broadcast %cst_28 : f32 to vector<32x1xf32>
      %37 = arith.addf %30, %36 : vector<32x1xf32>
      %38 = math.rsqrt %37 : vector<32x1xf32>
      %c0_29 = arith.constant 0 : index
      %c0_30 = arith.constant 0 : index
      %c0_31 = arith.constant 0 : index
      %39 = vector.load %arg9[%c0_29, %c0_30, %c0_31] : memref<1x32x1xf32, #tpu.memory_space<vmem>>, vector<1x32x1xf32>
      %40 = vector.shape_cast %39 : vector<1x32x1xf32> to vector<32x1xf32>
      %41 = vector.shape_cast %38 : vector<32x1xf32> to vector<1x32x1xf32>
      tpu.vector_store %arg9[%c0_29, %c0_30, %c0_31], %41 {strides = array<i32>} : memref<1x32x1xf32, #tpu.memory_space<vmem>>, vector<1x32x1xf32>,
    } else {
    }
    return
  }
  func.func @transform_0(%arg0: i32, %arg1: i32, %arg2: i32, %arg3: i32) -> (i32, i32) {
    %c0_i32 = arith.constant 0 : i32
    return %arg1, %arg3 : i32, i32
  }
  func.func @transform_1(%arg0: i32, %arg1: i32, %arg2: i32, %arg3: i32) -> (i32, i32, i32) {
    %c0_i32 = arith.constant 0 : i32
    return %arg0, %arg3, %arg2 : i32, i32, i32
  }
  func.func @transform_2(%arg0: i32, %arg1: i32, %arg2: i32, %arg3: i32) -> (i32, i32) {
    %c0_i32 = arith.constant 0 : i32
    %c0_i32_0 = arith.constant 0 : i32
    return %arg1, %c0_i32 : i32, i32
  }
  func.func @transform_3(%arg0: i32, %arg1: i32, %arg2: i32, %arg3: i32) -> (i32, i32, i32) {
    %c0_i32 = arith.constant 0 : i32
    return %arg0, %arg1, %arg2 : i32, i32, i32
  }
  func.func @transform_4(%arg0: i32, %arg1: i32, %arg2: i32, %arg3: i32) -> (i32, i32, i32) {
    %c0_i32 = arith.constant 0 : i32
    %c0_i32_0 = arith.constant 0 : i32
    return %arg0, %arg1, %c0_i32 : i32, i32, i32
  }
  func.func @transform_5(%arg0: i32, %arg1: i32, %arg2: i32, %arg3: i32) -> (i32, i32, i32) {
    %c0_i32 = arith.constant 0 : i32
    %c0_i32_0 = arith.constant 0 : i32
    return %arg0, %arg1, %c0_i32 : i32, i32, i32
  }
}

module attributes {stable_mosaic.version = 11 : i64} {
  func.func @_inorm_apply_kernel(%arg0: i32, %arg1: i32, %arg2: i32, %arg3: memref<1x64x128xbf16, #tpu.memory_space<vmem>>, %arg4: memref<1x64x1xf32, #tpu.memory_space<vmem>>, %arg5: memref<1x64x1xf32, #tpu.memory_space<vmem>>, %arg6: memref<1x64x128xbf16, #tpu.memory_space<vmem>>) attributes {dimension_semantics = [#tpu.dimension_semantics<parallel>, #tpu.dimension_semantics<parallel>, #tpu.dimension_semantics<parallel>], iteration_bounds = array<i64: 2, 1, 1>, scalar_prefetch = 0 : i64, scratch_operands = 0 : i64, tpu.core_type = #tpu.core_type<tc>, window_params = [{transform_indices = @transform_0, window_bounds = array<i64: 1, 64, 128>}, {transform_indices = @transform_1, window_bounds = array<i64: 1, 64, 1>}, {transform_indices = @transform_2, window_bounds = array<i64: 1, 64, 1>}, {transform_indices = @transform_3, window_bounds = array<i64: 1, 64, 128>}]} {
    %c0 = arith.constant 0 : index
    %c0_0 = arith.constant 0 : index
    %c0_1 = arith.constant 0 : index
    %0 = vector.load %arg3[%c0, %c0_0, %c0_1] : memref<1x64x128xbf16, #tpu.memory_space<vmem>>, vector<1x64x128xbf16>
    %1 = vector.shape_cast %0 : vector<1x64x128xbf16> to vector<64x128xbf16>
    %2 = arith.extf %1 : vector<64x128xbf16> to vector<64x128xf32>
    %c0_2 = arith.constant 0 : index
    %c0_3 = arith.constant 0 : index
    %c0_4 = arith.constant 0 : index
    %3 = vector.load %arg4[%c0_2, %c0_3, %c0_4] : memref<1x64x1xf32, #tpu.memory_space<vmem>>, vector<1x64x1xf32>
    %4 = vector.shape_cast %3 : vector<1x64x1xf32> to vector<64x1xf32>
    %5 = vector.broadcast %4 : vector<64x1xf32> to vector<64x128xf32>
    %6 = arith.subf %2, %5 : vector<64x128xf32>
    %c0_5 = arith.constant 0 : index
    %c0_6 = arith.constant 0 : index
    %c0_7 = arith.constant 0 : index
    %7 = vector.load %arg5[%c0_5, %c0_6, %c0_7] : memref<1x64x1xf32, #tpu.memory_space<vmem>>, vector<1x64x1xf32>
    %8 = vector.shape_cast %7 : vector<1x64x1xf32> to vector<64x1xf32>
    %9 = vector.broadcast %8 : vector<64x1xf32> to vector<64x128xf32>
    %10 = arith.mulf %6, %9 : vector<64x128xf32>
    %cst = arith.constant 0.000000e+00 : f32
    %11 = vector.broadcast %cst : f32 to vector<64x128xf32>
    %12 = arith.maximumf %10, %11 : vector<64x128xf32>
    %13 = arith.truncf %12 : vector<64x128xf32> to vector<64x128xbf16>
    %c0_8 = arith.constant 0 : index
    %c0_9 = arith.constant 0 : index
    %c0_10 = arith.constant 0 : index
    %14 = vector.load %arg6[%c0_8, %c0_9, %c0_10] : memref<1x64x128xbf16, #tpu.memory_space<vmem>>, vector<1x64x128xbf16>
    %15 = vector.shape_cast %14 : vector<1x64x128xbf16> to vector<64x128xbf16>
    %16 = vector.shape_cast %13 : vector<64x128xbf16> to vector<1x64x128xbf16>
    tpu.vector_store %arg6[%c0_8, %c0_9, %c0_10], %16 {strides = array<i32>} : memref<1x64x128xbf16, #tpu.memory_space<vmem>>, vector<1x64x128xbf16>,
    return
  }
  func.func @transform_0(%arg0: i32, %arg1: i32, %arg2: i32) -> (i32, i32, i32) {
    %c0_i32 = arith.constant 0 : i32
    return %arg0, %arg1, %arg2 : i32, i32, i32
  }
  func.func @transform_1(%arg0: i32, %arg1: i32, %arg2: i32) -> (i32, i32, i32) {
    %c0_i32 = arith.constant 0 : i32
    %c0_i32_0 = arith.constant 0 : i32
    return %arg0, %arg1, %c0_i32 : i32, i32, i32
  }
  func.func @transform_2(%arg0: i32, %arg1: i32, %arg2: i32) -> (i32, i32, i32) {
    %c0_i32 = arith.constant 0 : i32
    %c0_i32_0 = arith.constant 0 : i32
    return %arg0, %arg1, %c0_i32 : i32, i32, i32
  }
  func.func @transform_3(%arg0: i32, %arg1: i32, %arg2: i32) -> (i32, i32, i32) {
    %c0_i32 = arith.constant 0 : i32
    return %arg0, %arg1, %arg2 : i32, i32, i32
  }
}

module attributes {stable_mosaic.version = 11 : i64} {
  func.func @_conv_gemm_in_kernel(%arg0: i32, %arg1: i32, %arg2: i32, %arg3: i32, %arg4: memref<64x512xbf16, #tpu.memory_space<vmem>>, %arg5: memref<1x512x128xbf16, #tpu.memory_space<vmem>>, %arg6: memref<64x1xf32, #tpu.memory_space<vmem>>, %arg7: memref<1x64x128xbf16, #tpu.memory_space<vmem>>, %arg8: memref<1x64x1xf32, #tpu.memory_space<vmem>>, %arg9: memref<1x64x1xf32, #tpu.memory_space<vmem>>, %arg10: memref<64x128xf32, #tpu.memory_space<vmem>>, %arg11: memref<64x1xf32, #tpu.memory_space<vmem>>, %arg12: memref<64x1xf32, #tpu.memory_space<vmem>>) attributes {dimension_semantics = [#tpu.dimension_semantics<parallel>, #tpu.dimension_semantics<parallel>, #tpu.dimension_semantics<arbitrary>, #tpu.dimension_semantics<arbitrary>], iteration_bounds = array<i64: 2, 1, 1, 2>, scalar_prefetch = 0 : i64, scratch_operands = 3 : i64, tpu.core_type = #tpu.core_type<tc>, window_params = [{transform_indices = @transform_0, window_bounds = array<i64: 64, 512>}, {transform_indices = @transform_1, window_bounds = array<i64: 1, 512, 128>}, {transform_indices = @transform_2, window_bounds = array<i64: 64, 1>}, {transform_indices = @transform_3, window_bounds = array<i64: 1, 64, 128>}, {transform_indices = @transform_4, window_bounds = array<i64: 1, 64, 1>}, {transform_indices = @transform_5, window_bounds = array<i64: 1, 64, 1>}]} {
    %c0_i32 = arith.constant 0 : i32
    %0 = arith.cmpi eq, %arg3, %c0_i32 : i32
    %1 = arith.extui %0 : i1 to i32
    %c0_i32_0 = arith.constant 0 : i32
    %2 = arith.cmpi ne, %1, %c0_i32_0 : i32
    scf.if %2 {
      %cst_16 = arith.constant 0.000000e+00 : f32
      %23 = vector.broadcast %cst_16 : f32 to vector<64x128xf32>
      %c0_17 = arith.constant 0 : index
      %c0_18 = arith.constant 0 : index
      %24 = vector.load %arg10[%c0_17, %c0_18] : memref<64x128xf32, #tpu.memory_space<vmem>>, vector<64x128xf32>
      tpu.vector_store %arg10[%c0_17, %c0_18], %23 {strides = array<i32>} : memref<64x128xf32, #tpu.memory_space<vmem>>, vector<64x128xf32>,
    } else {
    }
    %c0_i32_1 = arith.constant 0 : i32
    %3 = arith.cmpi eq, %arg2, %c0_i32_1 : i32
    %c0_i32_2 = arith.constant 0 : i32
    %4 = arith.cmpi eq, %arg3, %c0_i32_2 : i32
    %5 = arith.andi %3, %4 : i1
    %6 = arith.extui %5 : i1 to i32
    %c0_i32_3 = arith.constant 0 : i32
    %7 = arith.cmpi ne, %6, %c0_i32_3 : i32
    scf.if %7 {
      %cst_16 = arith.constant 0.000000e+00 : f32
      %23 = vector.broadcast %cst_16 : f32 to vector<64x1xf32>
      %c0_17 = arith.constant 0 : index
      %c0_18 = arith.constant 0 : index
      %24 = vector.load %arg11[%c0_17, %c0_18] : memref<64x1xf32, #tpu.memory_space<vmem>>, vector<64x1xf32>
      tpu.vector_store %arg11[%c0_17, %c0_18], %23 {strides = array<i32>} : memref<64x1xf32, #tpu.memory_space<vmem>>, vector<64x1xf32>,
      %cst_19 = arith.constant 0.000000e+00 : f32
      %25 = vector.broadcast %cst_19 : f32 to vector<64x1xf32>
      %c0_20 = arith.constant 0 : index
      %c0_21 = arith.constant 0 : index
      %26 = vector.load %arg12[%c0_20, %c0_21] : memref<64x1xf32, #tpu.memory_space<vmem>>, vector<64x1xf32>
      tpu.vector_store %arg12[%c0_20, %c0_21], %25 {strides = array<i32>} : memref<64x1xf32, #tpu.memory_space<vmem>>, vector<64x1xf32>,
    } else {
    }
    %c0 = arith.constant 0 : index
    %c0_4 = arith.constant 0 : index
    %8 = vector.load %arg10[%c0, %c0_4] : memref<64x128xf32, #tpu.memory_space<vmem>>, vector<64x128xf32>
    %c0_5 = arith.constant 0 : index
    %c0_6 = arith.constant 0 : index
    %9 = vector.load %arg4[%c0_5, %c0_6] : memref<64x512xbf16, #tpu.memory_space<vmem>>, vector<64x512xbf16>
    %c0_7 = arith.constant 0 : index
    %c0_8 = arith.constant 0 : index
    %c0_9 = arith.constant 0 : index
    %10 = vector.load %arg5[%c0_7, %c0_8, %c0_9] : memref<1x512x128xbf16, #tpu.memory_space<vmem>>, vector<1x512x128xbf16>
    %11 = vector.shape_cast %10 : vector<1x512x128xbf16> to vector<512x128xbf16>
    %cst = arith.constant dense<0.000000e+00> : vector<64x128xf32>
    %12 = tpu.matmul %9, %11, %cst {dimension_numbers = #tpu.dot_dimension_numbers<[1], [0], [0], [1], [0, 0, 1, 1], [], []>} : vector<64x512xbf16>, vector<512x128xbf16>, vector<64x128xf32> -> vector<64x128xf32>
    %13 = arith.addf %8, %12 : vector<64x128xf32>
    %c0_10 = arith.constant 0 : index
    %c0_11 = arith.constant 0 : index
    %14 = vector.load %arg10[%c0_10, %c0_11] : memref<64x128xf32, #tpu.memory_space<vmem>>, vector<64x128xf32>
    tpu.vector_store %arg10[%c0_10, %c0_11], %13 {strides = array<i32>} : memref<64x128xf32, #tpu.memory_space<vmem>>, vector<64x128xf32>,
    %c1_i32 = arith.constant 1 : i32
    %15 = arith.cmpi eq, %arg3, %c1_i32 : i32
    %16 = arith.extui %15 : i1 to i32
    %c0_i32_12 = arith.constant 0 : i32
    %17 = arith.cmpi ne, %16, %c0_i32_12 : i32
    scf.if %17 {
      %c0_16 = arith.constant 0 : index
      %c0_17 = arith.constant 0 : index
      %23 = vector.load %arg10[%c0_16, %c0_17] : memref<64x128xf32, #tpu.memory_space<vmem>>, vector<64x128xf32>
      %c0_18 = arith.constant 0 : index
      %c0_19 = arith.constant 0 : index
      %24 = vector.load %arg11[%c0_18, %c0_19] : memref<64x1xf32, #tpu.memory_space<vmem>>, vector<64x1xf32>
      %cst_20 = arith.constant dense<0.000000e+00> : vector<64xf32>
      %25 = vector.multi_reduction <add>, %23, %cst_20 [1] : vector<64x128xf32> to vector<64xf32>
      %26 = vector.shape_cast %25 : vector<64xf32> to vector<64x1xf32>
      %27 = arith.addf %24, %26 : vector<64x1xf32>
      %c0_21 = arith.constant 0 : index
      %c0_22 = arith.constant 0 : index
      %28 = vector.load %arg11[%c0_21, %c0_22] : memref<64x1xf32, #tpu.memory_space<vmem>>, vector<64x1xf32>
      tpu.vector_store %arg11[%c0_21, %c0_22], %27 {strides = array<i32>} : memref<64x1xf32, #tpu.memory_space<vmem>>, vector<64x1xf32>,
      %c0_23 = arith.constant 0 : index
      %c0_24 = arith.constant 0 : index
      %29 = vector.load %arg12[%c0_23, %c0_24] : memref<64x1xf32, #tpu.memory_space<vmem>>, vector<64x1xf32>
      %30 = arith.mulf %23, %23 : vector<64x128xf32>
      %cst_25 = arith.constant dense<0.000000e+00> : vector<64xf32>
      %31 = vector.multi_reduction <add>, %30, %cst_25 [1] : vector<64x128xf32> to vector<64xf32>
      %32 = vector.shape_cast %31 : vector<64xf32> to vector<64x1xf32>
      %33 = arith.addf %29, %32 : vector<64x1xf32>
      %c0_26 = arith.constant 0 : index
      %c0_27 = arith.constant 0 : index
      %34 = vector.load %arg12[%c0_26, %c0_27] : memref<64x1xf32, #tpu.memory_space<vmem>>, vector<64x1xf32>
      tpu.vector_store %arg12[%c0_26, %c0_27], %33 {strides = array<i32>} : memref<64x1xf32, #tpu.memory_space<vmem>>, vector<64x1xf32>,
      %c0_28 = arith.constant 0 : index
      %c0_29 = arith.constant 0 : index
      %35 = vector.load %arg6[%c0_28, %c0_29] : memref<64x1xf32, #tpu.memory_space<vmem>>, vector<64x1xf32>
      %36 = vector.broadcast %35 : vector<64x1xf32> to vector<64x128xf32>
      %37 = arith.addf %23, %36 : vector<64x128xf32>
      %38 = arith.truncf %37 : vector<64x128xf32> to vector<64x128xbf16>
      %c0_30 = arith.constant 0 : index
      %c0_31 = arith.constant 0 : index
      %c0_32 = arith.constant 0 : index
      %39 = vector.load %arg7[%c0_30, %c0_31, %c0_32] : memref<1x64x128xbf16, #tpu.memory_space<vmem>>, vector<1x64x128xbf16>
      %40 = vector.shape_cast %39 : vector<1x64x128xbf16> to vector<64x128xbf16>
      %41 = vector.shape_cast %38 : vector<64x128xbf16> to vector<1x64x128xbf16>
      tpu.vector_store %arg7[%c0_30, %c0_31, %c0_32], %41 {strides = array<i32>} : memref<1x64x128xbf16, #tpu.memory_space<vmem>>, vector<1x64x128xbf16>,
    } else {
    }
    %c0_i32_13 = arith.constant 0 : i32
    %18 = arith.cmpi eq, %arg2, %c0_i32_13 : i32
    %c1_i32_14 = arith.constant 1 : i32
    %19 = arith.cmpi eq, %arg3, %c1_i32_14 : i32
    %20 = arith.andi %18, %19 : i1
    %21 = arith.extui %20 : i1 to i32
    %c0_i32_15 = arith.constant 0 : i32
    %22 = arith.cmpi ne, %21, %c0_i32_15 : i32
    scf.if %22 {
      %c0_16 = arith.constant 0 : index
      %c0_17 = arith.constant 0 : index
      %23 = vector.load %arg11[%c0_16, %c0_17] : memref<64x1xf32, #tpu.memory_space<vmem>>, vector<64x1xf32>
      %cst_18 = arith.constant 1.250000e-01 : f32
      %24 = vector.broadcast %cst_18 : f32 to vector<64x1xf32>
      %25 = arith.mulf %23, %24 : vector<64x1xf32>
      %c0_19 = arith.constant 0 : index
      %c0_20 = arith.constant 0 : index
      %26 = vector.load %arg12[%c0_19, %c0_20] : memref<64x1xf32, #tpu.memory_space<vmem>>, vector<64x1xf32>
      %cst_21 = arith.constant 1.250000e-01 : f32
      %27 = vector.broadcast %cst_21 : f32 to vector<64x1xf32>
      %28 = arith.mulf %26, %27 : vector<64x1xf32>
      %29 = arith.mulf %25, %25 : vector<64x1xf32>
      %30 = arith.subf %28, %29 : vector<64x1xf32>
      %c0_22 = arith.constant 0 : index
      %c0_23 = arith.constant 0 : index
      %31 = vector.load %arg6[%c0_22, %c0_23] : memref<64x1xf32, #tpu.memory_space<vmem>>, vector<64x1xf32>
      %32 = arith.addf %25, %31 : vector<64x1xf32>
      %c0_24 = arith.constant 0 : index
      %c0_25 = arith.constant 0 : index
      %c0_26 = arith.constant 0 : index
      %33 = vector.load %arg8[%c0_24, %c0_25, %c0_26] : memref<1x64x1xf32, #tpu.memory_space<vmem>>, vector<1x64x1xf32>
      %34 = vector.shape_cast %33 : vector<1x64x1xf32> to vector<64x1xf32>
      %35 = vector.shape_cast %32 : vector<64x1xf32> to vector<1x64x1xf32>
      tpu.vector_store %arg8[%c0_24, %c0_25, %c0_26], %35 {strides = array<i32>} : memref<1x64x1xf32, #tpu.memory_space<vmem>>, vector<1x64x1xf32>,
      %cst_27 = arith.constant 9.99999974E-6 : f32
      %36 = vector.broadcast %cst_27 : f32 to vector<64x1xf32>
      %37 = arith.addf %30, %36 : vector<64x1xf32>
      %38 = math.rsqrt %37 : vector<64x1xf32>
      %c0_28 = arith.constant 0 : index
      %c0_29 = arith.constant 0 : index
      %c0_30 = arith.constant 0 : index
      %39 = vector.load %arg9[%c0_28, %c0_29, %c0_30] : memref<1x64x1xf32, #tpu.memory_space<vmem>>, vector<1x64x1xf32>
      %40 = vector.shape_cast %39 : vector<1x64x1xf32> to vector<64x1xf32>
      %41 = vector.shape_cast %38 : vector<64x1xf32> to vector<1x64x1xf32>
      tpu.vector_store %arg9[%c0_28, %c0_29, %c0_30], %41 {strides = array<i32>} : memref<1x64x1xf32, #tpu.memory_space<vmem>>, vector<1x64x1xf32>,
    } else {
    }
    return
  }
  func.func @transform_0(%arg0: i32, %arg1: i32, %arg2: i32, %arg3: i32) -> (i32, i32) {
    %c0_i32 = arith.constant 0 : i32
    return %arg1, %arg3 : i32, i32
  }
  func.func @transform_1(%arg0: i32, %arg1: i32, %arg2: i32, %arg3: i32) -> (i32, i32, i32) {
    %c0_i32 = arith.constant 0 : i32
    return %arg0, %arg3, %arg2 : i32, i32, i32
  }
  func.func @transform_2(%arg0: i32, %arg1: i32, %arg2: i32, %arg3: i32) -> (i32, i32) {
    %c0_i32 = arith.constant 0 : i32
    %c0_i32_0 = arith.constant 0 : i32
    return %arg1, %c0_i32 : i32, i32
  }
  func.func @transform_3(%arg0: i32, %arg1: i32, %arg2: i32, %arg3: i32) -> (i32, i32, i32) {
    %c0_i32 = arith.constant 0 : i32
    return %arg0, %arg1, %arg2 : i32, i32, i32
  }
  func.func @transform_4(%arg0: i32, %arg1: i32, %arg2: i32, %arg3: i32) -> (i32, i32, i32) {
    %c0_i32 = arith.constant 0 : i32
    %c0_i32_0 = arith.constant 0 : i32
    return %arg0, %arg1, %c0_i32 : i32, i32, i32
  }
  func.func @transform_5(%arg0: i32, %arg1: i32, %arg2: i32, %arg3: i32) -> (i32, i32, i32) {
    %c0_i32 = arith.constant 0 : i32
    %c0_i32_0 = arith.constant 0 : i32
    return %arg0, %arg1, %c0_i32 : i32, i32, i32
  }
}

module attributes {stable_mosaic.version = 11 : i64} {
  func.func @_conv_gemm_in_kernel(%arg0: i32, %arg1: i32, %arg2: i32, %arg3: i32, %arg4: memref<128x512xbf16, #tpu.memory_space<vmem>>, %arg5: memref<1x512x128xbf16, #tpu.memory_space<vmem>>, %arg6: memref<128x1xf32, #tpu.memory_space<vmem>>, %arg7: memref<1x128x128xbf16, #tpu.memory_space<vmem>>, %arg8: memref<1x128x1xf32, #tpu.memory_space<vmem>>, %arg9: memref<1x128x1xf32, #tpu.memory_space<vmem>>, %arg10: memref<128x128xf32, #tpu.memory_space<vmem>>, %arg11: memref<128x1xf32, #tpu.memory_space<vmem>>, %arg12: memref<128x1xf32, #tpu.memory_space<vmem>>) attributes {dimension_semantics = [#tpu.dimension_semantics<parallel>, #tpu.dimension_semantics<parallel>, #tpu.dimension_semantics<arbitrary>, #tpu.dimension_semantics<arbitrary>], iteration_bounds = array<i64: 2, 1, 1, 4>, scalar_prefetch = 0 : i64, scratch_operands = 3 : i64, tpu.core_type = #tpu.core_type<tc>, window_params = [{transform_indices = @transform_0, window_bounds = array<i64: 128, 512>}, {transform_indices = @transform_1, window_bounds = array<i64: 1, 512, 128>}, {transform_indices = @transform_2, window_bounds = array<i64: 128, 1>}, {transform_indices = @transform_3, window_bounds = array<i64: 1, 128, 128>}, {transform_indices = @transform_4, window_bounds = array<i64: 1, 128, 1>}, {transform_indices = @transform_5, window_bounds = array<i64: 1, 128, 1>}]} {
    %c0_i32 = arith.constant 0 : i32
    %0 = arith.cmpi eq, %arg3, %c0_i32 : i32
    %1 = arith.extui %0 : i1 to i32
    %c0_i32_0 = arith.constant 0 : i32
    %2 = arith.cmpi ne, %1, %c0_i32_0 : i32
    scf.if %2 {
      %cst_16 = arith.constant 0.000000e+00 : f32
      %23 = vector.broadcast %cst_16 : f32 to vector<128x128xf32>
      %c0_17 = arith.constant 0 : index
      %c0_18 = arith.constant 0 : index
      %24 = vector.load %arg10[%c0_17, %c0_18] : memref<128x128xf32, #tpu.memory_space<vmem>>, vector<128x128xf32>
      tpu.vector_store %arg10[%c0_17, %c0_18], %23 {strides = array<i32>} : memref<128x128xf32, #tpu.memory_space<vmem>>, vector<128x128xf32>,
    } else {
    }
    %c0_i32_1 = arith.constant 0 : i32
    %3 = arith.cmpi eq, %arg2, %c0_i32_1 : i32
    %c0_i32_2 = arith.constant 0 : i32
    %4 = arith.cmpi eq, %arg3, %c0_i32_2 : i32
    %5 = arith.andi %3, %4 : i1
    %6 = arith.extui %5 : i1 to i32
    %c0_i32_3 = arith.constant 0 : i32
    %7 = arith.cmpi ne, %6, %c0_i32_3 : i32
    scf.if %7 {
      %cst_16 = arith.constant 0.000000e+00 : f32
      %23 = vector.broadcast %cst_16 : f32 to vector<128x1xf32>
      %c0_17 = arith.constant 0 : index
      %c0_18 = arith.constant 0 : index
      %24 = vector.load %arg11[%c0_17, %c0_18] : memref<128x1xf32, #tpu.memory_space<vmem>>, vector<128x1xf32>
      tpu.vector_store %arg11[%c0_17, %c0_18], %23 {strides = array<i32>} : memref<128x1xf32, #tpu.memory_space<vmem>>, vector<128x1xf32>,
      %cst_19 = arith.constant 0.000000e+00 : f32
      %25 = vector.broadcast %cst_19 : f32 to vector<128x1xf32>
      %c0_20 = arith.constant 0 : index
      %c0_21 = arith.constant 0 : index
      %26 = vector.load %arg12[%c0_20, %c0_21] : memref<128x1xf32, #tpu.memory_space<vmem>>, vector<128x1xf32>
      tpu.vector_store %arg12[%c0_20, %c0_21], %25 {strides = array<i32>} : memref<128x1xf32, #tpu.memory_space<vmem>>, vector<128x1xf32>,
    } else {
    }
    %c0 = arith.constant 0 : index
    %c0_4 = arith.constant 0 : index
    %8 = vector.load %arg10[%c0, %c0_4] : memref<128x128xf32, #tpu.memory_space<vmem>>, vector<128x128xf32>
    %c0_5 = arith.constant 0 : index
    %c0_6 = arith.constant 0 : index
    %9 = vector.load %arg4[%c0_5, %c0_6] : memref<128x512xbf16, #tpu.memory_space<vmem>>, vector<128x512xbf16>
    %c0_7 = arith.constant 0 : index
    %c0_8 = arith.constant 0 : index
    %c0_9 = arith.constant 0 : index
    %10 = vector.load %arg5[%c0_7, %c0_8, %c0_9] : memref<1x512x128xbf16, #tpu.memory_space<vmem>>, vector<1x512x128xbf16>
    %11 = vector.shape_cast %10 : vector<1x512x128xbf16> to vector<512x128xbf16>
    %cst = arith.constant dense<0.000000e+00> : vector<128x128xf32>
    %12 = tpu.matmul %9, %11, %cst {dimension_numbers = #tpu.dot_dimension_numbers<[1], [0], [0], [1], [0, 0, 1, 1], [], []>} : vector<128x512xbf16>, vector<512x128xbf16>, vector<128x128xf32> -> vector<128x128xf32>
    %13 = arith.addf %8, %12 : vector<128x128xf32>
    %c0_10 = arith.constant 0 : index
    %c0_11 = arith.constant 0 : index
    %14 = vector.load %arg10[%c0_10, %c0_11] : memref<128x128xf32, #tpu.memory_space<vmem>>, vector<128x128xf32>
    tpu.vector_store %arg10[%c0_10, %c0_11], %13 {strides = array<i32>} : memref<128x128xf32, #tpu.memory_space<vmem>>, vector<128x128xf32>,
    %c3_i32 = arith.constant 3 : i32
    %15 = arith.cmpi eq, %arg3, %c3_i32 : i32
    %16 = arith.extui %15 : i1 to i32
    %c0_i32_12 = arith.constant 0 : i32
    %17 = arith.cmpi ne, %16, %c0_i32_12 : i32
    scf.if %17 {
      %c0_16 = arith.constant 0 : index
      %c0_17 = arith.constant 0 : index
      %23 = vector.load %arg10[%c0_16, %c0_17] : memref<128x128xf32, #tpu.memory_space<vmem>>, vector<128x128xf32>
      %c0_18 = arith.constant 0 : index
      %c0_19 = arith.constant 0 : index
      %24 = vector.load %arg11[%c0_18, %c0_19] : memref<128x1xf32, #tpu.memory_space<vmem>>, vector<128x1xf32>
      %cst_20 = arith.constant dense<0.000000e+00> : vector<128xf32>
      %25 = vector.multi_reduction <add>, %23, %cst_20 [1] : vector<128x128xf32> to vector<128xf32>
      %26 = vector.shape_cast %25 : vector<128xf32> to vector<128x1xf32>
      %27 = arith.addf %24, %26 : vector<128x1xf32>
      %c0_21 = arith.constant 0 : index
      %c0_22 = arith.constant 0 : index
      %28 = vector.load %arg11[%c0_21, %c0_22] : memref<128x1xf32, #tpu.memory_space<vmem>>, vector<128x1xf32>
      tpu.vector_store %arg11[%c0_21, %c0_22], %27 {strides = array<i32>} : memref<128x1xf32, #tpu.memory_space<vmem>>, vector<128x1xf32>,
      %c0_23 = arith.constant 0 : index
      %c0_24 = arith.constant 0 : index
      %29 = vector.load %arg12[%c0_23, %c0_24] : memref<128x1xf32, #tpu.memory_space<vmem>>, vector<128x1xf32>
      %30 = arith.mulf %23, %23 : vector<128x128xf32>
      %cst_25 = arith.constant dense<0.000000e+00> : vector<128xf32>
      %31 = vector.multi_reduction <add>, %30, %cst_25 [1] : vector<128x128xf32> to vector<128xf32>
      %32 = vector.shape_cast %31 : vector<128xf32> to vector<128x1xf32>
      %33 = arith.addf %29, %32 : vector<128x1xf32>
      %c0_26 = arith.constant 0 : index
      %c0_27 = arith.constant 0 : index
      %34 = vector.load %arg12[%c0_26, %c0_27] : memref<128x1xf32, #tpu.memory_space<vmem>>, vector<128x1xf32>
      tpu.vector_store %arg12[%c0_26, %c0_27], %33 {strides = array<i32>} : memref<128x1xf32, #tpu.memory_space<vmem>>, vector<128x1xf32>,
      %c0_28 = arith.constant 0 : index
      %c0_29 = arith.constant 0 : index
      %35 = vector.load %arg6[%c0_28, %c0_29] : memref<128x1xf32, #tpu.memory_space<vmem>>, vector<128x1xf32>
      %36 = vector.broadcast %35 : vector<128x1xf32> to vector<128x128xf32>
      %37 = arith.addf %23, %36 : vector<128x128xf32>
      %38 = arith.truncf %37 : vector<128x128xf32> to vector<128x128xbf16>
      %c0_30 = arith.constant 0 : index
      %c0_31 = arith.constant 0 : index
      %c0_32 = arith.constant 0 : index
      %39 = vector.load %arg7[%c0_30, %c0_31, %c0_32] : memref<1x128x128xbf16, #tpu.memory_space<vmem>>, vector<1x128x128xbf16>
      %40 = vector.shape_cast %39 : vector<1x128x128xbf16> to vector<128x128xbf16>
      %41 = vector.shape_cast %38 : vector<128x128xbf16> to vector<1x128x128xbf16>
      tpu.vector_store %arg7[%c0_30, %c0_31, %c0_32], %41 {strides = array<i32>} : memref<1x128x128xbf16, #tpu.memory_space<vmem>>, vector<1x128x128xbf16>,
    } else {
    }
    %c0_i32_13 = arith.constant 0 : i32
    %18 = arith.cmpi eq, %arg2, %c0_i32_13 : i32
    %c3_i32_14 = arith.constant 3 : i32
    %19 = arith.cmpi eq, %arg3, %c3_i32_14 : i32
    %20 = arith.andi %18, %19 : i1
    %21 = arith.extui %20 : i1 to i32
    %c0_i32_15 = arith.constant 0 : i32
    %22 = arith.cmpi ne, %21, %c0_i32_15 : i32
    scf.if %22 {
      %c0_16 = arith.constant 0 : index
      %c0_17 = arith.constant 0 : index
      %23 = vector.load %arg11[%c0_16, %c0_17] : memref<128x1xf32, #tpu.memory_space<vmem>>, vector<128x1xf32>
      %cst_18 = arith.constant 1.250000e-01 : f32
      %24 = vector.broadcast %cst_18 : f32 to vector<128x1xf32>
      %25 = arith.mulf %23, %24 : vector<128x1xf32>
      %c0_19 = arith.constant 0 : index
      %c0_20 = arith.constant 0 : index
      %26 = vector.load %arg12[%c0_19, %c0_20] : memref<128x1xf32, #tpu.memory_space<vmem>>, vector<128x1xf32>
      %cst_21 = arith.constant 1.250000e-01 : f32
      %27 = vector.broadcast %cst_21 : f32 to vector<128x1xf32>
      %28 = arith.mulf %26, %27 : vector<128x1xf32>
      %29 = arith.mulf %25, %25 : vector<128x1xf32>
      %30 = arith.subf %28, %29 : vector<128x1xf32>
      %c0_22 = arith.constant 0 : index
      %c0_23 = arith.constant 0 : index
      %31 = vector.load %arg6[%c0_22, %c0_23] : memref<128x1xf32, #tpu.memory_space<vmem>>, vector<128x1xf32>
      %32 = arith.addf %25, %31 : vector<128x1xf32>
      %c0_24 = arith.constant 0 : index
      %c0_25 = arith.constant 0 : index
      %c0_26 = arith.constant 0 : index
      %33 = vector.load %arg8[%c0_24, %c0_25, %c0_26] : memref<1x128x1xf32, #tpu.memory_space<vmem>>, vector<1x128x1xf32>
      %34 = vector.shape_cast %33 : vector<1x128x1xf32> to vector<128x1xf32>
      %35 = vector.shape_cast %32 : vector<128x1xf32> to vector<1x128x1xf32>
      tpu.vector_store %arg8[%c0_24, %c0_25, %c0_26], %35 {strides = array<i32>} : memref<1x128x1xf32, #tpu.memory_space<vmem>>, vector<1x128x1xf32>,
      %cst_27 = arith.constant 9.99999974E-6 : f32
      %36 = vector.broadcast %cst_27 : f32 to vector<128x1xf32>
      %37 = arith.addf %30, %36 : vector<128x1xf32>
      %38 = math.rsqrt %37 : vector<128x1xf32>
      %c0_28 = arith.constant 0 : index
      %c0_29 = arith.constant 0 : index
      %c0_30 = arith.constant 0 : index
      %39 = vector.load %arg9[%c0_28, %c0_29, %c0_30] : memref<1x128x1xf32, #tpu.memory_space<vmem>>, vector<1x128x1xf32>
      %40 = vector.shape_cast %39 : vector<1x128x1xf32> to vector<128x1xf32>
      %41 = vector.shape_cast %38 : vector<128x1xf32> to vector<1x128x1xf32>
      tpu.vector_store %arg9[%c0_28, %c0_29, %c0_30], %41 {strides = array<i32>} : memref<1x128x1xf32, #tpu.memory_space<vmem>>, vector<1x128x1xf32>,
    } else {
    }
    return
  }
  func.func @transform_0(%arg0: i32, %arg1: i32, %arg2: i32, %arg3: i32) -> (i32, i32) {
    %c0_i32 = arith.constant 0 : i32
    return %arg1, %arg3 : i32, i32
  }
  func.func @transform_1(%arg0: i32, %arg1: i32, %arg2: i32, %arg3: i32) -> (i32, i32, i32) {
    %c0_i32 = arith.constant 0 : i32
    return %arg0, %arg3, %arg2 : i32, i32, i32
  }
  func.func @transform_2(%arg0: i32, %arg1: i32, %arg2: i32, %arg3: i32) -> (i32, i32) {
    %c0_i32 = arith.constant 0 : i32
    %c0_i32_0 = arith.constant 0 : i32
    return %arg1, %c0_i32 : i32, i32
  }
  func.func @transform_3(%arg0: i32, %arg1: i32, %arg2: i32, %arg3: i32) -> (i32, i32, i32) {
    %c0_i32 = arith.constant 0 : i32
    return %arg0, %arg1, %arg2 : i32, i32, i32
  }
  func.func @transform_4(%arg0: i32, %arg1: i32, %arg2: i32, %arg3: i32) -> (i32, i32, i32) {
    %c0_i32 = arith.constant 0 : i32
    %c0_i32_0 = arith.constant 0 : i32
    return %arg0, %arg1, %c0_i32 : i32, i32, i32
  }
  func.func @transform_5(%arg0: i32, %arg1: i32, %arg2: i32, %arg3: i32) -> (i32, i32, i32) {
    %c0_i32 = arith.constant 0 : i32
    %c0_i32_0 = arith.constant 0 : i32
    return %arg0, %arg1, %c0_i32 : i32, i32, i32
  }
}

module attributes {stable_mosaic.version = 11 : i64} {
  func.func @_inorm_apply_kernel(%arg0: i32, %arg1: i32, %arg2: i32, %arg3: memref<1x128x128xbf16, #tpu.memory_space<vmem>>, %arg4: memref<1x128x1xf32, #tpu.memory_space<vmem>>, %arg5: memref<1x128x1xf32, #tpu.memory_space<vmem>>, %arg6: memref<1x128x128xbf16, #tpu.memory_space<vmem>>) attributes {dimension_semantics = [#tpu.dimension_semantics<parallel>, #tpu.dimension_semantics<parallel>, #tpu.dimension_semantics<parallel>], iteration_bounds = array<i64: 2, 1, 1>, scalar_prefetch = 0 : i64, scratch_operands = 0 : i64, tpu.core_type = #tpu.core_type<tc>, window_params = [{transform_indices = @transform_0, window_bounds = array<i64: 1, 128, 128>}, {transform_indices = @transform_1, window_bounds = array<i64: 1, 128, 1>}, {transform_indices = @transform_2, window_bounds = array<i64: 1, 128, 1>}, {transform_indices = @transform_3, window_bounds = array<i64: 1, 128, 128>}]} {
    %c0 = arith.constant 0 : index
    %c0_0 = arith.constant 0 : index
    %c0_1 = arith.constant 0 : index
    %0 = vector.load %arg3[%c0, %c0_0, %c0_1] : memref<1x128x128xbf16, #tpu.memory_space<vmem>>, vector<1x128x128xbf16>
    %1 = vector.shape_cast %0 : vector<1x128x128xbf16> to vector<128x128xbf16>
    %2 = arith.extf %1 : vector<128x128xbf16> to vector<128x128xf32>
    %c0_2 = arith.constant 0 : index
    %c0_3 = arith.constant 0 : index
    %c0_4 = arith.constant 0 : index
    %3 = vector.load %arg4[%c0_2, %c0_3, %c0_4] : memref<1x128x1xf32, #tpu.memory_space<vmem>>, vector<1x128x1xf32>
    %4 = vector.shape_cast %3 : vector<1x128x1xf32> to vector<128x1xf32>
    %5 = vector.broadcast %4 : vector<128x1xf32> to vector<128x128xf32>
    %6 = arith.subf %2, %5 : vector<128x128xf32>
    %c0_5 = arith.constant 0 : index
    %c0_6 = arith.constant 0 : index
    %c0_7 = arith.constant 0 : index
    %7 = vector.load %arg5[%c0_5, %c0_6, %c0_7] : memref<1x128x1xf32, #tpu.memory_space<vmem>>, vector<1x128x1xf32>
    %8 = vector.shape_cast %7 : vector<1x128x1xf32> to vector<128x1xf32>
    %9 = vector.broadcast %8 : vector<128x1xf32> to vector<128x128xf32>
    %10 = arith.mulf %6, %9 : vector<128x128xf32>
    %cst = arith.constant 0.000000e+00 : f32
    %11 = vector.broadcast %cst : f32 to vector<128x128xf32>
    %12 = arith.maximumf %10, %11 : vector<128x128xf32>
    %13 = arith.truncf %12 : vector<128x128xf32> to vector<128x128xbf16>
    %c0_8 = arith.constant 0 : index
    %c0_9 = arith.constant 0 : index
    %c0_10 = arith.constant 0 : index
    %14 = vector.load %arg6[%c0_8, %c0_9, %c0_10] : memref<1x128x128xbf16, #tpu.memory_space<vmem>>, vector<1x128x128xbf16>
    %15 = vector.shape_cast %14 : vector<1x128x128xbf16> to vector<128x128xbf16>
    %16 = vector.shape_cast %13 : vector<128x128xbf16> to vector<1x128x128xbf16>
    tpu.vector_store %arg6[%c0_8, %c0_9, %c0_10], %16 {strides = array<i32>} : memref<1x128x128xbf16, #tpu.memory_space<vmem>>, vector<1x128x128xbf16>,
    return
  }
  func.func @transform_0(%arg0: i32, %arg1: i32, %arg2: i32) -> (i32, i32, i32) {
    %c0_i32 = arith.constant 0 : i32
    return %arg0, %arg1, %arg2 : i32, i32, i32
  }
  func.func @transform_1(%arg0: i32, %arg1: i32, %arg2: i32) -> (i32, i32, i32) {
    %c0_i32 = arith.constant 0 : i32
    %c0_i32_0 = arith.constant 0 : i32
    return %arg0, %arg1, %c0_i32 : i32, i32, i32
  }
  func.func @transform_2(%arg0: i32, %arg1: i32, %arg2: i32) -> (i32, i32, i32) {
    %c0_i32 = arith.constant 0 : i32
    %c0_i32_0 = arith.constant 0 : i32
    return %arg0, %arg1, %c0_i32 : i32, i32, i32
  }
  func.func @transform_3(%arg0: i32, %arg1: i32, %arg2: i32) -> (i32, i32, i32) {
    %c0_i32 = arith.constant 0 : i32
    return %arg0, %arg1, %arg2 : i32, i32, i32
  }
}

module attributes {stable_mosaic.version = 11 : i64} {
  func.func @_inorm_apply_kernel(%arg0: i32, %arg1: i32, %arg2: i32, %arg3: memref<1x48x128xbf16, #tpu.memory_space<vmem>>, %arg4: memref<1x48x1xf32, #tpu.memory_space<vmem>>, %arg5: memref<1x48x1xf32, #tpu.memory_space<vmem>>, %arg6: memref<1x48x128xbf16, #tpu.memory_space<vmem>>) attributes {dimension_semantics = [#tpu.dimension_semantics<parallel>, #tpu.dimension_semantics<parallel>, #tpu.dimension_semantics<parallel>], iteration_bounds = array<i64: 2, 1, 1>, scalar_prefetch = 0 : i64, scratch_operands = 0 : i64, tpu.core_type = #tpu.core_type<tc>, window_params = [{transform_indices = @transform_0, window_bounds = array<i64: 1, 48, 128>}, {transform_indices = @transform_1, window_bounds = array<i64: 1, 48, 1>}, {transform_indices = @transform_2, window_bounds = array<i64: 1, 48, 1>}, {transform_indices = @transform_3, window_bounds = array<i64: 1, 48, 128>}]} {
    %c0 = arith.constant 0 : index
    %c0_0 = arith.constant 0 : index
    %c0_1 = arith.constant 0 : index
    %0 = vector.load %arg3[%c0, %c0_0, %c0_1] : memref<1x48x128xbf16, #tpu.memory_space<vmem>>, vector<1x48x128xbf16>
    %1 = vector.shape_cast %0 : vector<1x48x128xbf16> to vector<48x128xbf16>
    %2 = arith.extf %1 : vector<48x128xbf16> to vector<48x128xf32>
    %c0_2 = arith.constant 0 : index
    %c0_3 = arith.constant 0 : index
    %c0_4 = arith.constant 0 : index
    %3 = vector.load %arg4[%c0_2, %c0_3, %c0_4] : memref<1x48x1xf32, #tpu.memory_space<vmem>>, vector<1x48x1xf32>
    %4 = vector.shape_cast %3 : vector<1x48x1xf32> to vector<48x1xf32>
    %5 = vector.broadcast %4 : vector<48x1xf32> to vector<48x128xf32>
    %6 = arith.subf %2, %5 : vector<48x128xf32>
    %c0_5 = arith.constant 0 : index
    %c0_6 = arith.constant 0 : index
    %c0_7 = arith.constant 0 : index
    %7 = vector.load %arg5[%c0_5, %c0_6, %c0_7] : memref<1x48x1xf32, #tpu.memory_space<vmem>>, vector<1x48x1xf32>
    %8 = vector.shape_cast %7 : vector<1x48x1xf32> to vector<48x1xf32>
    %9 = vector.broadcast %8 : vector<48x1xf32> to vector<48x128xf32>
    %10 = arith.mulf %6, %9 : vector<48x128xf32>
    %cst = arith.constant 0.000000e+00 : f32
    %11 = vector.broadcast %cst : f32 to vector<48x128xf32>
    %12 = arith.maximumf %10, %11 : vector<48x128xf32>
    %13 = arith.truncf %12 : vector<48x128xf32> to vector<48x128xbf16>
    %c0_8 = arith.constant 0 : index
    %c0_9 = arith.constant 0 : index
    %c0_10 = arith.constant 0 : index
    %14 = vector.load %arg6[%c0_8, %c0_9, %c0_10] : memref<1x48x128xbf16, #tpu.memory_space<vmem>>, vector<1x48x128xbf16>
    %15 = vector.shape_cast %14 : vector<1x48x128xbf16> to vector<48x128xbf16>
    %16 = vector.shape_cast %13 : vector<48x128xbf16> to vector<1x48x128xbf16>
    tpu.vector_store %arg6[%c0_8, %c0_9, %c0_10], %16 {strides = array<i32>} : memref<1x48x128xbf16, #tpu.memory_space<vmem>>, vector<1x48x128xbf16>,
    return
  }
  func.func @transform_0(%arg0: i32, %arg1: i32, %arg2: i32) -> (i32, i32, i32) {
    %c0_i32 = arith.constant 0 : i32
    return %arg0, %arg1, %arg2 : i32, i32, i32
  }
  func.func @transform_1(%arg0: i32, %arg1: i32, %arg2: i32) -> (i32, i32, i32) {
    %c0_i32 = arith.constant 0 : i32
    %c0_i32_0 = arith.constant 0 : i32
    return %arg0, %arg1, %c0_i32 : i32, i32, i32
  }
  func.func @transform_2(%arg0: i32, %arg1: i32, %arg2: i32) -> (i32, i32, i32) {
    %c0_i32 = arith.constant 0 : i32
    %c0_i32_0 = arith.constant 0 : i32
    return %arg0, %arg1, %c0_i32 : i32, i32, i32
  }
  func.func @transform_3(%arg0: i32, %arg1: i32, %arg2: i32) -> (i32, i32, i32) {
    %c0_i32 = arith.constant 0 : i32
    return %arg0, %arg1, %arg2 : i32, i32, i32
  }
}

module attributes {stable_mosaic.version = 11 : i64} {
  func.func @_conv_gemm_in_kernel(%arg0: i32, %arg1: i32, %arg2: i32, %arg3: i32, %arg4: memref<48x128xbf16, #tpu.memory_space<vmem>>, %arg5: memref<1x128x128xbf16, #tpu.memory_space<vmem>>, %arg6: memref<48x1xf32, #tpu.memory_space<vmem>>, %arg7: memref<1x48x128xbf16, #tpu.memory_space<vmem>>, %arg8: memref<1x48x1xf32, #tpu.memory_space<vmem>>, %arg9: memref<1x48x1xf32, #tpu.memory_space<vmem>>, %arg10: memref<48x128xf32, #tpu.memory_space<vmem>>, %arg11: memref<48x1xf32, #tpu.memory_space<vmem>>, %arg12: memref<48x1xf32, #tpu.memory_space<vmem>>) attributes {dimension_semantics = [#tpu.dimension_semantics<parallel>, #tpu.dimension_semantics<parallel>, #tpu.dimension_semantics<arbitrary>, #tpu.dimension_semantics<arbitrary>], iteration_bounds = array<i64: 2, 1, 1, 1>, scalar_prefetch = 0 : i64, scratch_operands = 3 : i64, tpu.core_type = #tpu.core_type<tc>, window_params = [{transform_indices = @transform_0, window_bounds = array<i64: 48, 128>}, {transform_indices = @transform_1, window_bounds = array<i64: 1, 128, 128>}, {transform_indices = @transform_2, window_bounds = array<i64: 48, 1>}, {transform_indices = @transform_3, window_bounds = array<i64: 1, 48, 128>}, {transform_indices = @transform_4, window_bounds = array<i64: 1, 48, 1>}, {transform_indices = @transform_5, window_bounds = array<i64: 1, 48, 1>}]} {
    %c0_i32 = arith.constant 0 : i32
    %0 = arith.cmpi eq, %arg3, %c0_i32 : i32
    %1 = arith.extui %0 : i1 to i32
    %c0_i32_0 = arith.constant 0 : i32
    %2 = arith.cmpi ne, %1, %c0_i32_0 : i32
    scf.if %2 {
      %cst_17 = arith.constant 0.000000e+00 : f32
      %23 = vector.broadcast %cst_17 : f32 to vector<48x128xf32>
      %c0_18 = arith.constant 0 : index
      %c0_19 = arith.constant 0 : index
      %24 = vector.load %arg10[%c0_18, %c0_19] : memref<48x128xf32, #tpu.memory_space<vmem>>, vector<48x128xf32>
      tpu.vector_store %arg10[%c0_18, %c0_19], %23 {strides = array<i32>} : memref<48x128xf32, #tpu.memory_space<vmem>>, vector<48x128xf32>,
    } else {
    }
    %c0_i32_1 = arith.constant 0 : i32
    %3 = arith.cmpi eq, %arg2, %c0_i32_1 : i32
    %c0_i32_2 = arith.constant 0 : i32
    %4 = arith.cmpi eq, %arg3, %c0_i32_2 : i32
    %5 = arith.andi %3, %4 : i1
    %6 = arith.extui %5 : i1 to i32
    %c0_i32_3 = arith.constant 0 : i32
    %7 = arith.cmpi ne, %6, %c0_i32_3 : i32
    scf.if %7 {
      %cst_17 = arith.constant 0.000000e+00 : f32
      %23 = vector.broadcast %cst_17 : f32 to vector<48x1xf32>
      %c0_18 = arith.constant 0 : index
      %c0_19 = arith.constant 0 : index
      %24 = vector.load %arg11[%c0_18, %c0_19] : memref<48x1xf32, #tpu.memory_space<vmem>>, vector<48x1xf32>
      tpu.vector_store %arg11[%c0_18, %c0_19], %23 {strides = array<i32>} : memref<48x1xf32, #tpu.memory_space<vmem>>, vector<48x1xf32>,
      %cst_20 = arith.constant 0.000000e+00 : f32
      %25 = vector.broadcast %cst_20 : f32 to vector<48x1xf32>
      %c0_21 = arith.constant 0 : index
      %c0_22 = arith.constant 0 : index
      %26 = vector.load %arg12[%c0_21, %c0_22] : memref<48x1xf32, #tpu.memory_space<vmem>>, vector<48x1xf32>
      tpu.vector_store %arg12[%c0_21, %c0_22], %25 {strides = array<i32>} : memref<48x1xf32, #tpu.memory_space<vmem>>, vector<48x1xf32>,
    } else {
    }
    %c0 = arith.constant 0 : index
    %c0_4 = arith.constant 0 : index
    %8 = vector.load %arg10[%c0, %c0_4] : memref<48x128xf32, #tpu.memory_space<vmem>>, vector<48x128xf32>
    %c0_5 = arith.constant 0 : index
    %c0_6 = arith.constant 0 : index
    %9 = vector.load %arg4[%c0_5, %c0_6] : memref<48x128xbf16, #tpu.memory_space<vmem>>, vector<48x128xbf16>
    %c0_7 = arith.constant 0 : index
    %c0_8 = arith.constant 0 : index
    %c0_9 = arith.constant 0 : index
    %10 = vector.load %arg5[%c0_7, %c0_8, %c0_9] : memref<1x128x128xbf16, #tpu.memory_space<vmem>>, vector<1x128x128xbf16>
    %11 = vector.shape_cast %10 : vector<1x128x128xbf16> to vector<128x128xbf16>
    %cst = arith.constant dense<0.000000e+00> : vector<48x128xf32>
    %12 = tpu.matmul %9, %11, %cst {dimension_numbers = #tpu.dot_dimension_numbers<[1], [0], [0], [1], [0, 0, 1, 1], [], []>} : vector<48x128xbf16>, vector<128x128xbf16>, vector<48x128xf32> -> vector<48x128xf32>
    %13 = arith.addf %8, %12 : vector<48x128xf32>
    %c0_10 = arith.constant 0 : index
    %c0_11 = arith.constant 0 : index
    %14 = vector.load %arg10[%c0_10, %c0_11] : memref<48x128xf32, #tpu.memory_space<vmem>>, vector<48x128xf32>
    tpu.vector_store %arg10[%c0_10, %c0_11], %13 {strides = array<i32>} : memref<48x128xf32, #tpu.memory_space<vmem>>, vector<48x128xf32>,
    %c0_i32_12 = arith.constant 0 : i32
    %15 = arith.cmpi eq, %arg3, %c0_i32_12 : i32
    %16 = arith.extui %15 : i1 to i32
    %c0_i32_13 = arith.constant 0 : i32
    %17 = arith.cmpi ne, %16, %c0_i32_13 : i32
    scf.if %17 {
      %c0_17 = arith.constant 0 : index
      %c0_18 = arith.constant 0 : index
      %23 = vector.load %arg10[%c0_17, %c0_18] : memref<48x128xf32, #tpu.memory_space<vmem>>, vector<48x128xf32>
      %c0_19 = arith.constant 0 : index
      %c0_20 = arith.constant 0 : index
      %24 = vector.load %arg11[%c0_19, %c0_20] : memref<48x1xf32, #tpu.memory_space<vmem>>, vector<48x1xf32>
      %cst_21 = arith.constant dense<0.000000e+00> : vector<48xf32>
      %25 = vector.multi_reduction <add>, %23, %cst_21 [1] : vector<48x128xf32> to vector<48xf32>
      %26 = vector.shape_cast %25 : vector<48xf32> to vector<48x1xf32>
      %27 = arith.addf %24, %26 : vector<48x1xf32>
      %c0_22 = arith.constant 0 : index
      %c0_23 = arith.constant 0 : index
      %28 = vector.load %arg11[%c0_22, %c0_23] : memref<48x1xf32, #tpu.memory_space<vmem>>, vector<48x1xf32>
      tpu.vector_store %arg11[%c0_22, %c0_23], %27 {strides = array<i32>} : memref<48x1xf32, #tpu.memory_space<vmem>>, vector<48x1xf32>,
      %c0_24 = arith.constant 0 : index
      %c0_25 = arith.constant 0 : index
      %29 = vector.load %arg12[%c0_24, %c0_25] : memref<48x1xf32, #tpu.memory_space<vmem>>, vector<48x1xf32>
      %30 = arith.mulf %23, %23 : vector<48x128xf32>
      %cst_26 = arith.constant dense<0.000000e+00> : vector<48xf32>
      %31 = vector.multi_reduction <add>, %30, %cst_26 [1] : vector<48x128xf32> to vector<48xf32>
      %32 = vector.shape_cast %31 : vector<48xf32> to vector<48x1xf32>
      %33 = arith.addf %29, %32 : vector<48x1xf32>
      %c0_27 = arith.constant 0 : index
      %c0_28 = arith.constant 0 : index
      %34 = vector.load %arg12[%c0_27, %c0_28] : memref<48x1xf32, #tpu.memory_space<vmem>>, vector<48x1xf32>
      tpu.vector_store %arg12[%c0_27, %c0_28], %33 {strides = array<i32>} : memref<48x1xf32, #tpu.memory_space<vmem>>, vector<48x1xf32>,
      %c0_29 = arith.constant 0 : index
      %c0_30 = arith.constant 0 : index
      %35 = vector.load %arg6[%c0_29, %c0_30] : memref<48x1xf32, #tpu.memory_space<vmem>>, vector<48x1xf32>
      %36 = vector.broadcast %35 : vector<48x1xf32> to vector<48x128xf32>
      %37 = arith.addf %23, %36 : vector<48x128xf32>
      %38 = arith.truncf %37 : vector<48x128xf32> to vector<48x128xbf16>
      %c0_31 = arith.constant 0 : index
      %c0_32 = arith.constant 0 : index
      %c0_33 = arith.constant 0 : index
      %39 = vector.load %arg7[%c0_31, %c0_32, %c0_33] : memref<1x48x128xbf16, #tpu.memory_space<vmem>>, vector<1x48x128xbf16>
      %40 = vector.shape_cast %39 : vector<1x48x128xbf16> to vector<48x128xbf16>
      %41 = vector.shape_cast %38 : vector<48x128xbf16> to vector<1x48x128xbf16>
      tpu.vector_store %arg7[%c0_31, %c0_32, %c0_33], %41 {strides = array<i32>} : memref<1x48x128xbf16, #tpu.memory_space<vmem>>, vector<1x48x128xbf16>,
    } else {
    }
    %c0_i32_14 = arith.constant 0 : i32
    %18 = arith.cmpi eq, %arg2, %c0_i32_14 : i32
    %c0_i32_15 = arith.constant 0 : i32
    %19 = arith.cmpi eq, %arg3, %c0_i32_15 : i32
    %20 = arith.andi %18, %19 : i1
    %21 = arith.extui %20 : i1 to i32
    %c0_i32_16 = arith.constant 0 : i32
    %22 = arith.cmpi ne, %21, %c0_i32_16 : i32
    scf.if %22 {
      %c0_17 = arith.constant 0 : index
      %c0_18 = arith.constant 0 : index
      %23 = vector.load %arg11[%c0_17, %c0_18] : memref<48x1xf32, #tpu.memory_space<vmem>>, vector<48x1xf32>
      %cst_19 = arith.constant 1.562500e-02 : f32
      %24 = vector.broadcast %cst_19 : f32 to vector<48x1xf32>
      %25 = arith.mulf %23, %24 : vector<48x1xf32>
      %c0_20 = arith.constant 0 : index
      %c0_21 = arith.constant 0 : index
      %26 = vector.load %arg12[%c0_20, %c0_21] : memref<48x1xf32, #tpu.memory_space<vmem>>, vector<48x1xf32>
      %cst_22 = arith.constant 1.562500e-02 : f32
      %27 = vector.broadcast %cst_22 : f32 to vector<48x1xf32>
      %28 = arith.mulf %26, %27 : vector<48x1xf32>
      %29 = arith.mulf %25, %25 : vector<48x1xf32>
      %30 = arith.subf %28, %29 : vector<48x1xf32>
      %c0_23 = arith.constant 0 : index
      %c0_24 = arith.constant 0 : index
      %31 = vector.load %arg6[%c0_23, %c0_24] : memref<48x1xf32, #tpu.memory_space<vmem>>, vector<48x1xf32>
      %32 = arith.addf %25, %31 : vector<48x1xf32>
      %c0_25 = arith.constant 0 : index
      %c0_26 = arith.constant 0 : index
      %c0_27 = arith.constant 0 : index
      %33 = vector.load %arg8[%c0_25, %c0_26, %c0_27] : memref<1x48x1xf32, #tpu.memory_space<vmem>>, vector<1x48x1xf32>
      %34 = vector.shape_cast %33 : vector<1x48x1xf32> to vector<48x1xf32>
      %35 = vector.shape_cast %32 : vector<48x1xf32> to vector<1x48x1xf32>
      tpu.vector_store %arg8[%c0_25, %c0_26, %c0_27], %35 {strides = array<i32>} : memref<1x48x1xf32, #tpu.memory_space<vmem>>, vector<1x48x1xf32>,
      %cst_28 = arith.constant 9.99999974E-6 : f32
      %36 = vector.broadcast %cst_28 : f32 to vector<48x1xf32>
      %37 = arith.addf %30, %36 : vector<48x1xf32>
      %38 = math.rsqrt %37 : vector<48x1xf32>
      %c0_29 = arith.constant 0 : index
      %c0_30 = arith.constant 0 : index
      %c0_31 = arith.constant 0 : index
      %39 = vector.load %arg9[%c0_29, %c0_30, %c0_31] : memref<1x48x1xf32, #tpu.memory_space<vmem>>, vector<1x48x1xf32>
      %40 = vector.shape_cast %39 : vector<1x48x1xf32> to vector<48x1xf32>
      %41 = vector.shape_cast %38 : vector<48x1xf32> to vector<1x48x1xf32>
      tpu.vector_store %arg9[%c0_29, %c0_30, %c0_31], %41 {strides = array<i32>} : memref<1x48x1xf32, #tpu.memory_space<vmem>>, vector<1x48x1xf32>,
    } else {
    }
    return
  }
  func.func @transform_0(%arg0: i32, %arg1: i32, %arg2: i32, %arg3: i32) -> (i32, i32) {
    %c0_i32 = arith.constant 0 : i32
    return %arg1, %arg3 : i32, i32
  }
  func.func @transform_1(%arg0: i32, %arg1: i32, %arg2: i32, %arg3: i32) -> (i32, i32, i32) {
    %c0_i32 = arith.constant 0 : i32
    return %arg0, %arg3, %arg2 : i32, i32, i32
  }
  func.func @transform_2(%arg0: i32, %arg1: i32, %arg2: i32, %arg3: i32) -> (i32, i32) {
    %c0_i32 = arith.constant 0 : i32
    %c0_i32_0 = arith.constant 0 : i32
    return %arg1, %c0_i32 : i32, i32
  }
  func.func @transform_3(%arg0: i32, %arg1: i32, %arg2: i32, %arg3: i32) -> (i32, i32, i32) {
    %c0_i32 = arith.constant 0 : i32
    return %arg0, %arg1, %arg2 : i32, i32, i32
  }
  func.func @transform_4(%arg0: i32, %arg1: i32, %arg2: i32, %arg3: i32) -> (i32, i32, i32) {
    %c0_i32 = arith.constant 0 : i32
    %c0_i32_0 = arith.constant 0 : i32
    return %arg0, %arg1, %c0_i32 : i32, i32, i32
  }
  func.func @transform_5(%arg0: i32, %arg1: i32, %arg2: i32, %arg3: i32) -> (i32, i32, i32) {
    %c0_i32 = arith.constant 0 : i32
    %c0_i32_0 = arith.constant 0 : i32
    return %arg0, %arg1, %c0_i32 : i32, i32, i32
  }
}

module attributes {stable_mosaic.version = 11 : i64} {
  func.func @_conv_gemm_in_kernel(%arg0: i32, %arg1: i32, %arg2: i32, %arg3: i32, %arg4: memref<64x512xbf16, #tpu.memory_space<vmem>>, %arg5: memref<1x512x128xbf16, #tpu.memory_space<vmem>>, %arg6: memref<64x1xf32, #tpu.memory_space<vmem>>, %arg7: memref<1x64x128xbf16, #tpu.memory_space<vmem>>, %arg8: memref<1x64x1xf32, #tpu.memory_space<vmem>>, %arg9: memref<1x64x1xf32, #tpu.memory_space<vmem>>, %arg10: memref<64x128xf32, #tpu.memory_space<vmem>>, %arg11: memref<64x1xf32, #tpu.memory_space<vmem>>, %arg12: memref<64x1xf32, #tpu.memory_space<vmem>>) attributes {dimension_semantics = [#tpu.dimension_semantics<parallel>, #tpu.dimension_semantics<parallel>, #tpu.dimension_semantics<arbitrary>, #tpu.dimension_semantics<arbitrary>], iteration_bounds = array<i64: 2, 1, 1, 10>, scalar_prefetch = 0 : i64, scratch_operands = 3 : i64, tpu.core_type = #tpu.core_type<tc>, window_params = [{transform_indices = @transform_0, window_bounds = array<i64: 64, 512>}, {transform_indices = @transform_1, window_bounds = array<i64: 1, 512, 128>}, {transform_indices = @transform_2, window_bounds = array<i64: 64, 1>}, {transform_indices = @transform_3, window_bounds = array<i64: 1, 64, 128>}, {transform_indices = @transform_4, window_bounds = array<i64: 1, 64, 1>}, {transform_indices = @transform_5, window_bounds = array<i64: 1, 64, 1>}]} {
    %c0_i32 = arith.constant 0 : i32
    %0 = arith.cmpi eq, %arg3, %c0_i32 : i32
    %1 = arith.extui %0 : i1 to i32
    %c0_i32_0 = arith.constant 0 : i32
    %2 = arith.cmpi ne, %1, %c0_i32_0 : i32
    scf.if %2 {
      %cst_16 = arith.constant 0.000000e+00 : f32
      %23 = vector.broadcast %cst_16 : f32 to vector<64x128xf32>
      %c0_17 = arith.constant 0 : index
      %c0_18 = arith.constant 0 : index
      %24 = vector.load %arg10[%c0_17, %c0_18] : memref<64x128xf32, #tpu.memory_space<vmem>>, vector<64x128xf32>
      tpu.vector_store %arg10[%c0_17, %c0_18], %23 {strides = array<i32>} : memref<64x128xf32, #tpu.memory_space<vmem>>, vector<64x128xf32>,
    } else {
    }
    %c0_i32_1 = arith.constant 0 : i32
    %3 = arith.cmpi eq, %arg2, %c0_i32_1 : i32
    %c0_i32_2 = arith.constant 0 : i32
    %4 = arith.cmpi eq, %arg3, %c0_i32_2 : i32
    %5 = arith.andi %3, %4 : i1
    %6 = arith.extui %5 : i1 to i32
    %c0_i32_3 = arith.constant 0 : i32
    %7 = arith.cmpi ne, %6, %c0_i32_3 : i32
    scf.if %7 {
      %cst_16 = arith.constant 0.000000e+00 : f32
      %23 = vector.broadcast %cst_16 : f32 to vector<64x1xf32>
      %c0_17 = arith.constant 0 : index
      %c0_18 = arith.constant 0 : index
      %24 = vector.load %arg11[%c0_17, %c0_18] : memref<64x1xf32, #tpu.memory_space<vmem>>, vector<64x1xf32>
      tpu.vector_store %arg11[%c0_17, %c0_18], %23 {strides = array<i32>} : memref<64x1xf32, #tpu.memory_space<vmem>>, vector<64x1xf32>,
      %cst_19 = arith.constant 0.000000e+00 : f32
      %25 = vector.broadcast %cst_19 : f32 to vector<64x1xf32>
      %c0_20 = arith.constant 0 : index
      %c0_21 = arith.constant 0 : index
      %26 = vector.load %arg12[%c0_20, %c0_21] : memref<64x1xf32, #tpu.memory_space<vmem>>, vector<64x1xf32>
      tpu.vector_store %arg12[%c0_20, %c0_21], %25 {strides = array<i32>} : memref<64x1xf32, #tpu.memory_space<vmem>>, vector<64x1xf32>,
    } else {
    }
    %c0 = arith.constant 0 : index
    %c0_4 = arith.constant 0 : index
    %8 = vector.load %arg10[%c0, %c0_4] : memref<64x128xf32, #tpu.memory_space<vmem>>, vector<64x128xf32>
    %c0_5 = arith.constant 0 : index
    %c0_6 = arith.constant 0 : index
    %9 = vector.load %arg4[%c0_5, %c0_6] : memref<64x512xbf16, #tpu.memory_space<vmem>>, vector<64x512xbf16>
    %c0_7 = arith.constant 0 : index
    %c0_8 = arith.constant 0 : index
    %c0_9 = arith.constant 0 : index
    %10 = vector.load %arg5[%c0_7, %c0_8, %c0_9] : memref<1x512x128xbf16, #tpu.memory_space<vmem>>, vector<1x512x128xbf16>
    %11 = vector.shape_cast %10 : vector<1x512x128xbf16> to vector<512x128xbf16>
    %cst = arith.constant dense<0.000000e+00> : vector<64x128xf32>
    %12 = tpu.matmul %9, %11, %cst {dimension_numbers = #tpu.dot_dimension_numbers<[1], [0], [0], [1], [0, 0, 1, 1], [], []>} : vector<64x512xbf16>, vector<512x128xbf16>, vector<64x128xf32> -> vector<64x128xf32>
    %13 = arith.addf %8, %12 : vector<64x128xf32>
    %c0_10 = arith.constant 0 : index
    %c0_11 = arith.constant 0 : index
    %14 = vector.load %arg10[%c0_10, %c0_11] : memref<64x128xf32, #tpu.memory_space<vmem>>, vector<64x128xf32>
    tpu.vector_store %arg10[%c0_10, %c0_11], %13 {strides = array<i32>} : memref<64x128xf32, #tpu.memory_space<vmem>>, vector<64x128xf32>,
    %c9_i32 = arith.constant 9 : i32
    %15 = arith.cmpi eq, %arg3, %c9_i32 : i32
    %16 = arith.extui %15 : i1 to i32
    %c0_i32_12 = arith.constant 0 : i32
    %17 = arith.cmpi ne, %16, %c0_i32_12 : i32
    scf.if %17 {
      %c0_16 = arith.constant 0 : index
      %c0_17 = arith.constant 0 : index
      %23 = vector.load %arg10[%c0_16, %c0_17] : memref<64x128xf32, #tpu.memory_space<vmem>>, vector<64x128xf32>
      %c0_18 = arith.constant 0 : index
      %c0_19 = arith.constant 0 : index
      %24 = vector.load %arg11[%c0_18, %c0_19] : memref<64x1xf32, #tpu.memory_space<vmem>>, vector<64x1xf32>
      %cst_20 = arith.constant dense<0.000000e+00> : vector<64xf32>
      %25 = vector.multi_reduction <add>, %23, %cst_20 [1] : vector<64x128xf32> to vector<64xf32>
      %26 = vector.shape_cast %25 : vector<64xf32> to vector<64x1xf32>
      %27 = arith.addf %24, %26 : vector<64x1xf32>
      %c0_21 = arith.constant 0 : index
      %c0_22 = arith.constant 0 : index
      %28 = vector.load %arg11[%c0_21, %c0_22] : memref<64x1xf32, #tpu.memory_space<vmem>>, vector<64x1xf32>
      tpu.vector_store %arg11[%c0_21, %c0_22], %27 {strides = array<i32>} : memref<64x1xf32, #tpu.memory_space<vmem>>, vector<64x1xf32>,
      %c0_23 = arith.constant 0 : index
      %c0_24 = arith.constant 0 : index
      %29 = vector.load %arg12[%c0_23, %c0_24] : memref<64x1xf32, #tpu.memory_space<vmem>>, vector<64x1xf32>
      %30 = arith.mulf %23, %23 : vector<64x128xf32>
      %cst_25 = arith.constant dense<0.000000e+00> : vector<64xf32>
      %31 = vector.multi_reduction <add>, %30, %cst_25 [1] : vector<64x128xf32> to vector<64xf32>
      %32 = vector.shape_cast %31 : vector<64xf32> to vector<64x1xf32>
      %33 = arith.addf %29, %32 : vector<64x1xf32>
      %c0_26 = arith.constant 0 : index
      %c0_27 = arith.constant 0 : index
      %34 = vector.load %arg12[%c0_26, %c0_27] : memref<64x1xf32, #tpu.memory_space<vmem>>, vector<64x1xf32>
      tpu.vector_store %arg12[%c0_26, %c0_27], %33 {strides = array<i32>} : memref<64x1xf32, #tpu.memory_space<vmem>>, vector<64x1xf32>,
      %c0_28 = arith.constant 0 : index
      %c0_29 = arith.constant 0 : index
      %35 = vector.load %arg6[%c0_28, %c0_29] : memref<64x1xf32, #tpu.memory_space<vmem>>, vector<64x1xf32>
      %36 = vector.broadcast %35 : vector<64x1xf32> to vector<64x128xf32>
      %37 = arith.addf %23, %36 : vector<64x128xf32>
      %38 = arith.truncf %37 : vector<64x128xf32> to vector<64x128xbf16>
      %c0_30 = arith.constant 0 : index
      %c0_31 = arith.constant 0 : index
      %c0_32 = arith.constant 0 : index
      %39 = vector.load %arg7[%c0_30, %c0_31, %c0_32] : memref<1x64x128xbf16, #tpu.memory_space<vmem>>, vector<1x64x128xbf16>
      %40 = vector.shape_cast %39 : vector<1x64x128xbf16> to vector<64x128xbf16>
      %41 = vector.shape_cast %38 : vector<64x128xbf16> to vector<1x64x128xbf16>
      tpu.vector_store %arg7[%c0_30, %c0_31, %c0_32], %41 {strides = array<i32>} : memref<1x64x128xbf16, #tpu.memory_space<vmem>>, vector<1x64x128xbf16>,
    } else {
    }
    %c0_i32_13 = arith.constant 0 : i32
    %18 = arith.cmpi eq, %arg2, %c0_i32_13 : i32
    %c9_i32_14 = arith.constant 9 : i32
    %19 = arith.cmpi eq, %arg3, %c9_i32_14 : i32
    %20 = arith.andi %18, %19 : i1
    %21 = arith.extui %20 : i1 to i32
    %c0_i32_15 = arith.constant 0 : i32
    %22 = arith.cmpi ne, %21, %c0_i32_15 : i32
    scf.if %22 {
      %c0_16 = arith.constant 0 : index
      %c0_17 = arith.constant 0 : index
      %23 = vector.load %arg11[%c0_16, %c0_17] : memref<64x1xf32, #tpu.memory_space<vmem>>, vector<64x1xf32>
      %cst_18 = arith.constant 1.562500e-02 : f32
      %24 = vector.broadcast %cst_18 : f32 to vector<64x1xf32>
      %25 = arith.mulf %23, %24 : vector<64x1xf32>
      %c0_19 = arith.constant 0 : index
      %c0_20 = arith.constant 0 : index
      %26 = vector.load %arg12[%c0_19, %c0_20] : memref<64x1xf32, #tpu.memory_space<vmem>>, vector<64x1xf32>
      %cst_21 = arith.constant 1.562500e-02 : f32
      %27 = vector.broadcast %cst_21 : f32 to vector<64x1xf32>
      %28 = arith.mulf %26, %27 : vector<64x1xf32>
      %29 = arith.mulf %25, %25 : vector<64x1xf32>
      %30 = arith.subf %28, %29 : vector<64x1xf32>
      %c0_22 = arith.constant 0 : index
      %c0_23 = arith.constant 0 : index
      %31 = vector.load %arg6[%c0_22, %c0_23] : memref<64x1xf32, #tpu.memory_space<vmem>>, vector<64x1xf32>
      %32 = arith.addf %25, %31 : vector<64x1xf32>
      %c0_24 = arith.constant 0 : index
      %c0_25 = arith.constant 0 : index
      %c0_26 = arith.constant 0 : index
      %33 = vector.load %arg8[%c0_24, %c0_25, %c0_26] : memref<1x64x1xf32, #tpu.memory_space<vmem>>, vector<1x64x1xf32>
      %34 = vector.shape_cast %33 : vector<1x64x1xf32> to vector<64x1xf32>
      %35 = vector.shape_cast %32 : vector<64x1xf32> to vector<1x64x1xf32>
      tpu.vector_store %arg8[%c0_24, %c0_25, %c0_26], %35 {strides = array<i32>} : memref<1x64x1xf32, #tpu.memory_space<vmem>>, vector<1x64x1xf32>,
      %cst_27 = arith.constant 9.99999974E-6 : f32
      %36 = vector.broadcast %cst_27 : f32 to vector<64x1xf32>
      %37 = arith.addf %30, %36 : vector<64x1xf32>
      %38 = math.rsqrt %37 : vector<64x1xf32>
      %c0_28 = arith.constant 0 : index
      %c0_29 = arith.constant 0 : index
      %c0_30 = arith.constant 0 : index
      %39 = vector.load %arg9[%c0_28, %c0_29, %c0_30] : memref<1x64x1xf32, #tpu.memory_space<vmem>>, vector<1x64x1xf32>
      %40 = vector.shape_cast %39 : vector<1x64x1xf32> to vector<64x1xf32>
      %41 = vector.shape_cast %38 : vector<64x1xf32> to vector<1x64x1xf32>
      tpu.vector_store %arg9[%c0_28, %c0_29, %c0_30], %41 {strides = array<i32>} : memref<1x64x1xf32, #tpu.memory_space<vmem>>, vector<1x64x1xf32>,
    } else {
    }
    return
  }
  func.func @transform_0(%arg0: i32, %arg1: i32, %arg2: i32, %arg3: i32) -> (i32, i32) {
    %c0_i32 = arith.constant 0 : i32
    return %arg1, %arg3 : i32, i32
  }
  func.func @transform_1(%arg0: i32, %arg1: i32, %arg2: i32, %arg3: i32) -> (i32, i32, i32) {
    %c0_i32 = arith.constant 0 : i32
    return %arg0, %arg3, %arg2 : i32, i32, i32
  }
  func.func @transform_2(%arg0: i32, %arg1: i32, %arg2: i32, %arg3: i32) -> (i32, i32) {
    %c0_i32 = arith.constant 0 : i32
    %c0_i32_0 = arith.constant 0 : i32
    return %arg1, %c0_i32 : i32, i32
  }
  func.func @transform_3(%arg0: i32, %arg1: i32, %arg2: i32, %arg3: i32) -> (i32, i32, i32) {
    %c0_i32 = arith.constant 0 : i32
    return %arg0, %arg1, %arg2 : i32, i32, i32
  }
  func.func @transform_4(%arg0: i32, %arg1: i32, %arg2: i32, %arg3: i32) -> (i32, i32, i32) {
    %c0_i32 = arith.constant 0 : i32
    %c0_i32_0 = arith.constant 0 : i32
    return %arg0, %arg1, %c0_i32 : i32, i32, i32
  }
  func.func @transform_5(%arg0: i32, %arg1: i32, %arg2: i32, %arg3: i32) -> (i32, i32, i32) {
    %c0_i32 = arith.constant 0 : i32
    %c0_i32_0 = arith.constant 0 : i32
    return %arg0, %arg1, %c0_i32 : i32, i32, i32
  }
}

module attributes {stable_mosaic.version = 11 : i64} {
  func.func @_conv_gemm_in_kernel(%arg0: i32, %arg1: i32, %arg2: i32, %arg3: i32, %arg4: memref<16x128xbf16, #tpu.memory_space<vmem>>, %arg5: memref<1x128x128xbf16, #tpu.memory_space<vmem>>, %arg6: memref<16x1xf32, #tpu.memory_space<vmem>>, %arg7: memref<1x16x128xf32, #tpu.memory_space<vmem>>, %arg8: memref<1x16x1xf32, #tpu.memory_space<vmem>>, %arg9: memref<1x16x1xf32, #tpu.memory_space<vmem>>, %arg10: memref<16x128xf32, #tpu.memory_space<vmem>>, %arg11: memref<16x1xf32, #tpu.memory_space<vmem>>, %arg12: memref<16x1xf32, #tpu.memory_space<vmem>>) attributes {dimension_semantics = [#tpu.dimension_semantics<parallel>, #tpu.dimension_semantics<parallel>, #tpu.dimension_semantics<arbitrary>, #tpu.dimension_semantics<arbitrary>], iteration_bounds = array<i64: 2, 1, 1, 1>, scalar_prefetch = 0 : i64, scratch_operands = 3 : i64, tpu.core_type = #tpu.core_type<tc>, window_params = [{transform_indices = @transform_0, window_bounds = array<i64: 16, 128>}, {transform_indices = @transform_1, window_bounds = array<i64: 1, 128, 128>}, {transform_indices = @transform_2, window_bounds = array<i64: 16, 1>}, {transform_indices = @transform_3, window_bounds = array<i64: 1, 16, 128>}, {transform_indices = @transform_4, window_bounds = array<i64: 1, 16, 1>}, {transform_indices = @transform_5, window_bounds = array<i64: 1, 16, 1>}]} {
    %c0_i32 = arith.constant 0 : i32
    %0 = arith.cmpi eq, %arg3, %c0_i32 : i32
    %1 = arith.extui %0 : i1 to i32
    %c0_i32_0 = arith.constant 0 : i32
    %2 = arith.cmpi ne, %1, %c0_i32_0 : i32
    scf.if %2 {
      %cst_17 = arith.constant 0.000000e+00 : f32
      %23 = vector.broadcast %cst_17 : f32 to vector<16x128xf32>
      %c0_18 = arith.constant 0 : index
      %c0_19 = arith.constant 0 : index
      %24 = vector.load %arg10[%c0_18, %c0_19] : memref<16x128xf32, #tpu.memory_space<vmem>>, vector<16x128xf32>
      tpu.vector_store %arg10[%c0_18, %c0_19], %23 {strides = array<i32>} : memref<16x128xf32, #tpu.memory_space<vmem>>, vector<16x128xf32>,
    } else {
    }
    %c0_i32_1 = arith.constant 0 : i32
    %3 = arith.cmpi eq, %arg2, %c0_i32_1 : i32
    %c0_i32_2 = arith.constant 0 : i32
    %4 = arith.cmpi eq, %arg3, %c0_i32_2 : i32
    %5 = arith.andi %3, %4 : i1
    %6 = arith.extui %5 : i1 to i32
    %c0_i32_3 = arith.constant 0 : i32
    %7 = arith.cmpi ne, %6, %c0_i32_3 : i32
    scf.if %7 {
      %cst_17 = arith.constant 0.000000e+00 : f32
      %23 = vector.broadcast %cst_17 : f32 to vector<16x1xf32>
      %c0_18 = arith.constant 0 : index
      %c0_19 = arith.constant 0 : index
      %24 = vector.load %arg11[%c0_18, %c0_19] : memref<16x1xf32, #tpu.memory_space<vmem>>, vector<16x1xf32>
      tpu.vector_store %arg11[%c0_18, %c0_19], %23 {strides = array<i32>} : memref<16x1xf32, #tpu.memory_space<vmem>>, vector<16x1xf32>,
      %cst_20 = arith.constant 0.000000e+00 : f32
      %25 = vector.broadcast %cst_20 : f32 to vector<16x1xf32>
      %c0_21 = arith.constant 0 : index
      %c0_22 = arith.constant 0 : index
      %26 = vector.load %arg12[%c0_21, %c0_22] : memref<16x1xf32, #tpu.memory_space<vmem>>, vector<16x1xf32>
      tpu.vector_store %arg12[%c0_21, %c0_22], %25 {strides = array<i32>} : memref<16x1xf32, #tpu.memory_space<vmem>>, vector<16x1xf32>,
    } else {
    }
    %c0 = arith.constant 0 : index
    %c0_4 = arith.constant 0 : index
    %8 = vector.load %arg10[%c0, %c0_4] : memref<16x128xf32, #tpu.memory_space<vmem>>, vector<16x128xf32>
    %c0_5 = arith.constant 0 : index
    %c0_6 = arith.constant 0 : index
    %9 = vector.load %arg4[%c0_5, %c0_6] : memref<16x128xbf16, #tpu.memory_space<vmem>>, vector<16x128xbf16>
    %c0_7 = arith.constant 0 : index
    %c0_8 = arith.constant 0 : index
    %c0_9 = arith.constant 0 : index
    %10 = vector.load %arg5[%c0_7, %c0_8, %c0_9] : memref<1x128x128xbf16, #tpu.memory_space<vmem>>, vector<1x128x128xbf16>
    %11 = vector.shape_cast %10 : vector<1x128x128xbf16> to vector<128x128xbf16>
    %cst = arith.constant dense<0.000000e+00> : vector<16x128xf32>
    %12 = tpu.matmul %9, %11, %cst {dimension_numbers = #tpu.dot_dimension_numbers<[1], [0], [0], [1], [0, 0, 1, 1], [], []>} : vector<16x128xbf16>, vector<128x128xbf16>, vector<16x128xf32> -> vector<16x128xf32>
    %13 = arith.addf %8, %12 : vector<16x128xf32>
    %c0_10 = arith.constant 0 : index
    %c0_11 = arith.constant 0 : index
    %14 = vector.load %arg10[%c0_10, %c0_11] : memref<16x128xf32, #tpu.memory_space<vmem>>, vector<16x128xf32>
    tpu.vector_store %arg10[%c0_10, %c0_11], %13 {strides = array<i32>} : memref<16x128xf32, #tpu.memory_space<vmem>>, vector<16x128xf32>,
    %c0_i32_12 = arith.constant 0 : i32
    %15 = arith.cmpi eq, %arg3, %c0_i32_12 : i32
    %16 = arith.extui %15 : i1 to i32
    %c0_i32_13 = arith.constant 0 : i32
    %17 = arith.cmpi ne, %16, %c0_i32_13 : i32
    scf.if %17 {
      %c0_17 = arith.constant 0 : index
      %c0_18 = arith.constant 0 : index
      %23 = vector.load %arg10[%c0_17, %c0_18] : memref<16x128xf32, #tpu.memory_space<vmem>>, vector<16x128xf32>
      %c0_19 = arith.constant 0 : index
      %c0_20 = arith.constant 0 : index
      %24 = vector.load %arg11[%c0_19, %c0_20] : memref<16x1xf32, #tpu.memory_space<vmem>>, vector<16x1xf32>
      %cst_21 = arith.constant dense<0.000000e+00> : vector<16xf32>
      %25 = vector.multi_reduction <add>, %23, %cst_21 [1] : vector<16x128xf32> to vector<16xf32>
      %26 = vector.shape_cast %25 : vector<16xf32> to vector<16x1xf32>
      %27 = arith.addf %24, %26 : vector<16x1xf32>
      %c0_22 = arith.constant 0 : index
      %c0_23 = arith.constant 0 : index
      %28 = vector.load %arg11[%c0_22, %c0_23] : memref<16x1xf32, #tpu.memory_space<vmem>>, vector<16x1xf32>
      tpu.vector_store %arg11[%c0_22, %c0_23], %27 {strides = array<i32>} : memref<16x1xf32, #tpu.memory_space<vmem>>, vector<16x1xf32>,
      %c0_24 = arith.constant 0 : index
      %c0_25 = arith.constant 0 : index
      %29 = vector.load %arg12[%c0_24, %c0_25] : memref<16x1xf32, #tpu.memory_space<vmem>>, vector<16x1xf32>
      %30 = arith.mulf %23, %23 : vector<16x128xf32>
      %cst_26 = arith.constant dense<0.000000e+00> : vector<16xf32>
      %31 = vector.multi_reduction <add>, %30, %cst_26 [1] : vector<16x128xf32> to vector<16xf32>
      %32 = vector.shape_cast %31 : vector<16xf32> to vector<16x1xf32>
      %33 = arith.addf %29, %32 : vector<16x1xf32>
      %c0_27 = arith.constant 0 : index
      %c0_28 = arith.constant 0 : index
      %34 = vector.load %arg12[%c0_27, %c0_28] : memref<16x1xf32, #tpu.memory_space<vmem>>, vector<16x1xf32>
      tpu.vector_store %arg12[%c0_27, %c0_28], %33 {strides = array<i32>} : memref<16x1xf32, #tpu.memory_space<vmem>>, vector<16x1xf32>,
      %c0_29 = arith.constant 0 : index
      %c0_30 = arith.constant 0 : index
      %35 = vector.load %arg6[%c0_29, %c0_30] : memref<16x1xf32, #tpu.memory_space<vmem>>, vector<16x1xf32>
      %36 = vector.broadcast %35 : vector<16x1xf32> to vector<16x128xf32>
      %37 = arith.addf %23, %36 : vector<16x128xf32>
      %c0_31 = arith.constant 0 : index
      %c0_32 = arith.constant 0 : index
      %c0_33 = arith.constant 0 : index
      %38 = vector.load %arg7[%c0_31, %c0_32, %c0_33] : memref<1x16x128xf32, #tpu.memory_space<vmem>>, vector<1x16x128xf32>
      %39 = vector.shape_cast %38 : vector<1x16x128xf32> to vector<16x128xf32>
      %40 = vector.shape_cast %37 : vector<16x128xf32> to vector<1x16x128xf32>
      tpu.vector_store %arg7[%c0_31, %c0_32, %c0_33], %40 {strides = array<i32>} : memref<1x16x128xf32, #tpu.memory_space<vmem>>, vector<1x16x128xf32>,
    } else {
    }
    %c0_i32_14 = arith.constant 0 : i32
    %18 = arith.cmpi eq, %arg2, %c0_i32_14 : i32
    %c0_i32_15 = arith.constant 0 : i32
    %19 = arith.cmpi eq, %arg3, %c0_i32_15 : i32
    %20 = arith.andi %18, %19 : i1
    %21 = arith.extui %20 : i1 to i32
    %c0_i32_16 = arith.constant 0 : i32
    %22 = arith.cmpi ne, %21, %c0_i32_16 : i32
    scf.if %22 {
      %c0_17 = arith.constant 0 : index
      %c0_18 = arith.constant 0 : index
      %23 = vector.load %arg11[%c0_17, %c0_18] : memref<16x1xf32, #tpu.memory_space<vmem>>, vector<16x1xf32>
      %cst_19 = arith.constant 1.562500e-02 : f32
      %24 = vector.broadcast %cst_19 : f32 to vector<16x1xf32>
      %25 = arith.mulf %23, %24 : vector<16x1xf32>
      %c0_20 = arith.constant 0 : index
      %c0_21 = arith.constant 0 : index
      %26 = vector.load %arg12[%c0_20, %c0_21] : memref<16x1xf32, #tpu.memory_space<vmem>>, vector<16x1xf32>
      %cst_22 = arith.constant 1.562500e-02 : f32
      %27 = vector.broadcast %cst_22 : f32 to vector<16x1xf32>
      %28 = arith.mulf %26, %27 : vector<16x1xf32>
      %29 = arith.mulf %25, %25 : vector<16x1xf32>
      %30 = arith.subf %28, %29 : vector<16x1xf32>
      %c0_23 = arith.constant 0 : index
      %c0_24 = arith.constant 0 : index
      %31 = vector.load %arg6[%c0_23, %c0_24] : memref<16x1xf32, #tpu.memory_space<vmem>>, vector<16x1xf32>
      %32 = arith.addf %25, %31 : vector<16x1xf32>
      %c0_25 = arith.constant 0 : index
      %c0_26 = arith.constant 0 : index
      %c0_27 = arith.constant 0 : index
      %33 = vector.load %arg8[%c0_25, %c0_26, %c0_27] : memref<1x16x1xf32, #tpu.memory_space<vmem>>, vector<1x16x1xf32>
      %34 = vector.shape_cast %33 : vector<1x16x1xf32> to vector<16x1xf32>
      %35 = vector.shape_cast %32 : vector<16x1xf32> to vector<1x16x1xf32>
      tpu.vector_store %arg8[%c0_25, %c0_26, %c0_27], %35 {strides = array<i32>} : memref<1x16x1xf32, #tpu.memory_space<vmem>>, vector<1x16x1xf32>,
      %cst_28 = arith.constant 9.99999974E-6 : f32
      %36 = vector.broadcast %cst_28 : f32 to vector<16x1xf32>
      %37 = arith.addf %30, %36 : vector<16x1xf32>
      %38 = math.rsqrt %37 : vector<16x1xf32>
      %c0_29 = arith.constant 0 : index
      %c0_30 = arith.constant 0 : index
      %c0_31 = arith.constant 0 : index
      %39 = vector.load %arg9[%c0_29, %c0_30, %c0_31] : memref<1x16x1xf32, #tpu.memory_space<vmem>>, vector<1x16x1xf32>
      %40 = vector.shape_cast %39 : vector<1x16x1xf32> to vector<16x1xf32>
      %41 = vector.shape_cast %38 : vector<16x1xf32> to vector<1x16x1xf32>
      tpu.vector_store %arg9[%c0_29, %c0_30, %c0_31], %41 {strides = array<i32>} : memref<1x16x1xf32, #tpu.memory_space<vmem>>, vector<1x16x1xf32>,
    } else {
    }
    return
  }
  func.func @transform_0(%arg0: i32, %arg1: i32, %arg2: i32, %arg3: i32) -> (i32, i32) {
    %c0_i32 = arith.constant 0 : i32
    return %arg1, %arg3 : i32, i32
  }
  func.func @transform_1(%arg0: i32, %arg1: i32, %arg2: i32, %arg3: i32) -> (i32, i32, i32) {
    %c0_i32 = arith.constant 0 : i32
    return %arg0, %arg3, %arg2 : i32, i32, i32
  }
  func.func @transform_2(%arg0: i32, %arg1: i32, %arg2: i32, %arg3: i32) -> (i32, i32) {
    %c0_i32 = arith.constant 0 : i32
    %c0_i32_0 = arith.constant 0 : i32
    return %arg1, %c0_i32 : i32, i32
  }
  func.func @transform_3(%arg0: i32, %arg1: i32, %arg2: i32, %arg3: i32) -> (i32, i32, i32) {
    %c0_i32 = arith.constant 0 : i32
    return %arg0, %arg1, %arg2 : i32, i32, i32
  }
  func.func @transform_4(%arg0: i32, %arg1: i32, %arg2: i32, %arg3: i32) -> (i32, i32, i32) {
    %c0_i32 = arith.constant 0 : i32
    %c0_i32_0 = arith.constant 0 : i32
    return %arg0, %arg1, %c0_i32 : i32, i32, i32
  }
  func.func @transform_5(%arg0: i32, %arg1: i32, %arg2: i32, %arg3: i32) -> (i32, i32, i32) {
    %c0_i32 = arith.constant 0 : i32
    %c0_i32_0 = arith.constant 0 : i32
    return %arg0, %arg1, %c0_i32 : i32, i32, i32
  }
}

</mosaic_0001>

<bundles_post_ra>
// kernel: gnet_forward.12
= control target key start
LH: loop header
LB: loop body
LE: loop exit
PB: predicated region body
PF: predicated region fallthrough
CT: control target
= control target key end

     0   :  { %s654_s12 = smov 0   ;;  %s656_s13 = smov 0   ;;  %s697_s0 = inlined_call_operand.vmem [shape: bf16[2,32,128], index: 0, kind: input, shape index: {}]   ;;  %s698_s1 = inlined_call_operand.vmem [shape: f32[2,32,1], index: 1, kind: input, shape index: {}]   ;;  %s699_s2 = inlined_call_operand.vmem [shape: f32[2,32,1], index: 2, kind: input, shape index: {}]   ;;  %s700_s3 = inlined_call_operand.vmem [shape: bf16[2,32,128], index: 3, kind: output, shape index: {}]  }
   0x1   :  { %s658_s14 = smov 0  }
   0x2 LB: > { %s32_s15 = sadd.s32 1, %s627_s13  ;;  %p539_p0 = scmp.ge.s32.totalorder %s631_s14, 1  ;;  %s631_s14 = sphi %s658_s14, %s13_s14   ;;  %s627_s13 = sphi %s656_s13, %s702_s13   ;;  %s623_s12 = sphi %s654_s12, %s701_s12  }
   0x3   : > { %p34_p1 = scmp.ge.s32.totalorder %s32_s15, 2  ;;  %p206_p2 = scmp.lt.s32.totalorder %s631_s14, 3 }
   0x5   : > { %s704_s15 = smov (%p34_p1, %s32_s15), 0  ;;  %p207_p3 = pnand %p539_p0, %p206_p2 }
   0x6   : > { %p263_p4 = scmp.lt.s32.totalorder (!%p207_p3), %s623_s12, 1  ;;  %v633_v0 = vmov (!%p207_p3), 0  }
   0x7   : > { %210 = sbr.rel (%p207_p3) target bundleno = 165 (0xa5), region = 32  ;;  %608 = vset.pattern.permute.xlu1 (!%p207_p3), %v633_v0  ;;  %607 = vset.pattern.permute.xlu0 (!%p207_p3), %v633_v0 }
   0xe   : > { %s706_s12 = smov (!%p263_p4, %s623_s12), 1 }
   0xf   : > { %s555_s16 = sshll.u32 %s706_s12, 5  ;;  %s554_s23 = sshll.u32 %s706_s12, 4 }
  0x10   : > { %s283_s19 = scalar_lea.vmem %s698_s1, %s555_s16  ;;  %s293_s22 = scalar_lea.vmem %s699_s2, %s555_s16 }
  0x11   : > { %v318_v1 = vld [vmem:[%s283_s19 + $0x10] sm:$0xff]  ;;  %v316_v2 = vld [vmem:[%s283_s19] sm:$0xff]  ;;  %v319_v3 = vld [vmem:[%s283_s19 + $0x18] sm:$0xff]  ;;  %s273_s26 = scalar_lea.vmem %s697_s0, %s554_s23  ;;  %s306_s29 = scalar_lea.vmem %s700_s3, %s554_s23 }
  0x12   : > { %332 = vperm.xlu1 %608, %v318_v1   ;;  %322 = vperm.xlu0 %607, %v316_v2   ;;  %v317_v4 = vld [vmem:[%s283_s19 + $0x8] sm:$0xff]  ;;  %v344_v6 = vld [vmem:[%s293_s22] sm:$0xff]  ;;  %v347_v7 = vld [vmem:[%s293_s22 + $0x18] sm:$0xff] }
  0x13   : > { %v345_v5 = vld [vmem:[%s293_s22 + $0x8] sm:$0xff]  ;;  %v346_v8 = vld [vmem:[%s293_s22 + $0x10] sm:$0xff]  ;;  %v563_v11 = vld [vmem:[%s273_s26] sm:$0xff]  }
  0x14   : > { %v564_v12 = vunpack.c.l.bf16 %v563_v11  ;;  %v565_v13 = vunpack.c.h.bf16 %v563_v11  ;;  %v580_v14 = vld [vmem:[%s273_s26 + $0x8] sm:$0xff]  }
  0x15   : > { %v568_v17 = vunpack.c.l.bf16 %v580_v14  ;;  %v569_v19 = vunpack.c.h.bf16 %v580_v14 }
  0x16   : > { %337 = vperm.xlu1 %608, %v319_v3   ;;  %327 = vperm.xlu0 %607, %v317_v4  }
  0x1a   : > { %355 = vperm.xlu1 %608, %v345_v5   ;;  %350 = vperm.xlu0 %607, %v344_v6  }
  0x1e   : > { %365 = vperm.xlu1 %608, %v347_v7   ;;  %360 = vperm.xlu0 %607, %v346_v8  }
  0x91   : > { %v333_v9 = vpop.permute.xlu1 %332  ;;  %v323_v10 = vpop.permute.xlu0 %322 }
  0x92   : > { %v340_v18 = vsub.f32 %v564_v12, %v323_v10  ;;  %v342_v25 = vsub.f32 %v568_v17, %v333_v9 }
  0x95   : > { %v338_v15 = vpop.permute.xlu1 %337  ;;  %v328_v16 = vpop.permute.xlu0 %327 }
  0x96   : > { %v341_v20 = vsub.f32 %v565_v13, %v328_v16  ;;  %v343_v26 = vsub.f32 %v569_v19, %v338_v15 }
  0x99   : > { %v356_v21 = vpop.permute.xlu1 %355  ;;  %v351_v22 = vpop.permute.xlu0 %350 }
  0x9a   : > { %v369_v23 = vmul.f32 %v356_v21, %v341_v20  ;;  %v368_v24 = vmul.f32 %v351_v22, %v340_v18 }
  0x9c   : > { %v373_v27 = vmax.f32 %v369_v23, 0.0  ;;  %v372_v28 = vmax.f32 %v368_v24, 0.0 }
  0x9d   : > { %v366_v29 = vpop.permute.xlu1 %365  ;;  %v361_v30 = vpop.permute.xlu0 %360 }
  0x9e   : > { %v573_v31 = vpack.c.bf16 %v373_v27, %v372_v28  ;;  %v371_v32 = vmul.f32 %v366_v29, %v343_v26  ;;  %v370_v33 = vmul.f32 %v361_v30, %v342_v25 }
  0xa0   : > { %574 = vst [vmem:[%s306_s29] sm:$0xff] %v573_v31   ;;  %v375_v34 = vmax.f32 %v371_v32, 0.0  ;;  %v374_v35 = vmax.f32 %v370_v33, 0.0 }
  0xa2   : > { %v578_v36 = vpack.c.bf16 %v375_v34, %v374_v35 }
  0xa4   : > { %581 = vst [vmem:[%s306_s29 + $0x8] sm:$0xff] %v578_v36  }
  0xa5 PF: > { %s13_s14 = sadd.s32 1, %s631_s14   ;;  %s701_s12 = smov %s627_s13 }
  0xa6   : > { %p10_p5 = scmp.ge.s32.totalorder %s13_s14, 4   ;;  %s702_s13 = smov %s704_s15 }
  0xa8   :  { %12 = sbr.rel (!%p10_p5) target bundleno = 2 (0x2), region = 68 }

// kernel: gnet_forward.11
= control target key start
LH: loop header
LB: loop body
LE: loop exit
PB: predicated region body
PF: predicated region fallthrough
CT: control target
= control target key end

     0   :  { %s1135_s18 = smov 0   ;;  %s1137_s19 = smov 0   ;;  %s1265_s0 = inlined_call_operand.vmem [shape: bf16[32,128], index: 0, kind: input, shape index: {}]   ;;  %s1266_s1 = inlined_call_operand.vmem [shape: bf16[2,128,128], index: 1, kind: input, shape index: {}]   ;;  %s1267_s2 = inlined_call_operand.vmem [shape: f32[32,1], index: 2, kind: input, shape index: {}]   ;;  %s1268_s3 = inlined_call_operand.vmem [shape: bf16[2,32,128], index: 3, kind: output, shape index: {0}]   ;;  %s1269_s4 = inlined_call_operand.vmem [shape: f32[2,32,1], index: 4, kind: output, shape index: {1}]   ;;  %s1270_s5 = inlined_call_operand.vmem [shape: f32[2,32,1], index: 5, kind: output, shape index: {2}]  }
   0x1   :  { %s1139_s20 = smov 0  }
   0x2 LB: > { %s42_s21 = sadd.s32 1, %s1097_s19  ;;  %p959_p0 = scmp.ge.s32.totalorder %s1101_s20, 1  ;;  %s1101_s20 = sphi %s1139_s20, %s16_s20   ;;  %s1097_s19 = sphi %s1137_s19, %s1272_s19   ;;  %s1093_s18 = sphi %s1135_s18, %s1271_s18  }
   0x3   : > { %p44_p1 = scmp.ge.s32.totalorder %s42_s21, 2  ;;  %p265_p2 = scmp.lt.s32.totalorder %s1101_s20, 3 }
   0x5   : > { %s1274_s21 = smov (%p44_p1, %s42_s21), 0  ;;  %p266_p3 = pnand %p959_p0, %p265_p2 }
   0x6   : > { %p348_p4 = scmp.lt.s32.totalorder (!%p266_p3), %s1093_s18, 1  ;;  %v1069_v0 = vld [vmem:[%s1265_s0] sm:$0xff] (!%p266_p3)   ;;  %v1070_v9 = vld [vmem:[%s1265_s0 + $0x8] sm:$0xff] (!%p266_p3)   ;;  %v1103_v10 = vmov (!%p266_p3), 0   ;;  %vm413_vm0 = vcmask (!%p266_p3), 7168   ;;  %v1104_v11 = vmov (!%p266_p3), 0.0  }
   0x7   : > { %269 = sbr.rel (%p266_p3) target bundleno = 497 (0x1f1), region = 32  ;;  %1029 = vmatprep.mubr.bf16.mxu0 (!%p266_p3), %v1069_v0  ;;  %1060 = vset.pattern.permute.xlu1 (!%p266_p3), %v1103_v10  ;;  %416 = vst.msk [vmem:[#allocation3 + $0x10] sm:$0xff] (!%p266_p3), %vm413_vm0, %v1104_v11  ;;  %414 = vst.msk [vmem:[#allocation3] sm:$0xff] (!%p266_p3), %vm413_vm0, %v1104_v11  ;;  %v616_v18 = vld [vmem:[%s1267_s2 + $0x8] sm:$0xff] (!%p266_p3)  ;;  %v617_v19 = vld [vmem:[%s1267_s2 + $0x10] sm:$0xff] (!%p266_p3) }
   0x8   : > { %1059 = vset.pattern.permute.xlu0 (!%p266_p3), %v1103_v10  ;;  %415 = vst.msk [vmem:[#allocation3 + $0x8] sm:$0xff] (!%p266_p3), %vm413_vm0, %v1104_v11  ;;  %417 = vst.msk [vmem:[#allocation3 + $0x18] sm:$0xff] (!%p266_p3), %vm413_vm0, %v1104_v11  ;;  %v615_v20 = vld [vmem:[%s1267_s2] sm:$0xff] (!%p266_p3)  ;;  %v618_v23 = vld [vmem:[%s1267_s2 + $0x18] sm:$0xff] (!%p266_p3) }
   0x9   : > { %418 = vst.msk [vmem:[#allocation4] sm:$0xff] (!%p266_p3), %vm413_vm0, %v1104_v11  ;;  %419 = vst.msk [vmem:[#allocation4 + $0x8] sm:$0xff] (!%p266_p3), %vm413_vm0, %v1104_v11 }
   0xa   : > { %420 = vst.msk [vmem:[#allocation4 + $0x10] sm:$0xff] (!%p266_p3), %vm413_vm0, %v1104_v11  ;;  %421 = vst.msk [vmem:[#allocation4 + $0x18] sm:$0xff] (!%p266_p3), %vm413_vm0, %v1104_v11 }
   0xe   : > { %s1276_s18 = smov (!%p348_p4, %s1093_s18), 1  ;;  %v572_v24 = vld [vmem:[#allocation3 + $0x10] sm:$0xff]  ;;  %v570_v25 = vld [vmem:[#allocation3] sm:$0xff] }
   0xf   : > { %s984_s24 = sshll.u32 %s1276_s18, 6  ;;  %v573_v30 = vld [vmem:[#allocation3 + $0x18] sm:$0xff]  ;;  %v571_v36 = vld [vmem:[#allocation3 + $0x8] sm:$0xff]  ;;  %s986_s13 = sshll.u32 %s1276_s18, 5 }
  0x10   : > { %s358_s27 = scalar_lea.vmem %s1266_s1, %s984_s24  ;;  %v591_v42 = vld [vmem:[#allocation4] sm:$0xff]  ;;  %s1215_s16 = scalar_lea.vmem %s1269_s4, %s986_s13  ;;  %v592_v11 = vld [vmem:[#allocation4 + $0x8] sm:$0xff] }
  0x11   : > { %v1061_v1 = vld [vmem:[%s358_s27] sm:$0xff]   ;;  %v1062_v2 = vld [vmem:[%s358_s27 + $0x8] sm:$0xff]   ;;  %v1063_v3 = vld [vmem:[%s358_s27 + $0x10] sm:$0xff]   ;;  %s985_s17 = sshll.u32 %s1276_s18, 4 }
  0x12   : > { %1013 = vmatprep.subr.bf16.mxu0 %v1061_v1  ;;  %v1064_v4 = vld [vmem:[%s358_s27 + $0x18] sm:$0xff]   ;;  %v1065_v5 = vld [vmem:[%s358_s27 + $0x20] sm:$0xff]   ;;  %v1066_v6 = vld [vmem:[%s358_s27 + $0x28] sm:$0xff]   ;;  %s1231_s24 = scalar_lea.vmem %s1268_s3, %s985_s17 }
  0x13   : > { %1014 = vmatpush3.bf16.msra.mxu0 %v1061_v1  ;;  %v1067_v7 = vld [vmem:[%s358_s27 + $0x30] sm:$0xff]   ;;  %v1068_v8 = vld [vmem:[%s358_s27 + $0x38] sm:$0xff]   ;;  %s1241_s27 = scalar_lea.vmem %s1270_s5, %s986_s13 }
  0x14   : > { %1015 = vmatprep.subr.bf16.mxu0 %v1062_v2  ;;  %v593_v31 = vld [vmem:[#allocation4 + $0x10] sm:$0xff] }
  0x17   : > { %1016 = vmatpush3.bf16.msra.mxu0 %v1062_v2 }
  0x18   : > { %1017 = vmatprep.subr.bf16.mxu0 %v1063_v3 }
  0x1b   : > { %1018 = vmatpush3.bf16.msra.mxu0 %v1063_v3 }
  0x1c   : > { %1019 = vmatprep.subr.bf16.mxu0 %v1064_v4 }
  0x1f   : > { %1020 = vmatpush3.bf16.msra.mxu0 %v1064_v4 }
  0x20   : > { %1021 = vmatprep.subr.bf16.mxu0 %v1065_v5 }
  0x23   : > { %1022 = vmatpush3.bf16.msra.mxu0 %v1065_v5 }
  0x24   : > { %1023 = vmatprep.subr.bf16.mxu0 %v1066_v6 }
  0x27   : > { %1024 = vmatpush3.bf16.msra.mxu0 %v1066_v6 }
  0x28   : > { %1025 = vmatprep.subr.bf16.mxu0 %v1067_v7 }
  0x2b   : > { %1026 = vmatpush3.bf16.msra.mxu0 %v1067_v7 }
  0x2c   : > { %1027 = vmatprep.subr.bf16.mxu0 %v1068_v8 }
  0x2f   : > { %1028 = vmatpush3.bf16.msra.mxu0 %v1068_v8  ;;  %v594_v8 = vld [vmem:[#allocation4 + $0x18] sm:$0xff] }
  0x32   : > { %1030 = vmatmul.mubr.bf16.vlgmr.msra.gmra.mrb[0].mxu0 %v1070_v9 }
 0x105   : > { %v1173_v12 = vpop.f32.mrb[0].mxu0 }
 0x106   : > { %578 = vadd.xlane.f32.xlu1 %v1173_v12  ;;  %v1176_v13 = vpop.f32.mrb[1].mxu0  ;;  %v597_v16 = vmul.f32 %v1173_v12, %v1173_v12 }
 0x107   : > { %574 = vadd.xlane.f32.xlu0 %v1176_v13  ;;  %v1179_v14 = vpop.f32.mrb[2].mxu0  ;;  %v595_v17 = vmul.f32 %v1176_v13, %v1176_v13 }
 0x108   : > { %v1181_v15 = vpop.f32.mrb[3].mxu0  ;;  %v598_v21 = vmul.f32 %v1179_v14, %v1179_v14 }
 0x109   : > { %v596_v22 = vmul.f32 %v1181_v15, %v1181_v15 }
 0x10a   : > { %580 = vadd.xlane.f32.xlu1 %v1179_v14 }
 0x10b   : > { %603 = vadd.xlane.f32.xlu0 %v597_v16 }
 0x10f   : > { %576 = vadd.xlane.f32.xlu0 %v1181_v15 }
 0x113   : > { %599 = vadd.xlane.f32.xlu0 %v595_v17 }
 0x11b   : > { %626 = vperm.xlu1 %1060, %v616_v18  }
 0x11f   : > { %631 = vperm.xlu1 %1060, %v617_v19  }
 0x129   : > { %621 = vperm.xlu0 %1059, %v615_v20  }
 0x143   : > { %605 = vadd.xlane.f32.xlu1 %v598_v21 }
 0x147   : > { %601 = vadd.xlane.f32.xlu1 %v596_v22 }
 0x158   : > { %636 = vperm.xlu1 %1060, %v618_v23  }
 0x193   : > { %v579_v26 = vpop.xlane.xlu1 %578 }
 0x194   : > { %v584_v27 = vadd.f32 %v579_v26, %v572_v24  ;;  %v575_v28 = vpop.xlane.xlu0 %574 }
 0x195   : > { %v582_v29 = vadd.f32 %v575_v28, %v570_v25 }
 0x196   : > { %589 = vst.msk [vmem:[#allocation3 + $0x10] sm:$0xff] %vm413_vm0, %v584_v27 }
 0x197   : > { %587 = vst.msk [vmem:[#allocation3] sm:$0xff] %vm413_vm0, %v582_v29  ;;  %v581_v32 = vpop.xlane.xlu1 %580 }
 0x198   : > { %v585_v33 = vadd.f32 %v581_v32, %v573_v30  ;;  %v604_v34 = vpop.xlane.xlu0 %603 }
 0x199   : > { %v609_v35 = vadd.f32 %v604_v34, %v593_v31 }
 0x19a   : > { %590 = vst.msk [vmem:[#allocation3 + $0x18] sm:$0xff] %vm413_vm0, %v585_v33 }
 0x19b   : > { %613 = vst.msk [vmem:[#allocation4 + $0x10] sm:$0xff] %vm413_vm0, %v609_v35  ;;  %v627_v55 = vpop.permute.xlu1 %626 }
 0x19c   : > { %v577_v37 = vpop.xlane.xlu0 %576  ;;  %v640_v60 = vadd.f32 %v627_v55, %v1181_v15 }
 0x19d   : > { %v667_v38 = vld [vmem:[#allocation3 + $0x10] sm:$0xff]  ;;  %v583_v39 = vadd.f32 %v577_v37, %v571_v36 }
 0x19e   : > { %v671_v40 = vmul.f32 0.015625, %v667_v38  ;;  %v665_v41 = vld [vmem:[#allocation3] sm:$0xff] }
 0x19f   : > { %v669_v43 = vmul.f32 0.015625, %v665_v41  ;;  %588 = vst.msk [vmem:[#allocation3 + $0x8] sm:$0xff] %vm413_vm0, %v583_v39  ;;  %v632_v7 = vpop.permute.xlu1 %631 }
 0x1a0   : > { %v695_v44 = vadd.f32 %v671_v40, %v617_v19  ;;  %v600_v45 = vpop.xlane.xlu0 %599  ;;  %v683_v51 = vmul.f32 %v671_v40, %v671_v40  ;;  %v641_v17 = vadd.f32 %v1173_v12, %v632_v7 }
 0x1a1   : > { %v693_v46 = vadd.f32 %v669_v43, %v615_v20  ;;  %v668_v47 = vld [vmem:[#allocation3 + $0x18] sm:$0xff]  ;;  %v607_v48 = vadd.f32 %v600_v45, %v591_v42  ;;  %v681_v0 = vmul.f32 %v669_v43, %v669_v43 }
 0x1a2   : > { %700 = vst.msk [vmem:[%s1215_s16 + $0x10] sm:$0xff] %vm413_vm0, %v695_v44  ;;  %v672_v49 = vmul.f32 0.015625, %v668_v47  ;;  %v675_v50 = vld [vmem:[#allocation4 + $0x10] sm:$0xff] }
 0x1a3   : > { %698 = vst.msk [vmem:[%s1215_s16] sm:$0xff] %vm413_vm0, %v693_v46  ;;  %v679_v52 = vmul.f32 0.015625, %v675_v50  ;;  %611 = vst.msk [vmem:[#allocation4] sm:$0xff] %vm413_vm0, %v607_v48 }
 0x1a4   : > { %v696_v53 = vadd.f32 %v672_v49, %v618_v23  ;;  %v684_v20 = vmul.f32 %v672_v49, %v672_v49 }
 0x1a5   : > { %v687_v54 = vsub.f32 %v679_v52, %v683_v51 }
 0x1a6   : > { %701 = vst.msk [vmem:[%s1215_s16 + $0x18] sm:$0xff] %vm413_vm0, %v696_v53  ;;  %v666_v56 = vld [vmem:[#allocation3 + $0x8] sm:$0xff] }
 0x1a7   : > { %v704_v57 = vadd.f32 1e-05, %v687_v54  ;;  %v670_v58 = vmul.f32 0.015625, %v666_v56 }
 0x1a8   : > { %v622_v59 = vpop.permute.xlu0 %621 }
 0x1a9   : > { %1071 = vrsqrt.f32 %v704_v57  ;;  %v694_v61 = vadd.f32 %v670_v58, %v616_v18  ;;  %v639_v62 = vadd.f32 %v622_v59, %v1176_v13  ;;  %v682_v25 = vmul.f32 %v670_v58, %v670_v58 }
 0x1aa   : > { %v673_v63 = vld [vmem:[#allocation4] sm:$0xff] }
 0x1ab   : > { %699 = vst.msk [vmem:[%s1215_s16 + $0x8] sm:$0xff] %vm413_vm0, %v694_v61  ;;  %v677_v1 = vmul.f32 0.015625, %v673_v63  ;;  %v995_v2 = vpack.c.bf16 %v640_v60, %v639_v62 }
 0x1ad   : > { %v685_v3 = vsub.f32 %v677_v1, %v681_v0  ;;  %996 = vst [vmem:[%s1231_s24] sm:$0xff] %v995_v2  }
 0x1af   : > { %v702_v4 = vadd.f32 1e-05, %v685_v3 }
 0x1b1   : > { %1073 = vrsqrt.f32 %v702_v4 }
 0x1b3   : > { %v1072_v5 = vpop.eup %1071 }
 0x1b4   : > { %712 = vst.msk [vmem:[%s1241_s27 + $0x10] sm:$0xff] %vm413_vm0, %v1072_v5 }
 0x1bb   : > { %v1074_v6 = vpop.eup %1073 }
 0x1bc   : > { %710 = vst.msk [vmem:[%s1241_s27] sm:$0xff] %vm413_vm0, %v1074_v6 }
 0x1d0   : > { %v606_v9 = vpop.xlane.xlu1 %605 }
 0x1d1   : > { %v610_v10 = vadd.f32 %v606_v9, %v594_v8 }
 0x1d3   : > { %614 = vst.msk [vmem:[#allocation4 + $0x18] sm:$0xff] %vm413_vm0, %v610_v10 }
 0x1d4   : > { %v602_v13 = vpop.xlane.xlu1 %601 }
 0x1d5   : > { %v608_v15 = vadd.f32 %v602_v13, %v592_v11 }
 0x1d7   : > { %612 = vst.msk [vmem:[#allocation4 + $0x8] sm:$0xff] %vm413_vm0, %v608_v15 }
 0x1d8   : > { %v637_v16 = vpop.permute.xlu1 %636 }
 0x1d9   : > { %v642_v18 = vadd.f32 %v1179_v14, %v637_v16 }
 0x1da   : > { %v676_v19 = vld [vmem:[#allocation4 + $0x18] sm:$0xff] }
 0x1db   : > { %v680_v21 = vmul.f32 0.015625, %v676_v19  ;;  %v1000_v22 = vpack.c.bf16 %v642_v18, %v641_v17 }
 0x1dd   : > { %v688_v23 = vsub.f32 %v680_v21, %v684_v20  ;;  %1002 = vst [vmem:[%s1231_s24 + $0x8] sm:$0xff] %v1000_v22  }
 0x1de   : > { %v674_v24 = vld [vmem:[#allocation4 + $0x8] sm:$0xff] }
 0x1df   : > { %v705_v26 = vadd.f32 1e-05, %v688_v23  ;;  %v678_v27 = vmul.f32 0.015625, %v674_v24 }
 0x1e1   : > { %1075 = vrsqrt.f32 %v705_v26  ;;  %v686_v28 = vsub.f32 %v678_v27, %v682_v25 }
 0x1e3   : > { %v703_v29 = vadd.f32 1e-05, %v686_v28 }
 0x1e5   : > { %1077 = vrsqrt.f32 %v703_v29 }
 0x1eb   : > { %v1076_v30 = vpop.eup %1075 }
 0x1ec   : > { %713 = vst.msk [vmem:[%s1241_s27 + $0x18] sm:$0xff] %vm413_vm0, %v1076_v30 }
 0x1ef   : > { %v1078_v12 = vpop.eup %1077 }
 0x1f0   : > { %711 = vst.msk [vmem:[%s1241_s27 + $0x8] sm:$0xff] %vm413_vm0, %v1078_v12 }
 0x1f1 PF: > { %s16_s20 = sadd.s32 1, %s1101_s20   ;;  %s1271_s18 = smov %s1097_s19 }
 0x1f2   : > { %p13_p5 = scmp.ge.s32.totalorder %s16_s20, 4   ;;  %s1272_s19 = smov %s1274_s21 }
 0x1f4   :  { %15 = sbr.rel (!%p13_p5) target bundleno = 2 (0x2), region = 108 }

// kernel: gnet_forward.14
= control target key start
LH: loop header
LB: loop body
LE: loop exit
PB: predicated region body
PF: predicated region fallthrough
CT: control target
= control target key end

     0   :  { %s772_s12 = smov 0   ;;  %s774_s13 = smov 0   ;;  %s821_s0 = inlined_call_operand.vmem [shape: bf16[2,64,128], index: 0, kind: input, shape index: {}]   ;;  %s822_s1 = inlined_call_operand.vmem [shape: f32[2,64,1], index: 1, kind: input, shape index: {}]   ;;  %s823_s2 = inlined_call_operand.vmem [shape: f32[2,64,1], index: 2, kind: input, shape index: {}]   ;;  %s824_s3 = inlined_call_operand.vmem [shape: bf16[2,64,128], index: 3, kind: output, shape index: {}]  }
   0x1   :  { %s776_s14 = smov 0  }
   0x2 LB: > { %s32_s15 = sadd.s32 1, %s745_s13  ;;  %p627_p0 = scmp.ge.s32.totalorder %s749_s14, 1  ;;  %s749_s14 = sphi %s776_s14, %s13_s14   ;;  %s745_s13 = sphi %s774_s13, %s826_s13   ;;  %s741_s12 = sphi %s772_s12, %s825_s12  }
   0x3   : > { %p34_p1 = scmp.ge.s32.totalorder %s32_s15, 2  ;;  %p206_p2 = scmp.lt.s32.totalorder %s749_s14, 3 }
   0x5   : > { %s828_s15 = smov (%p34_p1, %s32_s15), 0  ;;  %p207_p3 = pnand %p627_p0, %p206_p2 }
   0x6   : > { %p263_p4 = scmp.lt.s32.totalorder (!%p207_p3), %s741_s12, 1  ;;  %v751_v0 = vmov (!%p207_p3), 0  }
   0x7   : > { %210 = sbr.rel (%p207_p3) target bundleno = 181 (0xb5), region = 32  ;;  %726 = vset.pattern.permute.xlu1 (!%p207_p3), %v751_v0  ;;  %725 = vset.pattern.permute.xlu0 (!%p207_p3), %v751_v0 }
   0xe   : > { %s830_s12 = smov (!%p263_p4, %s741_s12), 1 }
   0xf   : > { %s647_s16 = sshll.u32 %s830_s12, 6  ;;  %s646_s23 = sshll.u32 %s830_s12, 5 }
  0x10   : > { %s283_s19 = scalar_lea.vmem %s822_s1, %s647_s16  ;;  %s293_s22 = scalar_lea.vmem %s823_s2, %s647_s16 }
  0x11   : > { %v326_v1 = vld [vmem:[%s283_s19 + $0x10] sm:$0xff]  ;;  %v324_v2 = vld [vmem:[%s283_s19] sm:$0xff]  ;;  %v327_v3 = vld [vmem:[%s283_s19 + $0x18] sm:$0xff]  ;;  %s273_s26 = scalar_lea.vmem %s821_s0, %s646_s23  ;;  %s806_s29 = scalar_lea.vmem %s824_s3, %s646_s23 }
  0x12   : > { %344 = vperm.xlu1 %726, %v326_v1   ;;  %334 = vperm.xlu0 %725, %v324_v2   ;;  %v325_v4 = vld [vmem:[%s283_s19 + $0x8] sm:$0xff]  ;;  %v328_v6 = vld [vmem:[%s283_s19 + $0x20] sm:$0xff]  ;;  %v331_v7 = vld [vmem:[%s283_s19 + $0x38] sm:$0xff] }
  0x13   : > { %v329_v5 = vld [vmem:[%s283_s19 + $0x28] sm:$0xff]  ;;  %v330_v8 = vld [vmem:[%s283_s19 + $0x30] sm:$0xff]  ;;  %v380_v10 = vld [vmem:[%s293_s22] sm:$0xff] }
  0x14   : > { %v381_v9 = vld [vmem:[%s293_s22 + $0x8] sm:$0xff]  ;;  %v383_v11 = vld [vmem:[%s293_s22 + $0x18] sm:$0xff]  ;;  %v382_v12 = vld [vmem:[%s293_s22 + $0x10] sm:$0xff] }
  0x15   : > { %v385_v13 = vld [vmem:[%s293_s22 + $0x28] sm:$0xff]  ;;  %v384_v14 = vld [vmem:[%s293_s22 + $0x20] sm:$0xff]  ;;  %v387_v15 = vld [vmem:[%s293_s22 + $0x38] sm:$0xff] }
  0x16   : > { %349 = vperm.xlu1 %726, %v327_v3   ;;  %339 = vperm.xlu0 %725, %v325_v4   ;;  %v386_v16 = vld [vmem:[%s293_s22 + $0x30] sm:$0xff]  ;;  %v659_v21 = vld [vmem:[%s273_s26] sm:$0xff]   ;;  %v694_v26 = vld [vmem:[%s273_s26 + $0x8] sm:$0xff]  }
  0x17   : > { %v660_v24 = vunpack.c.l.bf16 %v659_v21  ;;  %v661_v25 = vunpack.c.h.bf16 %v659_v21  ;;  %v664_v29 = vunpack.c.l.bf16 %v694_v26  ;;  %v665_v31 = vunpack.c.h.bf16 %v694_v26  ;;  %v695_v33 = vld [vmem:[%s273_s26 + $0x10] sm:$0xff]   ;;  %v696_v42 = vld [vmem:[%s273_s26 + $0x18] sm:$0xff]  }
  0x18   : > { %v669_v38 = vunpack.c.h.bf16 %v695_v33  ;;  %v668_v39 = vunpack.c.l.bf16 %v695_v33  ;;  %v673_v50 = vunpack.c.h.bf16 %v696_v42  ;;  %v672_v51 = vunpack.c.l.bf16 %v696_v42 }
  0x1a   : > { %359 = vperm.xlu1 %726, %v329_v5   ;;  %354 = vperm.xlu0 %725, %v328_v6  }
  0x1e   : > { %369 = vperm.xlu1 %726, %v331_v7   ;;  %364 = vperm.xlu0 %725, %v330_v8  }
  0x22   : > { %395 = vperm.xlu1 %726, %v381_v9   ;;  %390 = vperm.xlu0 %725, %v380_v10  }
  0x26   : > { %405 = vperm.xlu1 %726, %v383_v11   ;;  %400 = vperm.xlu0 %725, %v382_v12  }
  0x2a   : > { %415 = vperm.xlu1 %726, %v385_v13   ;;  %410 = vperm.xlu0 %725, %v384_v14  }
  0x2e   : > { %425 = vperm.xlu1 %726, %v387_v15   ;;  %420 = vperm.xlu0 %725, %v386_v16  }
  0x91   : > { %v345_v17 = vpop.permute.xlu1 %344  ;;  %v335_v18 = vpop.permute.xlu0 %334 }
  0x92   : > { %v372_v30 = vsub.f32 %v660_v24, %v335_v18  ;;  %v374_v40 = vsub.f32 %v664_v29, %v345_v17 }
  0x95   : > { %v350_v19 = vpop.permute.xlu1 %349  ;;  %v340_v20 = vpop.permute.xlu0 %339 }
  0x96   : > { %v373_v32 = vsub.f32 %v661_v25, %v340_v20  ;;  %v375_v41 = vsub.f32 %v665_v31, %v350_v19 }
  0x99   : > { %v360_v22 = vpop.permute.xlu1 %359  ;;  %v355_v23 = vpop.permute.xlu0 %354 }
  0x9a   : > { %v377_v52 = vsub.f32 %v669_v38, %v360_v22  ;;  %v376_v53 = vsub.f32 %v668_v39, %v355_v23 }
  0x9d   : > { %v370_v27 = vpop.permute.xlu1 %369  ;;  %v365_v28 = vpop.permute.xlu0 %364 }
  0x9e   : > { %v379_v61 = vsub.f32 %v673_v50, %v370_v27  ;;  %v378_v62 = vsub.f32 %v672_v51, %v365_v28 }
  0xa1   : > { %v396_v34 = vpop.permute.xlu1 %395  ;;  %v391_v35 = vpop.permute.xlu0 %390 }
  0xa2   : > { %v429_v36 = vmul.f32 %v396_v34, %v373_v32  ;;  %v428_v37 = vmul.f32 %v391_v35, %v372_v30 }
  0xa4   : > { %v437_v43 = vmax.f32 %v429_v36, 0.0  ;;  %v436_v44 = vmax.f32 %v428_v37, 0.0 }
  0xa5   : > { %v406_v45 = vpop.permute.xlu1 %405  ;;  %v401_v46 = vpop.permute.xlu0 %400 }
  0xa6   : > { %v677_v47 = vpack.c.bf16 %v437_v43, %v436_v44  ;;  %v431_v48 = vmul.f32 %v406_v45, %v375_v41  ;;  %v430_v49 = vmul.f32 %v401_v46, %v374_v40 }
  0xa8   : > { %678 = vst [vmem:[%s806_s29] sm:$0xff] %v677_v47   ;;  %v439_v54 = vmax.f32 %v431_v48, 0.0  ;;  %v438_v55 = vmax.f32 %v430_v49, 0.0 }
  0xa9   : > { %v416_v56 = vpop.permute.xlu1 %415  ;;  %v411_v57 = vpop.permute.xlu0 %410 }
  0xaa   : > { %v682_v58 = vpack.c.bf16 %v439_v54, %v438_v55  ;;  %v433_v59 = vmul.f32 %v416_v56, %v377_v52  ;;  %v432_v60 = vmul.f32 %v411_v57, %v376_v53 }
  0xac   : > { %697 = vst [vmem:[%s806_s29 + $0x8] sm:$0xff] %v682_v58   ;;  %v441_v63 = vmax.f32 %v433_v59, 0.0  ;;  %v440_v0 = vmax.f32 %v432_v60, 0.0 }
  0xad   : > { %v426_v1 = vpop.permute.xlu1 %425  ;;  %v421_v2 = vpop.permute.xlu0 %420 }
  0xae   : > { %v687_v3 = vpack.c.bf16 %v441_v63, %v440_v0  ;;  %v435_v4 = vmul.f32 %v426_v1, %v379_v61  ;;  %v434_v5 = vmul.f32 %v421_v2, %v378_v62 }
  0xb0   : > { %698 = vst [vmem:[%s806_s29 + $0x10] sm:$0xff] %v687_v3   ;;  %v443_v6 = vmax.f32 %v435_v4, 0.0  ;;  %v442_v7 = vmax.f32 %v434_v5, 0.0 }
  0xb2   : > { %v692_v8 = vpack.c.bf16 %v443_v6, %v442_v7 }
  0xb4   : > { %699 = vst [vmem:[%s806_s29 + $0x18] sm:$0xff] %v692_v8  }
  0xb5 PF: > { %s13_s14 = sadd.s32 1, %s749_s14   ;;  %s825_s12 = smov %s745_s13 }
  0xb6   : > { %p10_p5 = scmp.ge.s32.totalorder %s13_s14, 4   ;;  %s826_s13 = smov %s828_s15 }
  0xb8   :  { %12 = sbr.rel (!%p10_p5) target bundleno = 2 (0x2), region = 68 }

// kernel: gnet_forward.13
= control target key start
LH: loop header
LB: loop body
LE: loop exit
PB: predicated region body
PF: predicated region fallthrough
CT: control target
= control target key end

     0   :  { %s2291_s0 = inlined_call_operand.vmem [shape: bf16[64,1024], index: 0, kind: input, shape index: {}]   ;;  %s2292_s1 = inlined_call_operand.vmem [shape: bf16[2,1024,128], index: 1, kind: input, shape index: {}]   ;;  %s2293_s2 = inlined_call_operand.vmem [shape: f32[64,1], index: 2, kind: input, shape index: {}]   ;;  %s2294_s3 = inlined_call_operand.vmem [shape: bf16[2,64,128], index: 3, kind: output, shape index: {0}]   ;;  %s2295_s4 = inlined_call_operand.vmem [shape: f32[2,64,1], index: 4, kind: output, shape index: {1}]   ;;  %s2296_s5 = inlined_call_operand.vmem [shape: f32[2,64,1], index: 5, kind: output, shape index: {2}]  }
   0x1   :  { %2297 = sst [smem:[#allocation7_spill]] %s2291_s0 }
   0x2   :  { %s1947_s18 = smov 0   ;;  %s1949_s19 = smov 0  }
   0x3   :  { %s1951_s20 = smov 0   ;;  %s1953_s21 = smov 0  }
   0x4   :  { %s1955_s22 = smov 0   ;;  %s1957_s23 = smov 0  }
   0x5   :  { %s1959_s24 = smov 0  }
   0x6 LB: > { %s31_s25 = sadd.s32 1, %s1904_s22  ;;  %s42_s26 = sadd.s32 1, %s1908_s23  ;;  %s1912_s24 = sphi %s1959_s24, %s16_s24   ;;  %s1908_s23 = sphi %s1957_s23, %s2306_s23   ;;  %s1904_s22 = sphi %s1955_s22, %s2305_s22   ;;  %s1900_s21 = sphi %s1953_s21, %s2304_s21   ;;  %s1896_s20 = sphi %s1951_s20, %s2303_s20   ;;  %s1892_s19 = sphi %s1949_s19, %s2302_s19   ;;  %s1888_s18 = sphi %s1947_s18, %s2301_s18  }
   0x7   : > { %p32_p0 = scmp.ge.s32.totalorder %s31_s25, 2  ;;  %s51_s27 = sadd.s32 1, %s1892_s19 }
   0x8   : > { %p58_p1 = scmp.ne.s32.totalorder %s1892_s19, %s1888_s18  ;;  %p59_p2 = scmp.eq.s32.totalorder %s1912_s24, 0 }
   0x9   : > { %s2308_s25 = smov (%p32_p0, %s31_s25), 0  ;;  %s2310_s26 = smov (!%p32_p0, %s42_s26), %s1908_s23 }
   0xa   : > { %s47_s28 = ssub.s32 %s1904_s22, %s2308_s25  ;;  %p60_p3 = por %p59_p2, %p58_p1 }
   0xb   : > { %p44_p4 = scmp.ge.s32.totalorder %s2310_s26, 2  ;;  %p49_p5 = scmp.eq.s32.totalorder %s47_s28, 0 }
   0xc   : > { %p1531_p6 = scmp.ge.s32.totalorder %s1912_s24, 4 }
   0xd   : > { %s2312_s26 = smov (%p44_p4, %s2310_s26), 0 }
   0xe   : > { %2298 = sst [smem:[#allocation6_spill]] %s2312_s26  ;;  %235 = sbr.rel (%p1531_p6) target bundleno = 39 (0x27), region = 20 }
   0xf   : > { %s1996_s29 = scalar_select %p49_p5, %s1892_s19, %s51_s27  }
  0x15   : > { %238 = sbr.rel (!%p60_p3) target bundleno = 39 (0x27), region = 24  ;;  %s240_s30 = sand.u32 (%p60_p3), 1, %s1892_s19  }
  0x16   : > { %s1608_s6 = sshll.u32 (%p60_p3), %s1904_s22, 4  ;;  %s1532_s7 = sshll.u32 (%p60_p3), %s240_s30, 7 }
  0x17   : > { %s2299_s0 = sld [smem:[#allocation7_spill]] (%p60_p3)  ;;  %s242_s11 = scalar_lea.vmem (%p60_p3), [#allocation5], %s1532_s7 }
  0x1d   : > { %s2004_s10 = scalar_lea.vmem %s2299_s0, %s1608_s6 }
  0x1e   : > { %v261_v0 = vld [vmem:[%s2004_s10] sm:$0xff]  ;;  %v263_v1 = vld [vmem:[%s2004_s10 + $0x8] sm:$0xff] }
  0x1f   : > { %v265_v2 = vld [vmem:[%s2004_s10 + $0x20] sm:$0xff]  ;;  %262 = vst [vmem:[%s242_s11] sm:$0xff] %v261_v0  ;;  %264 = vst [vmem:[%s242_s11 + $0x8] sm:$0xff] %v263_v1  ;;  %v267_v3 = vld [vmem:[%s2004_s10 + $0x28] sm:$0xff] }
  0x20   : > { %266 = vst [vmem:[%s242_s11 + $0x10] sm:$0xff] %v265_v2  ;;  %v269_v4 = vld [vmem:[%s2004_s10 + $0x40] sm:$0xff]  ;;  %v271_v5 = vld [vmem:[%s2004_s10 + $0x48] sm:$0xff]  ;;  %268 = vst [vmem:[%s242_s11 + $0x18] sm:$0xff] %v267_v3 }
  0x21   : > { %270 = vst [vmem:[%s242_s11 + $0x20] sm:$0xff] %v269_v4  ;;  %272 = vst [vmem:[%s242_s11 + $0x28] sm:$0xff] %v271_v5  ;;  %v273_v6 = vld [vmem:[%s2004_s10 + $0x60] sm:$0xff]  ;;  %v275_v7 = vld [vmem:[%s2004_s10 + $0x68] sm:$0xff] }
  0x22   : > { %v277_v8 = vld [vmem:[%s2004_s10 + $0x80] sm:$0xff]  ;;  %274 = vst [vmem:[%s242_s11 + $0x30] sm:$0xff] %v273_v6  ;;  %276 = vst [vmem:[%s242_s11 + $0x38] sm:$0xff] %v275_v7  ;;  %v279_v9 = vld [vmem:[%s2004_s10 + $0x88] sm:$0xff] }
  0x23   : > { %278 = vst [vmem:[%s242_s11 + $0x40] sm:$0xff] %v277_v8  ;;  %v281_v10 = vld [vmem:[%s2004_s10 + $0xa0] sm:$0xff]  ;;  %v283_v11 = vld [vmem:[%s2004_s10 + $0xa8] sm:$0xff]  ;;  %280 = vst [vmem:[%s242_s11 + $0x48] sm:$0xff] %v279_v9 }
  0x24   : > { %282 = vst [vmem:[%s242_s11 + $0x50] sm:$0xff] %v281_v10  ;;  %284 = vst [vmem:[%s242_s11 + $0x58] sm:$0xff] %v283_v11  ;;  %v285_v12 = vld [vmem:[%s2004_s10 + $0xc0] sm:$0xff]  ;;  %v287_v13 = vld [vmem:[%s2004_s10 + $0xc8] sm:$0xff] }
  0x25   : > { %v289_v14 = vld [vmem:[%s2004_s10 + $0xe0] sm:$0xff]  ;;  %286 = vst [vmem:[%s242_s11 + $0x60] sm:$0xff] %v285_v12  ;;  %288 = vst [vmem:[%s242_s11 + $0x68] sm:$0xff] %v287_v13  ;;  %v291_v15 = vld [vmem:[%s2004_s10 + $0xe8] sm:$0xff] }
  0x26   : > { %290 = vst [vmem:[%s242_s11 + $0x70] sm:$0xff] %v289_v14  ;;  %292 = vst [vmem:[%s242_s11 + $0x78] sm:$0xff] %v291_v15 }
  0x27 PF: > { %p1535_p7 = scmp.ge.s32.totalorder %s1912_s24, 1  ;;  %p313_p8 = scmp.lt.s32.totalorder %s1912_s24, 5 }
  0x29   : > { %p314_p9 = pnand %p1535_p7, %p313_p8 }
  0x2a   : > { %s320_s12 = sand.u32 (!%p314_p9), 1, %s1888_s18   ;;  %s1537_s13 = sshll.u32 (!%p314_p9), %s1896_s20, 6 }
  0x2b   : > { %317 = sbr.rel (%p314_p9) target bundleno = 583 (0x247), region = 51  ;;  %s1536_s14 = sshll.u32 (!%p314_p9), %s320_s12, 7 }
  0x2c   : > { %p392_p10 = scmp.lt.s32.totalorder (!%p314_p9), %s1900_s21, 1  ;;  %p394_p11 = scmp.lt.s32.totalorder (!%p314_p9), %s1537_s13, 127 }
  0x2d   : > { %p444_p12 = scmp.eq.s32.totalorder (!%p314_p9), %s1896_s20, 0  ;;  %p1546_p13 = scmp.ne.s32.totalorder (!%p314_p9), %s1896_s20, 0 }
  0x32   : > { %s2314_s21 = smov (!%p392_p10, %s1900_s21), 1  ;;  %s2316_s13 = smov (!%p394_p11, %s1537_s13), 127 }
  0x33   : > { %s1538_s15 = sshll.u32 %s2314_s21, 7  ;;  %s1609_s16 = sshll.u32 %s2314_s21, 5  ;;  %v1914_v16 = vmov (!%p1546_p13), 0.0  }
  0x34   : > { %s400_s17 = sadd.s32 %s1538_s15, %s2316_s13  ;;  %s2031_s30 = scalar_lea.vmem %s2294_s3, %s1609_s16  ;;  %448 = vst [vmem:[#allocation2] sm:$0xff] (!%p1546_p13), %v1914_v16  ;;  %449 = vst [vmem:[#allocation2 + $0x8] sm:$0xff] (!%p1546_p13), %v1914_v16 }
  0x35   : > { %s1539_s6 = sshll.u32 %s400_s17, 2  ;;  %s1610_s7 = sshll.u32 %s2314_s21, 6  ;;  %450 = vst [vmem:[#allocation2 + $0x10] sm:$0xff] (!%p1546_p13), %v1914_v16  ;;  %451 = vst [vmem:[#allocation2 + $0x18] sm:$0xff] (!%p1546_p13), %v1914_v16 }
  0x36   : > { %s2036_s18 = scalar_lea.vmem %s2292_s1, %s1539_s6  ;;  %s2041_s12 = scalar_lea.vmem %s2295_s4, %s1610_s7  ;;  %452 = vst [vmem:[#allocation2 + $0x20] sm:$0xff] (!%p1546_p13), %v1914_v16  ;;  %453 = vst [vmem:[#allocation2 + $0x28] sm:$0xff] (!%p1546_p13), %v1914_v16 }
  0x37   : > { %s2046_s13 = scalar_lea.vmem %s2296_s5, %s1610_s7  ;;  %s2049_s15 = scalar_lea.vmem [#allocation5], %s1536_s14  ;;  %454 = vst [vmem:[#allocation2 + $0x30] sm:$0xff] (!%p1546_p13), %v1914_v16  ;;  %455 = vst [vmem:[#allocation2 + $0x38] sm:$0xff] (!%p1546_p13), %v1914_v16 }
  0x38   : > { %447 = sbr.rel (%p1546_p13) target bundleno = 63 (0x3f), region = 59 }
  0x3f PF: > { %460 = sbr.rel (!%p444_p12) target bundleno = 72 (0x48), region = 63  ;;  %vm461_vm0 = vcmask (%p444_p12), 7168   ;;  %v1915_v17 = vmov (%p444_p12), 0.0  }
  0x40   : > { %462 = vst.msk [vmem:[#allocation3] sm:$0xff] (%p444_p12), %vm461_vm0, %v1915_v17  ;;  %463 = vst.msk [vmem:[#allocation3 + $0x8] sm:$0xff] (%p444_p12), %vm461_vm0, %v1915_v17 }
  0x41   : > { %464 = vst.msk [vmem:[#allocation3 + $0x10] sm:$0xff] (%p444_p12), %vm461_vm0, %v1915_v17  ;;  %465 = vst.msk [vmem:[#allocation3 + $0x18] sm:$0xff] (%p444_p12), %vm461_vm0, %v1915_v17 }
  0x42   : > { %466 = vst.msk [vmem:[#allocation3 + $0x20] sm:$0xff] (%p444_p12), %vm461_vm0, %v1915_v17  ;;  %467 = vst.msk [vmem:[#allocation3 + $0x28] sm:$0xff] (%p444_p12), %vm461_vm0, %v1915_v17 }
  0x43   : > { %468 = vst.msk [vmem:[#allocation3 + $0x30] sm:$0xff] (%p444_p12), %vm461_vm0, %v1915_v17  ;;  %469 = vst.msk [vmem:[#allocation3 + $0x38] sm:$0xff] (%p444_p12), %vm461_vm0, %v1915_v17 }
  0x44   : > { %470 = vst.msk [vmem:[#allocation4] sm:$0xff] (%p444_p12), %vm461_vm0, %v1915_v17  ;;  %471 = vst.msk [vmem:[#allocation4 + $0x8] sm:$0xff] (%p444_p12), %vm461_vm0, %v1915_v17 }
  0x45   : > { %472 = vst.msk [vmem:[#allocation4 + $0x10] sm:$0xff] (%p444_p12), %vm461_vm0, %v1915_v17  ;;  %473 = vst.msk [vmem:[#allocation4 + $0x18] sm:$0xff] (%p444_p12), %vm461_vm0, %v1915_v17 }
  0x46   : > { %474 = vst.msk [vmem:[#allocation4 + $0x20] sm:$0xff] %vm461_vm0, %v1915_v17  ;;  %475 = vst.msk [vmem:[#allocation4 + $0x28] sm:$0xff] %vm461_vm0, %v1915_v17 }
  0x47   : > { %476 = vst.msk [vmem:[#allocation4 + $0x30] sm:$0xff] %vm461_vm0, %v1915_v17  ;;  %477 = vst.msk [vmem:[#allocation4 + $0x38] sm:$0xff] %vm461_vm0, %v1915_v17 }
  0x48 PF: > { %v1784_v18 = vld [vmem:[%s2036_s18 + $0x40] sm:$0xff]   ;;  %v1788_v22 = vld [vmem:[%s2036_s18 + $0x48] sm:$0xff]   ;;  %v1792_v26 = vld [vmem:[%s2036_s18 + $0x50] sm:$0xff]   ;;  %p984_p0 = scmp.eq.s32.totalorder %s1896_s20, 1  ;;  %p1596_p1 = scmp.ne.s32.totalorder %s1896_s20, 1 }
  0x49   : > { %v1785_v19 = vld [vmem:[%s2036_s18 + $0xc0] sm:$0xff]   ;;  %1645 = vmatprep.subr.bf16.mxu0 %v1784_v18  ;;  %v1789_v23 = vld [vmem:[%s2036_s18 + $0xc8] sm:$0xff]   ;;  %v1793_v27 = vld [vmem:[%s2036_s18 + $0xd0] sm:$0xff]   ;;  %vm1028_vm1 = vcmask (!%p1596_p1), 7168  }
  0x4a   : > { %v1786_v20 = vld [vmem:[%s2036_s18] sm:$0xff]   ;;  %1685 = vmatprep.subr.bf16.mxu1 %v1785_v19  ;;  %v1790_v24 = vld [vmem:[%s2036_s18 + $0x8] sm:$0xff]   ;;  %v1794_v28 = vld [vmem:[%s2036_s18 + $0x10] sm:$0xff]  }
  0x4b   : > { %v1787_v21 = vld [vmem:[%s2036_s18 + $0x80] sm:$0xff]   ;;  %1646 = vmatpush3.bf16.msra.mxu0 %v1786_v20  ;;  %v1791_v25 = vld [vmem:[%s2036_s18 + $0x88] sm:$0xff]   ;;  %v1795_v29 = vld [vmem:[%s2036_s18 + $0x90] sm:$0xff]  }
  0x4c   : > { %1686 = vmatpush3.bf16.msra.mxu1 %v1787_v21  ;;  %1647 = vmatprep.subr.bf16.mxu0 %v1788_v22  ;;  %v1796_v30 = vld [vmem:[%s2036_s18 + $0x58] sm:$0xff]   ;;  %v1800_v34 = vld [vmem:[%s2036_s18 + $0x60] sm:$0xff]   ;;  %v1804_v38 = vld [vmem:[%s2036_s18 + $0x68] sm:$0xff]  }
  0x4d   : > { %1687 = vmatprep.subr.bf16.mxu1 %v1789_v23  ;;  %v1797_v31 = vld [vmem:[%s2036_s18 + $0xd8] sm:$0xff]   ;;  %v1801_v35 = vld [vmem:[%s2036_s18 + $0xe0] sm:$0xff]   ;;  %v1805_v39 = vld [vmem:[%s2036_s18 + $0xe8] sm:$0xff]  }
  0x4e   : > { %v1798_v32 = vld [vmem:[%s2036_s18 + $0x18] sm:$0xff]   ;;  %v1802_v36 = vld [vmem:[%s2036_s18 + $0x20] sm:$0xff]   ;;  %v1806_v40 = vld [vmem:[%s2036_s18 + $0x28] sm:$0xff]  }
  0x4f   : > { %1648 = vmatpush3.bf16.msra.mxu0 %v1790_v24  ;;  %v1799_v33 = vld [vmem:[%s2036_s18 + $0x98] sm:$0xff]   ;;  %v1803_v37 = vld [vmem:[%s2036_s18 + $0xa0] sm:$0xff]   ;;  %v1807_v41 = vld [vmem:[%s2036_s18 + $0xa8] sm:$0xff]  }
  0x50   : > { %1688 = vmatpush3.bf16.msra.mxu1 %v1791_v25  ;;  %1649 = vmatprep.subr.bf16.mxu0 %v1792_v26  ;;  %v1808_v42 = vld [vmem:[%s2036_s18 + $0x70] sm:$0xff]   ;;  %v1812_v46 = vld [vmem:[%s2036_s18 + $0x78] sm:$0xff]   ;;  %v478_v11 = vld [vmem:[#allocation2] sm:$0xff] }
  0x51   : > { %1689 = vmatprep.subr.bf16.mxu1 %v1793_v27  ;;  %v1809_v43 = vld [vmem:[%s2036_s18 + $0xf0] sm:$0xff]   ;;  %v1813_v47 = vld [vmem:[%s2036_s18 + $0xf8] sm:$0xff]   ;;  %v479_v16 = vld [vmem:[#allocation2 + $0x8] sm:$0xff] }
  0x52   : > { %v1810_v44 = vld [vmem:[%s2036_s18 + $0x30] sm:$0xff]   ;;  %v1814_v48 = vld [vmem:[%s2036_s18 + $0x38] sm:$0xff]  }
  0x53   : > { %1650 = vmatpush3.bf16.msra.mxu0 %v1794_v28  ;;  %v1811_v45 = vld [vmem:[%s2036_s18 + $0xb0] sm:$0xff]   ;;  %v1815_v49 = vld [vmem:[%s2036_s18 + $0xb8] sm:$0xff]  }
  0x54   : > { %1690 = vmatpush3.bf16.msra.mxu1 %v1795_v29  ;;  %1651 = vmatprep.subr.bf16.mxu0 %v1796_v30  ;;  %v1816_v50 = vld [vmem:[%s2049_s15] ss:$16 sps:$4 sm:$0xff]   ;;  %v1818_v51 = vld [vmem:[%s2049_s15 + $0x4] ss:$16 sps:$4 sm:$0xff]   ;;  %v1819_v52 = vld [vmem:[%s2049_s15 + $0x8] ss:$16 sps:$4 sm:$0xff]  }
  0x55   : > { %1691 = vmatprep.subr.bf16.mxu1 %v1797_v31  ;;  %v1821_v53 = vld [vmem:[%s2049_s15 + $0xc] ss:$16 sps:$4 sm:$0xff]   ;;  %870 = vmatprep.mubr.bf16.mxu0 %v1818_v51  ;;  %v1822_v54 = vld [vmem:[%s2049_s15 + $0x24] ss:$16 sps:$4 sm:$0xff]   ;;  %v1826_v56 = vld [vmem:[%s2049_s15 + $0x20] ss:$16 sps:$4 sm:$0xff]  }
  0x56   : > { %935 = vmatprep.mubr.bf16.mxu1 %v1821_v53  ;;  %v1824_v55 = vld [vmem:[%s2049_s15 + $0x2c] ss:$16 sps:$4 sm:$0xff]   ;;  %v1827_v57 = vld [vmem:[%s2049_s15 + $0x28] ss:$16 sps:$4 sm:$0xff]   ;;  %v1828_v58 = vld [vmem:[%s2049_s15 + $0x44] ss:$16 sps:$4 sm:$0xff]  }
  0x57   : > { %1652 = vmatpush3.bf16.msra.mxu0 %v1798_v32  ;;  %v1830_v59 = vld [vmem:[%s2049_s15 + $0x4c] ss:$16 sps:$4 sm:$0xff]   ;;  %v1832_v60 = vld [vmem:[%s2049_s15 + $0x40] ss:$16 sps:$4 sm:$0xff]   ;;  %v1833_v61 = vld [vmem:[%s2049_s15 + $0x48] ss:$16 sps:$4 sm:$0xff]  }
  0x58   : > { %1692 = vmatpush3.bf16.msra.mxu1 %v1799_v33  ;;  %1653 = vmatprep.subr.bf16.mxu0 %v1800_v34  ;;  %v1834_v62 = vld [vmem:[%s2049_s15 + $0x64] ss:$16 sps:$4 sm:$0xff]   ;;  %v1836_v63 = vld [vmem:[%s2049_s15 + $0x6c] ss:$16 sps:$4 sm:$0xff]   ;;  %v1838_v0 = vld [vmem:[%s2049_s15 + $0x60] ss:$16 sps:$4 sm:$0xff]  }
  0x59   : > { %1693 = vmatprep.subr.bf16.mxu1 %v1801_v35  ;;  %v1839_v1 = vld [vmem:[%s2049_s15 + $0x68] ss:$16 sps:$4 sm:$0xff]   ;;  %v480_v29 = vld [vmem:[#allocation2 + $0x10] sm:$0xff] }
  0x5a   : > { %v481_v34 = vld [vmem:[#allocation2 + $0x18] sm:$0xff] }
  0x5b   : > { %1654 = vmatpush3.bf16.msra.mxu0 %v1802_v36 }
  0x5c   : > { %1694 = vmatpush3.bf16.msra.mxu1 %v1803_v37  ;;  %1655 = vmatprep.subr.bf16.mxu0 %v1804_v38 }
  0x5d   : > { %1695 = vmatprep.subr.bf16.mxu1 %v1805_v39 }
  0x5f   : > { %1656 = vmatpush3.bf16.msra.mxu0 %v1806_v40 }
  0x60   : > { %1696 = vmatpush3.bf16.msra.mxu1 %v1807_v41  ;;  %1657 = vmatprep.subr.bf16.mxu0 %v1808_v42 }
  0x61   : > { %1697 = vmatprep.subr.bf16.mxu1 %v1809_v43 }
  0x63   : > { %1658 = vmatpush3.bf16.msra.mxu0 %v1810_v44 }
  0x64   : > { %1698 = vmatpush3.bf16.msra.mxu1 %v1811_v45  ;;  %1659 = vmatprep.subr.bf16.mxu0 %v1812_v46 }
  0x65   : > { %1699 = vmatprep.subr.bf16.mxu1 %v1813_v47  ;;  %v482_v47 = vld [vmem:[#allocation2 + $0x20] sm:$0xff] }
  0x67   : > { %1660 = vmatpush3.bf16.msra.mxu0 %v1814_v48 }
  0x68   : > { %1700 = vmatpush3.bf16.msra.mxu1 %v1815_v49 }
  0x6a   : > { %871 = vmatmul.mubr.bf16.vlgmr.msra.gmra.mrb[0].mxu0 %v1816_v50 }
  0x6b   : > { %936 = vmatmul.mubr.bf16.vlgmr.msra.gmra.mrb[0].mxu1 %v1819_v52  ;;  %878 = vmatprep.mubr.bf16.mxu0 %v1822_v54  ;;  %v483_v52 = vld [vmem:[#allocation2 + $0x28] sm:$0xff] }
  0x6c   : > { %943 = vmatprep.mubr.bf16.mxu1 %v1824_v55 }
  0x72   : > { %879 = vmatmul.mubr.bf16.gmra.mrb[4].mxu0 %v1826_v56 }
  0x73   : > { %944 = vmatmul.mubr.bf16.gmra.mrb[4].mxu1 %v1827_v57  ;;  %886 = vmatprep.mubr.bf16.mxu0 %v1828_v58 }
  0x74   : > { %951 = vmatprep.mubr.bf16.mxu1 %v1830_v59 }
  0x7a   : > { %887 = vmatmul.mubr.bf16.gmra.mrb[8].mxu0 %v1832_v60 }
  0x7b   : > { %952 = vmatmul.mubr.bf16.gmra.mrb[8].mxu1 %v1833_v61  ;;  %894 = vmatprep.mubr.bf16.mxu0 %v1834_v62 }
  0x7c   : > { %959 = vmatprep.mubr.bf16.mxu1 %v1836_v63 }
  0x82   : > { %895 = vmatmul.mubr.bf16.gmra.mrb[12].mxu0 %v1838_v0 }
  0x83   : > { %960 = vmatmul.mubr.bf16.gmra.mrb[12].mxu1 %v1839_v1  ;;  %v484_v1 = vld [vmem:[#allocation2 + $0x30] sm:$0xff] }
 0x13d   : > { %v1661_v2 = vpop.f32.mrb[0].mxu0 }
 0x13e   : > { %v1701_v3 = vpop.f32.mrb[0].mxu1  ;;  %v1662_v4 = vpop.f32.mrb[1].mxu0 }
 0x13f   : > { %v1663_v5 = vadd.f32 %v1662_v4, %v1661_v2  ;;  %v1702_v6 = vpop.f32.mrb[1].mxu1  ;;  %v1664_v7 = vpop.f32.mrb[2].mxu0 }
 0x140   : > { %v1703_v8 = vadd.f32 %v1702_v6, %v1701_v3  ;;  %v1704_v9 = vpop.f32.mrb[2].mxu1  ;;  %v1665_v10 = vpop.f32.mrb[3].mxu0  ;;  %v485_v6 = vld [vmem:[#allocation2 + $0x38] sm:$0xff] }
 0x141   : > { %v1666_v12 = vadd.f32 %v1665_v10, %v1664_v7  ;;  %v1705_v13 = vpop.f32.mrb[3].mxu1 }
 0x142   : > { %v938_v14 = vadd.f32 %v1703_v8, %v1663_v5  ;;  %v1706_v15 = vadd.f32 %v1705_v13, %v1704_v9 }
 0x144   : > { %v968_v17 = vadd.f32 %v938_v14, %v478_v11  ;;  %v941_v18 = vadd.f32 %v1706_v15, %v1666_v12  ;;  %v1916_v14 = vmov (!%p1596_p1), 0  }
 0x145   : > { %v1667_v19 = vpop.f32.mrb[4].mxu0  ;;  %1841 = vset.pattern.permute.xlu1 (!%p1596_p1), %v1916_v14  ;;  %1840 = vset.pattern.permute.xlu0 (!%p1596_p1), %v1916_v14 }
 0x146   : > { %976 = vst [vmem:[#allocation2] sm:$0xff] %v968_v17  ;;  %v969_v20 = vadd.f32 %v941_v18, %v479_v16  ;;  %v1707_v21 = vpop.f32.mrb[4].mxu1  ;;  %v1668_v22 = vpop.f32.mrb[5].mxu0 }
 0x147   : > { %v1669_v23 = vadd.f32 %v1668_v22, %v1667_v19  ;;  %v1708_v24 = vpop.f32.mrb[5].mxu1  ;;  %v1670_v25 = vpop.f32.mrb[6].mxu0 }
 0x148   : > { %977 = vst [vmem:[#allocation2 + $0x8] sm:$0xff] %v969_v20  ;;  %v1709_v26 = vadd.f32 %v1708_v24, %v1707_v21  ;;  %v1710_v27 = vpop.f32.mrb[6].mxu1  ;;  %v1671_v28 = vpop.f32.mrb[7].mxu0 }
 0x149   : > { %v1672_v30 = vadd.f32 %v1671_v28, %v1670_v25  ;;  %v1711_v31 = vpop.f32.mrb[7].mxu1  ;;  %v1087_v28 = vld [vmem:[%s2293_s2 + $0x10] sm:$0xff] (!%p1596_p1) }
 0x14a   : > { %v946_v32 = vadd.f32 %v1709_v26, %v1669_v23  ;;  %v1712_v33 = vadd.f32 %v1711_v31, %v1710_v27  ;;  %v1086_v27 = vld [vmem:[%s2293_s2 + $0x8] sm:$0xff] (!%p1596_p1)  ;;  %v1089_v31 = vld [vmem:[%s2293_s2 + $0x20] sm:$0xff] (!%p1596_p1) }
 0x14c   : > { %v970_v35 = vadd.f32 %v946_v32, %v480_v29  ;;  %v949_v36 = vadd.f32 %v1712_v33, %v1672_v30  ;;  %v1085_v29 = vld [vmem:[%s2293_s2] sm:$0xff] (!%p1596_p1)  ;;  %v1088_v30 = vld [vmem:[%s2293_s2 + $0x18] sm:$0xff] (!%p1596_p1)  ;;  %v1090_v32 = vld [vmem:[%s2293_s2 + $0x28] sm:$0xff] (!%p1596_p1) }
 0x14d   : > { %v1673_v37 = vpop.f32.mrb[8].mxu0  ;;  %v2122_v11 = vld [vmem:[#allocation2] sm:$0xff] (!%p1596_p1)  ;;  %v1091_v33 = vld [vmem:[%s2293_s2 + $0x30] sm:$0xff] (!%p1596_p1) }
 0x14e   : > { %978 = vst [vmem:[#allocation2 + $0x10] sm:$0xff] %v970_v35  ;;  %v971_v38 = vadd.f32 %v949_v36, %v481_v34  ;;  %v1713_v39 = vpop.f32.mrb[8].mxu1  ;;  %v1674_v40 = vpop.f32.mrb[9].mxu0  ;;  %1004 = vadd.xlane.f32.xlu0 (!%p1596_p1), %v2122_v11  ;;  %v1045_v20 = vmul.f32 (!%p1596_p1), %v2122_v11, %v2122_v11  ;;  %v1092_v34 = vld [vmem:[%s2293_s2 + $0x38] sm:$0xff] (!%p1596_p1)  ;;  %v998_v35 = vld [vmem:[#allocation3 + $0x10] sm:$0xff] (!%p1596_p1)  ;;  %v996_v36 = vld [vmem:[#allocation3] sm:$0xff] (!%p1596_p1) }
 0x14f   : > { %v1675_v41 = vadd.f32 %v1674_v40, %v1673_v37  ;;  %v1714_v42 = vpop.f32.mrb[9].mxu1  ;;  %v1676_v43 = vpop.f32.mrb[10].mxu0  ;;  %v2128_v13 = vld [vmem:[#allocation2 + $0x8] sm:$0xff] (!%p1596_p1) }
 0x150   : > { %979 = vst [vmem:[#allocation2 + $0x18] sm:$0xff] %v971_v38  ;;  %v1715_v44 = vadd.f32 %v1714_v42, %v1713_v39  ;;  %v1716_v45 = vpop.f32.mrb[10].mxu1  ;;  %v1677_v46 = vpop.f32.mrb[11].mxu0  ;;  %v1046_v19 = vmul.f32 (!%p1596_p1), %v2128_v13, %v2128_v13  ;;  %v997_v42 = vld [vmem:[#allocation3 + $0x8] sm:$0xff] (!%p1596_p1) }
 0x151   : > { %v1678_v48 = vadd.f32 %v1677_v46, %v1676_v43  ;;  %v1717_v49 = vpop.f32.mrb[11].mxu1 }
 0x152   : > { %v954_v50 = vadd.f32 %v1715_v44, %v1675_v41  ;;  %v1718_v51 = vadd.f32 %v1717_v49, %v1716_v45  ;;  %1006 = vadd.xlane.f32.xlu0 (!%p1596_p1), %v2128_v13  ;;  %v999_v41 = vld [vmem:[#allocation3 + $0x18] sm:$0xff] (!%p1596_p1) }
 0x154   : > { %v972_v53 = vadd.f32 %v954_v50, %v482_v47  ;;  %v957_v54 = vadd.f32 %v1718_v51, %v1678_v48  ;;  %v1001_v47 = vld [vmem:[#allocation3 + $0x28] sm:$0xff] (!%p1596_p1)  ;;  %v1000_v48 = vld [vmem:[#allocation3 + $0x20] sm:$0xff] (!%p1596_p1) }
 0x155   : > { %v1679_v55 = vpop.f32.mrb[12].mxu0  ;;  %v2120_v10 = vld [vmem:[#allocation2 + $0x10] sm:$0xff] (!%p1596_p1) }
 0x156   : > { %980 = vst [vmem:[#allocation2 + $0x20] sm:$0xff] %v972_v53  ;;  %v973_v56 = vadd.f32 %v957_v54, %v483_v52  ;;  %v1719_v57 = vpop.f32.mrb[12].mxu1  ;;  %v1680_v58 = vpop.f32.mrb[13].mxu0  ;;  %1008 = vadd.xlane.f32.xlu1 (!%p1596_p1), %v2120_v10  ;;  %v1047_v22 = vmul.f32 (!%p1596_p1), %v2120_v10, %v2120_v10  ;;  %v1003_v53 = vld [vmem:[#allocation3 + $0x38] sm:$0xff] (!%p1596_p1)  ;;  %v1002_v54 = vld [vmem:[#allocation3 + $0x30] sm:$0xff] (!%p1596_p1) }
 0x157   : > { %v1681_v59 = vadd.f32 %v1680_v58, %v1679_v55  ;;  %v1720_v60 = vpop.f32.mrb[13].mxu1  ;;  %v1682_v61 = vpop.f32.mrb[14].mxu0  ;;  %v2126_v12 = vld [vmem:[#allocation2 + $0x18] sm:$0xff] (!%p1596_p1) }
 0x158   : > { %981 = vst [vmem:[#allocation2 + $0x28] sm:$0xff] %v973_v56  ;;  %v1721_v62 = vadd.f32 %v1720_v60, %v1719_v57  ;;  %v1722_v63 = vpop.f32.mrb[14].mxu1  ;;  %v1683_v0 = vpop.f32.mrb[15].mxu0  ;;  %v1048_v21 = vmul.f32 (!%p1596_p1), %v2126_v12, %v2126_v12  ;;  %v1037_v60 = vld [vmem:[#allocation4] sm:$0xff] (!%p1596_p1) }
 0x159   : > { %v1684_v2 = vadd.f32 %v1683_v0, %v1682_v61  ;;  %v1723_v3 = vpop.f32.mrb[15].mxu1 }
 0x15a   : > { %v962_v4 = vadd.f32 %v1721_v62, %v1681_v59  ;;  %v1724_v5 = vadd.f32 %v1723_v3, %v1722_v63  ;;  %987 = sbr.rel (%p1596_p1) target bundleno = 551 (0x227), region = 67  ;;  %1010 = vadd.xlane.f32.xlu1 (!%p1596_p1), %v2126_v12  ;;  %v1038_v59 = vld [vmem:[#allocation4 + $0x8] sm:$0xff] (!%p1596_p1) }
 0x15c   : > { %v974_v7 = vadd.f32 %v962_v4, %v484_v1  ;;  %v965_v8 = vadd.f32 %v1724_v5, %v1684_v2  ;;  %v1040_v1 = vld [vmem:[#allocation4 + $0x18] sm:$0xff] (!%p1596_p1)  ;;  %v1039_v2 = vld [vmem:[#allocation4 + $0x10] sm:$0xff] (!%p1596_p1) }
 0x15d   : > { %v2134_v16 = vld [vmem:[#allocation2 + $0x20] sm:$0xff] (!%p1596_p1) }
 0x15e   : > { %982 = vst [vmem:[#allocation2 + $0x30] sm:$0xff] %v974_v7  ;;  %v975_v9 = vadd.f32 %v965_v8, %v485_v6  ;;  %1012 = vadd.xlane.f32.xlu0 (!%p1596_p1), %v2134_v16  ;;  %v1049_v24 = vmul.f32 (!%p1596_p1), %v2134_v16, %v2134_v16  ;;  %v1042_v7 = vld [vmem:[#allocation4 + $0x28] sm:$0xff] (!%p1596_p1)  ;;  %v1041_v8 = vld [vmem:[#allocation4 + $0x20] sm:$0xff] (!%p1596_p1) }
 0x15f   : > { %v2132_v15 = vld [vmem:[#allocation2 + $0x28] sm:$0xff] (!%p1596_p1) }
 0x160   : > { %983 = vst [vmem:[#allocation2 + $0x38] sm:$0xff] %v975_v9  ;;  %1014 = vadd.xlane.f32.xlu1 (!%p1596_p1), %v2132_v15  ;;  %v1050_v23 = vmul.f32 (!%p1596_p1), %v2132_v15, %v2132_v15 }
 0x165   : > { %v2140_v18 = vld [vmem:[#allocation2 + $0x30] sm:$0xff] }
 0x166   : > { %1016 = vadd.xlane.f32.xlu0 %v2140_v18  ;;  %v1051_v26 = vmul.f32 %v2140_v18, %v2140_v18 }
 0x167   : > { %v2138_v17 = vld [vmem:[#allocation2 + $0x38] sm:$0xff] }
 0x168   : > { %1018 = vadd.xlane.f32.xlu1 %v2138_v17  ;;  %v1052_v25 = vmul.f32 %v2138_v17, %v2138_v17 }
 0x16a   : > { %1053 = vadd.xlane.f32.xlu0 %v1045_v20 }
 0x16c   : > { %1055 = vadd.xlane.f32.xlu1 %v1046_v19 }
 0x16e   : > { %1057 = vadd.xlane.f32.xlu0 %v1047_v22  ;;  %v1043_v22 = vld [vmem:[#allocation4 + $0x30] sm:$0xff] }
 0x170   : > { %1059 = vadd.xlane.f32.xlu1 %v1048_v21  ;;  %v1044_v21 = vld [vmem:[#allocation4 + $0x38] sm:$0xff] }
 0x172   : > { %1061 = vadd.xlane.f32.xlu0 %v1049_v24 }
 0x174   : > { %1063 = vadd.xlane.f32.xlu1 %v1050_v23 }
 0x176   : > { %1065 = vadd.xlane.f32.xlu0 %v1051_v26 }
 0x178   : > { %1067 = vadd.xlane.f32.xlu1 %v1052_v25 }
 0x189   : > { %1100 = vperm.xlu1 %1841, %v1086_v27  }
 0x18c   : > { %1095 = vperm.xlu0 %1840, %v1085_v29  }
 0x18d   : > { %1105 = vperm.xlu1 %1841, %v1087_v28  }
 0x191   : > { %1110 = vperm.xlu1 %1841, %v1088_v30  }
 0x195   : > { %1115 = vperm.xlu1 %1841, %v1089_v31  }
 0x199   : > { %1120 = vperm.xlu1 %1841, %v1090_v32  }
 0x19d   : > { %1125 = vperm.xlu1 %1841, %v1091_v33  }
 0x1a1   : > { %1130 = vperm.xlu1 %1841, %v1092_v34  }
 0x1db   : > { %v1005_v38 = vpop.xlane.xlu0 %1004 }
 0x1dc   : > { %v1020_v40 = vadd.f32 %v1005_v38, %v996_v36 }
 0x1de   : > { %1029 = vst.msk [vmem:[#allocation3] sm:$0xff] %vm1028_vm1, %v1020_v40 }
 0x1df   : > { %v1007_v44 = vpop.xlane.xlu0 %1006 }
 0x1e0   : > { %v1021_v46 = vadd.f32 %v1007_v44, %v997_v42 }
 0x1e2   : > { %1030 = vst.msk [vmem:[#allocation3 + $0x8] sm:$0xff] %vm1028_vm1, %v1021_v46 }
 0x1e3   : > { %v1009_v37 = vpop.xlane.xlu1 %1008 }
 0x1e4   : > { %v1022_v39 = vadd.f32 %v1009_v37, %v998_v35 }
 0x1e6   : > { %1031 = vst.msk [vmem:[#allocation3 + $0x10] sm:$0xff] %vm1028_vm1, %v1022_v39 }
 0x1e7   : > { %v1011_v43 = vpop.xlane.xlu1 %1010 }
 0x1e8   : > { %v1023_v45 = vadd.f32 %v1011_v43, %v999_v41 }
 0x1ea   : > { %1032 = vst.msk [vmem:[#allocation3 + $0x18] sm:$0xff] %vm1028_vm1, %v1023_v45 }
 0x1eb   : > { %v1013_v50 = vpop.xlane.xlu0 %1012 }
 0x1ec   : > { %v1024_v52 = vadd.f32 %v1013_v50, %v1000_v48 }
 0x1ed   : > { %v1015_v49 = vpop.xlane.xlu1 %1014 }
 0x1ee   : > { %v1025_v51 = vadd.f32 %v1015_v49, %v1001_v47  ;;  %1033 = vst.msk [vmem:[#allocation3 + $0x20] sm:$0xff] %vm1028_vm1, %v1024_v52 }
 0x1f0   : > { %1034 = vst.msk [vmem:[#allocation3 + $0x28] sm:$0xff] %vm1028_vm1, %v1025_v51 }
 0x1f3   : > { %v1017_v56 = vpop.xlane.xlu0 %1016 }
 0x1f4   : > { %v1026_v58 = vadd.f32 %v1017_v56, %v1002_v54 }
 0x1f5   : > { %v1019_v55 = vpop.xlane.xlu1 %1018 }
 0x1f6   : > { %v1027_v57 = vadd.f32 %v1019_v55, %v1003_v53  ;;  %1035 = vst.msk [vmem:[#allocation3 + $0x30] sm:$0xff] %vm1028_vm1, %v1026_v58 }
 0x1f7   : > { %v1054_v62 = vpop.xlane.xlu0 %1053 }
 0x1f8   : > { %1036 = vst.msk [vmem:[#allocation3 + $0x38] sm:$0xff] %vm1028_vm1, %v1027_v57  ;;  %v1069_v0 = vadd.f32 %v1054_v62, %v1037_v60 }
 0x1f9   : > { %v1056_v61 = vpop.xlane.xlu1 %1055 }
 0x1fa   : > { %v1070_v63 = vadd.f32 %v1056_v61, %v1038_v59  ;;  %1077 = vst.msk [vmem:[#allocation4] sm:$0xff] %vm1028_vm1, %v1069_v0 }
 0x1fb   : > { %v1058_v4 = vpop.xlane.xlu0 %1057 }
 0x1fc   : > { %1078 = vst.msk [vmem:[#allocation4 + $0x8] sm:$0xff] %vm1028_vm1, %v1070_v63  ;;  %v1071_v6 = vadd.f32 %v1058_v4, %v1039_v2 }
 0x1fd   : > { %v1060_v3 = vpop.xlane.xlu1 %1059 }
 0x1fe   : > { %v1072_v5 = vadd.f32 %v1060_v3, %v1040_v1  ;;  %1079 = vst.msk [vmem:[#allocation4 + $0x10] sm:$0xff] %vm1028_vm1, %v1071_v6 }
 0x1ff   : > { %v1062_v14 = vpop.xlane.xlu0 %1061 }
 0x200   : > { %1080 = vst.msk [vmem:[#allocation4 + $0x18] sm:$0xff] %vm1028_vm1, %v1072_v5  ;;  %v1073_v20 = vadd.f32 %v1062_v14, %v1041_v8 }
 0x201   : > { %v1064_v9 = vpop.xlane.xlu1 %1063 }
 0x202   : > { %v1074_v19 = vadd.f32 %v1064_v9, %v1042_v7  ;;  %1081 = vst.msk [vmem:[#allocation4 + $0x20] sm:$0xff] %vm1028_vm1, %v1073_v20 }
 0x203   : > { %v1066_v24 = vpop.xlane.xlu0 %1065 }
 0x204   : > { %1082 = vst.msk [vmem:[#allocation4 + $0x28] sm:$0xff] %vm1028_vm1, %v1074_v19  ;;  %v1075_v26 = vadd.f32 %v1066_v24, %v1043_v22 }
 0x205   : > { %v1068_v23 = vpop.xlane.xlu1 %1067 }
 0x206   : > { %v1076_v25 = vadd.f32 %v1068_v23, %v1044_v21  ;;  %1083 = vst.msk [vmem:[#allocation4 + $0x30] sm:$0xff] %vm1028_vm1, %v1075_v26 }
 0x208   : > { %1084 = vst.msk [vmem:[#allocation4 + $0x38] sm:$0xff] %vm1028_vm1, %v1076_v25 }
 0x209   : > { %v1101_v27 = vpop.permute.xlu1 %1100 }
 0x20a   : > { %v1134_v30 = vadd.f32 %v1101_v27, %v2128_v13 }
 0x20b   : > { %v1096_v29 = vpop.permute.xlu0 %1095 }
 0x20c   : > { %v1133_v31 = vadd.f32 %v1096_v29, %v2122_v11 }
 0x20d   : > { %v1106_v28 = vpop.permute.xlu1 %1105 }
 0x20e   : > { %v1625_v32 = vpack.c.bf16 %v1134_v30, %v1133_v31  ;;  %v1135_v34 = vadd.f32 %v1106_v28, %v2120_v10 }
 0x210   : > { %1626 = vst [vmem:[%s2031_s30] sm:$0xff] %v1625_v32  }
 0x211   : > { %v1111_v33 = vpop.permute.xlu1 %1110 }
 0x212   : > { %v1136_v35 = vadd.f32 %v1111_v33, %v2126_v12 }
 0x214   : > { %v1630_v36 = vpack.c.bf16 %v1136_v35, %v1135_v34 }
 0x215   : > { %v1116_v37 = vpop.permute.xlu1 %1115 }
 0x216   : > { %1642 = vst [vmem:[%s2031_s30 + $0x8] sm:$0xff] %v1630_v36   ;;  %v1137_v39 = vadd.f32 %v1116_v37, %v2134_v16 }
 0x219   : > { %v1121_v38 = vpop.permute.xlu1 %1120 }
 0x21a   : > { %v1138_v40 = vadd.f32 %v1121_v38, %v2132_v15 }
 0x21c   : > { %v1635_v41 = vpack.c.bf16 %v1138_v40, %v1137_v39 }
 0x21d   : > { %v1126_v13 = vpop.permute.xlu1 %1125 }
 0x21e   : > { %1643 = vst [vmem:[%s2031_s30 + $0x10] sm:$0xff] %v1635_v41   ;;  %v1139_v42 = vadd.f32 %v1126_v13, %v2140_v18 }
 0x221   : > { %v1131_v11 = vpop.permute.xlu1 %1130 }
 0x222   : > { %v1140_v10 = vadd.f32 %v1131_v11, %v2138_v17 }
 0x224   : > { %v1640_v43 = vpack.c.bf16 %v1140_v10, %v1139_v42 }
 0x226   : > { %1644 = vst [vmem:[%s2031_s30 + $0x18] sm:$0xff] %v1640_v43  }
 0x227 PF: > { %1184 = sbr.rel (!%p984_p0) target bundleno = 583 (0x247), region = 71  ;;  %v1185_v12 = vld [vmem:[#allocation3] sm:$0xff] (%p984_p0)  ;;  %v1186_v46 = vld [vmem:[#allocation3 + $0x8] sm:$0xff] (%p984_p0)  ;;  %vm1249_vm2 = vcmask (%p984_p0), 7168   ;;  %v1187_v49 = vld [vmem:[#allocation3 + $0x10] sm:$0xff] (%p984_p0) }
 0x228   : > { %v1201_v44 = vld [vmem:[#allocation4] sm:$0xff] (%p984_p0)  ;;  %v1193_v16 = vmul.f32 (%p984_p0), 0.125, %v1185_v12  ;;  %v1202_v47 = vld [vmem:[#allocation4 + $0x8] sm:$0xff] (%p984_p0)  ;;  %v1194_v18 = vmul.f32 (%p984_p0), 0.125, %v1186_v46  ;;  %v1203_v50 = vld [vmem:[#allocation4 + $0x10] sm:$0xff] (%p984_p0)  ;;  %v1195_v54 = vmul.f32 (%p984_p0), 0.125, %v1187_v49 }
 0x229   : > { %v1233_v15 = vld [vmem:[%s2293_s2] sm:$0xff] (%p984_p0)  ;;  %v1209_v45 = vmul.f32 (%p984_p0), 0.125, %v1201_v44  ;;  %v1234_v17 = vld [vmem:[%s2293_s2 + $0x8] sm:$0xff] (%p984_p0)  ;;  %v1210_v48 = vmul.f32 (%p984_p0), 0.125, %v1202_v47  ;;  %v1235_v51 = vld [vmem:[%s2293_s2 + $0x10] sm:$0xff] (%p984_p0)  ;;  %v1211_v55 = vmul.f32 (%p984_p0), 0.125, %v1203_v50 }
 0x22a   : > { %v1217_v52 = vmul.f32 (%p984_p0), %v1193_v16, %v1193_v16  ;;  %v1241_v53 = vadd.f32 (%p984_p0), %v1233_v15, %v1193_v16  ;;  %v1188_v56 = vld [vmem:[#allocation3 + $0x18] sm:$0xff] (%p984_p0)  ;;  %v1218_v59 = vmul.f32 (%p984_p0), %v1194_v18, %v1194_v18  ;;  %v1242_v60 = vadd.f32 (%p984_p0), %v1234_v17, %v1194_v18  ;;  %v1189_v63 = vld [vmem:[#allocation3 + $0x20] sm:$0xff] (%p984_p0)  ;;  %v1190_v6 = vld [vmem:[#allocation3 + $0x28] sm:$0xff] (%p984_p0) }
 0x22b   : > { %v1204_v57 = vld [vmem:[#allocation4 + $0x18] sm:$0xff] (%p984_p0)  ;;  %v1196_v61 = vmul.f32 (%p984_p0), 0.125, %v1188_v56  ;;  %v1205_v0 = vld [vmem:[#allocation4 + $0x20] sm:$0xff] (%p984_p0)  ;;  %v1219_v3 = vmul.f32 (%p984_p0), %v1195_v54, %v1195_v54  ;;  %v1243_v4 = vadd.f32 (%p984_p0), %v1235_v51, %v1195_v54  ;;  %v1197_v5 = vmul.f32 (%p984_p0), 0.125, %v1189_v63  ;;  %v1206_v7 = vld [vmem:[#allocation4 + $0x28] sm:$0xff] (%p984_p0) }
 0x22c   : > { %v1236_v58 = vld [vmem:[%s2293_s2 + $0x18] sm:$0xff] (%p984_p0)  ;;  %v1212_v62 = vmul.f32 (%p984_p0), 0.125, %v1204_v57  ;;  %v1237_v1 = vld [vmem:[%s2293_s2 + $0x20] sm:$0xff] (%p984_p0)  ;;  %v1225_v2 = vsub.f32 (%p984_p0), %v1209_v45, %v1217_v52  ;;  %1250 = vst.msk [vmem:[%s2041_s12] sm:$0xff] (%p984_p0), %vm1249_vm2, %v1241_v53  ;;  %v1226_v8 = vsub.f32 (%p984_p0), %v1210_v48, %v1218_v59  ;;  %1251 = vst.msk [vmem:[%s2041_s12 + $0x8] sm:$0xff] (%p984_p0), %vm1249_vm2, %v1242_v60  ;;  %v1213_v19 = vmul.f32 (%p984_p0), 0.125, %v1205_v0 }
 0x22d   : > { %v1220_v9 = vmul.f32 (%p984_p0), %v1196_v61, %v1196_v61  ;;  %v1244_v14 = vadd.f32 (%p984_p0), %v1236_v58, %v1196_v61  ;;  %v1191_v20 = vld [vmem:[#allocation3 + $0x30] sm:$0xff] (%p984_p0)  ;;  %v1227_v22 = vsub.f32 (%p984_p0), %v1211_v55, %v1219_v3  ;;  %1252 = vst.msk [vmem:[%s2041_s12 + $0x10] sm:$0xff] (%p984_p0), %vm1249_vm2, %v1243_v4  ;;  %v1221_v23 = vmul.f32 (%p984_p0), %v1197_v5, %v1197_v5  ;;  %v1238_v25 = vld [vmem:[%s2293_s2 + $0x28] sm:$0xff] (%p984_p0)  ;;  %v1192_v35 = vld [vmem:[#allocation3 + $0x38] sm:$0xff] (%p984_p0) }
 0x22e   : > { %v1258_v21 = vadd.f32 1e-05, %v1225_v2  ;;  %v1245_v24 = vadd.f32 %v1237_v1, %v1197_v5  ;;  %v1259_v26 = vadd.f32 1e-05, %v1226_v8  ;;  %v1198_v28 = vmul.f32 0.125, %v1190_v6  ;;  %v1207_v30 = vld [vmem:[#allocation4 + $0x30] sm:$0xff] }
 0x22f   : > { %v1228_v27 = vsub.f32 %v1212_v62, %v1220_v9  ;;  %1253 = vst.msk [vmem:[%s2041_s12 + $0x18] sm:$0xff] %vm1249_vm2, %v1244_v14  ;;  %v1214_v29 = vmul.f32 0.125, %v1206_v7  ;;  %v1260_v31 = vadd.f32 1e-05, %v1227_v22  ;;  %v1229_v32 = vsub.f32 %v1213_v19, %v1221_v23  ;;  %v1239_v34 = vld [vmem:[%s2293_s2 + $0x30] sm:$0xff]  ;;  %v1208_v39 = vld [vmem:[#allocation4 + $0x38] sm:$0xff] }
 0x230   : > { %1842 = vrsqrt.f32 %v1258_v21  ;;  %1254 = vst.msk [vmem:[%s2041_s12 + $0x20] sm:$0xff] %vm1249_vm2, %v1245_v24  ;;  %v1199_v33 = vmul.f32 0.125, %v1191_v20  ;;  %v1222_v37 = vmul.f32 %v1198_v28, %v1198_v28  ;;  %v1246_v38 = vadd.f32 %v1238_v25, %v1198_v28  ;;  %v1240_v11 = vld [vmem:[%s2293_s2 + $0x38] sm:$0xff] }
 0x231   : > { %1844 = vrsqrt.f32 %v1259_v26  ;;  %v1261_v36 = vadd.f32 1e-05, %v1228_v27  ;;  %v1262_v40 = vadd.f32 1e-05, %v1229_v32  ;;  %v1215_v41 = vmul.f32 0.125, %v1207_v30 }
 0x232   : > { %1846 = vrsqrt.f32 %v1260_v31  ;;  %v1223_v13 = vmul.f32 %v1199_v33, %v1199_v33  ;;  %v1230_v42 = vsub.f32 %v1214_v29, %v1222_v37  ;;  %1255 = vst.msk [vmem:[%s2041_s12 + $0x28] sm:$0xff] %vm1249_vm2, %v1246_v38  ;;  %v1247_v10 = vadd.f32 %v1239_v34, %v1199_v33 }
 0x233   : > { %1848 = vrsqrt.f32 %v1261_v36  ;;  %v1200_v43 = vmul.f32 0.125, %v1192_v35  ;;  %v1216_v44 = vmul.f32 0.125, %v1208_v39 }
 0x234   : > { %1850 = vrsqrt.f32 %v1262_v40  ;;  %v1231_v12 = vsub.f32 %v1215_v41, %v1223_v13  ;;  %v1263_v15 = vadd.f32 1e-05, %v1230_v42  ;;  %1256 = vst.msk [vmem:[%s2041_s12 + $0x30] sm:$0xff] %vm1249_vm2, %v1247_v10 }
 0x235   : > { %v1224_v16 = vmul.f32 %v1200_v43, %v1200_v43  ;;  %v1248_v45 = vadd.f32 %v1240_v11, %v1200_v43 }
 0x236   : > { %v1264_v46 = vadd.f32 1e-05, %v1231_v12  ;;  %1852 = vrsqrt.f32 %v1263_v15 }
 0x237   : > { %v1232_v47 = vsub.f32 %v1216_v44, %v1224_v16  ;;  %1257 = vst.msk [vmem:[%s2041_s12 + $0x38] sm:$0xff] %vm1249_vm2, %v1248_v45 }
 0x238   : > { %1854 = vrsqrt.f32 %v1264_v46 }
 0x239   : > { %v1265_v17 = vadd.f32 1e-05, %v1232_v47 }
 0x23a   : > { %v1843_v18 = vpop.eup %1842 }
 0x23b   : > { %v1845_v48 = vpop.eup %1844  ;;  %1274 = vst.msk [vmem:[%s2046_s13] sm:$0xff] %vm1249_vm2, %v1843_v18  ;;  %1856 = vrsqrt.f32 %v1265_v17 }
 0x23c   : > { %v1847_v49 = vpop.eup %1846  ;;  %1275 = vst.msk [vmem:[%s2046_s13 + $0x8] sm:$0xff] %vm1249_vm2, %v1845_v48 }
 0x23d   : > { %v1849_v50 = vpop.eup %1848  ;;  %1276 = vst.msk [vmem:[%s2046_s13 + $0x10] sm:$0xff] %vm1249_vm2, %v1847_v49 }
 0x23e   : > { %v1851_v51 = vpop.eup %1850  ;;  %1277 = vst.msk [vmem:[%s2046_s13 + $0x18] sm:$0xff] %vm1249_vm2, %v1849_v50 }
 0x23f   : > { %1278 = vst.msk [vmem:[%s2046_s13 + $0x20] sm:$0xff] %vm1249_vm2, %v1851_v51 }
 0x240   : > { %v1853_v52 = vpop.eup %1852 }
 0x241   : > { %1279 = vst.msk [vmem:[%s2046_s13 + $0x28] sm:$0xff] %vm1249_vm2, %v1853_v52 }
 0x242   : > { %v1855_v53 = vpop.eup %1854 }
 0x243   : > { %1280 = vst.msk [vmem:[%s2046_s13 + $0x30] sm:$0xff] %vm1249_vm2, %v1855_v53 }
 0x245   : > { %v1857_v54 = vpop.eup %1856 }
 0x246   : > { %1281 = vst.msk [vmem:[%s2046_s13 + $0x38] sm:$0xff] %vm1249_vm2, %v1857_v54 }
 0x247 PF: > { %s16_s24 = sadd.s32 1, %s1912_s24   ;;  %s2300_s12 = sld [smem:[#allocation6_spill]] }
 0x248   : > { %p13_p2 = scmp.ge.s32.totalorder %s16_s24, 6   ;;  %s2301_s18 = smov %s1892_s19 }
 0x249   : > { %s2302_s19 = smov %s1996_s29  ;;  %s2303_s20 = smov %s1904_s22 }
 0x24a   : > { %s2304_s21 = smov %s1908_s23  ;;  %s2305_s22 = smov %s2308_s25 }
 0x24b   :  { %15 = sbr.rel (!%p13_p2) target bundleno = 6 (0x6), region = 136 }
 0x24d   : > { %s2306_s23 = smov %s2300_s12 }

// kernel: gnet_forward.16
= control target key start
LH: loop header
LB: loop body
LE: loop exit
PB: predicated region body
PF: predicated region fallthrough
CT: control target
= control target key end

     0   :  { %s1008_s12 = smov 0   ;;  %s1010_s13 = smov 0   ;;  %s1117_s0 = inlined_call_operand.vmem [shape: bf16[2,128,128], index: 0, kind: input, shape index: {}]   ;;  %s1118_s1 = inlined_call_operand.vmem [shape: f32[2,128,1], index: 1, kind: input, shape index: {}]   ;;  %s1119_s2 = inlined_call_operand.vmem [shape: f32[2,128,1], index: 2, kind: input, shape index: {}]   ;;  %s1120_s3 = inlined_call_operand.vmem [shape: bf16[2,128,128], index: 3, kind: output, shape index: {}]  }
   0x1   :  { %s1012_s14 = smov 0  }
   0x2 LB: > { %s32_s15 = sadd.s32 1, %s981_s13  ;;  %p803_p0 = scmp.ge.s32.totalorder %s985_s14, 1  ;;  %s985_s14 = sphi %s1012_s14, %s13_s14   ;;  %s981_s13 = sphi %s1010_s13, %s1122_s13   ;;  %s977_s12 = sphi %s1008_s12, %s1121_s12  }
   0x3   : > { %p34_p1 = scmp.ge.s32.totalorder %s32_s15, 2  ;;  %p206_p2 = scmp.lt.s32.totalorder %s985_s14, 3 }
   0x5   : > { %s1124_s15 = smov (%p34_p1, %s32_s15), 0  ;;  %p207_p3 = pnand %p803_p0, %p206_p2 }
   0x6   : > { %p263_p4 = scmp.lt.s32.totalorder (!%p207_p3), %s977_s12, 1  ;;  %v987_v0 = vmov (!%p207_p3), 0  }
   0x7   : > { %210 = sbr.rel (%p207_p3) target bundleno = 213 (0xd5), region = 32  ;;  %962 = vset.pattern.permute.xlu1 (!%p207_p3), %v987_v0  ;;  %961 = vset.pattern.permute.xlu0 (!%p207_p3), %v987_v0 }
   0xe   : > { %s1126_s12 = smov (!%p263_p4, %s977_s12), 1 }
   0xf   : > { %s831_s16 = sshll.u32 %s1126_s12, 7  ;;  %s830_s23 = sshll.u32 %s1126_s12, 6 }
  0x10   : > { %s283_s19 = scalar_lea.vmem %s1118_s1, %s831_s16  ;;  %s1039_s22 = scalar_lea.vmem %s1119_s2, %s831_s16 }
  0x11   : > { %v342_v1 = vld [vmem:[%s283_s19 + $0x10] sm:$0xff]  ;;  %v340_v2 = vld [vmem:[%s283_s19] sm:$0xff]  ;;  %v343_v3 = vld [vmem:[%s283_s19 + $0x18] sm:$0xff]  ;;  %s1069_s26 = scalar_lea.vmem %s1117_s0, %s830_s23  ;;  %s1086_s29 = scalar_lea.vmem %s1120_s3, %s830_s23 }
  0x12   : > { %368 = vperm.xlu1 %962, %v342_v1   ;;  %358 = vperm.xlu0 %961, %v340_v2   ;;  %v341_v4 = vld [vmem:[%s283_s19 + $0x8] sm:$0xff]  ;;  %v344_v6 = vld [vmem:[%s283_s19 + $0x20] sm:$0xff]  ;;  %v347_v7 = vld [vmem:[%s283_s19 + $0x38] sm:$0xff] }
  0x13   : > { %v345_v5 = vld [vmem:[%s283_s19 + $0x28] sm:$0xff]  ;;  %v346_v8 = vld [vmem:[%s283_s19 + $0x30] sm:$0xff]  ;;  %v348_v10 = vld [vmem:[%s283_s19 + $0x40] sm:$0xff] }
  0x14   : > { %v349_v9 = vld [vmem:[%s283_s19 + $0x48] sm:$0xff]  ;;  %v351_v11 = vld [vmem:[%s283_s19 + $0x58] sm:$0xff]  ;;  %v350_v12 = vld [vmem:[%s283_s19 + $0x50] sm:$0xff] }
  0x15   : > { %v353_v13 = vld [vmem:[%s283_s19 + $0x68] sm:$0xff]  ;;  %v352_v14 = vld [vmem:[%s283_s19 + $0x60] sm:$0xff]  ;;  %v355_v15 = vld [vmem:[%s283_s19 + $0x78] sm:$0xff] }
  0x16   : > { %373 = vperm.xlu1 %962, %v343_v3   ;;  %363 = vperm.xlu0 %961, %v341_v4   ;;  %v354_v16 = vld [vmem:[%s283_s19 + $0x70] sm:$0xff]  ;;  %v453_v17 = vld [vmem:[%s1039_s22 + $0x8] sm:$0xff]  ;;  %v452_v18 = vld [vmem:[%s1039_s22] sm:$0xff] }
  0x17   : > { %v455_v19 = vld [vmem:[%s1039_s22 + $0x18] sm:$0xff]  ;;  %v454_v20 = vld [vmem:[%s1039_s22 + $0x10] sm:$0xff]  ;;  %v457_v21 = vld [vmem:[%s1039_s22 + $0x28] sm:$0xff] }
  0x18   : > { %v456_v22 = vld [vmem:[%s1039_s22 + $0x20] sm:$0xff]  ;;  %v459_v23 = vld [vmem:[%s1039_s22 + $0x38] sm:$0xff]  ;;  %v458_v24 = vld [vmem:[%s1039_s22 + $0x30] sm:$0xff] }
  0x19   : > { %v461_v25 = vld [vmem:[%s1039_s22 + $0x48] sm:$0xff]  ;;  %v460_v26 = vld [vmem:[%s1039_s22 + $0x40] sm:$0xff]  ;;  %v463_v27 = vld [vmem:[%s1039_s22 + $0x58] sm:$0xff] }
  0x1a   : > { %383 = vperm.xlu1 %962, %v345_v5   ;;  %378 = vperm.xlu0 %961, %v344_v6   ;;  %v462_v28 = vld [vmem:[%s1039_s22 + $0x50] sm:$0xff]  ;;  %v465_v29 = vld [vmem:[%s1039_s22 + $0x68] sm:$0xff]  ;;  %v464_v30 = vld [vmem:[%s1039_s22 + $0x60] sm:$0xff] }
  0x1b   : > { %v467_v31 = vld [vmem:[%s1039_s22 + $0x78] sm:$0xff]  ;;  %v466_v32 = vld [vmem:[%s1039_s22 + $0x70] sm:$0xff]  ;;  %v851_v45 = vld [vmem:[%s1069_s26] sm:$0xff]  }
  0x1c   : > { %v852_v48 = vunpack.c.l.bf16 %v851_v45  ;;  %v853_v49 = vunpack.c.h.bf16 %v851_v45  ;;  %v922_v50 = vld [vmem:[%s1069_s26 + $0x8] sm:$0xff]   ;;  %v923_v57 = vld [vmem:[%s1069_s26 + $0x10] sm:$0xff]   ;;  %v924_v2 = vld [vmem:[%s1069_s26 + $0x18] sm:$0xff]  }
  0x1d   : > { %v856_v53 = vunpack.c.l.bf16 %v922_v50  ;;  %v857_v55 = vunpack.c.h.bf16 %v922_v50  ;;  %v861_v62 = vunpack.c.h.bf16 %v923_v57  ;;  %v860_v63 = vunpack.c.l.bf16 %v923_v57 }
  0x1e   : > { %393 = vperm.xlu1 %962, %v347_v7   ;;  %388 = vperm.xlu0 %961, %v346_v8  }
  0x22   : > { %403 = vperm.xlu1 %962, %v349_v9   ;;  %398 = vperm.xlu0 %961, %v348_v10   ;;  %v865_v10 = vunpack.c.h.bf16 %v924_v2 }
  0x26   : > { %413 = vperm.xlu1 %962, %v351_v11   ;;  %408 = vperm.xlu0 %961, %v350_v12   ;;  %v864_v11 = vunpack.c.l.bf16 %v924_v2 }
  0x2a   : > { %423 = vperm.xlu1 %962, %v353_v13   ;;  %418 = vperm.xlu0 %961, %v352_v14   ;;  %v925_v14 = vld [vmem:[%s1069_s26 + $0x20] sm:$0xff]  }
  0x2e   : > { %433 = vperm.xlu1 %962, %v355_v15   ;;  %428 = vperm.xlu0 %961, %v354_v16  }
  0x32   : > { %475 = vperm.xlu1 %962, %v453_v17   ;;  %470 = vperm.xlu0 %961, %v452_v18  }
  0x36   : > { %485 = vperm.xlu1 %962, %v455_v19   ;;  %480 = vperm.xlu0 %961, %v454_v20  }
  0x3a   : > { %495 = vperm.xlu1 %962, %v457_v21   ;;  %490 = vperm.xlu0 %961, %v456_v22   ;;  %v869_v22 = vunpack.c.h.bf16 %v925_v14 }
  0x3e   : > { %505 = vperm.xlu1 %962, %v459_v23   ;;  %500 = vperm.xlu0 %961, %v458_v24   ;;  %v868_v23 = vunpack.c.l.bf16 %v925_v14 }
  0x42   : > { %515 = vperm.xlu1 %962, %v461_v25   ;;  %510 = vperm.xlu0 %961, %v460_v26   ;;  %v926_v26 = vld [vmem:[%s1069_s26 + $0x28] sm:$0xff]  }
  0x46   : > { %525 = vperm.xlu1 %962, %v463_v27   ;;  %520 = vperm.xlu0 %961, %v462_v28  }
  0x4a   : > { %535 = vperm.xlu1 %962, %v465_v29   ;;  %530 = vperm.xlu0 %961, %v464_v30  }
  0x4e   : > { %545 = vperm.xlu1 %962, %v467_v31   ;;  %540 = vperm.xlu0 %961, %v466_v32  }
  0x91   : > { %v369_v33 = vpop.permute.xlu1 %368  ;;  %v359_v34 = vpop.permute.xlu0 %358 }
  0x92   : > { %v436_v54 = vsub.f32 %v852_v48, %v359_v34  ;;  %v438_v0 = vsub.f32 %v856_v53, %v369_v33  ;;  %v873_v34 = vunpack.c.h.bf16 %v926_v26 }
  0x95   : > { %v374_v35 = vpop.permute.xlu1 %373  ;;  %v364_v36 = vpop.permute.xlu0 %363 }
  0x96   : > { %v437_v56 = vsub.f32 %v853_v49, %v364_v36  ;;  %v439_v1 = vsub.f32 %v857_v55, %v374_v35  ;;  %v872_v35 = vunpack.c.l.bf16 %v926_v26 }
  0x99   : > { %v384_v37 = vpop.permute.xlu1 %383  ;;  %v379_v38 = vpop.permute.xlu0 %378 }
  0x9a   : > { %v441_v12 = vsub.f32 %v861_v62, %v384_v37  ;;  %v440_v13 = vsub.f32 %v860_v63, %v379_v38  ;;  %v927_v38 = vld [vmem:[%s1069_s26 + $0x30] sm:$0xff]  }
  0x9b   : > { %v876_v55 = vunpack.c.l.bf16 %v927_v38 }
  0x9d   : > { %v394_v39 = vpop.permute.xlu1 %393  ;;  %v389_v40 = vpop.permute.xlu0 %388 }
  0x9e   : > { %v443_v24 = vsub.f32 %v865_v10, %v394_v39  ;;  %v442_v25 = vsub.f32 %v864_v11, %v389_v40 }
  0xa1   : > { %v1057_v41 = vpop.permute.xlu1 %403  ;;  %v1059_v42 = vpop.permute.xlu0 %398 }
  0xa2   : > { %v445_v36 = vsub.f32 %v869_v22, %v1057_v41  ;;  %v444_v37 = vsub.f32 %v868_v23, %v1059_v42  ;;  %v928_v41 = vld [vmem:[%s1069_s26 + $0x38] sm:$0xff]  }
  0xa5   : > { %v1062_v43 = vpop.permute.xlu1 %413  ;;  %v1064_v44 = vpop.permute.xlu0 %408 }
  0xa6   : > { %v446_v57 = vsub.f32 %v872_v35, %v1064_v44 }
  0xa9   : > { %v1072_v46 = vpop.permute.xlu1 %423  ;;  %v1074_v47 = vpop.permute.xlu0 %418 }
  0xad   : > { %v1077_v51 = vpop.permute.xlu1 %433  ;;  %v1079_v52 = vpop.permute.xlu0 %428 }
  0xb1   : > { %v476_v58 = vpop.permute.xlu1 %475  ;;  %v471_v59 = vpop.permute.xlu0 %470 }
  0xb2   : > { %v549_v60 = vmul.f32 %v476_v58, %v437_v56  ;;  %v548_v61 = vmul.f32 %v471_v59, %v436_v54  ;;  %v877_v54 = vunpack.c.h.bf16 %v927_v38  ;;  %v447_v56 = vsub.f32 %v873_v34, %v1062_v43 }
  0xb4   : > { %v565_v3 = vmax.f32 %v549_v60, 0.0  ;;  %v564_v4 = vmax.f32 %v548_v61, 0.0  ;;  %v449_v2 = vsub.f32 %v877_v54, %v1072_v46 }
  0xb5   : > { %v486_v5 = vpop.permute.xlu1 %485  ;;  %v481_v6 = vpop.permute.xlu0 %480 }
  0xb6   : > { %v885_v7 = vpack.c.bf16 %v565_v3, %v564_v4  ;;  %v551_v8 = vmul.f32 %v486_v5, %v439_v1  ;;  %v550_v9 = vmul.f32 %v481_v6, %v438_v0  ;;  %v881_v0 = vunpack.c.h.bf16 %v928_v41 }
  0xb7   : > { %v880_v1 = vunpack.c.l.bf16 %v928_v41  ;;  %v448_v3 = vsub.f32 %v876_v55, %v1074_v47 }
  0xb8   : > { %886 = vst [vmem:[%s1086_s29] sm:$0xff] %v885_v7   ;;  %v567_v15 = vmax.f32 %v551_v8, 0.0  ;;  %v566_v16 = vmax.f32 %v550_v9, 0.0  ;;  %v451_v9 = vsub.f32 %v881_v0, %v1077_v51 }
  0xb9   : > { %v496_v17 = vpop.permute.xlu1 %495  ;;  %v491_v18 = vpop.permute.xlu0 %490  ;;  %v450_v10 = vsub.f32 %v880_v1, %v1079_v52 }
  0xba   : > { %v890_v19 = vpack.c.bf16 %v567_v15, %v566_v16  ;;  %v553_v20 = vmul.f32 %v496_v17, %v441_v12  ;;  %v552_v21 = vmul.f32 %v491_v18, %v440_v13 }
  0xbc   : > { %929 = vst [vmem:[%s1086_s29 + $0x8] sm:$0xff] %v890_v19   ;;  %v569_v27 = vmax.f32 %v553_v20, 0.0  ;;  %v568_v28 = vmax.f32 %v552_v21, 0.0 }
  0xbd   : > { %v506_v29 = vpop.permute.xlu1 %505  ;;  %v501_v30 = vpop.permute.xlu0 %500 }
  0xbe   : > { %v895_v31 = vpack.c.bf16 %v569_v27, %v568_v28  ;;  %v555_v32 = vmul.f32 %v506_v29, %v443_v24  ;;  %v554_v33 = vmul.f32 %v501_v30, %v442_v25 }
  0xc0   : > { %930 = vst [vmem:[%s1086_s29 + $0x10] sm:$0xff] %v895_v31   ;;  %v571_v39 = vmax.f32 %v555_v32, 0.0  ;;  %v570_v40 = vmax.f32 %v554_v33, 0.0 }
  0xc1   : > { %v516_v45 = vpop.permute.xlu1 %515  ;;  %v511_v48 = vpop.permute.xlu0 %510 }
  0xc2   : > { %v900_v49 = vpack.c.bf16 %v571_v39, %v570_v40  ;;  %v557_v50 = vmul.f32 %v516_v45, %v445_v36  ;;  %v556_v53 = vmul.f32 %v511_v48, %v444_v37 }
  0xc4   : > { %931 = vst [vmem:[%s1086_s29 + $0x18] sm:$0xff] %v900_v49   ;;  %v573_v58 = vmax.f32 %v557_v50, 0.0  ;;  %v572_v42 = vmax.f32 %v556_v53, 0.0 }
  0xc5   : > { %v526_v59 = vpop.permute.xlu1 %525  ;;  %v521_v60 = vpop.permute.xlu0 %520 }
  0xc6   : > { %v905_v61 = vpack.c.bf16 %v573_v58, %v572_v42  ;;  %v559_v62 = vmul.f32 %v526_v59, %v447_v56  ;;  %v558_v63 = vmul.f32 %v521_v60, %v446_v57 }
  0xc8   : > { %932 = vst [vmem:[%s1086_s29 + $0x20] sm:$0xff] %v905_v61   ;;  %v575_v43 = vmax.f32 %v559_v62, 0.0  ;;  %v574_v4 = vmax.f32 %v558_v63, 0.0 }
  0xc9   : > { %v536_v44 = vpop.permute.xlu1 %535  ;;  %v531_v5 = vpop.permute.xlu0 %530 }
  0xca   : > { %v910_v6 = vpack.c.bf16 %v575_v43, %v574_v4  ;;  %v561_v7 = vmul.f32 %v536_v44, %v449_v2  ;;  %v560_v8 = vmul.f32 %v531_v5, %v448_v3 }
  0xcc   : > { %933 = vst [vmem:[%s1086_s29 + $0x28] sm:$0xff] %v910_v6   ;;  %v577_v11 = vmax.f32 %v561_v7, 0.0  ;;  %v576_v12 = vmax.f32 %v560_v8, 0.0 }
  0xcd   : > { %v546_v46 = vpop.permute.xlu1 %545  ;;  %v541_v13 = vpop.permute.xlu0 %540 }
  0xce   : > { %v915_v47 = vpack.c.bf16 %v577_v11, %v576_v12  ;;  %v563_v14 = vmul.f32 %v546_v46, %v451_v9  ;;  %v562_v15 = vmul.f32 %v541_v13, %v450_v10 }
  0xd0   : > { %934 = vst [vmem:[%s1086_s29 + $0x30] sm:$0xff] %v915_v47   ;;  %v579_v16 = vmax.f32 %v563_v14, 0.0  ;;  %v578_v17 = vmax.f32 %v562_v15, 0.0 }
  0xd2   : > { %v920_v18 = vpack.c.bf16 %v579_v16, %v578_v17 }
  0xd4   : > { %935 = vst [vmem:[%s1086_s29 + $0x38] sm:$0xff] %v920_v18  }
  0xd5 PF: > { %s13_s14 = sadd.s32 1, %s985_s14   ;;  %s1121_s12 = smov %s981_s13 }
  0xd6   : > { %p10_p5 = scmp.ge.s32.totalorder %s13_s14, 4   ;;  %s1122_s13 = smov %s1124_s15 }
  0xd8   :  { %12 = sbr.rel (!%p10_p5) target bundleno = 2 (0x2), region = 68 }

// kernel: gnet_forward.15
= control target key start
LH: loop header
LB: loop body
LE: loop exit
PB: predicated region body
PF: predicated region fallthrough
CT: control target
= control target key end

     0   :  { %s3193_s0 = inlined_call_operand.vmem [shape: bf16[128,2048], index: 0, kind: input, shape index: {}]   ;;  %s3194_s1 = inlined_call_operand.vmem [shape: bf16[2,2048,128], index: 1, kind: input, shape index: {}]   ;;  %s3195_s2 = inlined_call_operand.vmem [shape: f32[128,1], index: 2, kind: input, shape index: {}]   ;;  %s3196_s3 = inlined_call_operand.vmem [shape: bf16[2,128,128], index: 3, kind: output, shape index: {0}]   ;;  %s3197_s4 = inlined_call_operand.vmem [shape: f32[2,128,1], index: 4, kind: output, shape index: {1}]   ;;  %s3198_s5 = inlined_call_operand.vmem [shape: f32[2,128,1], index: 5, kind: output, shape index: {2}]  }
   0x1   :  { %3199 = sst [smem:[#allocation7_spill]] %s3193_s0 }
   0x2   :  { %s2619_s18 = smov 0   ;;  %s2621_s19 = smov 0  }
   0x3   :  { %s2623_s20 = smov 0   ;;  %s2625_s21 = smov 0  }
   0x4   :  { %s2627_s22 = smov 0   ;;  %s2629_s23 = smov 0  }
   0x5   :  { %s2631_s24 = smov 0  }
   0x6 LB: > { %s31_s25 = sadd.s32 1, %s2576_s22  ;;  %s42_s26 = sadd.s32 1, %s2580_s23  ;;  %s2584_s24 = sphi %s2631_s24, %s16_s24   ;;  %s2580_s23 = sphi %s2629_s23, %s3208_s23   ;;  %s2576_s22 = sphi %s2627_s22, %s3207_s22   ;;  %s2572_s21 = sphi %s2625_s21, %s3206_s21   ;;  %s2568_s20 = sphi %s2623_s20, %s3205_s20   ;;  %s2564_s19 = sphi %s2621_s19, %s3204_s19   ;;  %s2560_s18 = sphi %s2619_s18, %s3203_s18  }
   0x7   : > { %p32_p0 = scmp.ge.s32.totalorder %s31_s25, 4  ;;  %s51_s27 = sadd.s32 1, %s2564_s19 }
   0x8   : > { %p58_p1 = scmp.ne.s32.totalorder %s2564_s19, %s2560_s18  ;;  %p59_p2 = scmp.eq.s32.totalorder %s2584_s24, 0 }
   0x9   : > { %s3210_s25 = smov (%p32_p0, %s31_s25), 0  ;;  %s3212_s26 = smov (!%p32_p0, %s42_s26), %s2580_s23 }
   0xa   : > { %s47_s28 = ssub.s32 %s2576_s22, %s3210_s25  ;;  %p60_p3 = por %p59_p2, %p58_p1 }
   0xb   : > { %p44_p4 = scmp.ge.s32.totalorder %s3212_s26, 2  ;;  %p49_p5 = scmp.eq.s32.totalorder %s47_s28, 0 }
   0xc   : > { %p2059_p6 = scmp.ge.s32.totalorder %s2584_s24, 8 }
   0xd   : > { %s3214_s26 = smov (%p44_p4, %s3212_s26), 0 }
   0xe   : > { %3200 = sst [smem:[#allocation6_spill]] %s3214_s26  ;;  %235 = sbr.rel (%p2059_p6) target bundleno = 47 (0x2f), region = 20 }
   0xf   : > { %s2668_s29 = scalar_select %p49_p5, %s2564_s19, %s51_s27  }
  0x15   : > { %238 = sbr.rel (!%p60_p3) target bundleno = 47 (0x2f), region = 24  ;;  %s240_s30 = sand.u32 (%p60_p3), 1, %s2564_s19  }
  0x16   : > { %s2160_s6 = sshll.u32 (%p60_p3), %s2576_s22, 4  ;;  %s2060_s7 = sshll.u32 (%p60_p3), %s240_s30, 8 }
  0x17   : > { %s3201_s0 = sld [smem:[#allocation7_spill]] (%p60_p3)  ;;  %s2681_s11 = scalar_lea.vmem (%p60_p3), [#allocation5], %s2060_s7 }
  0x1d   : > { %s2676_s10 = scalar_lea.vmem %s3201_s0, %s2160_s6 }
  0x1e   : > { %v261_v0 = vld [vmem:[%s2676_s10] sm:$0xff]  ;;  %v263_v1 = vld [vmem:[%s2676_s10 + $0x8] sm:$0xff] }
  0x1f   : > { %v265_v2 = vld [vmem:[%s2676_s10 + $0x40] sm:$0xff]  ;;  %262 = vst [vmem:[%s2681_s11] sm:$0xff] %v261_v0  ;;  %264 = vst [vmem:[%s2681_s11 + $0x8] sm:$0xff] %v263_v1  ;;  %v267_v3 = vld [vmem:[%s2676_s10 + $0x48] sm:$0xff] }
  0x20   : > { %266 = vst [vmem:[%s2681_s11 + $0x10] sm:$0xff] %v265_v2  ;;  %v269_v4 = vld [vmem:[%s2676_s10 + $0x80] sm:$0xff]  ;;  %v271_v5 = vld [vmem:[%s2676_s10 + $0x88] sm:$0xff]  ;;  %268 = vst [vmem:[%s2681_s11 + $0x18] sm:$0xff] %v267_v3 }
  0x21   : > { %270 = vst [vmem:[%s2681_s11 + $0x20] sm:$0xff] %v269_v4  ;;  %272 = vst [vmem:[%s2681_s11 + $0x28] sm:$0xff] %v271_v5  ;;  %v273_v6 = vld [vmem:[%s2676_s10 + $0xc0] sm:$0xff]  ;;  %v275_v7 = vld [vmem:[%s2676_s10 + $0xc8] sm:$0xff] }
  0x22   : > { %v277_v8 = vld [vmem:[%s2676_s10 + $0x100] sm:$0xff]  ;;  %274 = vst [vmem:[%s2681_s11 + $0x30] sm:$0xff] %v273_v6  ;;  %276 = vst [vmem:[%s2681_s11 + $0x38] sm:$0xff] %v275_v7  ;;  %v279_v9 = vld [vmem:[%s2676_s10 + $0x108] sm:$0xff] }
  0x23   : > { %278 = vst [vmem:[%s2681_s11 + $0x40] sm:$0xff] %v277_v8  ;;  %v281_v10 = vld [vmem:[%s2676_s10 + $0x140] sm:$0xff]  ;;  %v283_v11 = vld [vmem:[%s2676_s10 + $0x148] sm:$0xff]  ;;  %280 = vst [vmem:[%s2681_s11 + $0x48] sm:$0xff] %v279_v9 }
  0x24   : > { %282 = vst [vmem:[%s2681_s11 + $0x50] sm:$0xff] %v281_v10  ;;  %284 = vst [vmem:[%s2681_s11 + $0x58] sm:$0xff] %v283_v11  ;;  %v285_v12 = vld [vmem:[%s2676_s10 + $0x180] sm:$0xff]  ;;  %v287_v13 = vld [vmem:[%s2676_s10 + $0x188] sm:$0xff] }
  0x25   : > { %v289_v14 = vld [vmem:[%s2676_s10 + $0x1c0] sm:$0xff]  ;;  %286 = vst [vmem:[%s2681_s11 + $0x60] sm:$0xff] %v285_v12  ;;  %288 = vst [vmem:[%s2681_s11 + $0x68] sm:$0xff] %v287_v13  ;;  %v291_v15 = vld [vmem:[%s2676_s10 + $0x1c8] sm:$0xff] }
  0x26   : > { %290 = vst [vmem:[%s2681_s11 + $0x70] sm:$0xff] %v289_v14  ;;  %v293_v16 = vld [vmem:[%s2676_s10 + $0x200] sm:$0xff]  ;;  %v295_v17 = vld [vmem:[%s2676_s10 + $0x208] sm:$0xff]  ;;  %292 = vst [vmem:[%s2681_s11 + $0x78] sm:$0xff] %v291_v15 }
  0x27   : > { %294 = vst [vmem:[%s2681_s11 + $0x80] sm:$0xff] %v293_v16  ;;  %296 = vst [vmem:[%s2681_s11 + $0x88] sm:$0xff] %v295_v17  ;;  %v297_v18 = vld [vmem:[%s2676_s10 + $0x240] sm:$0xff]  ;;  %v299_v19 = vld [vmem:[%s2676_s10 + $0x248] sm:$0xff] }
  0x28   : > { %v301_v20 = vld [vmem:[%s2676_s10 + $0x280] sm:$0xff]  ;;  %298 = vst [vmem:[%s2681_s11 + $0x90] sm:$0xff] %v297_v18  ;;  %300 = vst [vmem:[%s2681_s11 + $0x98] sm:$0xff] %v299_v19  ;;  %v303_v21 = vld [vmem:[%s2676_s10 + $0x288] sm:$0xff] }
  0x29   : > { %302 = vst [vmem:[%s2681_s11 + $0xa0] sm:$0xff] %v301_v20  ;;  %v305_v22 = vld [vmem:[%s2676_s10 + $0x2c0] sm:$0xff]  ;;  %v307_v23 = vld [vmem:[%s2676_s10 + $0x2c8] sm:$0xff]  ;;  %304 = vst [vmem:[%s2681_s11 + $0xa8] sm:$0xff] %v303_v21 }
  0x2a   : > { %306 = vst [vmem:[%s2681_s11 + $0xb0] sm:$0xff] %v305_v22  ;;  %308 = vst [vmem:[%s2681_s11 + $0xb8] sm:$0xff] %v307_v23  ;;  %v309_v24 = vld [vmem:[%s2676_s10 + $0x300] sm:$0xff]  ;;  %v311_v25 = vld [vmem:[%s2676_s10 + $0x308] sm:$0xff] }
  0x2b   : > { %v313_v26 = vld [vmem:[%s2676_s10 + $0x340] sm:$0xff]  ;;  %310 = vst [vmem:[%s2681_s11 + $0xc0] sm:$0xff] %v309_v24  ;;  %312 = vst [vmem:[%s2681_s11 + $0xc8] sm:$0xff] %v311_v25  ;;  %v315_v27 = vld [vmem:[%s2676_s10 + $0x348] sm:$0xff] }
  0x2c   : > { %314 = vst [vmem:[%s2681_s11 + $0xd0] sm:$0xff] %v313_v26  ;;  %v317_v28 = vld [vmem:[%s2676_s10 + $0x380] sm:$0xff]  ;;  %v319_v29 = vld [vmem:[%s2676_s10 + $0x388] sm:$0xff]  ;;  %316 = vst [vmem:[%s2681_s11 + $0xd8] sm:$0xff] %v315_v27 }
  0x2d   : > { %318 = vst [vmem:[%s2681_s11 + $0xe0] sm:$0xff] %v317_v28  ;;  %320 = vst [vmem:[%s2681_s11 + $0xe8] sm:$0xff] %v319_v29  ;;  %v321_v30 = vld [vmem:[%s2676_s10 + $0x3c0] sm:$0xff]  ;;  %v323_v31 = vld [vmem:[%s2676_s10 + $0x3c8] sm:$0xff] }
  0x2e   : > { %322 = vst [vmem:[%s2681_s11 + $0xf0] sm:$0xff] %v321_v30  ;;  %324 = vst [vmem:[%s2681_s11 + $0xf8] sm:$0xff] %v323_v31 }
  0x2f PF: > { %p2063_p7 = scmp.ge.s32.totalorder %s2584_s24, 1  ;;  %p345_p8 = scmp.lt.s32.totalorder %s2584_s24, 9 }
  0x31   : > { %p346_p9 = pnand %p2063_p7, %p345_p8 }
  0x32   : > { %s352_s12 = sand.u32 (!%p346_p9), 1, %s2560_s18   ;;  %s2065_s13 = sshll.u32 (!%p346_p9), %s2568_s20, 6 }
  0x33   : > { %349 = sbr.rel (%p346_p9) target bundleno = 676 (0x2a4), region = 51  ;;  %s2064_s14 = sshll.u32 (!%p346_p9), %s352_s12, 8 }
  0x34   : > { %p424_p10 = scmp.lt.s32.totalorder (!%p346_p9), %s2572_s21, 1  ;;  %p426_p11 = scmp.lt.s32.totalorder (!%p346_p9), %s2065_s13, 255 }
  0x35   : > { %p476_p12 = scmp.eq.s32.totalorder (!%p346_p9), %s2568_s20, 0  ;;  %p2074_p13 = scmp.ne.s32.totalorder (!%p346_p9), %s2568_s20, 0 }
  0x3a   : > { %s3216_s21 = smov (!%p424_p10, %s2572_s21), 1  ;;  %s3218_s13 = smov (!%p426_p11, %s2065_s13), 255 }
  0x3b   : > { %s2066_s15 = sshll.u32 %s3216_s21, 8  ;;  %s2161_s16 = sshll.u32 %s3216_s21, 6  ;;  %v2586_v32 = vmov (!%p2074_p13), 0.0  }
  0x3c   : > { %s432_s17 = sadd.s32 %s2066_s15, %s3218_s13  ;;  %s2753_s30 = scalar_lea.vmem %s3196_s3, %s2161_s16  ;;  %480 = vst [vmem:[#allocation2] sm:$0xff] (!%p2074_p13), %v2586_v32  ;;  %481 = vst [vmem:[#allocation2 + $0x8] sm:$0xff] (!%p2074_p13), %v2586_v32 }
  0x3d   : > { %s2067_s6 = sshll.u32 %s432_s17, 2  ;;  %s2162_s7 = sshll.u32 %s3216_s21, 7  ;;  %482 = vst [vmem:[#allocation2 + $0x10] sm:$0xff] (!%p2074_p13), %v2586_v32  ;;  %483 = vst [vmem:[#allocation2 + $0x18] sm:$0xff] (!%p2074_p13), %v2586_v32 }
  0x3e   : > { %s2758_s18 = scalar_lea.vmem %s3194_s1, %s2067_s6  ;;  %s2763_s12 = scalar_lea.vmem %s3197_s4, %s2162_s7  ;;  %484 = vst [vmem:[#allocation2 + $0x20] sm:$0xff] (!%p2074_p13), %v2586_v32  ;;  %485 = vst [vmem:[#allocation2 + $0x28] sm:$0xff] (!%p2074_p13), %v2586_v32 }
  0x3f   : > { %s2768_s13 = scalar_lea.vmem %s3198_s5, %s2162_s7  ;;  %s2771_s15 = scalar_lea.vmem [#allocation5], %s2064_s14  ;;  %486 = vst [vmem:[#allocation2 + $0x30] sm:$0xff] (!%p2074_p13), %v2586_v32  ;;  %487 = vst [vmem:[#allocation2 + $0x38] sm:$0xff] (!%p2074_p13), %v2586_v32 }
  0x40   : > { %479 = sbr.rel (%p2074_p13) target bundleno = 71 (0x47), region = 59  ;;  %488 = vst [vmem:[#allocation2 + $0x40] sm:$0xff] (!%p2074_p13), %v2586_v32  ;;  %489 = vst [vmem:[#allocation2 + $0x48] sm:$0xff] (!%p2074_p13), %v2586_v32 }
  0x41   : > { %490 = vst [vmem:[#allocation2 + $0x50] sm:$0xff] (!%p2074_p13), %v2586_v32  ;;  %491 = vst [vmem:[#allocation2 + $0x58] sm:$0xff] (!%p2074_p13), %v2586_v32 }
  0x42   : > { %492 = vst [vmem:[#allocation2 + $0x60] sm:$0xff] (!%p2074_p13), %v2586_v32  ;;  %493 = vst [vmem:[#allocation2 + $0x68] sm:$0xff] (!%p2074_p13), %v2586_v32 }
  0x43   : > { %494 = vst [vmem:[#allocation2 + $0x70] sm:$0xff] (!%p2074_p13), %v2586_v32  ;;  %495 = vst [vmem:[#allocation2 + $0x78] sm:$0xff] (!%p2074_p13), %v2586_v32 }
  0x47 PF: > { %500 = sbr.rel (!%p476_p12) target bundleno = 88 (0x58), region = 63  ;;  %vm501_vm0 = vcmask (%p476_p12), 7168   ;;  %v2587_v33 = vmov (%p476_p12), 0.0  }
  0x48   : > { %502 = vst.msk [vmem:[#allocation3] sm:$0xff] (%p476_p12), %vm501_vm0, %v2587_v33  ;;  %503 = vst.msk [vmem:[#allocation3 + $0x8] sm:$0xff] (%p476_p12), %vm501_vm0, %v2587_v33 }
  0x49   : > { %504 = vst.msk [vmem:[#allocation3 + $0x10] sm:$0xff] (%p476_p12), %vm501_vm0, %v2587_v33  ;;  %505 = vst.msk [vmem:[#allocation3 + $0x18] sm:$0xff] (%p476_p12), %vm501_vm0, %v2587_v33 }
  0x4a   : > { %506 = vst.msk [vmem:[#allocation3 + $0x20] sm:$0xff] (%p476_p12), %vm501_vm0, %v2587_v33  ;;  %507 = vst.msk [vmem:[#allocation3 + $0x28] sm:$0xff] (%p476_p12), %vm501_vm0, %v2587_v33 }
  0x4b   : > { %508 = vst.msk [vmem:[#allocation3 + $0x30] sm:$0xff] (%p476_p12), %vm501_vm0, %v2587_v33  ;;  %509 = vst.msk [vmem:[#allocation3 + $0x38] sm:$0xff] (%p476_p12), %vm501_vm0, %v2587_v33 }
  0x4c   : > { %510 = vst.msk [vmem:[#allocation3 + $0x40] sm:$0xff] (%p476_p12), %vm501_vm0, %v2587_v33  ;;  %511 = vst.msk [vmem:[#allocation3 + $0x48] sm:$0xff] (%p476_p12), %vm501_vm0, %v2587_v33 }
  0x4d   : > { %512 = vst.msk [vmem:[#allocation3 + $0x50] sm:$0xff] (%p476_p12), %vm501_vm0, %v2587_v33  ;;  %513 = vst.msk [vmem:[#allocation3 + $0x58] sm:$0xff] (%p476_p12), %vm501_vm0, %v2587_v33 }
  0x4e   : > { %514 = vst.msk [vmem:[#allocation3 + $0x60] sm:$0xff] %vm501_vm0, %v2587_v33  ;;  %515 = vst.msk [vmem:[#allocation3 + $0x68] sm:$0xff] %vm501_vm0, %v2587_v33 }
  0x4f   : > { %516 = vst.msk [vmem:[#allocation3 + $0x70] sm:$0xff] %vm501_vm0, %v2587_v33  ;;  %517 = vst.msk [vmem:[#allocation3 + $0x78] sm:$0xff] %vm501_vm0, %v2587_v33 }
  0x50   : > { %518 = vst.msk [vmem:[#allocation4] sm:$0xff] %vm501_vm0, %v2587_v33  ;;  %519 = vst.msk [vmem:[#allocation4 + $0x8] sm:$0xff] %vm501_vm0, %v2587_v33 }
  0x51   : > { %520 = vst.msk [vmem:[#allocation4 + $0x10] sm:$0xff] %vm501_vm0, %v2587_v33  ;;  %521 = vst.msk [vmem:[#allocation4 + $0x18] sm:$0xff] %vm501_vm0, %v2587_v33 }
  0x52   : > { %522 = vst.msk [vmem:[#allocation4 + $0x20] sm:$0xff] %vm501_vm0, %v2587_v33  ;;  %523 = vst.msk [vmem:[#allocation4 + $0x28] sm:$0xff] %vm501_vm0, %v2587_v33 }
  0x53   : > { %524 = vst.msk [vmem:[#allocation4 + $0x30] sm:$0xff] %vm501_vm0, %v2587_v33  ;;  %525 = vst.msk [vmem:[#allocation4 + $0x38] sm:$0xff] %vm501_vm0, %v2587_v33 }
  0x54   : > { %526 = vst.msk [vmem:[#allocation4 + $0x40] sm:$0xff] %vm501_vm0, %v2587_v33  ;;  %527 = vst.msk [vmem:[#allocation4 + $0x48] sm:$0xff] %vm501_vm0, %v2587_v33 }
  0x55   : > { %528 = vst.msk [vmem:[#allocation4 + $0x50] sm:$0xff] %vm501_vm0, %v2587_v33  ;;  %529 = vst.msk [vmem:[#allocation4 + $0x58] sm:$0xff] %vm501_vm0, %v2587_v33 }
  0x56   : > { %530 = vst.msk [vmem:[#allocation4 + $0x60] sm:$0xff] %vm501_vm0, %v2587_v33  ;;  %531 = vst.msk [vmem:[#allocation4 + $0x68] sm:$0xff] %vm501_vm0, %v2587_v33 }
  0x57   : > { %532 = vst.msk [vmem:[#allocation4 + $0x70] sm:$0xff] %vm501_vm0, %v2587_v33  ;;  %533 = vst.msk [vmem:[#allocation4 + $0x78] sm:$0xff] %vm501_vm0, %v2587_v33 }
  0x58 PF: > { %v2416_v34 = vld [vmem:[%s2758_s18 + $0x40] sm:$0xff]   ;;  %v2420_v38 = vld [vmem:[%s2758_s18 + $0x48] sm:$0xff]   ;;  %v2424_v42 = vld [vmem:[%s2758_s18 + $0x50] sm:$0xff]   ;;  %p1224_p0 = scmp.eq.s32.totalorder %s2568_s20, 3  ;;  %p2140_p1 = scmp.ne.s32.totalorder %s2568_s20, 3 }
  0x59   : > { %v2417_v35 = vld [vmem:[%s2758_s18 + $0xc0] sm:$0xff]   ;;  %2229 = vmatprep.subr.bf16.mxu0 %v2416_v34  ;;  %v2421_v39 = vld [vmem:[%s2758_s18 + $0xc8] sm:$0xff]   ;;  %v2425_v43 = vld [vmem:[%s2758_s18 + $0xd0] sm:$0xff]   ;;  %vm1308_vm1 = vcmask (!%p2140_p1), 7168  }
  0x5a   : > { %v2418_v36 = vld [vmem:[%s2758_s18] sm:$0xff]   ;;  %2293 = vmatprep.subr.bf16.mxu1 %v2417_v35  ;;  %v2422_v40 = vld [vmem:[%s2758_s18 + $0x8] sm:$0xff]   ;;  %v2426_v44 = vld [vmem:[%s2758_s18 + $0x10] sm:$0xff]  }
  0x5b   : > { %v2419_v37 = vld [vmem:[%s2758_s18 + $0x80] sm:$0xff]   ;;  %2230 = vmatpush3.bf16.msra.mxu0 %v2418_v36  ;;  %v2423_v41 = vld [vmem:[%s2758_s18 + $0x88] sm:$0xff]   ;;  %v2427_v45 = vld [vmem:[%s2758_s18 + $0x90] sm:$0xff]  }
  0x5c   : > { %2294 = vmatpush3.bf16.msra.mxu1 %v2419_v37  ;;  %2231 = vmatprep.subr.bf16.mxu0 %v2420_v38  ;;  %v2428_v46 = vld [vmem:[%s2758_s18 + $0x58] sm:$0xff]   ;;  %v2432_v50 = vld [vmem:[%s2758_s18 + $0x60] sm:$0xff]   ;;  %v2436_v54 = vld [vmem:[%s2758_s18 + $0x68] sm:$0xff]  }
  0x5d   : > { %2295 = vmatprep.subr.bf16.mxu1 %v2421_v39  ;;  %v2429_v47 = vld [vmem:[%s2758_s18 + $0xd8] sm:$0xff]   ;;  %v2433_v51 = vld [vmem:[%s2758_s18 + $0xe0] sm:$0xff]   ;;  %v2437_v55 = vld [vmem:[%s2758_s18 + $0xe8] sm:$0xff]  }
  0x5e   : > { %v2430_v48 = vld [vmem:[%s2758_s18 + $0x18] sm:$0xff]   ;;  %v2434_v52 = vld [vmem:[%s2758_s18 + $0x20] sm:$0xff]   ;;  %v2438_v56 = vld [vmem:[%s2758_s18 + $0x28] sm:$0xff]  }
  0x5f   : > { %2232 = vmatpush3.bf16.msra.mxu0 %v2422_v40  ;;  %v2431_v49 = vld [vmem:[%s2758_s18 + $0x98] sm:$0xff]   ;;  %v2435_v53 = vld [vmem:[%s2758_s18 + $0xa0] sm:$0xff]   ;;  %v2439_v57 = vld [vmem:[%s2758_s18 + $0xa8] sm:$0xff]  }
  0x60   : > { %2296 = vmatpush3.bf16.msra.mxu1 %v2423_v41  ;;  %2233 = vmatprep.subr.bf16.mxu0 %v2424_v42  ;;  %v2440_v58 = vld [vmem:[%s2758_s18 + $0x70] sm:$0xff]   ;;  %v2444_v62 = vld [vmem:[%s2758_s18 + $0x78] sm:$0xff]  }
  0x61   : > { %2297 = vmatprep.subr.bf16.mxu1 %v2425_v43  ;;  %v2441_v59 = vld [vmem:[%s2758_s18 + $0xf0] sm:$0xff]   ;;  %v2445_v63 = vld [vmem:[%s2758_s18 + $0xf8] sm:$0xff]   ;;  %v534_v43 = vld [vmem:[#allocation2] sm:$0xff] }
  0x62   : > { %v2442_v60 = vld [vmem:[%s2758_s18 + $0x30] sm:$0xff]   ;;  %v2446_v0 = vld [vmem:[%s2758_s18 + $0x38] sm:$0xff]  }
  0x63   : > { %2234 = vmatpush3.bf16.msra.mxu0 %v2426_v44  ;;  %v2443_v61 = vld [vmem:[%s2758_s18 + $0xb0] sm:$0xff]   ;;  %v2447_v1 = vld [vmem:[%s2758_s18 + $0xb8] sm:$0xff]  }
  0x64   : > { %2298 = vmatpush3.bf16.msra.mxu1 %v2427_v45  ;;  %2235 = vmatprep.subr.bf16.mxu0 %v2428_v46  ;;  %v2448_v2 = vld [vmem:[%s2771_s15] ss:$16 sps:$4 sm:$0xff]   ;;  %v2450_v3 = vld [vmem:[%s2771_s15 + $0x4] ss:$16 sps:$4 sm:$0xff]   ;;  %v2451_v4 = vld [vmem:[%s2771_s15 + $0x8] ss:$16 sps:$4 sm:$0xff]  }
  0x65   : > { %2299 = vmatprep.subr.bf16.mxu1 %v2429_v47  ;;  %v2453_v5 = vld [vmem:[%s2771_s15 + $0xc] ss:$16 sps:$4 sm:$0xff]   ;;  %1030 = vmatprep.mubr.bf16.mxu0 %v2450_v3  ;;  %v2454_v6 = vld [vmem:[%s2771_s15 + $0x24] ss:$16 sps:$4 sm:$0xff]   ;;  %v2458_v8 = vld [vmem:[%s2771_s15 + $0x20] ss:$16 sps:$4 sm:$0xff]  }
  0x66   : > { %1127 = vmatprep.mubr.bf16.mxu1 %v2453_v5  ;;  %v2456_v7 = vld [vmem:[%s2771_s15 + $0x2c] ss:$16 sps:$4 sm:$0xff]   ;;  %v2459_v9 = vld [vmem:[%s2771_s15 + $0x28] ss:$16 sps:$4 sm:$0xff]   ;;  %v2460_v10 = vld [vmem:[%s2771_s15 + $0x44] ss:$16 sps:$4 sm:$0xff]  }
  0x67   : > { %2236 = vmatpush3.bf16.msra.mxu0 %v2430_v48  ;;  %v2462_v11 = vld [vmem:[%s2771_s15 + $0x4c] ss:$16 sps:$4 sm:$0xff]   ;;  %v2464_v12 = vld [vmem:[%s2771_s15 + $0x40] ss:$16 sps:$4 sm:$0xff]   ;;  %v2465_v13 = vld [vmem:[%s2771_s15 + $0x48] ss:$16 sps:$4 sm:$0xff]  }
  0x68   : > { %2300 = vmatpush3.bf16.msra.mxu1 %v2431_v49  ;;  %2237 = vmatprep.subr.bf16.mxu0 %v2432_v50  ;;  %v2466_v14 = vld [vmem:[%s2771_s15 + $0x64] ss:$16 sps:$4 sm:$0xff]   ;;  %v2468_v15 = vld [vmem:[%s2771_s15 + $0x6c] ss:$16 sps:$4 sm:$0xff]   ;;  %v2470_v16 = vld [vmem:[%s2771_s15 + $0x60] ss:$16 sps:$4 sm:$0xff]  }
  0x69   : > { %2301 = vmatprep.subr.bf16.mxu1 %v2433_v51  ;;  %v2471_v17 = vld [vmem:[%s2771_s15 + $0x68] ss:$16 sps:$4 sm:$0xff]   ;;  %v2472_v18 = vld [vmem:[%s2771_s15 + $0x84] ss:$16 sps:$4 sm:$0xff]   ;;  %v2474_v19 = vld [vmem:[%s2771_s15 + $0x8c] ss:$16 sps:$4 sm:$0xff]  }
  0x6a   : > { %v2476_v20 = vld [vmem:[%s2771_s15 + $0x80] ss:$16 sps:$4 sm:$0xff]   ;;  %v2477_v21 = vld [vmem:[%s2771_s15 + $0x88] ss:$16 sps:$4 sm:$0xff]   ;;  %v2478_v22 = vld [vmem:[%s2771_s15 + $0xa4] ss:$16 sps:$4 sm:$0xff]  }
  0x6b   : > { %2238 = vmatpush3.bf16.msra.mxu0 %v2434_v52  ;;  %v2480_v23 = vld [vmem:[%s2771_s15 + $0xac] ss:$16 sps:$4 sm:$0xff]   ;;  %v2482_v24 = vld [vmem:[%s2771_s15 + $0xa0] ss:$16 sps:$4 sm:$0xff]   ;;  %v2483_v25 = vld [vmem:[%s2771_s15 + $0xa8] ss:$16 sps:$4 sm:$0xff]  }
  0x6c   : > { %2302 = vmatpush3.bf16.msra.mxu1 %v2435_v53  ;;  %2239 = vmatprep.subr.bf16.mxu0 %v2436_v54  ;;  %v2484_v26 = vld [vmem:[%s2771_s15 + $0xc4] ss:$16 sps:$4 sm:$0xff]   ;;  %v2486_v27 = vld [vmem:[%s2771_s15 + $0xcc] ss:$16 sps:$4 sm:$0xff]   ;;  %v2488_v28 = vld [vmem:[%s2771_s15 + $0xc0] ss:$16 sps:$4 sm:$0xff]  }
  0x6d   : > { %2303 = vmatprep.subr.bf16.mxu1 %v2437_v55  ;;  %v2489_v29 = vld [vmem:[%s2771_s15 + $0xc8] ss:$16 sps:$4 sm:$0xff]   ;;  %v2490_v30 = vld [vmem:[%s2771_s15 + $0xe4] ss:$16 sps:$4 sm:$0xff]   ;;  %v2492_v31 = vld [vmem:[%s2771_s15 + $0xec] ss:$16 sps:$4 sm:$0xff]  }
  0x6e   : > { %v2494_v32 = vld [vmem:[%s2771_s15 + $0xe0] ss:$16 sps:$4 sm:$0xff]   ;;  %v2495_v33 = vld [vmem:[%s2771_s15 + $0xe8] ss:$16 sps:$4 sm:$0xff]  }
  0x6f   : > { %2240 = vmatpush3.bf16.msra.mxu0 %v2438_v56  ;;  %v535_v48 = vld [vmem:[#allocation2 + $0x8] sm:$0xff] }
  0x70   : > { %2304 = vmatpush3.bf16.msra.mxu1 %v2439_v57  ;;  %2241 = vmatprep.subr.bf16.mxu0 %v2440_v58 }
  0x71   : > { %2305 = vmatprep.subr.bf16.mxu1 %v2441_v59 }
  0x73   : > { %2242 = vmatpush3.bf16.msra.mxu0 %v2442_v60 }
  0x74   : > { %2306 = vmatpush3.bf16.msra.mxu1 %v2443_v61  ;;  %2243 = vmatprep.subr.bf16.mxu0 %v2444_v62  ;;  %v536_v61 = vld [vmem:[#allocation2 + $0x10] sm:$0xff] }
  0x75   : > { %2307 = vmatprep.subr.bf16.mxu1 %v2445_v63 }
  0x77   : > { %2244 = vmatpush3.bf16.msra.mxu0 %v2446_v0 }
  0x78   : > { %2308 = vmatpush3.bf16.msra.mxu1 %v2447_v1 }
  0x7a   : > { %1031 = vmatmul.mubr.bf16.vlgmr.msra.gmra.mrb[0].mxu0 %v2448_v2  ;;  %v537_v2 = vld [vmem:[#allocation2 + $0x18] sm:$0xff] }
  0x7b   : > { %1128 = vmatmul.mubr.bf16.vlgmr.msra.gmra.mrb[0].mxu1 %v2451_v4  ;;  %1038 = vmatprep.mubr.bf16.mxu0 %v2454_v6 }
  0x7c   : > { %1135 = vmatprep.mubr.bf16.mxu1 %v2456_v7 }
  0x82   : > { %1039 = vmatmul.mubr.bf16.gmra.mrb[4].mxu0 %v2458_v8 }
  0x83   : > { %1136 = vmatmul.mubr.bf16.gmra.mrb[4].mxu1 %v2459_v9  ;;  %1046 = vmatprep.mubr.bf16.mxu0 %v2460_v10 }
  0x84   : > { %1143 = vmatprep.mubr.bf16.mxu1 %v2462_v11 }
  0x8a   : > { %1047 = vmatmul.mubr.bf16.gmra.mrb[8].mxu0 %v2464_v12 }
  0x8b   : > { %1144 = vmatmul.mubr.bf16.gmra.mrb[8].mxu1 %v2465_v13  ;;  %1054 = vmatprep.mubr.bf16.mxu0 %v2466_v14 }
  0x8c   : > { %1151 = vmatprep.mubr.bf16.mxu1 %v2468_v15  ;;  %v538_v15 = vld [vmem:[#allocation2 + $0x20] sm:$0xff] }
  0x92   : > { %1055 = vmatmul.mubr.bf16.gmra.mrb[12].mxu0 %v2470_v16 }
  0x93   : > { %1152 = vmatmul.mubr.bf16.gmra.mrb[12].mxu1 %v2471_v17  ;;  %1062 = vmatprep.mubr.bf16.mxu0 %v2472_v18 }
  0x94   : > { %1159 = vmatprep.mubr.bf16.mxu1 %v2474_v19 }
  0x9a   : > { %1063 = vmatmul.mubr.bf16.gmra.mrb[16].mxu0 %v2476_v20  ;;  %v539_v20 = vld [vmem:[#allocation2 + $0x28] sm:$0xff] }
  0x9b   : > { %1160 = vmatmul.mubr.bf16.gmra.mrb[16].mxu1 %v2477_v21  ;;  %1070 = vmatprep.mubr.bf16.mxu0 %v2478_v22 }
  0x9c   : > { %1167 = vmatprep.mubr.bf16.mxu1 %v2480_v23 }
  0xa2   : > { %1071 = vmatmul.mubr.bf16.gmra.mrb[20].mxu0 %v2482_v24 }
  0xa3   : > { %1168 = vmatmul.mubr.bf16.gmra.mrb[20].mxu1 %v2483_v25  ;;  %1078 = vmatprep.mubr.bf16.mxu0 %v2484_v26 }
  0xa4   : > { %1175 = vmatprep.mubr.bf16.mxu1 %v2486_v27 }
  0xaa   : > { %1079 = vmatmul.mubr.bf16.gmra.mrb[24].mxu0 %v2488_v28 }
  0xab   : > { %1176 = vmatmul.mubr.bf16.gmra.mrb[24].mxu1 %v2489_v29  ;;  %1086 = vmatprep.mubr.bf16.mxu0 %v2490_v30 }
  0xac   : > { %1183 = vmatprep.mubr.bf16.mxu1 %v2492_v31 }
  0xb2   : > { %1087 = vmatmul.mubr.bf16.gmra.mrb[28].mxu0 %v2494_v32 }
  0xb3   : > { %1184 = vmatmul.mubr.bf16.gmra.mrb[28].mxu1 %v2495_v33  ;;  %v540_v33 = vld [vmem:[#allocation2 + $0x30] sm:$0xff] }
 0x14d   : > { %v2245_v34 = vpop.f32.mrb[0].mxu0 }
 0x14e   : > { %v2309_v35 = vpop.f32.mrb[0].mxu1  ;;  %v2246_v36 = vpop.f32.mrb[1].mxu0 }
 0x14f   : > { %v2247_v37 = vadd.f32 %v2246_v36, %v2245_v34  ;;  %v2310_v38 = vpop.f32.mrb[1].mxu1  ;;  %v2248_v39 = vpop.f32.mrb[2].mxu0 }
 0x150   : > { %v2311_v40 = vadd.f32 %v2310_v38, %v2309_v35  ;;  %v2312_v41 = vpop.f32.mrb[2].mxu1  ;;  %v2249_v42 = vpop.f32.mrb[3].mxu0  ;;  %v541_v38 = vld [vmem:[#allocation2 + $0x38] sm:$0xff] }
 0x151   : > { %v2250_v44 = vadd.f32 %v2249_v42, %v2248_v39  ;;  %v2313_v45 = vpop.f32.mrb[3].mxu1 }
 0x152   : > { %v1130_v46 = vadd.f32 %v2311_v40, %v2247_v37  ;;  %v2314_v47 = vadd.f32 %v2313_v45, %v2312_v41 }
 0x154   : > { %v1192_v49 = vadd.f32 %v1130_v46, %v534_v43  ;;  %v1133_v50 = vadd.f32 %v2314_v47, %v2250_v44 }
 0x155   : > { %v2251_v51 = vpop.f32.mrb[4].mxu0 }
 0x156   : > { %1208 = vst [vmem:[#allocation2] sm:$0xff] %v1192_v49  ;;  %v1193_v52 = vadd.f32 %v1133_v50, %v535_v48  ;;  %v2315_v53 = vpop.f32.mrb[4].mxu1  ;;  %v2252_v54 = vpop.f32.mrb[5].mxu0 }
 0x157   : > { %v2253_v55 = vadd.f32 %v2252_v54, %v2251_v51  ;;  %v2316_v56 = vpop.f32.mrb[5].mxu1  ;;  %v2254_v57 = vpop.f32.mrb[6].mxu0  ;;  %v542_v51 = vld [vmem:[#allocation2 + $0x40] sm:$0xff] }
 0x158   : > { %1209 = vst [vmem:[#allocation2 + $0x8] sm:$0xff] %v1193_v52  ;;  %v2317_v58 = vadd.f32 %v2316_v56, %v2315_v53  ;;  %v2318_v59 = vpop.f32.mrb[6].mxu1  ;;  %v2255_v60 = vpop.f32.mrb[7].mxu0  ;;  %v543_v56 = vld [vmem:[#allocation2 + $0x48] sm:$0xff] }
 0x159   : > { %v2256_v62 = vadd.f32 %v2255_v60, %v2254_v57  ;;  %v2319_v63 = vpop.f32.mrb[7].mxu1 }
 0x15a   : > { %v1138_v0 = vadd.f32 %v2317_v58, %v2253_v55  ;;  %v2320_v1 = vadd.f32 %v2319_v63, %v2318_v59 }
 0x15c   : > { %v1194_v3 = vadd.f32 %v1138_v0, %v536_v61  ;;  %v1141_v4 = vadd.f32 %v2320_v1, %v2256_v62 }
 0x15d   : > { %v2257_v5 = vpop.f32.mrb[8].mxu0 }
 0x15e   : > { %1210 = vst [vmem:[#allocation2 + $0x10] sm:$0xff] %v1194_v3  ;;  %v1195_v6 = vadd.f32 %v1141_v4, %v537_v2  ;;  %v2321_v7 = vpop.f32.mrb[8].mxu1  ;;  %v2258_v8 = vpop.f32.mrb[9].mxu0 }
 0x15f   : > { %v2259_v9 = vadd.f32 %v2258_v8, %v2257_v5  ;;  %v2322_v10 = vpop.f32.mrb[9].mxu1  ;;  %v2260_v11 = vpop.f32.mrb[10].mxu0  ;;  %v544_v5 = vld [vmem:[#allocation2 + $0x50] sm:$0xff] }
 0x160   : > { %1211 = vst [vmem:[#allocation2 + $0x18] sm:$0xff] %v1195_v6  ;;  %v2323_v12 = vadd.f32 %v2322_v10, %v2321_v7  ;;  %v2324_v13 = vpop.f32.mrb[10].mxu1  ;;  %v2261_v14 = vpop.f32.mrb[11].mxu0  ;;  %v545_v10 = vld [vmem:[#allocation2 + $0x58] sm:$0xff] }
 0x161   : > { %v2262_v16 = vadd.f32 %v2261_v14, %v2260_v11  ;;  %v2325_v17 = vpop.f32.mrb[11].mxu1 }
 0x162   : > { %v1146_v18 = vadd.f32 %v2323_v12, %v2259_v9  ;;  %v2326_v19 = vadd.f32 %v2325_v17, %v2324_v13 }
 0x164   : > { %v1196_v21 = vadd.f32 %v1146_v18, %v538_v15  ;;  %v1149_v22 = vadd.f32 %v2326_v19, %v2262_v16 }
 0x165   : > { %v2263_v23 = vpop.f32.mrb[12].mxu0 }
 0x166   : > { %1212 = vst [vmem:[#allocation2 + $0x20] sm:$0xff] %v1196_v21  ;;  %v1197_v24 = vadd.f32 %v1149_v22, %v539_v20  ;;  %v2327_v25 = vpop.f32.mrb[12].mxu1  ;;  %v2264_v26 = vpop.f32.mrb[13].mxu0 }
 0x167   : > { %v2265_v27 = vadd.f32 %v2264_v26, %v2263_v23  ;;  %v2328_v28 = vpop.f32.mrb[13].mxu1  ;;  %v2266_v29 = vpop.f32.mrb[14].mxu0  ;;  %v546_v23 = vld [vmem:[#allocation2 + $0x60] sm:$0xff] }
 0x168   : > { %1213 = vst [vmem:[#allocation2 + $0x28] sm:$0xff] %v1197_v24  ;;  %v2329_v30 = vadd.f32 %v2328_v28, %v2327_v25  ;;  %v2330_v31 = vpop.f32.mrb[14].mxu1  ;;  %v2267_v32 = vpop.f32.mrb[15].mxu0  ;;  %v547_v28 = vld [vmem:[#allocation2 + $0x68] sm:$0xff] }
 0x169   : > { %v2268_v34 = vadd.f32 %v2267_v32, %v2266_v29  ;;  %v2331_v35 = vpop.f32.mrb[15].mxu1 }
 0x16a   : > { %v1154_v36 = vadd.f32 %v2329_v30, %v2265_v27  ;;  %v2332_v37 = vadd.f32 %v2331_v35, %v2330_v31 }
 0x16c   : > { %v1198_v39 = vadd.f32 %v1154_v36, %v540_v33  ;;  %v1157_v40 = vadd.f32 %v2332_v37, %v2268_v34 }
 0x16d   : > { %v2269_v41 = vpop.f32.mrb[16].mxu0 }
 0x16e   : > { %1214 = vst [vmem:[#allocation2 + $0x30] sm:$0xff] %v1198_v39  ;;  %v1199_v42 = vadd.f32 %v1157_v40, %v541_v38  ;;  %v2333_v43 = vpop.f32.mrb[16].mxu1  ;;  %v2270_v44 = vpop.f32.mrb[17].mxu0 }
 0x16f   : > { %v2271_v45 = vadd.f32 %v2270_v44, %v2269_v41  ;;  %v2334_v46 = vpop.f32.mrb[17].mxu1  ;;  %v2272_v47 = vpop.f32.mrb[18].mxu0  ;;  %v548_v41 = vld [vmem:[#allocation2 + $0x70] sm:$0xff] }
 0x170   : > { %1215 = vst [vmem:[#allocation2 + $0x38] sm:$0xff] %v1199_v42  ;;  %v2335_v48 = vadd.f32 %v2334_v46, %v2333_v43  ;;  %v2336_v49 = vpop.f32.mrb[18].mxu1  ;;  %v2273_v50 = vpop.f32.mrb[19].mxu0  ;;  %v549_v46 = vld [vmem:[#allocation2 + $0x78] sm:$0xff] }
 0x171   : > { %v2274_v52 = vadd.f32 %v2273_v50, %v2272_v47  ;;  %v2337_v53 = vpop.f32.mrb[19].mxu1  ;;  %v2874_v50 = vld [vmem:[#allocation2 + $0x10] sm:$0xff] (!%p2140_p1) }
 0x172   : > { %v1162_v54 = vadd.f32 %v2335_v48, %v2271_v45  ;;  %v2338_v55 = vadd.f32 %v2337_v53, %v2336_v49  ;;  %1264 = vadd.xlane.f32.xlu1 (!%p2140_p1), %v2874_v50  ;;  %v2882_v53 = vld [vmem:[#allocation2 + $0x8] sm:$0xff] (!%p2140_p1) }
 0x174   : > { %v1200_v57 = vadd.f32 %v1162_v54, %v542_v51  ;;  %v1165_v58 = vadd.f32 %v2338_v55, %v2274_v52  ;;  %v2876_v51 = vld [vmem:[#allocation2] sm:$0xff] (!%p2140_p1)  ;;  %v2880_v52 = vld [vmem:[#allocation2 + $0x18] sm:$0xff] (!%p2140_p1)  ;;  %v2588_v54 = vmov (!%p2140_p1), 0   ;;  %v2886_v55 = vld [vmem:[#allocation2 + $0x28] sm:$0xff] (!%p2140_p1) }
 0x175   : > { %v2275_v59 = vpop.f32.mrb[20].mxu0  ;;  %1260 = vadd.xlane.f32.xlu0 (!%p2140_p1), %v2876_v51  ;;  %2497 = vset.pattern.permute.xlu1 (!%p2140_p1), %v2588_v54 }
 0x176   : > { %1216 = vst [vmem:[#allocation2 + $0x40] sm:$0xff] %v1200_v57  ;;  %v1201_v60 = vadd.f32 %v1165_v58, %v543_v56  ;;  %v2339_v61 = vpop.f32.mrb[20].mxu1  ;;  %v2276_v62 = vpop.f32.mrb[21].mxu0  ;;  %2496 = vset.pattern.permute.xlu0 (!%p2140_p1), %v2588_v54  ;;  %1266 = vadd.xlane.f32.xlu1 (!%p2140_p1), %v2880_v52  ;;  %v2888_v56 = vld [vmem:[#allocation2 + $0x20] sm:$0xff] (!%p2140_p1)  ;;  %v2894_v58 = vld [vmem:[#allocation2 + $0x30] sm:$0xff] (!%p2140_p1) }
 0x177   : > { %v2277_v63 = vadd.f32 %v2276_v62, %v2275_v59  ;;  %v2340_v0 = vpop.f32.mrb[21].mxu1  ;;  %v2278_v1 = vpop.f32.mrb[22].mxu0  ;;  %v2892_v57 = vld [vmem:[#allocation2 + $0x38] sm:$0xff] (!%p2140_p1) }
 0x178   : > { %1217 = vst [vmem:[#allocation2 + $0x48] sm:$0xff] %v1201_v60  ;;  %v2341_v2 = vadd.f32 %v2340_v0, %v2339_v61  ;;  %v2342_v3 = vpop.f32.mrb[22].mxu1  ;;  %v2279_v4 = vpop.f32.mrb[23].mxu0 }
 0x179   : > { %v2280_v6 = vadd.f32 %v2279_v4, %v2278_v1  ;;  %v2343_v7 = vpop.f32.mrb[23].mxu1  ;;  %1262 = vadd.xlane.f32.xlu0 (!%p2140_p1), %v2882_v53  ;;  %v1341_v4 = vmul.f32 (!%p2140_p1), %v2876_v51, %v2876_v51 }
 0x17a   : > { %v1170_v8 = vadd.f32 %v2341_v2, %v2277_v63  ;;  %v2344_v9 = vadd.f32 %v2343_v7, %v2342_v3  ;;  %1270 = vadd.xlane.f32.xlu1 (!%p2140_p1), %v2886_v55  ;;  %v1342_v3 = vmul.f32 (!%p2140_p1), %v2882_v53, %v2882_v53  ;;  %v1346_v7 = vmul.f32 (!%p2140_p1), %v2886_v55, %v2886_v55 }
 0x17c   : > { %v1202_v11 = vadd.f32 %v1170_v8, %v544_v5  ;;  %v1173_v12 = vadd.f32 %v2344_v9, %v2280_v6  ;;  %v1344_v5 = vmul.f32 (!%p2140_p1), %v2880_v52, %v2880_v52  ;;  %v1343_v6 = vmul.f32 (!%p2140_p1), %v2874_v50, %v2874_v50 }
 0x17d   : > { %v2281_v13 = vpop.f32.mrb[24].mxu0  ;;  %1268 = vadd.xlane.f32.xlu0 (!%p2140_p1), %v2888_v56  ;;  %v2900_v60 = vld [vmem:[#allocation2 + $0x40] sm:$0xff] (!%p2140_p1)  ;;  %v1345_v8 = vmul.f32 (!%p2140_p1), %v2888_v56, %v2888_v56  ;;  %v1348_v9 = vmul.f32 (!%p2140_p1), %v2892_v57, %v2892_v57 }
 0x17e   : > { %1218 = vst [vmem:[#allocation2 + $0x50] sm:$0xff] %v1202_v11  ;;  %v1203_v14 = vadd.f32 %v1173_v12, %v545_v10  ;;  %v2345_v15 = vpop.f32.mrb[24].mxu1  ;;  %v2282_v16 = vpop.f32.mrb[25].mxu0  ;;  %1274 = vadd.xlane.f32.xlu1 (!%p2140_p1), %v2892_v57  ;;  %v1347_v10 = vmul.f32 (!%p2140_p1), %v2894_v58, %v2894_v58  ;;  %v1349_v12 = vmul.f32 (!%p2140_p1), %v2900_v60, %v2900_v60 }
 0x17f   : > { %v2283_v17 = vadd.f32 %v2282_v16, %v2281_v13  ;;  %v2346_v18 = vpop.f32.mrb[25].mxu1  ;;  %v2284_v19 = vpop.f32.mrb[26].mxu0  ;;  %v2898_v59 = vld [vmem:[#allocation2 + $0x48] sm:$0xff] (!%p2140_p1) }
 0x180   : > { %1219 = vst [vmem:[#allocation2 + $0x58] sm:$0xff] %v1203_v14  ;;  %v2347_v20 = vadd.f32 %v2346_v18, %v2345_v15  ;;  %v2348_v21 = vpop.f32.mrb[26].mxu1  ;;  %v2285_v22 = vpop.f32.mrb[27].mxu0  ;;  %v1350_v11 = vmul.f32 (!%p2140_p1), %v2898_v59, %v2898_v59 }
 0x181   : > { %v2286_v24 = vadd.f32 %v2285_v22, %v2284_v19  ;;  %v2349_v25 = vpop.f32.mrb[27].mxu1  ;;  %1272 = vadd.xlane.f32.xlu0 (!%p2140_p1), %v2894_v58  ;;  %v1422_v19 = vld [vmem:[%s3195_s2 + $0x8] sm:$0xff] (!%p2140_p1)  ;;  %v1424_v22 = vld [vmem:[%s3195_s2 + $0x18] sm:$0xff] (!%p2140_p1) }
 0x182   : > { %v1178_v26 = vadd.f32 %v2347_v20, %v2283_v17  ;;  %v2350_v27 = vadd.f32 %v2349_v25, %v2348_v21  ;;  %1278 = vadd.xlane.f32.xlu1 (!%p2140_p1), %v2898_v59  ;;  %v1423_v20 = vld [vmem:[%s3195_s2 + $0x10] sm:$0xff] (!%p2140_p1)  ;;  %v1421_v21 = vld [vmem:[%s3195_s2] sm:$0xff] (!%p2140_p1)  ;;  %v1432_v25 = vld [vmem:[%s3195_s2 + $0x58] sm:$0xff] (!%p2140_p1) }
 0x184   : > { %v1204_v29 = vadd.f32 %v1178_v26, %v546_v23  ;;  %v1181_v30 = vadd.f32 %v2350_v27, %v2286_v24  ;;  %v1430_v23 = vld [vmem:[%s3195_s2 + $0x48] sm:$0xff] (!%p2140_p1)  ;;  %v1425_v24 = vld [vmem:[%s3195_s2 + $0x20] sm:$0xff] (!%p2140_p1) }
 0x185   : > { %v2287_v31 = vpop.f32.mrb[28].mxu0  ;;  %1276 = vadd.xlane.f32.xlu0 (!%p2140_p1), %v2900_v60  ;;  %v2906_v62 = vld [vmem:[#allocation2 + $0x50] sm:$0xff] (!%p2140_p1)  ;;  %v1426_v26 = vld [vmem:[%s3195_s2 + $0x28] sm:$0xff] (!%p2140_p1) }
 0x186   : > { %1220 = vst [vmem:[#allocation2 + $0x60] sm:$0xff] %v1204_v29  ;;  %v1205_v32 = vadd.f32 %v1181_v30, %v547_v28  ;;  %v2351_v33 = vpop.f32.mrb[28].mxu1  ;;  %v2288_v34 = vpop.f32.mrb[29].mxu0  ;;  %v1351_v14 = vmul.f32 (!%p2140_p1), %v2906_v62, %v2906_v62  ;;  %v1434_v27 = vld [vmem:[%s3195_s2 + $0x68] sm:$0xff] (!%p2140_p1)  ;;  %v1427_v28 = vld [vmem:[%s3195_s2 + $0x30] sm:$0xff] (!%p2140_p1)  ;;  %v1436_v29 = vld [vmem:[%s3195_s2 + $0x78] sm:$0xff] (!%p2140_p1) }
 0x187   : > { %v2289_v35 = vadd.f32 %v2288_v34, %v2287_v31  ;;  %v2352_v36 = vpop.f32.mrb[29].mxu1  ;;  %v2290_v37 = vpop.f32.mrb[30].mxu0  ;;  %v2904_v61 = vld [vmem:[#allocation2 + $0x58] sm:$0xff] (!%p2140_p1)  ;;  %v1429_v31 = vld [vmem:[%s3195_s2 + $0x40] sm:$0xff] (!%p2140_p1)  ;;  %v1435_v34 = vld [vmem:[%s3195_s2 + $0x70] sm:$0xff] (!%p2140_p1) }
 0x188   : > { %1221 = vst [vmem:[#allocation2 + $0x68] sm:$0xff] %v1205_v32  ;;  %v2353_v38 = vadd.f32 %v2352_v36, %v2351_v33  ;;  %v2354_v39 = vpop.f32.mrb[30].mxu1  ;;  %v2291_v40 = vpop.f32.mrb[31].mxu0  ;;  %1282 = vadd.xlane.f32.xlu1 (!%p2140_p1), %v2904_v61  ;;  %v1352_v13 = vmul.f32 (!%p2140_p1), %v2904_v61, %v2904_v61  ;;  %v1428_v30 = vld [vmem:[%s3195_s2 + $0x38] sm:$0xff] (!%p2140_p1)  ;;  %v1431_v32 = vld [vmem:[%s3195_s2 + $0x50] sm:$0xff] (!%p2140_p1)  ;;  %v1433_v33 = vld [vmem:[%s3195_s2 + $0x60] sm:$0xff] (!%p2140_p1) }
 0x189   : > { %v2292_v42 = vadd.f32 %v2291_v40, %v2290_v37  ;;  %v2355_v43 = vpop.f32.mrb[31].mxu1  ;;  %1280 = vadd.xlane.f32.xlu0 (!%p2140_p1), %v2906_v62  ;;  %v1244_v36 = vld [vmem:[#allocation3] sm:$0xff] (!%p2140_p1) }
 0x18a   : > { %v1186_v44 = vadd.f32 %v2353_v38, %v2289_v35  ;;  %v2356_v45 = vadd.f32 %v2355_v43, %v2354_v39  ;;  %1227 = sbr.rel (%p2140_p1) target bundleno = 631 (0x277), region = 67  ;;  %v1246_v35 = vld [vmem:[#allocation3 + $0x10] sm:$0xff] (!%p2140_p1) }
 0x18c   : > { %v1206_v47 = vadd.f32 %v1186_v44, %v548_v41  ;;  %v1189_v48 = vadd.f32 %v2356_v45, %v2292_v42  ;;  %v1247_v41 = vld [vmem:[#allocation3 + $0x18] sm:$0xff] (!%p2140_p1)  ;;  %v1245_v42 = vld [vmem:[#allocation3 + $0x8] sm:$0xff] (!%p2140_p1) }
 0x18d   : > { %v2912_v0 = vld [vmem:[#allocation2 + $0x60] sm:$0xff] (!%p2140_p1) }
 0x18e   : > { %1222 = vst [vmem:[#allocation2 + $0x70] sm:$0xff] %v1206_v47  ;;  %v1207_v49 = vadd.f32 %v1189_v48, %v549_v46  ;;  %1284 = vadd.xlane.f32.xlu0 (!%p2140_p1), %v2912_v0  ;;  %v1353_v16 = vmul.f32 (!%p2140_p1), %v2912_v0, %v2912_v0  ;;  %v1249_v47 = vld [vmem:[#allocation3 + $0x28] sm:$0xff] (!%p2140_p1)  ;;  %v1248_v48 = vld [vmem:[#allocation3 + $0x20] sm:$0xff] (!%p2140_p1) }
 0x18f   : > { %v2910_v63 = vld [vmem:[#allocation2 + $0x68] sm:$0xff] (!%p2140_p1) }
 0x190   : > { %1223 = vst [vmem:[#allocation2 + $0x78] sm:$0xff] %v1207_v49  ;;  %1286 = vadd.xlane.f32.xlu1 (!%p2140_p1), %v2910_v63  ;;  %v1354_v15 = vmul.f32 (!%p2140_p1), %v2910_v63, %v2910_v63 }
 0x195   : > { %v2918_v2 = vld [vmem:[#allocation2 + $0x70] sm:$0xff] }
 0x196   : > { %1288 = vadd.xlane.f32.xlu0 %v2918_v2  ;;  %v1355_v18 = vmul.f32 %v2918_v2, %v2918_v2 }
 0x197   : > { %v2916_v1 = vld [vmem:[#allocation2 + $0x78] sm:$0xff] }
 0x198   : > { %1290 = vadd.xlane.f32.xlu1 %v2916_v1  ;;  %v1356_v17 = vmul.f32 %v2916_v1, %v2916_v1 }
 0x19a   : > { %1357 = vadd.xlane.f32.xlu0 %v1341_v4 }
 0x19c   : > { %1359 = vadd.xlane.f32.xlu1 %v1342_v3 }
 0x19e   : > { %1361 = vadd.xlane.f32.xlu0 %v1343_v6  ;;  %v1250_v6 = vld [vmem:[#allocation3 + $0x30] sm:$0xff] }
 0x1a0   : > { %1363 = vadd.xlane.f32.xlu1 %v1344_v5  ;;  %v1251_v5 = vld [vmem:[#allocation3 + $0x38] sm:$0xff] }
 0x1a2   : > { %1365 = vadd.xlane.f32.xlu0 %v1345_v8 }
 0x1a4   : > { %1367 = vadd.xlane.f32.xlu1 %v1346_v7 }
 0x1a6   : > { %1369 = vadd.xlane.f32.xlu0 %v1347_v10 }
 0x1a8   : > { %1371 = vadd.xlane.f32.xlu1 %v1348_v9 }
 0x1aa   : > { %1373 = vadd.xlane.f32.xlu0 %v1349_v12  ;;  %v1252_v12 = vld [vmem:[#allocation3 + $0x40] sm:$0xff] }
 0x1ac   : > { %1375 = vadd.xlane.f32.xlu1 %v1350_v11  ;;  %v1253_v11 = vld [vmem:[#allocation3 + $0x48] sm:$0xff] }
 0x1ae   : > { %1377 = vadd.xlane.f32.xlu0 %v1351_v14 }
 0x1b0   : > { %1379 = vadd.xlane.f32.xlu1 %v1352_v13 }
 0x1b2   : > { %1381 = vadd.xlane.f32.xlu0 %v1353_v16 }
 0x1b4   : > { %1383 = vadd.xlane.f32.xlu1 %v1354_v15 }
 0x1b6   : > { %1385 = vadd.xlane.f32.xlu0 %v1355_v18  ;;  %v1254_v18 = vld [vmem:[#allocation3 + $0x50] sm:$0xff] }
 0x1b8   : > { %1387 = vadd.xlane.f32.xlu1 %v1356_v17  ;;  %v1255_v17 = vld [vmem:[#allocation3 + $0x58] sm:$0xff] }
 0x1c9   : > { %1444 = vperm.xlu1 %2497, %v1422_v19  }
 0x1cc   : > { %1439 = vperm.xlu0 %2496, %v1421_v21  }
 0x1cd   : > { %1449 = vperm.xlu1 %2497, %v1423_v20  }
 0x1d0   : > { %1484 = vperm.xlu0 %2496, %v1430_v23   ;;  %v1257_v23 = vld [vmem:[#allocation3 + $0x68] sm:$0xff] }
 0x1d1   : > { %1454 = vperm.xlu1 %2497, %v1424_v22  }
 0x1d4   : > { %1494 = vperm.xlu0 %2496, %v1432_v25  }
 0x1d5   : > { %1459 = vperm.xlu1 %2497, %v1425_v24   ;;  %v1256_v24 = vld [vmem:[#allocation3 + $0x60] sm:$0xff] }
 0x1d8   : > { %1504 = vperm.xlu0 %2496, %v1434_v27  }
 0x1d9   : > { %1464 = vperm.xlu1 %2497, %v1426_v26  }
 0x1dc   : > { %1514 = vperm.xlu0 %2496, %v1436_v29   ;;  %v1259_v29 = vld [vmem:[#allocation3 + $0x78] sm:$0xff] }
 0x1dd   : > { %1469 = vperm.xlu1 %2497, %v1427_v28  }
 0x1e1   : > { %1474 = vperm.xlu1 %2497, %v1428_v30   ;;  %v1258_v30 = vld [vmem:[#allocation3 + $0x70] sm:$0xff] }
 0x1e5   : > { %1479 = vperm.xlu1 %2497, %v1429_v31  }
 0x1e9   : > { %1489 = vperm.xlu1 %2497, %v1431_v32  }
 0x1ed   : > { %1499 = vperm.xlu1 %2497, %v1433_v33  }
 0x1f1   : > { %1509 = vperm.xlu1 %2497, %v1435_v34  }
 0x1ff   : > { %v1265_v37 = vpop.xlane.xlu1 %1264 }
 0x200   : > { %v1294_v39 = vadd.f32 %v1265_v37, %v1246_v35  ;;  %v1326_v35 = vld [vmem:[#allocation4 + $0x8] sm:$0xff] }
 0x202   : > { %v1261_v38 = vpop.xlane.xlu0 %1260  ;;  %1311 = vst.msk [vmem:[#allocation3 + $0x10] sm:$0xff] %vm1308_vm1, %v1294_v39 }
 0x203   : > { %v1292_v40 = vadd.f32 %v1261_v38, %v1244_v36  ;;  %v1267_v43 = vpop.xlane.xlu1 %1266  ;;  %v1325_v36 = vld [vmem:[#allocation4] sm:$0xff] }
 0x204   : > { %v1295_v45 = vadd.f32 %v1267_v43, %v1247_v41  ;;  %v1328_v41 = vld [vmem:[#allocation4 + $0x18] sm:$0xff] }
 0x205   : > { %1309 = vst.msk [vmem:[#allocation3] sm:$0xff] %vm1308_vm1, %v1292_v40 }
 0x206   : > { %v1263_v44 = vpop.xlane.xlu0 %1262  ;;  %1312 = vst.msk [vmem:[#allocation3 + $0x18] sm:$0xff] %vm1308_vm1, %v1295_v45 }
 0x207   : > { %v1293_v46 = vadd.f32 %v1263_v44, %v1245_v42  ;;  %v1271_v49 = vpop.xlane.xlu1 %1270  ;;  %v1327_v42 = vld [vmem:[#allocation4 + $0x10] sm:$0xff] }
 0x208   : > { %v1297_v3 = vadd.f32 %v1271_v49, %v1249_v47  ;;  %v1330_v47 = vld [vmem:[#allocation4 + $0x28] sm:$0xff] }
 0x209   : > { %1310 = vst.msk [vmem:[#allocation3 + $0x8] sm:$0xff] %vm1308_vm1, %v1293_v46 }
 0x20a   : > { %v1269_v54 = vpop.xlane.xlu0 %1268  ;;  %1314 = vst.msk [vmem:[#allocation3 + $0x28] sm:$0xff] %vm1308_vm1, %v1297_v3 }
 0x20b   : > { %v1296_v4 = vadd.f32 %v1269_v54, %v1248_v48  ;;  %v1275_v7 = vpop.xlane.xlu1 %1274  ;;  %v1329_v48 = vld [vmem:[#allocation4 + $0x20] sm:$0xff] }
 0x20c   : > { %v1299_v9 = vadd.f32 %v1275_v7, %v1251_v5  ;;  %v1332_v5 = vld [vmem:[#allocation4 + $0x38] sm:$0xff] }
 0x20d   : > { %1313 = vst.msk [vmem:[#allocation3 + $0x20] sm:$0xff] %vm1308_vm1, %v1296_v4 }
 0x20e   : > { %v1273_v8 = vpop.xlane.xlu0 %1272  ;;  %1316 = vst.msk [vmem:[#allocation3 + $0x38] sm:$0xff] %vm1308_vm1, %v1299_v9 }
 0x20f   : > { %v1298_v10 = vadd.f32 %v1273_v8, %v1250_v6  ;;  %v1279_v13 = vpop.xlane.xlu1 %1278  ;;  %v1331_v6 = vld [vmem:[#allocation4 + $0x30] sm:$0xff] }
 0x210   : > { %v1301_v15 = vadd.f32 %v1279_v13, %v1253_v11  ;;  %v1334_v11 = vld [vmem:[#allocation4 + $0x48] sm:$0xff] }
 0x211   : > { %1315 = vst.msk [vmem:[#allocation3 + $0x30] sm:$0xff] %vm1308_vm1, %v1298_v10 }
 0x212   : > { %v1277_v14 = vpop.xlane.xlu0 %1276  ;;  %1318 = vst.msk [vmem:[#allocation3 + $0x48] sm:$0xff] %vm1308_vm1, %v1301_v15 }
 0x213   : > { %v1300_v16 = vadd.f32 %v1277_v14, %v1252_v12  ;;  %v1333_v12 = vld [vmem:[#allocation4 + $0x40] sm:$0xff] }
 0x215   : > { %1317 = vst.msk [vmem:[#allocation3 + $0x40] sm:$0xff] %vm1308_vm1, %v1300_v16  ;;  %v1283_v19 = vpop.xlane.xlu1 %1282 }
 0x216   : > { %v1281_v20 = vpop.xlane.xlu0 %1280  ;;  %v1303_v21 = vadd.f32 %v1283_v19, %v1255_v17  ;;  %v1336_v17 = vld [vmem:[#allocation4 + $0x58] sm:$0xff] }
 0x217   : > { %v1302_v22 = vadd.f32 %v1281_v20, %v1254_v18  ;;  %v1335_v18 = vld [vmem:[#allocation4 + $0x50] sm:$0xff] }
 0x218   : > { %1320 = vst.msk [vmem:[#allocation3 + $0x58] sm:$0xff] %vm1308_vm1, %v1303_v21 }
 0x219   : > { %1319 = vst.msk [vmem:[#allocation3 + $0x50] sm:$0xff] %vm1308_vm1, %v1302_v22 }
 0x21b   : > { %v1285_v26 = vpop.xlane.xlu0 %1284 }
 0x21c   : > { %v1304_v28 = vadd.f32 %v1285_v26, %v1256_v24  ;;  %v1337_v24 = vld [vmem:[#allocation4 + $0x60] sm:$0xff] }
 0x21d   : > { %v1287_v25 = vpop.xlane.xlu1 %1286 }
 0x21e   : > { %v1305_v27 = vadd.f32 %v1287_v25, %v1257_v23  ;;  %1321 = vst.msk [vmem:[#allocation3 + $0x60] sm:$0xff] %vm1308_vm1, %v1304_v28  ;;  %v1338_v23 = vld [vmem:[#allocation4 + $0x68] sm:$0xff] }
 0x220   : > { %1322 = vst.msk [vmem:[#allocation3 + $0x68] sm:$0xff] %vm1308_vm1, %v1305_v27 }
 0x223   : > { %v1289_v32 = vpop.xlane.xlu0 %1288 }
 0x224   : > { %v1306_v34 = vadd.f32 %v1289_v32, %v1258_v30  ;;  %v1339_v30 = vld [vmem:[#allocation4 + $0x70] sm:$0xff] }
 0x225   : > { %v1291_v31 = vpop.xlane.xlu1 %1290 }
 0x226   : > { %v1307_v33 = vadd.f32 %v1291_v31, %v1259_v29  ;;  %1323 = vst.msk [vmem:[#allocation3 + $0x70] sm:$0xff] %vm1308_vm1, %v1306_v34  ;;  %v1340_v29 = vld [vmem:[#allocation4 + $0x78] sm:$0xff] }
 0x227   : > { %v1358_v38 = vpop.xlane.xlu0 %1357 }
 0x228   : > { %1324 = vst.msk [vmem:[#allocation3 + $0x78] sm:$0xff] %vm1308_vm1, %v1307_v33  ;;  %v1389_v40 = vadd.f32 %v1358_v38, %v1325_v36 }
 0x229   : > { %v1360_v37 = vpop.xlane.xlu1 %1359 }
 0x22a   : > { %v1390_v39 = vadd.f32 %v1360_v37, %v1326_v35  ;;  %1405 = vst.msk [vmem:[#allocation4] sm:$0xff] %vm1308_vm1, %v1389_v40 }
 0x22b   : > { %v1362_v44 = vpop.xlane.xlu0 %1361 }
 0x22c   : > { %1406 = vst.msk [vmem:[#allocation4 + $0x8] sm:$0xff] %vm1308_vm1, %v1390_v39  ;;  %v1391_v46 = vadd.f32 %v1362_v44, %v1327_v42 }
 0x22d   : > { %v1364_v43 = vpop.xlane.xlu1 %1363 }
 0x22e   : > { %v1392_v45 = vadd.f32 %v1364_v43, %v1328_v41  ;;  %1407 = vst.msk [vmem:[#allocation4 + $0x10] sm:$0xff] %vm1308_vm1, %v1391_v46 }
 0x22f   : > { %v1366_v54 = vpop.xlane.xlu0 %1365 }
 0x230   : > { %1408 = vst.msk [vmem:[#allocation4 + $0x18] sm:$0xff] %vm1308_vm1, %v1392_v45  ;;  %v1393_v4 = vadd.f32 %v1366_v54, %v1329_v48 }
 0x231   : > { %v1368_v49 = vpop.xlane.xlu1 %1367 }
 0x232   : > { %v1394_v3 = vadd.f32 %v1368_v49, %v1330_v47  ;;  %1409 = vst.msk [vmem:[#allocation4 + $0x20] sm:$0xff] %vm1308_vm1, %v1393_v4 }
 0x233   : > { %v1370_v8 = vpop.xlane.xlu0 %1369 }
 0x234   : > { %1410 = vst.msk [vmem:[#allocation4 + $0x28] sm:$0xff] %vm1308_vm1, %v1394_v3  ;;  %v1395_v10 = vadd.f32 %v1370_v8, %v1331_v6 }
 0x235   : > { %v1372_v7 = vpop.xlane.xlu1 %1371 }
 0x236   : > { %v1396_v9 = vadd.f32 %v1372_v7, %v1332_v5  ;;  %1411 = vst.msk [vmem:[#allocation4 + $0x30] sm:$0xff] %vm1308_vm1, %v1395_v10 }
 0x237   : > { %v1374_v14 = vpop.xlane.xlu0 %1373 }
 0x238   : > { %1412 = vst.msk [vmem:[#allocation4 + $0x38] sm:$0xff] %vm1308_vm1, %v1396_v9  ;;  %v1397_v16 = vadd.f32 %v1374_v14, %v1333_v12 }
 0x239   : > { %v1376_v13 = vpop.xlane.xlu1 %1375 }
 0x23a   : > { %v1398_v15 = vadd.f32 %v1376_v13, %v1334_v11  ;;  %1413 = vst.msk [vmem:[#allocation4 + $0x40] sm:$0xff] %vm1308_vm1, %v1397_v16 }
 0x23b   : > { %v1378_v20 = vpop.xlane.xlu0 %1377 }
 0x23c   : > { %1414 = vst.msk [vmem:[#allocation4 + $0x48] sm:$0xff] %vm1308_vm1, %v1398_v15  ;;  %v1399_v22 = vadd.f32 %v1378_v20, %v1335_v18 }
 0x23d   : > { %v1380_v19 = vpop.xlane.xlu1 %1379 }
 0x23e   : > { %v1400_v21 = vadd.f32 %v1380_v19, %v1336_v17  ;;  %1415 = vst.msk [vmem:[#allocation4 + $0x50] sm:$0xff] %vm1308_vm1, %v1399_v22 }
 0x23f   : > { %v1382_v26 = vpop.xlane.xlu0 %1381 }
 0x240   : > { %1416 = vst.msk [vmem:[#allocation4 + $0x58] sm:$0xff] %vm1308_vm1, %v1400_v21  ;;  %v1401_v28 = vadd.f32 %v1382_v26, %v1337_v24 }
 0x241   : > { %v1384_v25 = vpop.xlane.xlu1 %1383 }
 0x242   : > { %v1402_v27 = vadd.f32 %v1384_v25, %v1338_v23  ;;  %1417 = vst.msk [vmem:[#allocation4 + $0x60] sm:$0xff] %vm1308_vm1, %v1401_v28 }
 0x243   : > { %v1386_v32 = vpop.xlane.xlu0 %1385 }
 0x244   : > { %1418 = vst.msk [vmem:[#allocation4 + $0x68] sm:$0xff] %vm1308_vm1, %v1402_v27  ;;  %v1403_v34 = vadd.f32 %v1386_v32, %v1339_v30 }
 0x245   : > { %v1388_v31 = vpop.xlane.xlu1 %1387 }
 0x246   : > { %v1404_v33 = vadd.f32 %v1388_v31, %v1340_v29  ;;  %1419 = vst.msk [vmem:[#allocation4 + $0x70] sm:$0xff] %vm1308_vm1, %v1403_v34 }
 0x248   : > { %1420 = vst.msk [vmem:[#allocation4 + $0x78] sm:$0xff] %vm1308_vm1, %v1404_v33 }
 0x249   : > { %v1445_v35 = vpop.permute.xlu1 %1444 }
 0x24a   : > { %v1518_v38 = vadd.f32 %v1445_v35, %v2882_v53 }
 0x24b   : > { %v1440_v37 = vpop.permute.xlu0 %1439 }
 0x24c   : > { %v1517_v39 = vadd.f32 %v1440_v37, %v2876_v51 }
 0x24d   : > { %v1450_v36 = vpop.permute.xlu1 %1449 }
 0x24e   : > { %v2185_v40 = vpack.c.bf16 %v1518_v38, %v1517_v39  ;;  %v1519_v42 = vadd.f32 %v1450_v36, %v2874_v50 }
 0x24f   : > { %v1485_v49 = vpop.permute.xlu0 %1484 }
 0x250   : > { %2186 = vst [vmem:[%s2753_s30] sm:$0xff] %v2185_v40   ;;  %v1526_v6 = vadd.f32 %v1485_v49, %v2898_v59 }
 0x251   : > { %v1455_v41 = vpop.permute.xlu1 %1454 }
 0x252   : > { %v1520_v43 = vadd.f32 %v1455_v41, %v2880_v52 }
 0x253   : > { %v1495_v52 = vpop.permute.xlu0 %1494 }
 0x254   : > { %v2190_v44 = vpack.c.bf16 %v1520_v43, %v1519_v42  ;;  %v1528_v9 = vadd.f32 %v1495_v52, %v2904_v61 }
 0x255   : > { %v1460_v45 = vpop.permute.xlu1 %1459 }
 0x256   : > { %2222 = vst [vmem:[%s2753_s30 + $0x8] sm:$0xff] %v2190_v44   ;;  %v1521_v47 = vadd.f32 %v1460_v45, %v2888_v56 }
 0x257   : > { %v1505_v7 = vpop.permute.xlu0 %1504 }
 0x258   : > { %v1530_v11 = vadd.f32 %v1505_v7, %v2910_v63 }
 0x259   : > { %v1465_v46 = vpop.permute.xlu1 %1464 }
 0x25a   : > { %v1522_v48 = vadd.f32 %v1465_v46, %v2886_v55 }
 0x25b   : > { %v1515_v12 = vpop.permute.xlu0 %1514 }
 0x25c   : > { %v2195_v53 = vpack.c.bf16 %v1522_v48, %v1521_v47  ;;  %v1532_v14 = vadd.f32 %v1515_v12, %v2916_v1 }
 0x25d   : > { %v1470_v51 = vpop.permute.xlu1 %1469 }
 0x25e   : > { %2223 = vst [vmem:[%s2753_s30 + $0x10] sm:$0xff] %v2195_v53   ;;  %v1523_v50 = vadd.f32 %v1470_v51, %v2894_v58 }
 0x261   : > { %v1475_v54 = vpop.permute.xlu1 %1474 }
 0x262   : > { %v1524_v3 = vadd.f32 %v1475_v54, %v2892_v57 }
 0x264   : > { %v2200_v4 = vpack.c.bf16 %v1524_v3, %v1523_v50 }
 0x265   : > { %v1480_v5 = vpop.permute.xlu1 %1479 }
 0x266   : > { %2224 = vst [vmem:[%s2753_s30 + $0x18] sm:$0xff] %v2200_v4   ;;  %v1525_v56 = vadd.f32 %v1480_v5, %v2900_v60 }
 0x268   : > { %v2205_v55 = vpack.c.bf16 %v1526_v6, %v1525_v56 }
 0x269   : > { %v1490_v8 = vpop.permute.xlu1 %1489 }
 0x26a   : > { %2225 = vst [vmem:[%s2753_s30 + $0x20] sm:$0xff] %v2205_v55   ;;  %v1527_v58 = vadd.f32 %v1490_v8, %v2906_v62 }
 0x26c   : > { %v2210_v57 = vpack.c.bf16 %v1528_v9, %v1527_v58 }
 0x26d   : > { %v1500_v10 = vpop.permute.xlu1 %1499 }
 0x26e   : > { %2226 = vst [vmem:[%s2753_s30 + $0x28] sm:$0xff] %v2210_v57   ;;  %v1529_v59 = vadd.f32 %v1500_v10, %v2912_v0 }
 0x270   : > { %v2215_v13 = vpack.c.bf16 %v1530_v11, %v1529_v59 }
 0x271   : > { %v1510_v60 = vpop.permute.xlu1 %1509 }
 0x272   : > { %2227 = vst [vmem:[%s2753_s30 + $0x30] sm:$0xff] %v2215_v13   ;;  %v1531_v15 = vadd.f32 %v1510_v60, %v2918_v2 }
 0x274   : > { %v2220_v16 = vpack.c.bf16 %v1532_v14, %v1531_v15 }
 0x276   : > { %2228 = vst [vmem:[%s2753_s30 + $0x38] sm:$0xff] %v2220_v16  }
 0x277 PF: > { %1616 = sbr.rel (!%p1224_p0) target bundleno = 676 (0x2a4), region = 71  ;;  %v1617_v61 = vld [vmem:[#allocation3] sm:$0xff] (%p1224_p0)  ;;  %v1618_v18 = vld [vmem:[#allocation3 + $0x8] sm:$0xff] (%p1224_p0)  ;;  %vm1745_vm2 = vcmask (%p1224_p0), 7168   ;;  %v1619_v21 = vld [vmem:[#allocation3 + $0x10] sm:$0xff] (%p1224_p0) }
 0x278   : > { %v1649_v62 = vld [vmem:[#allocation4] sm:$0xff] (%p1224_p0)  ;;  %v1633_v0 = vmul.f32 (%p1224_p0), 0.125, %v1617_v61  ;;  %v1650_v19 = vld [vmem:[#allocation4 + $0x8] sm:$0xff] (%p1224_p0)  ;;  %v1634_v2 = vmul.f32 (%p1224_p0), 0.125, %v1618_v18  ;;  %v1651_v22 = vld [vmem:[#allocation4 + $0x10] sm:$0xff] (%p1224_p0)  ;;  %v1635_v26 = vmul.f32 (%p1224_p0), 0.125, %v1619_v21 }
 0x279   : > { %v1713_v63 = vld [vmem:[%s3195_s2] sm:$0xff] (%p1224_p0)  ;;  %v1665_v17 = vmul.f32 (%p1224_p0), 0.125, %v1649_v62  ;;  %v1714_v1 = vld [vmem:[%s3195_s2 + $0x8] sm:$0xff] (%p1224_p0)  ;;  %v1666_v20 = vmul.f32 (%p1224_p0), 0.125, %v1650_v19  ;;  %v1715_v23 = vld [vmem:[%s3195_s2 + $0x10] sm:$0xff] (%p1224_p0)  ;;  %v1667_v27 = vmul.f32 (%p1224_p0), 0.125, %v1651_v22 }
 0x27a   : > { %v1681_v24 = vmul.f32 (%p1224_p0), %v1633_v0, %v1633_v0  ;;  %v1729_v25 = vadd.f32 (%p1224_p0), %v1713_v63, %v1633_v0  ;;  %v1620_v28 = vld [vmem:[#allocation3 + $0x18] sm:$0xff] (%p1224_p0)  ;;  %v1682_v31 = vmul.f32 (%p1224_p0), %v1634_v2, %v1634_v2  ;;  %v1730_v32 = vadd.f32 (%p1224_p0), %v1714_v1, %v1634_v2  ;;  %v1621_v35 = vld [vmem:[#allocation3 + $0x20] sm:$0xff] (%p1224_p0)  ;;  %v1622_v42 = vld [vmem:[#allocation3 + $0x28] sm:$0xff] (%p1224_p0) }
 0x27b   : > { %v1652_v29 = vld [vmem:[#allocation4 + $0x18] sm:$0xff] (%p1224_p0)  ;;  %v1636_v33 = vmul.f32 (%p1224_p0), 0.125, %v1620_v28  ;;  %v1653_v36 = vld [vmem:[#allocation4 + $0x20] sm:$0xff] (%p1224_p0)  ;;  %v1683_v39 = vmul.f32 (%p1224_p0), %v1635_v26, %v1635_v26  ;;  %v1731_v40 = vadd.f32 (%p1224_p0), %v1715_v23, %v1635_v26  ;;  %v1637_v41 = vmul.f32 (%p1224_p0), 0.125, %v1621_v35  ;;  %v1654_v43 = vld [vmem:[#allocation4 + $0x28] sm:$0xff] (%p1224_p0) }
 0x27c   : > { %v1716_v30 = vld [vmem:[%s3195_s2 + $0x18] sm:$0xff] (%p1224_p0)  ;;  %v1668_v34 = vmul.f32 (%p1224_p0), 0.125, %v1652_v29  ;;  %v1717_v37 = vld [vmem:[%s3195_s2 + $0x20] sm:$0xff] (%p1224_p0)  ;;  %v1697_v38 = vsub.f32 (%p1224_p0), %v1665_v17, %v1681_v24  ;;  %1746 = vst.msk [vmem:[%s2763_s12] sm:$0xff] (%p1224_p0), %vm1745_vm2, %v1729_v25  ;;  %v1698_v44 = vsub.f32 (%p1224_p0), %v1666_v20, %v1682_v31  ;;  %1747 = vst.msk [vmem:[%s2763_s12 + $0x8] sm:$0xff] (%p1224_p0), %vm1745_vm2, %v1730_v32  ;;  %v1669_v47 = vmul.f32 (%p1224_p0), 0.125, %v1653_v36 }
 0x27d   : > { %v1684_v45 = vmul.f32 (%p1224_p0), %v1636_v33, %v1636_v33  ;;  %v1732_v46 = vadd.f32 (%p1224_p0), %v1716_v30, %v1636_v33  ;;  %v1623_v48 = vld [vmem:[#allocation3 + $0x30] sm:$0xff] (%p1224_p0)  ;;  %v1699_v49 = vsub.f32 (%p1224_p0), %v1667_v27, %v1683_v39  ;;  %1748 = vst.msk [vmem:[%s2763_s12 + $0x10] sm:$0xff] (%p1224_p0), %vm1745_vm2, %v1731_v40  ;;  %v1685_v51 = vmul.f32 (%p1224_p0), %v1637_v41, %v1637_v41  ;;  %v1718_v50 = vld [vmem:[%s3195_s2 + $0x28] sm:$0xff] (%p1224_p0)  ;;  %v1624_v9 = vld [vmem:[#allocation3 + $0x38] sm:$0xff] (%p1224_p0) }
 0x27e   : > { %v1762_v53 = vadd.f32 1e-05, %v1697_v38  ;;  %v1733_v54 = vadd.f32 %v1717_v37, %v1637_v41  ;;  %v1763_v3 = vadd.f32 1e-05, %v1698_v44  ;;  %v1638_v4 = vmul.f32 0.125, %v1622_v42  ;;  %v1655_v6 = vld [vmem:[#allocation4 + $0x30] sm:$0xff] }
 0x27f   : > { %v1700_v52 = vsub.f32 %v1668_v34, %v1684_v45  ;;  %1749 = vst.msk [vmem:[%s2763_s12 + $0x18] sm:$0xff] %vm1745_vm2, %v1732_v46  ;;  %v1670_v5 = vmul.f32 0.125, %v1654_v43  ;;  %v1764_v56 = vadd.f32 1e-05, %v1699_v49  ;;  %v1701_v55 = vsub.f32 %v1669_v47, %v1685_v51  ;;  %v1719_v8 = vld [vmem:[%s3195_s2 + $0x30] sm:$0xff]  ;;  %v1656_v11 = vld [vmem:[#allocation4 + $0x38] sm:$0xff] }
 0x280   : > { %2498 = vrsqrt.f32 %v1762_v53  ;;  %1750 = vst.msk [vmem:[%s2763_s12 + $0x20] sm:$0xff] %vm1745_vm2, %v1733_v54  ;;  %v1639_v7 = vmul.f32 0.125, %v1623_v48  ;;  %v1686_v57 = vmul.f32 %v1638_v4, %v1638_v4  ;;  %v1734_v10 = vadd.f32 %v1718_v50, %v1638_v4  ;;  %v1625_v59 = vld [vmem:[#allocation3 + $0x40] sm:$0xff]  ;;  %v1720_v14 = vld [vmem:[%s3195_s2 + $0x38] sm:$0xff]  ;;  %v1626_v0 = vld [vmem:[#allocation3 + $0x48] sm:$0xff] }
 0x281   : > { %2500 = vrsqrt.f32 %v1763_v3  ;;  %v1765_v58 = vadd.f32 1e-05, %v1700_v52  ;;  %v1766_v12 = vadd.f32 1e-05, %v1701_v55  ;;  %v1671_v13 = vmul.f32 0.125, %v1655_v6  ;;  %v1657_v15 = vld [vmem:[#allocation4 + $0x40] sm:$0xff] }
 0x282   : > { %2502 = vrsqrt.f32 %v1764_v56  ;;  %v1687_v60 = vmul.f32 %v1639_v7, %v1639_v7  ;;  %v1702_v16 = vsub.f32 %v1670_v5, %v1686_v57  ;;  %1751 = vst.msk [vmem:[%s2763_s12 + $0x28] sm:$0xff] %vm1745_vm2, %v1734_v10  ;;  %v1735_v61 = vadd.f32 %v1719_v8, %v1639_v7  ;;  %v1721_v63 = vld [vmem:[%s3195_s2 + $0x40] sm:$0xff]  ;;  %v1658_v1 = vld [vmem:[#allocation4 + $0x48] sm:$0xff]  ;;  %v1627_v2 = vld [vmem:[#allocation3 + $0x50] sm:$0xff] }
 0x283   : > { %2504 = vrsqrt.f32 %v1765_v58  ;;  %v1640_v62 = vmul.f32 0.125, %v1624_v9  ;;  %v1672_v18 = vmul.f32 0.125, %v1656_v11  ;;  %v1641_v19 = vmul.f32 0.125, %v1625_v59  ;;  %v1722_v24 = vld [vmem:[%s3195_s2 + $0x48] sm:$0xff]  ;;  %v1659_v29 = vld [vmem:[#allocation4 + $0x50] sm:$0xff]  ;;  %v1628_v34 = vld [vmem:[#allocation3 + $0x58] sm:$0xff] }
 0x284   : > { %2506 = vrsqrt.f32 %v1766_v12  ;;  %v1703_v17 = vsub.f32 %v1671_v13, %v1687_v60  ;;  %v1767_v20 = vadd.f32 1e-05, %v1702_v16  ;;  %1752 = vst.msk [vmem:[%s2763_s12 + $0x30] sm:$0xff] %vm1745_vm2, %v1735_v61  ;;  %v1673_v23 = vmul.f32 0.125, %v1657_v15  ;;  %v1723_v30 = vld [vmem:[%s3195_s2 + $0x50] sm:$0xff]  ;;  %v1660_v35 = vld [vmem:[#allocation4 + $0x58] sm:$0xff] }
 0x285   : > { %v1688_v21 = vmul.f32 %v1640_v62, %v1640_v62  ;;  %v1736_v22 = vadd.f32 %v1720_v14, %v1640_v62  ;;  %v1689_v26 = vmul.f32 %v1641_v19, %v1641_v19  ;;  %v1737_v27 = vadd.f32 %v1721_v63, %v1641_v19  ;;  %v1629_v39 = vld [vmem:[#allocation3 + $0x60] sm:$0xff]  ;;  %v1724_v45 = vld [vmem:[%s3195_s2 + $0x58] sm:$0xff]  ;;  %v1630_v54 = vld [vmem:[#allocation3 + $0x68] sm:$0xff] }
 0x286   : > { %v1768_v25 = vadd.f32 1e-05, %v1703_v17  ;;  %v1642_v28 = vmul.f32 0.125, %v1626_v0  ;;  %2508 = vrsqrt.f32 %v1767_v20  ;;  %v1674_v32 = vmul.f32 0.125, %v1658_v1  ;;  %v1661_v40 = vld [vmem:[#allocation4 + $0x60] sm:$0xff]  ;;  %v1662_v5 = vld [vmem:[#allocation4 + $0x68] sm:$0xff] }
 0x287   : > { %v1704_v31 = vsub.f32 %v1672_v18, %v1688_v21  ;;  %1753 = vst.msk [vmem:[%s2763_s12 + $0x38] sm:$0xff] %vm1745_vm2, %v1736_v22  ;;  %v1643_v33 = vmul.f32 0.125, %v1627_v2  ;;  %v1705_v36 = vsub.f32 %v1673_v23, %v1689_v26  ;;  %1754 = vst.msk [vmem:[%s2763_s12 + $0x40] sm:$0xff] %vm1745_vm2, %v1737_v27  ;;  %v1675_v42 = vmul.f32 0.125, %v1659_v29  ;;  %v1725_v51 = vld [vmem:[%s3195_s2 + $0x60] sm:$0xff]  ;;  %v1631_v6 = vld [vmem:[#allocation3 + $0x70] sm:$0xff] }
 0x288   : > { %2510 = vrsqrt.f32 %v1768_v25  ;;  %v1690_v37 = vmul.f32 %v1642_v28, %v1642_v28  ;;  %v1738_v38 = vadd.f32 %v1722_v24, %v1642_v28  ;;  %v1644_v53 = vmul.f32 0.125, %v1628_v34  ;;  %v1726_v9 = vld [vmem:[%s3195_s2 + $0x68] sm:$0xff]  ;;  %v1663_v12 = vld [vmem:[#allocation4 + $0x70] sm:$0xff]  ;;  %v1632_v61 = vld [vmem:[#allocation3 + $0x78] sm:$0xff] }
 0x289   : > { %v1769_v41 = vadd.f32 1e-05, %v1704_v31  ;;  %v1691_v43 = vmul.f32 %v1643_v33, %v1643_v33  ;;  %v1739_v44 = vadd.f32 %v1723_v30, %v1643_v33  ;;  %v1770_v47 = vadd.f32 1e-05, %v1705_v36  ;;  %v1727_v13 = vld [vmem:[%s3195_s2 + $0x70] sm:$0xff]  ;;  %v1664_v62 = vld [vmem:[#allocation4 + $0x78] sm:$0xff] }
 0x28a   : > { %v2499_v46 = vpop.eup %2498  ;;  %v1706_v48 = vsub.f32 %v1674_v32, %v1690_v37  ;;  %1755 = vst.msk [vmem:[%s2763_s12 + $0x48] sm:$0xff] %vm1745_vm2, %v1738_v38  ;;  %v1676_v49 = vmul.f32 0.125, %v1660_v35  ;;  %v1645_v52 = vmul.f32 0.125, %v1629_v39  ;;  %v1677_v4 = vmul.f32 0.125, %v1661_v40  ;;  %v1728_v20 = vld [vmem:[%s3195_s2 + $0x78] sm:$0xff] }
 0x28b   : > { %v2501_v50 = vpop.eup %2500  ;;  %1794 = vst.msk [vmem:[%s2768_s13] sm:$0xff] %vm1745_vm2, %v2499_v46  ;;  %2512 = vrsqrt.f32 %v1769_v41  ;;  %v1707_v3 = vsub.f32 %v1675_v42, %v1691_v43  ;;  %1756 = vst.msk [vmem:[%s2763_s12 + $0x50] sm:$0xff] %vm1745_vm2, %v1739_v44  ;;  %v1692_v7 = vmul.f32 %v1644_v53, %v1644_v53  ;;  %v1740_v8 = vadd.f32 %v1724_v45, %v1644_v53 }
 0x28c   : > { %v2503_v56 = vpop.eup %2502  ;;  %1795 = vst.msk [vmem:[%s2768_s13 + $0x8] sm:$0xff] %vm1745_vm2, %v2501_v50  ;;  %2514 = vrsqrt.f32 %v1770_v47  ;;  %v1771_v55 = vadd.f32 1e-05, %v1706_v48  ;;  %v1693_v10 = vmul.f32 %v1645_v52, %v1645_v52  ;;  %v1741_v11 = vadd.f32 %v1725_v51, %v1645_v52 }
 0x28d   : > { %v2505_v58 = vpop.eup %2504  ;;  %1796 = vst.msk [vmem:[%s2768_s13 + $0x10] sm:$0xff] %vm1745_vm2, %v2503_v56  ;;  %v1772_v57 = vadd.f32 1e-05, %v1707_v3  ;;  %v1646_v59 = vmul.f32 0.125, %v1630_v54  ;;  %v1708_v14 = vsub.f32 %v1676_v49, %v1692_v7  ;;  %1757 = vst.msk [vmem:[%s2763_s12 + $0x58] sm:$0xff] %vm1745_vm2, %v1740_v8  ;;  %v1678_v15 = vmul.f32 0.125, %v1662_v5 }
 0x28e   : > { %v2507_v60 = vpop.eup %2506  ;;  %1797 = vst.msk [vmem:[%s2768_s13 + $0x18] sm:$0xff] %vm1745_vm2, %v2505_v58  ;;  %2516 = vrsqrt.f32 %v1771_v55  ;;  %v1647_v16 = vmul.f32 0.125, %v1631_v6  ;;  %v1709_v63 = vsub.f32 %v1677_v4, %v1693_v10  ;;  %1758 = vst.msk [vmem:[%s2763_s12 + $0x60] sm:$0xff] %vm1745_vm2, %v1741_v11  ;;  %v1679_v19 = vmul.f32 0.125, %v1663_v12 }
 0x28f   : > { %1798 = vst.msk [vmem:[%s2768_s13 + $0x20] sm:$0xff] %vm1745_vm2, %v2507_v60  ;;  %2518 = vrsqrt.f32 %v1772_v57  ;;  %v1694_v0 = vmul.f32 %v1646_v59, %v1646_v59  ;;  %v1742_v17 = vadd.f32 %v1726_v9, %v1646_v59  ;;  %v1773_v18 = vadd.f32 1e-05, %v1708_v14 }
 0x290   : > { %v1695_v1 = vmul.f32 %v1647_v16, %v1647_v16  ;;  %v1743_v2 = vadd.f32 %v1727_v13, %v1647_v16  ;;  %v2509_v21 = vpop.eup %2508  ;;  %v1774_v22 = vadd.f32 1e-05, %v1709_v63  ;;  %v1648_v24 = vmul.f32 0.125, %v1632_v61 }
 0x291   : > { %v1710_v23 = vsub.f32 %v1678_v15, %v1694_v0  ;;  %1759 = vst.msk [vmem:[%s2763_s12 + $0x68] sm:$0xff] %vm1745_vm2, %v1742_v17  ;;  %v1680_v25 = vmul.f32 0.125, %v1664_v62  ;;  %1799 = vst.msk [vmem:[%s2768_s13 + $0x28] sm:$0xff] %vm1745_vm2, %v2509_v21  ;;  %2520 = vrsqrt.f32 %v1773_v18 }
 0x292   : > { %v2511_v26 = vpop.eup %2510  ;;  %v1711_v27 = vsub.f32 %v1679_v19, %v1695_v1  ;;  %1760 = vst.msk [vmem:[%s2763_s12 + $0x70] sm:$0xff] %vm1745_vm2, %v1743_v2  ;;  %2522 = vrsqrt.f32 %v1774_v22  ;;  %v1696_v29 = vmul.f32 %v1648_v24, %v1648_v24  ;;  %v1744_v30 = vadd.f32 %v1728_v20, %v1648_v24 }
 0x293   : > { %1800 = vst.msk [vmem:[%s2768_s13 + $0x30] sm:$0xff] %vm1745_vm2, %v2511_v26  ;;  %v1775_v28 = vadd.f32 1e-05, %v1710_v23 }
 0x294   : > { %v1776_v31 = vadd.f32 1e-05, %v1711_v27  ;;  %v1712_v33 = vsub.f32 %v1680_v25, %v1696_v29  ;;  %1761 = vst.msk [vmem:[%s2763_s12 + $0x78] sm:$0xff] %vm1745_vm2, %v1744_v30 }
 0x295   : > { %v2513_v32 = vpop.eup %2512  ;;  %2524 = vrsqrt.f32 %v1775_v28 }
 0x296   : > { %v2515_v34 = vpop.eup %2514  ;;  %1801 = vst.msk [vmem:[%s2768_s13 + $0x38] sm:$0xff] %vm1745_vm2, %v2513_v32  ;;  %2526 = vrsqrt.f32 %v1776_v31  ;;  %v1777_v35 = vadd.f32 1e-05, %v1712_v33 }
 0x297   : > { %1802 = vst.msk [vmem:[%s2768_s13 + $0x40] sm:$0xff] %vm1745_vm2, %v2515_v34 }
 0x298   : > { %v2517_v36 = vpop.eup %2516  ;;  %2528 = vrsqrt.f32 %v1777_v35 }
 0x299   : > { %v2519_v37 = vpop.eup %2518  ;;  %1803 = vst.msk [vmem:[%s2768_s13 + $0x48] sm:$0xff] %vm1745_vm2, %v2517_v36 }
 0x29a   : > { %1804 = vst.msk [vmem:[%s2768_s13 + $0x50] sm:$0xff] %vm1745_vm2, %v2519_v37 }
 0x29b   : > { %v2521_v38 = vpop.eup %2520 }
 0x29c   : > { %v2523_v39 = vpop.eup %2522  ;;  %1805 = vst.msk [vmem:[%s2768_s13 + $0x58] sm:$0xff] %vm1745_vm2, %v2521_v38 }
 0x29d   : > { %1806 = vst.msk [vmem:[%s2768_s13 + $0x60] sm:$0xff] %vm1745_vm2, %v2523_v39 }
 0x29f   : > { %v2525_v40 = vpop.eup %2524 }
 0x2a0   : > { %v2527_v41 = vpop.eup %2526  ;;  %1807 = vst.msk [vmem:[%s2768_s13 + $0x68] sm:$0xff] %vm1745_vm2, %v2525_v40 }
 0x2a1   : > { %1808 = vst.msk [vmem:[%s2768_s13 + $0x70] sm:$0xff] %vm1745_vm2, %v2527_v41 }
 0x2a2   : > { %v2529_v42 = vpop.eup %2528 }
 0x2a3   : > { %1809 = vst.msk [vmem:[%s2768_s13 + $0x78] sm:$0xff] %vm1745_vm2, %v2529_v42 }
 0x2a4 PF: > { %s16_s24 = sadd.s32 1, %s2584_s24   ;;  %s3202_s12 = sld [smem:[#allocation6_spill]] }
 0x2a5   : > { %p13_p2 = scmp.ge.s32.totalorder %s16_s24, 10   ;;  %s3203_s18 = smov %s2564_s19 }
 0x2a6   : > { %s3204_s19 = smov %s2668_s29  ;;  %s3205_s20 = smov %s2576_s22 }
 0x2a7   : > { %s3206_s21 = smov %s2580_s23  ;;  %s3207_s22 = smov %s3210_s25 }
 0x2a8   :  { %15 = sbr.rel (!%p13_p2) target bundleno = 6 (0x6), region = 136 }
 0x2aa   : > { %s3208_s23 = smov %s3202_s12 }

// kernel: gnet_forward.18
= control target key start
LH: loop header
LB: loop body
LE: loop exit
PB: predicated region body
PF: predicated region fallthrough
CT: control target
= control target key end

     0   :  { %s707_s12 = smov 0   ;;  %s709_s13 = smov 0   ;;  %s750_s0 = inlined_call_operand.vmem [shape: bf16[2,48,128], index: 0, kind: input, shape index: {}]   ;;  %s751_s1 = inlined_call_operand.vmem [shape: f32[2,48,1], index: 1, kind: input, shape index: {}]   ;;  %s752_s2 = inlined_call_operand.vmem [shape: f32[2,48,1], index: 2, kind: input, shape index: {}]   ;;  %s753_s3 = inlined_call_operand.vmem [shape: bf16[2,48,128], index: 3, kind: output, shape index: {}]  }
   0x1   :  { %s711_s14 = smov 0  }
   0x2 LB: > { %s32_s15 = sadd.s32 1, %s680_s13  ;;  %p583_p0 = scmp.ge.s32.totalorder %s684_s14, 1  ;;  %s684_s14 = sphi %s711_s14, %s13_s14   ;;  %s680_s13 = sphi %s709_s13, %s755_s13   ;;  %s676_s12 = sphi %s707_s12, %s754_s12  }
   0x3   : > { %p34_p1 = scmp.ge.s32.totalorder %s32_s15, 2  ;;  %p206_p2 = scmp.lt.s32.totalorder %s684_s14, 3 }
   0x5   : > { %s757_s15 = smov (%p34_p1, %s32_s15), 0  ;;  %p207_p3 = pnand %p583_p0, %p206_p2 }
   0x6   : > { %p263_p4 = scmp.lt.s32.totalorder (!%p207_p3), %s676_s12, 1  ;;  %v686_v0 = vmov (!%p207_p3), 0  }
   0x7   : > { %210 = sbr.rel (%p207_p3) target bundleno = 174 (0xae), region = 32  ;;  %661 = vset.pattern.permute.xlu1 (!%p207_p3), %v686_v0  ;;  %660 = vset.pattern.permute.xlu0 (!%p207_p3), %v686_v0 }
   0xe   : > { %s759_s12 = smov (!%p263_p4, %s676_s12), 1 }
   0xf   : > { %s634_s16 = smul.u32 48, %s759_s12 }
  0x10   : > { %s633_s23 = smul.u32 24, %s759_s12 }
  0x11   : > { %s283_s19 = scalar_lea.vmem %s751_s1, %s634_s16  ;;  %s293_s22 = scalar_lea.vmem %s752_s2, %s634_s16 }
  0x12   : > { %v322_v1 = vld [vmem:[%s283_s19 + $0x10] sm:$0xff]  ;;  %v320_v2 = vld [vmem:[%s283_s19] sm:$0xff]  ;;  %v323_v3 = vld [vmem:[%s283_s19 + $0x18] sm:$0xff]  ;;  %s273_s26 = scalar_lea.vmem %s750_s0, %s633_s23  ;;  %s306_s29 = scalar_lea.vmem %s753_s3, %s633_s23 }
  0x13   : > { %338 = vperm.xlu1 %661, %v322_v1   ;;  %328 = vperm.xlu0 %660, %v320_v2   ;;  %v321_v4 = vld [vmem:[%s283_s19 + $0x8] sm:$0xff]  ;;  %v324_v6 = vld [vmem:[%s283_s19 + $0x20] sm:$0xff]  ;;  %v365_v9 = vld [vmem:[%s293_s22 + $0x18] sm:$0xff] }
  0x14   : > { %v325_v5 = vld [vmem:[%s283_s19 + $0x28] sm:$0xff]  ;;  %v362_v8 = vld [vmem:[%s293_s22] sm:$0xff]  ;;  %v364_v10 = vld [vmem:[%s293_s22 + $0x10] sm:$0xff] }
  0x15   : > { %v363_v7 = vld [vmem:[%s293_s22 + $0x8] sm:$0xff]  ;;  %v366_v12 = vld [vmem:[%s293_s22 + $0x20] sm:$0xff]  ;;  %v630_v27 = vld [vmem:[%s273_s26 + $0x10] sm:$0xff]  }
  0x16   : > { %v367_v11 = vld [vmem:[%s293_s22 + $0x28] sm:$0xff]  ;;  %v603_v15 = vld [vmem:[%s273_s26] sm:$0xff]   ;;  %v613_v32 = vunpack.c.h.bf16 %v630_v27  ;;  %v612_v33 = vunpack.c.l.bf16 %v630_v27 }
  0x17   : > { %343 = vperm.xlu1 %661, %v323_v3   ;;  %333 = vperm.xlu0 %660, %v321_v4   ;;  %v604_v18 = vunpack.c.l.bf16 %v603_v15  ;;  %v605_v19 = vunpack.c.h.bf16 %v603_v15  ;;  %v629_v20 = vld [vmem:[%s273_s26 + $0x8] sm:$0xff]  }
  0x18   : > { %v608_v23 = vunpack.c.l.bf16 %v629_v20  ;;  %v609_v25 = vunpack.c.h.bf16 %v629_v20 }
  0x1b   : > { %353 = vperm.xlu1 %661, %v325_v5   ;;  %348 = vperm.xlu0 %660, %v324_v6  }
  0x1f   : > { %375 = vperm.xlu1 %661, %v363_v7   ;;  %370 = vperm.xlu0 %660, %v362_v8  }
  0x23   : > { %385 = vperm.xlu1 %661, %v365_v9   ;;  %380 = vperm.xlu0 %660, %v364_v10  }
  0x27   : > { %395 = vperm.xlu1 %661, %v367_v11   ;;  %390 = vperm.xlu0 %660, %v366_v12  }
  0x92   : > { %v339_v13 = vpop.permute.xlu1 %338  ;;  %v329_v14 = vpop.permute.xlu0 %328 }
  0x93   : > { %v356_v24 = vsub.f32 %v604_v18, %v329_v14  ;;  %v358_v34 = vsub.f32 %v608_v23, %v339_v13 }
  0x96   : > { %v344_v16 = vpop.permute.xlu1 %343  ;;  %v334_v17 = vpop.permute.xlu0 %333 }
  0x97   : > { %v357_v26 = vsub.f32 %v605_v19, %v334_v17  ;;  %v359_v35 = vsub.f32 %v609_v25, %v344_v16 }
  0x9a   : > { %v354_v21 = vpop.permute.xlu1 %353  ;;  %v349_v22 = vpop.permute.xlu0 %348 }
  0x9b   : > { %v361_v43 = vsub.f32 %v613_v32, %v354_v21  ;;  %v360_v44 = vsub.f32 %v612_v33, %v349_v22 }
  0x9e   : > { %v376_v28 = vpop.permute.xlu1 %375  ;;  %v371_v29 = vpop.permute.xlu0 %370 }
  0x9f   : > { %v399_v30 = vmul.f32 %v376_v28, %v357_v26  ;;  %v398_v31 = vmul.f32 %v371_v29, %v356_v24 }
  0xa1   : > { %v405_v36 = vmax.f32 %v399_v30, 0.0  ;;  %v404_v37 = vmax.f32 %v398_v31, 0.0 }
  0xa2   : > { %v386_v38 = vpop.permute.xlu1 %385  ;;  %v381_v39 = vpop.permute.xlu0 %380 }
  0xa3   : > { %v617_v40 = vpack.c.bf16 %v405_v36, %v404_v37  ;;  %v401_v41 = vmul.f32 %v386_v38, %v359_v35  ;;  %v400_v42 = vmul.f32 %v381_v39, %v358_v34 }
  0xa5   : > { %618 = vst [vmem:[%s306_s29] sm:$0xff] %v617_v40   ;;  %v407_v45 = vmax.f32 %v401_v41, 0.0  ;;  %v406_v46 = vmax.f32 %v400_v42, 0.0 }
  0xa6   : > { %v396_v47 = vpop.permute.xlu1 %395  ;;  %v391_v48 = vpop.permute.xlu0 %390 }
  0xa7   : > { %v622_v49 = vpack.c.bf16 %v407_v45, %v406_v46  ;;  %v403_v50 = vmul.f32 %v396_v47, %v361_v43  ;;  %v402_v51 = vmul.f32 %v391_v48, %v360_v44 }
  0xa9   : > { %631 = vst [vmem:[%s306_s29 + $0x8] sm:$0xff] %v622_v49   ;;  %v409_v52 = vmax.f32 %v403_v50, 0.0  ;;  %v408_v53 = vmax.f32 %v402_v51, 0.0 }
  0xab   : > { %v627_v54 = vpack.c.bf16 %v409_v52, %v408_v53 }
  0xad   : > { %632 = vst [vmem:[%s306_s29 + $0x10] sm:$0xff] %v627_v54  }
  0xae PF: > { %s13_s14 = sadd.s32 1, %s684_s14   ;;  %s754_s12 = smov %s680_s13 }
  0xaf   : > { %p10_p5 = scmp.ge.s32.totalorder %s13_s14, 4   ;;  %s755_s13 = smov %s757_s15 }
  0xb1   :  { %12 = sbr.rel (!%p10_p5) target bundleno = 2 (0x2), region = 68 }

// kernel: gnet_forward.17
= control target key start
LH: loop header
LB: loop body
LE: loop exit
PB: predicated region body
PF: predicated region fallthrough
CT: control target
= control target key end

     0   :  { %s1274_s18 = smov 0   ;;  %s1276_s19 = smov 0   ;;  %s1498_s0 = inlined_call_operand.vmem [shape: bf16[48,128], index: 0, kind: input, shape index: {}]   ;;  %s1499_s1 = inlined_call_operand.vmem [shape: bf16[2,128,128], index: 1, kind: input, shape index: {}]   ;;  %s1500_s2 = inlined_call_operand.vmem [shape: f32[48,1], index: 2, kind: input, shape index: {}]   ;;  %s1501_s3 = inlined_call_operand.vmem [shape: bf16[2,48,128], index: 3, kind: output, shape index: {0}]   ;;  %s1502_s4 = inlined_call_operand.vmem [shape: f32[2,48,1], index: 4, kind: output, shape index: {1}]   ;;  %s1503_s5 = inlined_call_operand.vmem [shape: f32[2,48,1], index: 5, kind: output, shape index: {2}]  }
   0x1   :  { %s1278_s20 = smov 0  }
   0x2 LB: > { %s42_s21 = sadd.s32 1, %s1235_s19  ;;  %p1059_p0 = scmp.ge.s32.totalorder %s1239_s20, 1  ;;  %s1239_s20 = sphi %s1278_s20, %s16_s20   ;;  %s1235_s19 = sphi %s1276_s19, %s1505_s19   ;;  %s1231_s18 = sphi %s1274_s18, %s1504_s18  }
   0x3   : > { %p44_p1 = scmp.ge.s32.totalorder %s42_s21, 2  ;;  %p265_p2 = scmp.lt.s32.totalorder %s1239_s20, 3 }
   0x5   : > { %s1507_s21 = smov (%p44_p1, %s42_s21), 0  ;;  %p266_p3 = pnand %p1059_p0, %p265_p2 }
   0x6   : > { %p348_p4 = scmp.lt.s32.totalorder (!%p266_p3), %s1231_s18, 1  ;;  %v1241_v0 = vmov (!%p266_p3), 0.0   ;;  %vm1242_vm0 = vmmov (!%p266_p3), 0   ;;  %v1202_v9 = vld [vmem:[%s1498_s0] sm:$0xff] (!%p266_p3)   ;;  %v1203_v10 = vld [vmem:[%s1498_s0 + $0x8] sm:$0xff] (!%p266_p3)   ;;  %v1204_v11 = vld [vmem:[%s1498_s0 + $0x10] sm:$0xff] (!%p266_p3)  }
   0x7   : > { %269 = sbr.rel (%p266_p3) target bundleno = 512 (0x200), region = 32  ;;  %1119 = vmatprep.subr.bf16.mxu0 (!%p266_p3), %v1241_v0  ;;  %1147 = vmatprep.subr.bf16.mxu1 (!%p266_p3), %v1241_v0  ;;  %v1243_v12 = vmov (!%p266_p3), 0   ;;  %vm415_vm1 = vcmask (!%p266_p3), 7168   ;;  %v1394_v30 = vld [vmem:[%s1500_s2 + $0x8] sm:$0xff] (!%p266_p3)  ;;  %v669_v31 = vld [vmem:[%s1500_s2 + $0x10] sm:$0xff] (!%p266_p3)  ;;  %v670_v32 = vld [vmem:[%s1500_s2 + $0x18] sm:$0xff] (!%p266_p3) }
   0x8   : > { %1135 = vmatprep.mubr.msk.bf16.mxu0 (!%p266_p3), %vm1242_vm0, %v1241_v0  ;;  %1139 = vmatprep.mubr.msk.bf16.mxu1 (!%p266_p3), %vm1242_vm0, %v1241_v0  ;;  %418 = vst.msk [vmem:[#allocation3 + $0x10] sm:$0xff] (!%p266_p3), %vm415_vm1, %v1241_v0  ;;  %416 = vst.msk [vmem:[#allocation3] sm:$0xff] (!%p266_p3), %vm415_vm1, %v1241_v0  ;;  %v667_v33 = vld [vmem:[%s1500_s2] sm:$0xff] (!%p266_p3)  ;;  %v1417_v36 = vld [vmem:[%s1500_s2 + $0x28] sm:$0xff] (!%p266_p3) }
   0x9   : > { %1193 = vset.pattern.permute.xlu1 (!%p266_p3), %v1243_v12  ;;  %1192 = vset.pattern.permute.xlu0 (!%p266_p3), %v1243_v12  ;;  %417 = vst.msk [vmem:[#allocation3 + $0x8] sm:$0xff] (!%p266_p3), %vm415_vm1, %v1241_v0  ;;  %419 = vst.msk [vmem:[#allocation3 + $0x18] sm:$0xff] (!%p266_p3), %vm415_vm1, %v1241_v0  ;;  %v1409_v34 = vld [vmem:[%s1500_s2 + $0x20] sm:$0xff] (!%p266_p3) }
   0xa   : > { %420 = vst.msk [vmem:[#allocation3 + $0x20] sm:$0xff] (!%p266_p3), %vm415_vm1, %v1241_v0  ;;  %421 = vst.msk [vmem:[#allocation3 + $0x28] sm:$0xff] (!%p266_p3), %vm415_vm1, %v1241_v0 }
   0xb   : > { %422 = vst.msk [vmem:[#allocation4] sm:$0xff] (!%p266_p3), %vm415_vm1, %v1241_v0  ;;  %423 = vst.msk [vmem:[#allocation4 + $0x8] sm:$0xff] (!%p266_p3), %vm415_vm1, %v1241_v0 }
   0xc   : > { %424 = vst.msk [vmem:[#allocation4 + $0x10] sm:$0xff] (!%p266_p3), %vm415_vm1, %v1241_v0  ;;  %425 = vst.msk [vmem:[#allocation4 + $0x18] sm:$0xff] (!%p266_p3), %vm415_vm1, %v1241_v0 }
   0xd   : > { %426 = vst.msk [vmem:[#allocation4 + $0x20] sm:$0xff] (!%p266_p3), %vm415_vm1, %v1241_v0  ;;  %427 = vst.msk [vmem:[#allocation4 + $0x28] sm:$0xff] (!%p266_p3), %vm415_vm1, %v1241_v0 }
   0xe   : > { %s1509_s18 = smov (!%p348_p4, %s1231_s18), 1 }
   0xf   : > { %s1084_s22 = sshll.u32 %s1509_s18, 6  ;;  %v602_v37 = vld [vmem:[#allocation3 + $0x10] sm:$0xff]  ;;  %v600_v38 = vld [vmem:[#allocation3] sm:$0xff]  ;;  %s1164_s23 = smul.u32 48, %s1509_s18 }
  0x10   : > { %s1304_s25 = scalar_lea.vmem %s1499_s1, %s1084_s22  ;;  %v603_v43 = vld [vmem:[#allocation3 + $0x18] sm:$0xff]  ;;  %v601_v44 = vld [vmem:[#allocation3 + $0x8] sm:$0xff]  ;;  %s1163_s27 = smul.u32 24, %s1509_s18 }
  0x11   : > { %v1194_v1 = vld [vmem:[%s1304_s25] sm:$0xff]   ;;  %v1195_v2 = vld [vmem:[%s1304_s25 + $0x8] sm:$0xff]   ;;  %v1196_v3 = vld [vmem:[%s1304_s25 + $0x10] sm:$0xff]   ;;  %s1432_s26 = scalar_lea.vmem %s1502_s4, %s1164_s23  ;;  %s1467_s8 = scalar_lea.vmem %s1503_s5, %s1164_s23 }
  0x12   : > { %1120 = vmatpush3.bf16.msra.mxu0 %v1194_v1  ;;  %1155 = vmatpush3.bf16.msra.mxu1 %v1194_v1  ;;  %v1197_v4 = vld [vmem:[%s1304_s25 + $0x18] sm:$0xff]   ;;  %v1198_v5 = vld [vmem:[%s1304_s25 + $0x20] sm:$0xff]   ;;  %v1199_v6 = vld [vmem:[%s1304_s25 + $0x28] sm:$0xff]   ;;  %s1457_s30 = scalar_lea.vmem %s1501_s3, %s1163_s27 }
  0x13   : > { %1121 = vmatprep.subr.bf16.mxu0 %v1241_v0  ;;  %1148 = vmatprep.subr.bf16.mxu1 %v1241_v0  ;;  %v1200_v7 = vld [vmem:[%s1304_s25 + $0x30] sm:$0xff]   ;;  %v1201_v8 = vld [vmem:[%s1304_s25 + $0x38] sm:$0xff]   ;;  %v633_v59 = vld [vmem:[#allocation4 + $0x10] sm:$0xff] }
  0x14   : > { %v631_v49 = vld [vmem:[#allocation4] sm:$0xff]  ;;  %v632_v50 = vld [vmem:[#allocation4 + $0x8] sm:$0xff]  ;;  %v634_v60 = vld [vmem:[#allocation4 + $0x18] sm:$0xff] }
  0x16   : > { %1122 = vmatpush3.bf16.msra.mxu0 %v1195_v2  ;;  %1156 = vmatpush3.bf16.msra.mxu1 %v1195_v2 }
  0x17   : > { %1123 = vmatprep.subr.bf16.mxu0 %v1241_v0  ;;  %1149 = vmatprep.subr.bf16.mxu1 %v1241_v0 }
  0x1a   : > { %1124 = vmatpush3.bf16.msra.mxu0 %v1196_v3  ;;  %1157 = vmatpush3.bf16.msra.mxu1 %v1196_v3 }
  0x1b   : > { %1125 = vmatprep.subr.bf16.mxu0 %v1241_v0  ;;  %1150 = vmatprep.subr.bf16.mxu1 %v1241_v0 }
  0x1e   : > { %1126 = vmatpush3.bf16.msra.mxu0 %v1197_v4  ;;  %1158 = vmatpush3.bf16.msra.mxu1 %v1197_v4 }
  0x1f   : > { %1127 = vmatprep.subr.bf16.mxu0 %v1241_v0  ;;  %1151 = vmatprep.subr.bf16.mxu1 %v1241_v0 }
  0x22   : > { %1128 = vmatpush3.bf16.msra.mxu0 %v1198_v5  ;;  %1159 = vmatpush3.bf16.msra.mxu1 %v1198_v5 }
  0x23   : > { %1129 = vmatprep.subr.bf16.mxu0 %v1241_v0  ;;  %1152 = vmatprep.subr.bf16.mxu1 %v1241_v0 }
  0x26   : > { %1130 = vmatpush3.bf16.msra.mxu0 %v1199_v6  ;;  %1160 = vmatpush3.bf16.msra.mxu1 %v1199_v6 }
  0x27   : > { %1131 = vmatprep.subr.bf16.mxu0 %v1241_v0  ;;  %1153 = vmatprep.subr.bf16.mxu1 %v1241_v0 }
  0x2a   : > { %1132 = vmatpush3.bf16.msra.mxu0 %v1200_v7  ;;  %1161 = vmatpush3.bf16.msra.mxu1 %v1200_v7  ;;  %v604_v7 = vld [vmem:[#allocation3 + $0x20] sm:$0xff] }
  0x2b   : > { %1133 = vmatprep.subr.bf16.mxu0 %v1241_v0  ;;  %1154 = vmatprep.subr.bf16.mxu1 %v1241_v0 }
  0x2e   : > { %1134 = vmatpush3.bf16.msra.mxu0 %v1201_v8  ;;  %1162 = vmatpush3.bf16.msra.mxu1 %v1201_v8  ;;  %v605_v8 = vld [vmem:[#allocation3 + $0x28] sm:$0xff] }
  0x31   : > { %1136 = vmatmul.mubr.bf16.vlgmr.msra.gmra.mrb[0].mxu0 %v1202_v9  ;;  %1140 = vmatmul.mubr.bf16.vlgmr.msra.gmra.mrb[0].mxu1 %v1203_v10 }
  0x32   : > { %1143 = vmatprep.mubr.msk.bf16.mxu1 %vm1242_vm0, %v1241_v0 }
  0x39   : > { %1144 = vmatmul.mubr.bf16.gmra.mrb[4].mxu1 %v1204_v11 }
 0x104   : > { %v1363_v13 = vpop.f32.mrb[0].mxu0  ;;  %v1365_v14 = vpop.f32.mrb[0].mxu1 }
 0x105   : > { %610 = vadd.xlane.f32.xlu1 %v1365_v14  ;;  %v1141_v15 = vpop.f32.mrb[1].mxu1  ;;  %606 = vadd.xlane.f32.xlu0 %v1363_v13  ;;  %v1137_v16 = vpop.f32.mrb[1].mxu0  ;;  %v637_v21 = vmul.f32 %v1363_v13, %v1363_v13  ;;  %v639_v26 = vmul.f32 %v1365_v14, %v1365_v14 }
 0x106   : > { %v1369_v17 = vpop.f32.mrb[2].mxu1  ;;  %v1371_v18 = vpop.f32.mrb[2].mxu0 }
 0x107   : > { %v1142_v19 = vpop.f32.mrb[3].mxu1  ;;  %v1138_v20 = vpop.f32.mrb[3].mxu0  ;;  %v638_v22 = vmul.f32 %v1371_v18, %v1371_v18  ;;  %v640_v27 = vmul.f32 %v1369_v17, %v1369_v17 }
 0x109   : > { %612 = vadd.xlane.f32.xlu1 %v1369_v17  ;;  %608 = vadd.xlane.f32.xlu0 %v1371_v18 }
 0x10c   : > { %v1379_v23 = vpop.f32.mrb[4].mxu1 }
 0x10d   : > { %643 = vadd.xlane.f32.xlu0 %v637_v21  ;;  %645 = vadd.xlane.f32.xlu1 %v638_v22  ;;  %v1145_v24 = vpop.f32.mrb[5].mxu1  ;;  %v641_v29 = vmul.f32 %v1379_v23, %v1379_v23  ;;  %v635_v21 = vld [vmem:[#allocation4 + $0x20] sm:$0xff] }
 0x10e   : > { %v1381_v25 = vpop.f32.mrb[6].mxu1 }
 0x10f   : > { %v1146_v28 = vpop.f32.mrb[7].mxu1  ;;  %v642_v35 = vmul.f32 %v1381_v25, %v1381_v25 }
 0x111   : > { %647 = vadd.xlane.f32.xlu0 %v639_v26  ;;  %649 = vadd.xlane.f32.xlu1 %v640_v27 }
 0x115   : > { %614 = vadd.xlane.f32.xlu0 %v1379_v23  ;;  %616 = vadd.xlane.f32.xlu1 %v1381_v25 }
 0x119   : > { %651 = vadd.xlane.f32.xlu0 %v641_v29 }
 0x126   : > { %680 = vperm.xlu1 %1193, %v1394_v30  }
 0x12a   : > { %685 = vperm.xlu1 %1193, %v669_v31  }
 0x12e   : > { %690 = vperm.xlu1 %1193, %v670_v32  }
 0x12f   : > { %675 = vperm.xlu0 %1192, %v667_v33  }
 0x132   : > { %695 = vperm.xlu1 %1193, %v1409_v34  }
 0x156   : > { %653 = vadd.xlane.f32.xlu1 %v642_v35 }
 0x167   : > { %700 = vperm.xlu1 %1193, %v1417_v36  }
 0x192   : > { %v611_v39 = vpop.xlane.xlu1 %610  ;;  %v607_v40 = vpop.xlane.xlu0 %606 }
 0x193   : > { %v620_v41 = vadd.f32 %v611_v39, %v602_v37  ;;  %v618_v42 = vadd.f32 %v607_v40, %v600_v38 }
 0x195   : > { %627 = vst.msk [vmem:[#allocation3 + $0x10] sm:$0xff] %vm415_vm1, %v620_v41  ;;  %625 = vst.msk [vmem:[#allocation3] sm:$0xff] %vm415_vm1, %v618_v42 }
 0x196   : > { %v613_v45 = vpop.xlane.xlu1 %612  ;;  %v609_v46 = vpop.xlane.xlu0 %608 }
 0x197   : > { %v621_v47 = vadd.f32 %v613_v45, %v603_v43  ;;  %v619_v48 = vadd.f32 %v609_v46, %v601_v44 }
 0x199   : > { %628 = vst.msk [vmem:[#allocation3 + $0x18] sm:$0xff] %vm415_vm1, %v621_v47  ;;  %626 = vst.msk [vmem:[#allocation3 + $0x8] sm:$0xff] %vm415_vm1, %v619_v48 }
 0x19a   : > { %v644_v51 = vpop.xlane.xlu0 %643  ;;  %v646_v52 = vpop.xlane.xlu1 %645 }
 0x19b   : > { %v655_v53 = vadd.f32 %v644_v51, %v631_v49  ;;  %v656_v54 = vadd.f32 %v646_v52, %v632_v50 }
 0x19c   : > { %v743_v55 = vld [vmem:[#allocation3 + $0x10] sm:$0xff]  ;;  %v741_v56 = vld [vmem:[#allocation3] sm:$0xff] }
 0x19d   : > { %v749_v57 = vmul.f32 0.015625, %v743_v55  ;;  %v747_v58 = vmul.f32 0.015625, %v741_v56  ;;  %661 = vst.msk [vmem:[#allocation4] sm:$0xff] %vm415_vm1, %v655_v53  ;;  %662 = vst.msk [vmem:[#allocation4 + $0x8] sm:$0xff] %vm415_vm1, %v656_v54 }
 0x19e   : > { %v648_v61 = vpop.xlane.xlu0 %647  ;;  %v650_v62 = vpop.xlane.xlu1 %649 }
 0x19f   : > { %v785_v63 = vadd.f32 %v749_v57, %v669_v31  ;;  %v783_v0 = vadd.f32 %v747_v58, %v667_v33  ;;  %v657_v3 = vadd.f32 %v648_v61, %v633_v59  ;;  %v658_v4 = vadd.f32 %v650_v62, %v634_v60 }
 0x1a0   : > { %v744_v1 = vld [vmem:[#allocation3 + $0x18] sm:$0xff]  ;;  %v742_v2 = vld [vmem:[#allocation3 + $0x8] sm:$0xff]  ;;  %v765_v22 = vmul.f32 %v747_v58, %v747_v58  ;;  %v767_v39 = vmul.f32 %v749_v57, %v749_v57 }
 0x1a1   : > { %792 = vst.msk [vmem:[%s1432_s26 + $0x10] sm:$0xff] %vm415_vm1, %v785_v63  ;;  %790 = vst.msk [vmem:[%s1432_s26] sm:$0xff] %vm415_vm1, %v783_v0  ;;  %v750_v5 = vmul.f32 0.015625, %v744_v1  ;;  %v748_v6 = vmul.f32 0.015625, %v742_v2 }
 0x1a2   : > { %663 = vst.msk [vmem:[#allocation4 + $0x10] sm:$0xff] %vm415_vm1, %v657_v3  ;;  %664 = vst.msk [vmem:[#allocation4 + $0x18] sm:$0xff] %vm415_vm1, %v658_v4  ;;  %v615_v9 = vpop.xlane.xlu0 %614  ;;  %v617_v10 = vpop.xlane.xlu1 %616  ;;  %v636_v3 = vld [vmem:[#allocation4 + $0x28] sm:$0xff] }
 0x1a3   : > { %v786_v11 = vadd.f32 %v750_v5, %v670_v32  ;;  %v784_v12 = vadd.f32 %v748_v6, %v1394_v30  ;;  %v622_v19 = vadd.f32 %v615_v9, %v604_v7  ;;  %v623_v20 = vadd.f32 %v617_v10, %v605_v8 }
 0x1a4   : > { %v753_v15 = vld [vmem:[#allocation4] sm:$0xff]  ;;  %v754_v16 = vld [vmem:[#allocation4 + $0x8] sm:$0xff]  ;;  %v766_v24 = vmul.f32 %v748_v6, %v748_v6  ;;  %v768_v40 = vmul.f32 %v750_v5, %v750_v5 }
 0x1a5   : > { %793 = vst.msk [vmem:[%s1432_s26 + $0x18] sm:$0xff] %vm415_vm1, %v786_v11  ;;  %791 = vst.msk [vmem:[%s1432_s26 + $0x8] sm:$0xff] %vm415_vm1, %v784_v12  ;;  %v759_v26 = vmul.f32 0.015625, %v753_v15  ;;  %v760_v27 = vmul.f32 0.015625, %v754_v16 }
 0x1a6   : > { %629 = vst.msk [vmem:[#allocation3 + $0x20] sm:$0xff] %vm415_vm1, %v622_v19  ;;  %630 = vst.msk [vmem:[#allocation3 + $0x28] sm:$0xff] %vm415_vm1, %v623_v20  ;;  %v652_v28 = vpop.xlane.xlu0 %651  ;;  %v681_v29 = vpop.permute.xlu1 %680 }
 0x1a7   : > { %v771_v30 = vsub.f32 %v759_v26, %v765_v22  ;;  %v772_v31 = vsub.f32 %v760_v27, %v766_v24  ;;  %v659_v32 = vadd.f32 %v652_v28, %v635_v21  ;;  %v704_v54 = vadd.f32 %v681_v29, %v1371_v18 }
 0x1a9   : > { %v796_v33 = vadd.f32 1e-05, %v771_v30  ;;  %v797_v35 = vadd.f32 1e-05, %v772_v31  ;;  %v755_v37 = vld [vmem:[#allocation4 + $0x10] sm:$0xff]  ;;  %v756_v38 = vld [vmem:[#allocation4 + $0x18] sm:$0xff] }
 0x1aa   : > { %665 = vst.msk [vmem:[#allocation4 + $0x20] sm:$0xff] %vm415_vm1, %v659_v32  ;;  %v761_v41 = vmul.f32 0.015625, %v755_v37  ;;  %v762_v42 = vmul.f32 0.015625, %v756_v38  ;;  %v686_v43 = vpop.permute.xlu1 %685 }
 0x1ab   : > { %1205 = vrsqrt.f32 %v796_v33  ;;  %v705_v60 = vadd.f32 %v686_v43, %v1365_v14 }
 0x1ac   : > { %1207 = vrsqrt.f32 %v797_v35  ;;  %v773_v44 = vsub.f32 %v761_v41, %v767_v39  ;;  %v774_v45 = vsub.f32 %v762_v42, %v768_v40 }
 0x1ad   : > { %v745_v46 = vld [vmem:[#allocation3 + $0x20] sm:$0xff]  ;;  %v746_v47 = vld [vmem:[#allocation3 + $0x28] sm:$0xff] }
 0x1ae   : > { %v798_v48 = vadd.f32 1e-05, %v773_v44  ;;  %v799_v49 = vadd.f32 1e-05, %v774_v45  ;;  %v751_v50 = vmul.f32 0.015625, %v745_v46  ;;  %v752_v51 = vmul.f32 0.015625, %v746_v47  ;;  %v676_v52 = vpop.permute.xlu0 %675  ;;  %v691_v53 = vpop.permute.xlu1 %690 }
 0x1af   : > { %v703_v55 = vadd.f32 %v676_v52, %v1363_v13  ;;  %v706_v56 = vadd.f32 %v691_v53, %v1369_v17 }
 0x1b0   : > { %1209 = vrsqrt.f32 %v798_v48  ;;  %v769_v57 = vmul.f32 %v751_v50, %v751_v50  ;;  %v787_v58 = vadd.f32 %v751_v50, %v1409_v34  ;;  %v788_v18 = vadd.f32 %v752_v51, %v1417_v36 }
 0x1b1   : > { %v757_v59 = vld [vmem:[#allocation4 + $0x20] sm:$0xff]  ;;  %1211 = vrsqrt.f32 %v799_v49  ;;  %v1094_v61 = vpack.c.bf16 %v704_v54, %v703_v55  ;;  %v1099_v17 = vpack.c.bf16 %v706_v56, %v705_v60  ;;  %v770_v11 = vmul.f32 %v752_v51, %v752_v51 }
 0x1b2   : > { %v763_v13 = vmul.f32 0.015625, %v757_v59  ;;  %794 = vst.msk [vmem:[%s1432_s26 + $0x20] sm:$0xff] %vm415_vm1, %v787_v58  ;;  %795 = vst.msk [vmem:[%s1432_s26 + $0x28] sm:$0xff] %vm415_vm1, %v788_v18  ;;  %v696_v2 = vpop.permute.xlu1 %695 }
 0x1b3   : > { %1095 = vst [vmem:[%s1457_s30] sm:$0xff] %v1094_v61   ;;  %1106 = vst [vmem:[%s1457_s30 + $0x8] sm:$0xff] %v1099_v17   ;;  %v707_v7 = vadd.f32 %v696_v2, %v1379_v23 }
 0x1b4   : > { %v775_v14 = vsub.f32 %v763_v13, %v769_v57 }
 0x1b5   : > { %v1206_v34 = vpop.eup %1205 }
 0x1b6   : > { %v800_v36 = vadd.f32 1e-05, %v775_v14  ;;  %v1208_v62 = vpop.eup %1207  ;;  %808 = vst.msk [vmem:[%s1467_s8] sm:$0xff] %vm415_vm1, %v1206_v34 }
 0x1b7   : > { %809 = vst.msk [vmem:[%s1467_s8 + $0x8] sm:$0xff] %vm415_vm1, %v1208_v62 }
 0x1b8   : > { %1213 = vrsqrt.f32 %v800_v36 }
 0x1ba   : > { %v1210_v63 = vpop.eup %1209 }
 0x1bb   : > { %v1212_v0 = vpop.eup %1211  ;;  %810 = vst.msk [vmem:[%s1467_s8 + $0x10] sm:$0xff] %vm415_vm1, %v1210_v63 }
 0x1bc   : > { %811 = vst.msk [vmem:[%s1467_s8 + $0x18] sm:$0xff] %vm415_vm1, %v1212_v0 }
 0x1c2   : > { %v1214_v1 = vpop.eup %1213 }
 0x1c3   : > { %812 = vst.msk [vmem:[%s1467_s8 + $0x20] sm:$0xff] %vm415_vm1, %v1214_v1 }
 0x1e3   : > { %v654_v4 = vpop.xlane.xlu1 %653 }
 0x1e4   : > { %v660_v5 = vadd.f32 %v654_v4, %v636_v3 }
 0x1e6   : > { %666 = vst.msk [vmem:[#allocation4 + $0x28] sm:$0xff] %vm415_vm1, %v660_v5 }
 0x1e7   : > { %v701_v6 = vpop.permute.xlu1 %700 }
 0x1e8   : > { %v708_v8 = vadd.f32 %v701_v6, %v1381_v25 }
 0x1ea   : > { %v1104_v9 = vpack.c.bf16 %v708_v8, %v707_v7 }
 0x1ec   : > { %1107 = vst [vmem:[%s1457_s30 + $0x10] sm:$0xff] %v1104_v9  }
 0x1ed   : > { %v758_v10 = vld [vmem:[#allocation4 + $0x28] sm:$0xff] }
 0x1ee   : > { %v764_v12 = vmul.f32 0.015625, %v758_v10 }
 0x1f0   : > { %v776_v15 = vsub.f32 %v764_v12, %v770_v11 }
 0x1f2   : > { %v801_v16 = vadd.f32 1e-05, %v776_v15 }
 0x1f4   : > { %1215 = vrsqrt.f32 %v801_v16 }
 0x1fe   : > { %v1216_v19 = vpop.eup %1215 }
 0x1ff   : > { %813 = vst.msk [vmem:[%s1467_s8 + $0x28] sm:$0xff] %vm415_vm1, %v1216_v19 }
 0x200 PF: > { %s16_s20 = sadd.s32 1, %s1239_s20   ;;  %s1504_s18 = smov %s1235_s19 }
 0x201   : > { %p13_p5 = scmp.ge.s32.totalorder %s16_s20, 4   ;;  %s1505_s19 = smov %s1507_s21 }
 0x203   :  { %15 = sbr.rel (!%p13_p5) target bundleno = 2 (0x2), region = 108 }

// kernel: gnet_forward.19
= control target key start
LH: loop header
LB: loop body
LE: loop exit
PB: predicated region body
PF: predicated region fallthrough
CT: control target
= control target key end

     0   :  { %s2291_s0 = inlined_call_operand.vmem [shape: bf16[64,5120], index: 0, kind: input, shape index: {}]   ;;  %s2292_s1 = inlined_call_operand.vmem [shape: bf16[2,5120,128], index: 1, kind: input, shape index: {}]   ;;  %s2293_s2 = inlined_call_operand.vmem [shape: f32[64,1], index: 2, kind: input, shape index: {}]   ;;  %s2294_s3 = inlined_call_operand.vmem [shape: bf16[2,64,128], index: 3, kind: output, shape index: {0}]   ;;  %s2295_s4 = inlined_call_operand.vmem [shape: f32[2,64,1], index: 4, kind: output, shape index: {1}]   ;;  %s2296_s5 = inlined_call_operand.vmem [shape: f32[2,64,1], index: 5, kind: output, shape index: {2}]  }
   0x1   :  { %2298 = sst [smem:[#allocation8_spill]] %s2291_s0 }
   0x2   :  { %s1947_s18 = smov 0   ;;  %s1949_s19 = smov 0  }
   0x3   :  { %s1951_s20 = smov 0   ;;  %s1953_s21 = smov 0  }
   0x4   :  { %s1955_s22 = smov 0   ;;  %s1957_s23 = smov 0  }
   0x5   :  { %s1959_s24 = smov 0  }
   0x6 LB: > { %s31_s25 = sadd.s32 1, %s1904_s22  ;;  %s42_s26 = sadd.s32 1, %s1908_s23  ;;  %s1912_s24 = sphi %s1959_s24, %s16_s24   ;;  %s1908_s23 = sphi %s1957_s23, %s2309_s23   ;;  %s1904_s22 = sphi %s1955_s22, %s2308_s22   ;;  %s1900_s21 = sphi %s1953_s21, %s2307_s21   ;;  %s1896_s20 = sphi %s1951_s20, %s2306_s20   ;;  %s1892_s19 = sphi %s1949_s19, %s2305_s19   ;;  %s1888_s18 = sphi %s1947_s18, %s2304_s18  }
   0x7   : > { %p32_p0 = scmp.ge.s32.totalorder %s31_s25, 10  ;;  %s51_s27 = sadd.s32 1, %s1892_s19 }
   0x8   : > { %p58_p1 = scmp.ne.s32.totalorder %s1892_s19, %s1888_s18  ;;  %p59_p2 = scmp.eq.s32.totalorder %s1912_s24, 0 }
   0x9   : > { %s2311_s25 = smov (%p32_p0, %s31_s25), 0  ;;  %s2313_s26 = smov (!%p32_p0, %s42_s26), %s1908_s23 }
   0xa   : > { %2299 = sst [smem:[#allocation6_spill]] %s2311_s25  ;;  %s47_s28 = ssub.s32 %s1904_s22, %s2311_s25 }
   0xb   : > { %p60_p3 = por %p59_p2, %p58_p1  ;;  %p44_p4 = scmp.ge.s32.totalorder %s2313_s26, 2 }
   0xc   : > { %p49_p5 = scmp.eq.s32.totalorder %s47_s28, 0  ;;  %p1531_p6 = scmp.ge.s32.totalorder %s1912_s24, 20 }
   0xd   : > { %s2315_s26 = smov (%p44_p4, %s2313_s26), 0 }
   0xe   : > { %2300 = sst [smem:[#allocation7_spill]] %s2315_s26  ;;  %235 = sbr.rel (%p1531_p6) target bundleno = 39 (0x27), region = 20 }
   0xf   : > { %s1996_s29 = scalar_select %p49_p5, %s1892_s19, %s51_s27  }
  0x15   : > { %238 = sbr.rel (!%p60_p3) target bundleno = 39 (0x27), region = 24  ;;  %s240_s30 = sand.u32 (%p60_p3), 1, %s1892_s19  }
  0x16   : > { %s1607_s6 = sshll.u32 (%p60_p3), %s1904_s22, 4  ;;  %s1532_s7 = sshll.u32 (%p60_p3), %s240_s30, 7 }
  0x17   : > { %s2301_s0 = sld [smem:[#allocation8_spill]] (%p60_p3)  ;;  %s242_s11 = scalar_lea.vmem (%p60_p3), [#allocation5], %s1532_s7 }
  0x1d   : > { %s2004_s10 = scalar_lea.vmem %s2301_s0, %s1607_s6 }
  0x1e   : > { %v261_v0 = vld [vmem:[%s2004_s10] sm:$0xff]  ;;  %v263_v1 = vld [vmem:[%s2004_s10 + $0x8] sm:$0xff] }
  0x1f   : > { %v265_v2 = vld [vmem:[%s2004_s10 + $0xa0] sm:$0xff]  ;;  %262 = vst [vmem:[%s242_s11] sm:$0xff] %v261_v0  ;;  %264 = vst [vmem:[%s242_s11 + $0x8] sm:$0xff] %v263_v1  ;;  %v267_v3 = vld [vmem:[%s2004_s10 + $0xa8] sm:$0xff] }
  0x20   : > { %266 = vst [vmem:[%s242_s11 + $0x10] sm:$0xff] %v265_v2  ;;  %v269_v4 = vld [vmem:[%s2004_s10 + $0x140] sm:$0xff]  ;;  %v271_v5 = vld [vmem:[%s2004_s10 + $0x148] sm:$0xff]  ;;  %268 = vst [vmem:[%s242_s11 + $0x18] sm:$0xff] %v267_v3 }
  0x21   : > { %270 = vst [vmem:[%s242_s11 + $0x20] sm:$0xff] %v269_v4  ;;  %272 = vst [vmem:[%s242_s11 + $0x28] sm:$0xff] %v271_v5  ;;  %v273_v6 = vld [vmem:[%s2004_s10 + $0x1e0] sm:$0xff]  ;;  %v275_v7 = vld [vmem:[%s2004_s10 + $0x1e8] sm:$0xff] }
  0x22   : > { %v277_v8 = vld [vmem:[%s2004_s10 + $0x280] sm:$0xff]  ;;  %274 = vst [vmem:[%s242_s11 + $0x30] sm:$0xff] %v273_v6  ;;  %276 = vst [vmem:[%s242_s11 + $0x38] sm:$0xff] %v275_v7  ;;  %v279_v9 = vld [vmem:[%s2004_s10 + $0x288] sm:$0xff] }
  0x23   : > { %278 = vst [vmem:[%s242_s11 + $0x40] sm:$0xff] %v277_v8  ;;  %v281_v10 = vld [vmem:[%s2004_s10 + $0x320] sm:$0xff]  ;;  %v283_v11 = vld [vmem:[%s2004_s10 + $0x328] sm:$0xff]  ;;  %280 = vst [vmem:[%s242_s11 + $0x48] sm:$0xff] %v279_v9 }
  0x24   : > { %282 = vst [vmem:[%s242_s11 + $0x50] sm:$0xff] %v281_v10  ;;  %284 = vst [vmem:[%s242_s11 + $0x58] sm:$0xff] %v283_v11  ;;  %v285_v12 = vld [vmem:[%s2004_s10 + $0x3c0] sm:$0xff]  ;;  %v287_v13 = vld [vmem:[%s2004_s10 + $0x3c8] sm:$0xff] }
  0x25   : > { %v289_v14 = vld [vmem:[%s2004_s10 + $0x460] sm:$0xff]  ;;  %286 = vst [vmem:[%s242_s11 + $0x60] sm:$0xff] %v285_v12  ;;  %288 = vst [vmem:[%s242_s11 + $0x68] sm:$0xff] %v287_v13  ;;  %v291_v15 = vld [vmem:[%s2004_s10 + $0x468] sm:$0xff] }
  0x26   : > { %290 = vst [vmem:[%s242_s11 + $0x70] sm:$0xff] %v289_v14  ;;  %292 = vst [vmem:[%s242_s11 + $0x78] sm:$0xff] %v291_v15 }
  0x27 PF: > { %p1535_p7 = scmp.ge.s32.totalorder %s1912_s24, 1  ;;  %p313_p8 = scmp.lt.s32.totalorder %s1912_s24, 21 }
  0x29   : > { %p314_p9 = pnand %p1535_p7, %p313_p8 }
  0x2a   : > { %s320_s12 = sand.u32 (!%p314_p9), 1, %s1888_s18   ;;  %s1537_s13 = sshll.u32 (!%p314_p9), %s1896_s20, 6 }
  0x2b   : > { %317 = sbr.rel (%p314_p9) target bundleno = 583 (0x247), region = 51  ;;  %s1536_s14 = sshll.u32 (!%p314_p9), %s320_s12, 7 }
  0x2c   : > { %p392_p10 = scmp.lt.s32.totalorder (!%p314_p9), %s1900_s21, 1  ;;  %p394_p11 = scmp.lt.s32.totalorder (!%p314_p9), %s1537_s13, 639 }
  0x2d   : > { %p444_p12 = scmp.eq.s32.totalorder (!%p314_p9), %s1896_s20, 0  ;;  %p1545_p13 = scmp.ne.s32.totalorder (!%p314_p9), %s1896_s20, 0 }
  0x32   : > { %s2317_s21 = smov (!%p392_p10, %s1900_s21), 1  ;;  %s2319_s13 = smov (!%p394_p11, %s1537_s13), 639 }
  0x33   : > { %s1724_s15 = smul.u32 640, %s2317_s21  ;;  %s1608_s16 = sshll.u32 %s2317_s21, 5  ;;  %v1914_v16 = vmov (!%p1545_p13), 0.0  }
  0x34   : > { %s2031_s28 = scalar_lea.vmem %s2294_s3, %s1608_s16  ;;  %s1609_s30 = sshll.u32 %s2317_s21, 6  ;;  %448 = vst [vmem:[#allocation2] sm:$0xff] (!%p1545_p13), %v1914_v16  ;;  %449 = vst [vmem:[#allocation2 + $0x8] sm:$0xff] (!%p1545_p13), %v1914_v16 }
  0x35   : > { %s400_s6 = sadd.s32 %s1724_s15, %s2319_s13  ;;  %s2036_s18 = scalar_lea.vmem %s2295_s4, %s1609_s30  ;;  %450 = vst [vmem:[#allocation2 + $0x10] sm:$0xff] (!%p1545_p13), %v1914_v16  ;;  %451 = vst [vmem:[#allocation2 + $0x18] sm:$0xff] (!%p1545_p13), %v1914_v16 }
  0x36   : > { %s1538_s9 = sshll.u32 %s400_s6, 2  ;;  %s2041_s12 = scalar_lea.vmem %s2296_s5, %s1609_s30  ;;  %452 = vst [vmem:[#allocation2 + $0x20] sm:$0xff] (!%p1545_p13), %v1914_v16  ;;  %453 = vst [vmem:[#allocation2 + $0x28] sm:$0xff] (!%p1545_p13), %v1914_v16 }
  0x37   : > { %s2046_s25 = scalar_lea.vmem %s2292_s1, %s1538_s9  ;;  %s2049_s16 = scalar_lea.vmem [#allocation5], %s1536_s14  ;;  %454 = vst [vmem:[#allocation2 + $0x30] sm:$0xff] (!%p1545_p13), %v1914_v16  ;;  %455 = vst [vmem:[#allocation2 + $0x38] sm:$0xff] (!%p1545_p13), %v1914_v16 }
  0x38   : > { %447 = sbr.rel (%p1545_p13) target bundleno = 63 (0x3f), region = 59 }
  0x3f PF: > { %460 = sbr.rel (!%p444_p12) target bundleno = 72 (0x48), region = 63  ;;  %vm461_vm0 = vcmask (%p444_p12), 7168   ;;  %v1915_v17 = vmov (%p444_p12), 0.0  }
  0x40   : > { %462 = vst.msk [vmem:[#allocation3] sm:$0xff] (%p444_p12), %vm461_vm0, %v1915_v17  ;;  %463 = vst.msk [vmem:[#allocation3 + $0x8] sm:$0xff] (%p444_p12), %vm461_vm0, %v1915_v17 }
  0x41   : > { %464 = vst.msk [vmem:[#allocation3 + $0x10] sm:$0xff] (%p444_p12), %vm461_vm0, %v1915_v17  ;;  %465 = vst.msk [vmem:[#allocation3 + $0x18] sm:$0xff] (%p444_p12), %vm461_vm0, %v1915_v17 }
  0x42   : > { %466 = vst.msk [vmem:[#allocation3 + $0x20] sm:$0xff] (%p444_p12), %vm461_vm0, %v1915_v17  ;;  %467 = vst.msk [vmem:[#allocation3 + $0x28] sm:$0xff] (%p444_p12), %vm461_vm0, %v1915_v17 }
  0x43   : > { %468 = vst.msk [vmem:[#allocation3 + $0x30] sm:$0xff] (%p444_p12), %vm461_vm0, %v1915_v17  ;;  %469 = vst.msk [vmem:[#allocation3 + $0x38] sm:$0xff] (%p444_p12), %vm461_vm0, %v1915_v17 }
  0x44   : > { %470 = vst.msk [vmem:[#allocation4] sm:$0xff] (%p444_p12), %vm461_vm0, %v1915_v17  ;;  %471 = vst.msk [vmem:[#allocation4 + $0x8] sm:$0xff] (%p444_p12), %vm461_vm0, %v1915_v17 }
  0x45   : > { %472 = vst.msk [vmem:[#allocation4 + $0x10] sm:$0xff] (%p444_p12), %vm461_vm0, %v1915_v17  ;;  %473 = vst.msk [vmem:[#allocation4 + $0x18] sm:$0xff] (%p444_p12), %vm461_vm0, %v1915_v17 }
  0x46   : > { %474 = vst.msk [vmem:[#allocation4 + $0x20] sm:$0xff] %vm461_vm0, %v1915_v17  ;;  %475 = vst.msk [vmem:[#allocation4 + $0x28] sm:$0xff] %vm461_vm0, %v1915_v17 }
  0x47   : > { %476 = vst.msk [vmem:[#allocation4 + $0x30] sm:$0xff] %vm461_vm0, %v1915_v17  ;;  %477 = vst.msk [vmem:[#allocation4 + $0x38] sm:$0xff] %vm461_vm0, %v1915_v17 }
  0x48 PF: > { %v1784_v18 = vld [vmem:[%s2046_s25 + $0x40] sm:$0xff]   ;;  %v1788_v22 = vld [vmem:[%s2046_s25 + $0x48] sm:$0xff]   ;;  %v1792_v26 = vld [vmem:[%s2046_s25 + $0x50] sm:$0xff]   ;;  %p984_p0 = scmp.eq.s32.totalorder %s1896_s20, 9  ;;  %p1595_p1 = scmp.ne.s32.totalorder %s1896_s20, 9 }
  0x49   : > { %v1785_v19 = vld [vmem:[%s2046_s25 + $0xc0] sm:$0xff]   ;;  %1644 = vmatprep.subr.bf16.mxu0 %v1784_v18  ;;  %v1789_v23 = vld [vmem:[%s2046_s25 + $0xc8] sm:$0xff]   ;;  %v1793_v27 = vld [vmem:[%s2046_s25 + $0xd0] sm:$0xff]   ;;  %vm1028_vm1 = vcmask (!%p1595_p1), 7168  }
  0x4a   : > { %v1786_v20 = vld [vmem:[%s2046_s25] sm:$0xff]   ;;  %1684 = vmatprep.subr.bf16.mxu1 %v1785_v19  ;;  %v1790_v24 = vld [vmem:[%s2046_s25 + $0x8] sm:$0xff]   ;;  %v1794_v28 = vld [vmem:[%s2046_s25 + $0x10] sm:$0xff]  }
  0x4b   : > { %v1787_v21 = vld [vmem:[%s2046_s25 + $0x80] sm:$0xff]   ;;  %1645 = vmatpush3.bf16.msra.mxu0 %v1786_v20  ;;  %v1791_v25 = vld [vmem:[%s2046_s25 + $0x88] sm:$0xff]   ;;  %v1795_v29 = vld [vmem:[%s2046_s25 + $0x90] sm:$0xff]  }
  0x4c   : > { %1685 = vmatpush3.bf16.msra.mxu1 %v1787_v21  ;;  %1646 = vmatprep.subr.bf16.mxu0 %v1788_v22  ;;  %v1796_v30 = vld [vmem:[%s2046_s25 + $0x58] sm:$0xff]   ;;  %v1800_v34 = vld [vmem:[%s2046_s25 + $0x60] sm:$0xff]   ;;  %v1804_v38 = vld [vmem:[%s2046_s25 + $0x68] sm:$0xff]  }
  0x4d   : > { %1686 = vmatprep.subr.bf16.mxu1 %v1789_v23  ;;  %v1797_v31 = vld [vmem:[%s2046_s25 + $0xd8] sm:$0xff]   ;;  %v1801_v35 = vld [vmem:[%s2046_s25 + $0xe0] sm:$0xff]   ;;  %v1805_v39 = vld [vmem:[%s2046_s25 + $0xe8] sm:$0xff]  }
  0x4e   : > { %v1798_v32 = vld [vmem:[%s2046_s25 + $0x18] sm:$0xff]   ;;  %v1802_v36 = vld [vmem:[%s2046_s25 + $0x20] sm:$0xff]   ;;  %v1806_v40 = vld [vmem:[%s2046_s25 + $0x28] sm:$0xff]  }
  0x4f   : > { %1647 = vmatpush3.bf16.msra.mxu0 %v1790_v24  ;;  %v1799_v33 = vld [vmem:[%s2046_s25 + $0x98] sm:$0xff]   ;;  %v1803_v37 = vld [vmem:[%s2046_s25 + $0xa0] sm:$0xff]   ;;  %v1807_v41 = vld [vmem:[%s2046_s25 + $0xa8] sm:$0xff]  }
  0x50   : > { %1687 = vmatpush3.bf16.msra.mxu1 %v1791_v25  ;;  %1648 = vmatprep.subr.bf16.mxu0 %v1792_v26  ;;  %v1808_v42 = vld [vmem:[%s2046_s25 + $0x70] sm:$0xff]   ;;  %v1812_v46 = vld [vmem:[%s2046_s25 + $0x78] sm:$0xff]   ;;  %v478_v11 = vld [vmem:[#allocation2] sm:$0xff] }
  0x51   : > { %1688 = vmatprep.subr.bf16.mxu1 %v1793_v27  ;;  %v1809_v43 = vld [vmem:[%s2046_s25 + $0xf0] sm:$0xff]   ;;  %v1813_v47 = vld [vmem:[%s2046_s25 + $0xf8] sm:$0xff]   ;;  %v479_v16 = vld [vmem:[#allocation2 + $0x8] sm:$0xff] }
  0x52   : > { %v1810_v44 = vld [vmem:[%s2046_s25 + $0x30] sm:$0xff]   ;;  %v1814_v48 = vld [vmem:[%s2046_s25 + $0x38] sm:$0xff]  }
  0x53   : > { %1649 = vmatpush3.bf16.msra.mxu0 %v1794_v28  ;;  %v1811_v45 = vld [vmem:[%s2046_s25 + $0xb0] sm:$0xff]   ;;  %v1815_v49 = vld [vmem:[%s2046_s25 + $0xb8] sm:$0xff]  }
  0x54   : > { %1689 = vmatpush3.bf16.msra.mxu1 %v1795_v29  ;;  %1650 = vmatprep.subr.bf16.mxu0 %v1796_v30  ;;  %v1816_v50 = vld [vmem:[%s2049_s16] ss:$16 sps:$4 sm:$0xff]   ;;  %v1818_v51 = vld [vmem:[%s2049_s16 + $0x4] ss:$16 sps:$4 sm:$0xff]   ;;  %v1819_v52 = vld [vmem:[%s2049_s16 + $0x8] ss:$16 sps:$4 sm:$0xff]  }
  0x55   : > { %1690 = vmatprep.subr.bf16.mxu1 %v1797_v31  ;;  %v1821_v53 = vld [vmem:[%s2049_s16 + $0xc] ss:$16 sps:$4 sm:$0xff]   ;;  %870 = vmatprep.mubr.bf16.mxu0 %v1818_v51  ;;  %v1822_v54 = vld [vmem:[%s2049_s16 + $0x24] ss:$16 sps:$4 sm:$0xff]   ;;  %v1826_v56 = vld [vmem:[%s2049_s16 + $0x20] ss:$16 sps:$4 sm:$0xff]  }
  0x56   : > { %935 = vmatprep.mubr.bf16.mxu1 %v1821_v53  ;;  %v1824_v55 = vld [vmem:[%s2049_s16 + $0x2c] ss:$16 sps:$4 sm:$0xff]   ;;  %v1827_v57 = vld [vmem:[%s2049_s16 + $0x28] ss:$16 sps:$4 sm:$0xff]   ;;  %v1828_v58 = vld [vmem:[%s2049_s16 + $0x44] ss:$16 sps:$4 sm:$0xff]  }
  0x57   : > { %1651 = vmatpush3.bf16.msra.mxu0 %v1798_v32  ;;  %v1830_v59 = vld [vmem:[%s2049_s16 + $0x4c] ss:$16 sps:$4 sm:$0xff]   ;;  %v1832_v60 = vld [vmem:[%s2049_s16 + $0x40] ss:$16 sps:$4 sm:$0xff]   ;;  %v1833_v61 = vld [vmem:[%s2049_s16 + $0x48] ss:$16 sps:$4 sm:$0xff]  }
  0x58   : > { %1691 = vmatpush3.bf16.msra.mxu1 %v1799_v33  ;;  %1652 = vmatprep.subr.bf16.mxu0 %v1800_v34  ;;  %v1834_v62 = vld [vmem:[%s2049_s16 + $0x64] ss:$16 sps:$4 sm:$0xff]   ;;  %v1836_v63 = vld [vmem:[%s2049_s16 + $0x6c] ss:$16 sps:$4 sm:$0xff]   ;;  %v1838_v0 = vld [vmem:[%s2049_s16 + $0x60] ss:$16 sps:$4 sm:$0xff]  }
  0x59   : > { %1692 = vmatprep.subr.bf16.mxu1 %v1801_v35  ;;  %v1839_v1 = vld [vmem:[%s2049_s16 + $0x68] ss:$16 sps:$4 sm:$0xff]   ;;  %v480_v29 = vld [vmem:[#allocation2 + $0x10] sm:$0xff] }
  0x5a   : > { %v481_v34 = vld [vmem:[#allocation2 + $0x18] sm:$0xff] }
  0x5b   : > { %1653 = vmatpush3.bf16.msra.mxu0 %v1802_v36 }
  0x5c   : > { %1693 = vmatpush3.bf16.msra.mxu1 %v1803_v37  ;;  %1654 = vmatprep.subr.bf16.mxu0 %v1804_v38 }
  0x5d   : > { %1694 = vmatprep.subr.bf16.mxu1 %v1805_v39 }
  0x5f   : > { %1655 = vmatpush3.bf16.msra.mxu0 %v1806_v40 }
  0x60   : > { %1695 = vmatpush3.bf16.msra.mxu1 %v1807_v41  ;;  %1656 = vmatprep.subr.bf16.mxu0 %v1808_v42 }
  0x61   : > { %1696 = vmatprep.subr.bf16.mxu1 %v1809_v43 }
  0x63   : > { %1657 = vmatpush3.bf16.msra.mxu0 %v1810_v44 }
  0x64   : > { %1697 = vmatpush3.bf16.msra.mxu1 %v1811_v45  ;;  %1658 = vmatprep.subr.bf16.mxu0 %v1812_v46 }
  0x65   : > { %1698 = vmatprep.subr.bf16.mxu1 %v1813_v47  ;;  %v482_v47 = vld [vmem:[#allocation2 + $0x20] sm:$0xff] }
  0x67   : > { %1659 = vmatpush3.bf16.msra.mxu0 %v1814_v48 }
  0x68   : > { %1699 = vmatpush3.bf16.msra.mxu1 %v1815_v49 }
  0x6a   : > { %871 = vmatmul.mubr.bf16.vlgmr.msra.gmra.mrb[0].mxu0 %v1816_v50 }
  0x6b   : > { %936 = vmatmul.mubr.bf16.vlgmr.msra.gmra.mrb[0].mxu1 %v1819_v52  ;;  %878 = vmatprep.mubr.bf16.mxu0 %v1822_v54  ;;  %v483_v52 = vld [vmem:[#allocation2 + $0x28] sm:$0xff] }
  0x6c   : > { %943 = vmatprep.mubr.bf16.mxu1 %v1824_v55 }
  0x72   : > { %879 = vmatmul.mubr.bf16.gmra.mrb[4].mxu0 %v1826_v56 }
  0x73   : > { %944 = vmatmul.mubr.bf16.gmra.mrb[4].mxu1 %v1827_v57  ;;  %886 = vmatprep.mubr.bf16.mxu0 %v1828_v58 }
  0x74   : > { %951 = vmatprep.mubr.bf16.mxu1 %v1830_v59 }
  0x7a   : > { %887 = vmatmul.mubr.bf16.gmra.mrb[8].mxu0 %v1832_v60 }
  0x7b   : > { %952 = vmatmul.mubr.bf16.gmra.mrb[8].mxu1 %v1833_v61  ;;  %894 = vmatprep.mubr.bf16.mxu0 %v1834_v62 }
  0x7c   : > { %959 = vmatprep.mubr.bf16.mxu1 %v1836_v63 }
  0x82   : > { %895 = vmatmul.mubr.bf16.gmra.mrb[12].mxu0 %v1838_v0 }
  0x83   : > { %960 = vmatmul.mubr.bf16.gmra.mrb[12].mxu1 %v1839_v1  ;;  %v484_v1 = vld [vmem:[#allocation2 + $0x30] sm:$0xff] }
 0x13d   : > { %v1660_v2 = vpop.f32.mrb[0].mxu0 }
 0x13e   : > { %v1700_v3 = vpop.f32.mrb[0].mxu1  ;;  %v1661_v4 = vpop.f32.mrb[1].mxu0 }
 0x13f   : > { %v1662_v5 = vadd.f32 %v1661_v4, %v1660_v2  ;;  %v1701_v6 = vpop.f32.mrb[1].mxu1  ;;  %v1663_v7 = vpop.f32.mrb[2].mxu0 }
 0x140   : > { %v1702_v8 = vadd.f32 %v1701_v6, %v1700_v3  ;;  %v1703_v9 = vpop.f32.mrb[2].mxu1  ;;  %v1664_v10 = vpop.f32.mrb[3].mxu0  ;;  %v485_v6 = vld [vmem:[#allocation2 + $0x38] sm:$0xff] }
 0x141   : > { %v1665_v12 = vadd.f32 %v1664_v10, %v1663_v7  ;;  %v1704_v13 = vpop.f32.mrb[3].mxu1 }
 0x142   : > { %v938_v14 = vadd.f32 %v1702_v8, %v1662_v5  ;;  %v1705_v15 = vadd.f32 %v1704_v13, %v1703_v9 }
 0x144   : > { %v968_v17 = vadd.f32 %v938_v14, %v478_v11  ;;  %v941_v18 = vadd.f32 %v1705_v15, %v1665_v12  ;;  %v1916_v14 = vmov (!%p1595_p1), 0  }
 0x145   : > { %v1666_v19 = vpop.f32.mrb[4].mxu0  ;;  %1841 = vset.pattern.permute.xlu1 (!%p1595_p1), %v1916_v14  ;;  %1840 = vset.pattern.permute.xlu0 (!%p1595_p1), %v1916_v14 }
 0x146   : > { %976 = vst [vmem:[#allocation2] sm:$0xff] %v968_v17  ;;  %v969_v20 = vadd.f32 %v941_v18, %v479_v16  ;;  %v1706_v21 = vpop.f32.mrb[4].mxu1  ;;  %v1667_v22 = vpop.f32.mrb[5].mxu0 }
 0x147   : > { %v1668_v23 = vadd.f32 %v1667_v22, %v1666_v19  ;;  %v1707_v24 = vpop.f32.mrb[5].mxu1  ;;  %v1669_v25 = vpop.f32.mrb[6].mxu0 }
 0x148   : > { %977 = vst [vmem:[#allocation2 + $0x8] sm:$0xff] %v969_v20  ;;  %v1708_v26 = vadd.f32 %v1707_v24, %v1706_v21  ;;  %v1709_v27 = vpop.f32.mrb[6].mxu1  ;;  %v1670_v28 = vpop.f32.mrb[7].mxu0 }
 0x149   : > { %v1671_v30 = vadd.f32 %v1670_v28, %v1669_v25  ;;  %v1710_v31 = vpop.f32.mrb[7].mxu1  ;;  %v1087_v28 = vld [vmem:[%s2293_s2 + $0x10] sm:$0xff] (!%p1595_p1) }
 0x14a   : > { %v946_v32 = vadd.f32 %v1708_v26, %v1668_v23  ;;  %v1711_v33 = vadd.f32 %v1710_v31, %v1709_v27  ;;  %v1086_v27 = vld [vmem:[%s2293_s2 + $0x8] sm:$0xff] (!%p1595_p1)  ;;  %v1089_v31 = vld [vmem:[%s2293_s2 + $0x20] sm:$0xff] (!%p1595_p1) }
 0x14c   : > { %v970_v35 = vadd.f32 %v946_v32, %v480_v29  ;;  %v949_v36 = vadd.f32 %v1711_v33, %v1671_v30  ;;  %v1085_v29 = vld [vmem:[%s2293_s2] sm:$0xff] (!%p1595_p1)  ;;  %v1088_v30 = vld [vmem:[%s2293_s2 + $0x18] sm:$0xff] (!%p1595_p1)  ;;  %v1090_v32 = vld [vmem:[%s2293_s2 + $0x28] sm:$0xff] (!%p1595_p1) }
 0x14d   : > { %v1672_v37 = vpop.f32.mrb[8].mxu0  ;;  %v2122_v11 = vld [vmem:[#allocation2] sm:$0xff] (!%p1595_p1)  ;;  %v1091_v33 = vld [vmem:[%s2293_s2 + $0x30] sm:$0xff] (!%p1595_p1) }
 0x14e   : > { %978 = vst [vmem:[#allocation2 + $0x10] sm:$0xff] %v970_v35  ;;  %v971_v38 = vadd.f32 %v949_v36, %v481_v34  ;;  %v1712_v39 = vpop.f32.mrb[8].mxu1  ;;  %v1673_v40 = vpop.f32.mrb[9].mxu0  ;;  %1004 = vadd.xlane.f32.xlu0 (!%p1595_p1), %v2122_v11  ;;  %v1045_v20 = vmul.f32 (!%p1595_p1), %v2122_v11, %v2122_v11  ;;  %v1092_v34 = vld [vmem:[%s2293_s2 + $0x38] sm:$0xff] (!%p1595_p1)  ;;  %v998_v35 = vld [vmem:[#allocation3 + $0x10] sm:$0xff] (!%p1595_p1)  ;;  %v996_v36 = vld [vmem:[#allocation3] sm:$0xff] (!%p1595_p1) }
 0x14f   : > { %v1674_v41 = vadd.f32 %v1673_v40, %v1672_v37  ;;  %v1713_v42 = vpop.f32.mrb[9].mxu1  ;;  %v1675_v43 = vpop.f32.mrb[10].mxu0  ;;  %v2128_v13 = vld [vmem:[#allocation2 + $0x8] sm:$0xff] (!%p1595_p1) }
 0x150   : > { %979 = vst [vmem:[#allocation2 + $0x18] sm:$0xff] %v971_v38  ;;  %v1714_v44 = vadd.f32 %v1713_v42, %v1712_v39  ;;  %v1715_v45 = vpop.f32.mrb[10].mxu1  ;;  %v1676_v46 = vpop.f32.mrb[11].mxu0  ;;  %v1046_v19 = vmul.f32 (!%p1595_p1), %v2128_v13, %v2128_v13  ;;  %v997_v42 = vld [vmem:[#allocation3 + $0x8] sm:$0xff] (!%p1595_p1) }
 0x151   : > { %v1677_v48 = vadd.f32 %v1676_v46, %v1675_v43  ;;  %v1716_v49 = vpop.f32.mrb[11].mxu1 }
 0x152   : > { %v954_v50 = vadd.f32 %v1714_v44, %v1674_v41  ;;  %v1717_v51 = vadd.f32 %v1716_v49, %v1715_v45  ;;  %1006 = vadd.xlane.f32.xlu0 (!%p1595_p1), %v2128_v13  ;;  %v999_v41 = vld [vmem:[#allocation3 + $0x18] sm:$0xff] (!%p1595_p1) }
 0x154   : > { %v972_v53 = vadd.f32 %v954_v50, %v482_v47  ;;  %v957_v54 = vadd.f32 %v1717_v51, %v1677_v48  ;;  %v1001_v47 = vld [vmem:[#allocation3 + $0x28] sm:$0xff] (!%p1595_p1)  ;;  %v1000_v48 = vld [vmem:[#allocation3 + $0x20] sm:$0xff] (!%p1595_p1) }
 0x155   : > { %v1678_v55 = vpop.f32.mrb[12].mxu0  ;;  %v2120_v10 = vld [vmem:[#allocation2 + $0x10] sm:$0xff] (!%p1595_p1) }
 0x156   : > { %980 = vst [vmem:[#allocation2 + $0x20] sm:$0xff] %v972_v53  ;;  %v973_v56 = vadd.f32 %v957_v54, %v483_v52  ;;  %v1718_v57 = vpop.f32.mrb[12].mxu1  ;;  %v1679_v58 = vpop.f32.mrb[13].mxu0  ;;  %1008 = vadd.xlane.f32.xlu1 (!%p1595_p1), %v2120_v10  ;;  %v1047_v22 = vmul.f32 (!%p1595_p1), %v2120_v10, %v2120_v10  ;;  %v1003_v53 = vld [vmem:[#allocation3 + $0x38] sm:$0xff] (!%p1595_p1)  ;;  %v1002_v54 = vld [vmem:[#allocation3 + $0x30] sm:$0xff] (!%p1595_p1) }
 0x157   : > { %v1680_v59 = vadd.f32 %v1679_v58, %v1678_v55  ;;  %v1719_v60 = vpop.f32.mrb[13].mxu1  ;;  %v1681_v61 = vpop.f32.mrb[14].mxu0  ;;  %v2126_v12 = vld [vmem:[#allocation2 + $0x18] sm:$0xff] (!%p1595_p1) }
 0x158   : > { %981 = vst [vmem:[#allocation2 + $0x28] sm:$0xff] %v973_v56  ;;  %v1720_v62 = vadd.f32 %v1719_v60, %v1718_v57  ;;  %v1721_v63 = vpop.f32.mrb[14].mxu1  ;;  %v1682_v0 = vpop.f32.mrb[15].mxu0  ;;  %v1048_v21 = vmul.f32 (!%p1595_p1), %v2126_v12, %v2126_v12  ;;  %v1037_v60 = vld [vmem:[#allocation4] sm:$0xff] (!%p1595_p1) }
 0x159   : > { %v1683_v2 = vadd.f32 %v1682_v0, %v1681_v61  ;;  %v1722_v3 = vpop.f32.mrb[15].mxu1 }
 0x15a   : > { %v962_v4 = vadd.f32 %v1720_v62, %v1680_v59  ;;  %v1723_v5 = vadd.f32 %v1722_v3, %v1721_v63  ;;  %987 = sbr.rel (%p1595_p1) target bundleno = 551 (0x227), region = 67  ;;  %1010 = vadd.xlane.f32.xlu1 (!%p1595_p1), %v2126_v12  ;;  %v1038_v59 = vld [vmem:[#allocation4 + $0x8] sm:$0xff] (!%p1595_p1) }
 0x15c   : > { %v974_v7 = vadd.f32 %v962_v4, %v484_v1  ;;  %v965_v8 = vadd.f32 %v1723_v5, %v1683_v2  ;;  %v1040_v1 = vld [vmem:[#allocation4 + $0x18] sm:$0xff] (!%p1595_p1)  ;;  %v1039_v2 = vld [vmem:[#allocation4 + $0x10] sm:$0xff] (!%p1595_p1) }
 0x15d   : > { %v2134_v16 = vld [vmem:[#allocation2 + $0x20] sm:$0xff] (!%p1595_p1) }
 0x15e   : > { %982 = vst [vmem:[#allocation2 + $0x30] sm:$0xff] %v974_v7  ;;  %v975_v9 = vadd.f32 %v965_v8, %v485_v6  ;;  %1012 = vadd.xlane.f32.xlu0 (!%p1595_p1), %v2134_v16  ;;  %v1049_v24 = vmul.f32 (!%p1595_p1), %v2134_v16, %v2134_v16  ;;  %v1042_v7 = vld [vmem:[#allocation4 + $0x28] sm:$0xff] (!%p1595_p1)  ;;  %v1041_v8 = vld [vmem:[#allocation4 + $0x20] sm:$0xff] (!%p1595_p1) }
 0x15f   : > { %v2132_v15 = vld [vmem:[#allocation2 + $0x28] sm:$0xff] (!%p1595_p1) }
 0x160   : > { %983 = vst [vmem:[#allocation2 + $0x38] sm:$0xff] %v975_v9  ;;  %1014 = vadd.xlane.f32.xlu1 (!%p1595_p1), %v2132_v15  ;;  %v1050_v23 = vmul.f32 (!%p1595_p1), %v2132_v15, %v2132_v15 }
 0x165   : > { %v2140_v18 = vld [vmem:[#allocation2 + $0x30] sm:$0xff] }
 0x166   : > { %1016 = vadd.xlane.f32.xlu0 %v2140_v18  ;;  %v1051_v26 = vmul.f32 %v2140_v18, %v2140_v18 }
 0x167   : > { %v2138_v17 = vld [vmem:[#allocation2 + $0x38] sm:$0xff] }
 0x168   : > { %1018 = vadd.xlane.f32.xlu1 %v2138_v17  ;;  %v1052_v25 = vmul.f32 %v2138_v17, %v2138_v17 }
 0x16a   : > { %1053 = vadd.xlane.f32.xlu0 %v1045_v20 }
 0x16c   : > { %1055 = vadd.xlane.f32.xlu1 %v1046_v19 }
 0x16e   : > { %1057 = vadd.xlane.f32.xlu0 %v1047_v22  ;;  %v1043_v22 = vld [vmem:[#allocation4 + $0x30] sm:$0xff] }
 0x170   : > { %1059 = vadd.xlane.f32.xlu1 %v1048_v21  ;;  %v1044_v21 = vld [vmem:[#allocation4 + $0x38] sm:$0xff] }
 0x172   : > { %1061 = vadd.xlane.f32.xlu0 %v1049_v24 }
 0x174   : > { %1063 = vadd.xlane.f32.xlu1 %v1050_v23 }
 0x176   : > { %1065 = vadd.xlane.f32.xlu0 %v1051_v26 }
 0x178   : > { %1067 = vadd.xlane.f32.xlu1 %v1052_v25 }
 0x189   : > { %1100 = vperm.xlu1 %1841, %v1086_v27  }
 0x18c   : > { %1095 = vperm.xlu0 %1840, %v1085_v29  }
 0x18d   : > { %1105 = vperm.xlu1 %1841, %v1087_v28  }
 0x191   : > { %1110 = vperm.xlu1 %1841, %v1088_v30  }
 0x195   : > { %1115 = vperm.xlu1 %1841, %v1089_v31  }
 0x199   : > { %1120 = vperm.xlu1 %1841, %v1090_v32  }
 0x19d   : > { %1125 = vperm.xlu1 %1841, %v1091_v33  }
 0x1a1   : > { %1130 = vperm.xlu1 %1841, %v1092_v34  }
 0x1db   : > { %v1005_v38 = vpop.xlane.xlu0 %1004 }
 0x1dc   : > { %v1020_v40 = vadd.f32 %v1005_v38, %v996_v36 }
 0x1de   : > { %1029 = vst.msk [vmem:[#allocation3] sm:$0xff] %vm1028_vm1, %v1020_v40 }
 0x1df   : > { %v1007_v44 = vpop.xlane.xlu0 %1006 }
 0x1e0   : > { %v1021_v46 = vadd.f32 %v1007_v44, %v997_v42 }
 0x1e2   : > { %1030 = vst.msk [vmem:[#allocation3 + $0x8] sm:$0xff] %vm1028_vm1, %v1021_v46 }
 0x1e3   : > { %v1009_v37 = vpop.xlane.xlu1 %1008 }
 0x1e4   : > { %v1022_v39 = vadd.f32 %v1009_v37, %v998_v35 }
 0x1e6   : > { %1031 = vst.msk [vmem:[#allocation3 + $0x10] sm:$0xff] %vm1028_vm1, %v1022_v39 }
 0x1e7   : > { %v1011_v43 = vpop.xlane.xlu1 %1010 }
 0x1e8   : > { %v1023_v45 = vadd.f32 %v1011_v43, %v999_v41 }
 0x1ea   : > { %1032 = vst.msk [vmem:[#allocation3 + $0x18] sm:$0xff] %vm1028_vm1, %v1023_v45 }
 0x1eb   : > { %v1013_v50 = vpop.xlane.xlu0 %1012 }
 0x1ec   : > { %v1024_v52 = vadd.f32 %v1013_v50, %v1000_v48 }
 0x1ed   : > { %v1015_v49 = vpop.xlane.xlu1 %1014 }
 0x1ee   : > { %v1025_v51 = vadd.f32 %v1015_v49, %v1001_v47  ;;  %1033 = vst.msk [vmem:[#allocation3 + $0x20] sm:$0xff] %vm1028_vm1, %v1024_v52 }
 0x1f0   : > { %1034 = vst.msk [vmem:[#allocation3 + $0x28] sm:$0xff] %vm1028_vm1, %v1025_v51 }
 0x1f3   : > { %v1017_v56 = vpop.xlane.xlu0 %1016 }
 0x1f4   : > { %v1026_v58 = vadd.f32 %v1017_v56, %v1002_v54 }
 0x1f5   : > { %v1019_v55 = vpop.xlane.xlu1 %1018 }
 0x1f6   : > { %v1027_v57 = vadd.f32 %v1019_v55, %v1003_v53  ;;  %1035 = vst.msk [vmem:[#allocation3 + $0x30] sm:$0xff] %vm1028_vm1, %v1026_v58 }
 0x1f7   : > { %v1054_v62 = vpop.xlane.xlu0 %1053 }
 0x1f8   : > { %1036 = vst.msk [vmem:[#allocation3 + $0x38] sm:$0xff] %vm1028_vm1, %v1027_v57  ;;  %v1069_v0 = vadd.f32 %v1054_v62, %v1037_v60 }
 0x1f9   : > { %v1056_v61 = vpop.xlane.xlu1 %1055 }
 0x1fa   : > { %v1070_v63 = vadd.f32 %v1056_v61, %v1038_v59  ;;  %1077 = vst.msk [vmem:[#allocation4] sm:$0xff] %vm1028_vm1, %v1069_v0 }
 0x1fb   : > { %v1058_v4 = vpop.xlane.xlu0 %1057 }
 0x1fc   : > { %1078 = vst.msk [vmem:[#allocation4 + $0x8] sm:$0xff] %vm1028_vm1, %v1070_v63  ;;  %v1071_v6 = vadd.f32 %v1058_v4, %v1039_v2 }
 0x1fd   : > { %v1060_v3 = vpop.xlane.xlu1 %1059 }
 0x1fe   : > { %v1072_v5 = vadd.f32 %v1060_v3, %v1040_v1  ;;  %1079 = vst.msk [vmem:[#allocation4 + $0x10] sm:$0xff] %vm1028_vm1, %v1071_v6 }
 0x1ff   : > { %v1062_v14 = vpop.xlane.xlu0 %1061 }
 0x200   : > { %1080 = vst.msk [vmem:[#allocation4 + $0x18] sm:$0xff] %vm1028_vm1, %v1072_v5  ;;  %v1073_v20 = vadd.f32 %v1062_v14, %v1041_v8 }
 0x201   : > { %v1064_v9 = vpop.xlane.xlu1 %1063 }
 0x202   : > { %v1074_v19 = vadd.f32 %v1064_v9, %v1042_v7  ;;  %1081 = vst.msk [vmem:[#allocation4 + $0x20] sm:$0xff] %vm1028_vm1, %v1073_v20 }
 0x203   : > { %v1066_v24 = vpop.xlane.xlu0 %1065 }
 0x204   : > { %1082 = vst.msk [vmem:[#allocation4 + $0x28] sm:$0xff] %vm1028_vm1, %v1074_v19  ;;  %v1075_v26 = vadd.f32 %v1066_v24, %v1043_v22 }
 0x205   : > { %v1068_v23 = vpop.xlane.xlu1 %1067 }
 0x206   : > { %v1076_v25 = vadd.f32 %v1068_v23, %v1044_v21  ;;  %1083 = vst.msk [vmem:[#allocation4 + $0x30] sm:$0xff] %vm1028_vm1, %v1075_v26 }
 0x208   : > { %1084 = vst.msk [vmem:[#allocation4 + $0x38] sm:$0xff] %vm1028_vm1, %v1076_v25 }
 0x209   : > { %v1101_v27 = vpop.permute.xlu1 %1100 }
 0x20a   : > { %v1134_v30 = vadd.f32 %v1101_v27, %v2128_v13 }
 0x20b   : > { %v1096_v29 = vpop.permute.xlu0 %1095 }
 0x20c   : > { %v1133_v31 = vadd.f32 %v1096_v29, %v2122_v11 }
 0x20d   : > { %v1106_v28 = vpop.permute.xlu1 %1105 }
 0x20e   : > { %v1624_v32 = vpack.c.bf16 %v1134_v30, %v1133_v31  ;;  %v1135_v34 = vadd.f32 %v1106_v28, %v2120_v10 }
 0x210   : > { %1625 = vst [vmem:[%s2031_s28] sm:$0xff] %v1624_v32  }
 0x211   : > { %v1111_v33 = vpop.permute.xlu1 %1110 }
 0x212   : > { %v1136_v35 = vadd.f32 %v1111_v33, %v2126_v12 }
 0x214   : > { %v1629_v36 = vpack.c.bf16 %v1136_v35, %v1135_v34 }
 0x215   : > { %v1116_v37 = vpop.permute.xlu1 %1115 }
 0x216   : > { %1641 = vst [vmem:[%s2031_s28 + $0x8] sm:$0xff] %v1629_v36   ;;  %v1137_v39 = vadd.f32 %v1116_v37, %v2134_v16 }
 0x219   : > { %v1121_v38 = vpop.permute.xlu1 %1120 }
 0x21a   : > { %v1138_v40 = vadd.f32 %v1121_v38, %v2132_v15 }
 0x21c   : > { %v1634_v41 = vpack.c.bf16 %v1138_v40, %v1137_v39 }
 0x21d   : > { %v1126_v13 = vpop.permute.xlu1 %1125 }
 0x21e   : > { %1642 = vst [vmem:[%s2031_s28 + $0x10] sm:$0xff] %v1634_v41   ;;  %v1139_v42 = vadd.f32 %v1126_v13, %v2140_v18 }
 0x221   : > { %v1131_v11 = vpop.permute.xlu1 %1130 }
 0x222   : > { %v1140_v10 = vadd.f32 %v1131_v11, %v2138_v17 }
 0x224   : > { %v1639_v43 = vpack.c.bf16 %v1140_v10, %v1139_v42 }
 0x226   : > { %1643 = vst [vmem:[%s2031_s28 + $0x18] sm:$0xff] %v1639_v43  }
 0x227 PF: > { %1184 = sbr.rel (!%p984_p0) target bundleno = 583 (0x247), region = 71  ;;  %v1185_v12 = vld [vmem:[#allocation3] sm:$0xff] (%p984_p0)  ;;  %v1186_v46 = vld [vmem:[#allocation3 + $0x8] sm:$0xff] (%p984_p0)  ;;  %vm1249_vm2 = vcmask (%p984_p0), 7168   ;;  %v1187_v49 = vld [vmem:[#allocation3 + $0x10] sm:$0xff] (%p984_p0) }
 0x228   : > { %v1201_v44 = vld [vmem:[#allocation4] sm:$0xff] (%p984_p0)  ;;  %v1193_v16 = vmul.f32 (%p984_p0), 0.015625, %v1185_v12  ;;  %v1202_v47 = vld [vmem:[#allocation4 + $0x8] sm:$0xff] (%p984_p0)  ;;  %v1194_v18 = vmul.f32 (%p984_p0), 0.015625, %v1186_v46  ;;  %v1203_v50 = vld [vmem:[#allocation4 + $0x10] sm:$0xff] (%p984_p0)  ;;  %v1195_v54 = vmul.f32 (%p984_p0), 0.015625, %v1187_v49 }
 0x229   : > { %v1233_v15 = vld [vmem:[%s2293_s2] sm:$0xff] (%p984_p0)  ;;  %v1209_v45 = vmul.f32 (%p984_p0), 0.015625, %v1201_v44  ;;  %v1234_v17 = vld [vmem:[%s2293_s2 + $0x8] sm:$0xff] (%p984_p0)  ;;  %v1210_v48 = vmul.f32 (%p984_p0), 0.015625, %v1202_v47  ;;  %v1235_v51 = vld [vmem:[%s2293_s2 + $0x10] sm:$0xff] (%p984_p0)  ;;  %v1211_v55 = vmul.f32 (%p984_p0), 0.015625, %v1203_v50 }
 0x22a   : > { %v1217_v52 = vmul.f32 (%p984_p0), %v1193_v16, %v1193_v16  ;;  %v1241_v53 = vadd.f32 (%p984_p0), %v1233_v15, %v1193_v16  ;;  %v1188_v56 = vld [vmem:[#allocation3 + $0x18] sm:$0xff] (%p984_p0)  ;;  %v1218_v59 = vmul.f32 (%p984_p0), %v1194_v18, %v1194_v18  ;;  %v1242_v60 = vadd.f32 (%p984_p0), %v1234_v17, %v1194_v18  ;;  %v1189_v63 = vld [vmem:[#allocation3 + $0x20] sm:$0xff] (%p984_p0)  ;;  %v1190_v6 = vld [vmem:[#allocation3 + $0x28] sm:$0xff] (%p984_p0) }
 0x22b   : > { %v1204_v57 = vld [vmem:[#allocation4 + $0x18] sm:$0xff] (%p984_p0)  ;;  %v1196_v61 = vmul.f32 (%p984_p0), 0.015625, %v1188_v56  ;;  %v1205_v0 = vld [vmem:[#allocation4 + $0x20] sm:$0xff] (%p984_p0)  ;;  %v1219_v3 = vmul.f32 (%p984_p0), %v1195_v54, %v1195_v54  ;;  %v1243_v4 = vadd.f32 (%p984_p0), %v1235_v51, %v1195_v54  ;;  %v1197_v5 = vmul.f32 (%p984_p0), 0.015625, %v1189_v63  ;;  %v1206_v7 = vld [vmem:[#allocation4 + $0x28] sm:$0xff] (%p984_p0) }
 0x22c   : > { %v1236_v58 = vld [vmem:[%s2293_s2 + $0x18] sm:$0xff] (%p984_p0)  ;;  %v1212_v62 = vmul.f32 (%p984_p0), 0.015625, %v1204_v57  ;;  %v1237_v1 = vld [vmem:[%s2293_s2 + $0x20] sm:$0xff] (%p984_p0)  ;;  %v1225_v2 = vsub.f32 (%p984_p0), %v1209_v45, %v1217_v52  ;;  %1250 = vst.msk [vmem:[%s2036_s18] sm:$0xff] (%p984_p0), %vm1249_vm2, %v1241_v53  ;;  %v1226_v8 = vsub.f32 (%p984_p0), %v1210_v48, %v1218_v59  ;;  %1251 = vst.msk [vmem:[%s2036_s18 + $0x8] sm:$0xff] (%p984_p0), %vm1249_vm2, %v1242_v60  ;;  %v1213_v19 = vmul.f32 (%p984_p0), 0.015625, %v1205_v0 }
 0x22d   : > { %v1220_v9 = vmul.f32 (%p984_p0), %v1196_v61, %v1196_v61  ;;  %v1244_v14 = vadd.f32 (%p984_p0), %v1236_v58, %v1196_v61  ;;  %v1191_v20 = vld [vmem:[#allocation3 + $0x30] sm:$0xff] (%p984_p0)  ;;  %v1227_v22 = vsub.f32 (%p984_p0), %v1211_v55, %v1219_v3  ;;  %1252 = vst.msk [vmem:[%s2036_s18 + $0x10] sm:$0xff] (%p984_p0), %vm1249_vm2, %v1243_v4  ;;  %v1221_v23 = vmul.f32 (%p984_p0), %v1197_v5, %v1197_v5  ;;  %v1238_v25 = vld [vmem:[%s2293_s2 + $0x28] sm:$0xff] (%p984_p0)  ;;  %v1192_v35 = vld [vmem:[#allocation3 + $0x38] sm:$0xff] (%p984_p0) }
 0x22e   : > { %v1258_v21 = vadd.f32 1e-05, %v1225_v2  ;;  %v1245_v24 = vadd.f32 %v1237_v1, %v1197_v5  ;;  %v1259_v26 = vadd.f32 1e-05, %v1226_v8  ;;  %v1198_v28 = vmul.f32 0.015625, %v1190_v6  ;;  %v1207_v30 = vld [vmem:[#allocation4 + $0x30] sm:$0xff] }
 0x22f   : > { %v1228_v27 = vsub.f32 %v1212_v62, %v1220_v9  ;;  %1253 = vst.msk [vmem:[%s2036_s18 + $0x18] sm:$0xff] %vm1249_vm2, %v1244_v14  ;;  %v1214_v29 = vmul.f32 0.015625, %v1206_v7  ;;  %v1260_v31 = vadd.f32 1e-05, %v1227_v22  ;;  %v1229_v32 = vsub.f32 %v1213_v19, %v1221_v23  ;;  %v1239_v34 = vld [vmem:[%s2293_s2 + $0x30] sm:$0xff]  ;;  %v1208_v39 = vld [vmem:[#allocation4 + $0x38] sm:$0xff] }
 0x230   : > { %1842 = vrsqrt.f32 %v1258_v21  ;;  %1254 = vst.msk [vmem:[%s2036_s18 + $0x20] sm:$0xff] %vm1249_vm2, %v1245_v24  ;;  %v1199_v33 = vmul.f32 0.015625, %v1191_v20  ;;  %v1222_v37 = vmul.f32 %v1198_v28, %v1198_v28  ;;  %v1246_v38 = vadd.f32 %v1238_v25, %v1198_v28  ;;  %v1240_v11 = vld [vmem:[%s2293_s2 + $0x38] sm:$0xff] }
 0x231   : > { %1844 = vrsqrt.f32 %v1259_v26  ;;  %v1261_v36 = vadd.f32 1e-05, %v1228_v27  ;;  %v1262_v40 = vadd.f32 1e-05, %v1229_v32  ;;  %v1215_v41 = vmul.f32 0.015625, %v1207_v30 }
 0x232   : > { %1846 = vrsqrt.f32 %v1260_v31  ;;  %v1223_v13 = vmul.f32 %v1199_v33, %v1199_v33  ;;  %v1230_v42 = vsub.f32 %v1214_v29, %v1222_v37  ;;  %1255 = vst.msk [vmem:[%s2036_s18 + $0x28] sm:$0xff] %vm1249_vm2, %v1246_v38  ;;  %v1247_v10 = vadd.f32 %v1239_v34, %v1199_v33 }
 0x233   : > { %1848 = vrsqrt.f32 %v1261_v36  ;;  %v1200_v43 = vmul.f32 0.015625, %v1192_v35  ;;  %v1216_v44 = vmul.f32 0.015625, %v1208_v39 }
 0x234   : > { %1850 = vrsqrt.f32 %v1262_v40  ;;  %v1231_v12 = vsub.f32 %v1215_v41, %v1223_v13  ;;  %v1263_v15 = vadd.f32 1e-05, %v1230_v42  ;;  %1256 = vst.msk [vmem:[%s2036_s18 + $0x30] sm:$0xff] %vm1249_vm2, %v1247_v10 }
 0x235   : > { %v1224_v16 = vmul.f32 %v1200_v43, %v1200_v43  ;;  %v1248_v45 = vadd.f32 %v1240_v11, %v1200_v43 }
 0x236   : > { %v1264_v46 = vadd.f32 1e-05, %v1231_v12  ;;  %1852 = vrsqrt.f32 %v1263_v15 }
 0x237   : > { %v1232_v47 = vsub.f32 %v1216_v44, %v1224_v16  ;;  %1257 = vst.msk [vmem:[%s2036_s18 + $0x38] sm:$0xff] %vm1249_vm2, %v1248_v45 }
 0x238   : > { %1854 = vrsqrt.f32 %v1264_v46 }
 0x239   : > { %v1265_v17 = vadd.f32 1e-05, %v1232_v47 }
 0x23a   : > { %v1843_v18 = vpop.eup %1842 }
 0x23b   : > { %v1845_v48 = vpop.eup %1844  ;;  %1274 = vst.msk [vmem:[%s2041_s12] sm:$0xff] %vm1249_vm2, %v1843_v18  ;;  %1856 = vrsqrt.f32 %v1265_v17 }
 0x23c   : > { %v1847_v49 = vpop.eup %1846  ;;  %1275 = vst.msk [vmem:[%s2041_s12 + $0x8] sm:$0xff] %vm1249_vm2, %v1845_v48 }
 0x23d   : > { %v1849_v50 = vpop.eup %1848  ;;  %1276 = vst.msk [vmem:[%s2041_s12 + $0x10] sm:$0xff] %vm1249_vm2, %v1847_v49 }
 0x23e   : > { %v1851_v51 = vpop.eup %1850  ;;  %1277 = vst.msk [vmem:[%s2041_s12 + $0x18] sm:$0xff] %vm1249_vm2, %v1849_v50 }
 0x23f   : > { %1278 = vst.msk [vmem:[%s2041_s12 + $0x20] sm:$0xff] %vm1249_vm2, %v1851_v51 }
 0x240   : > { %v1853_v52 = vpop.eup %1852 }
 0x241   : > { %1279 = vst.msk [vmem:[%s2041_s12 + $0x28] sm:$0xff] %vm1249_vm2, %v1853_v52 }
 0x242   : > { %v1855_v53 = vpop.eup %1854 }
 0x243   : > { %1280 = vst.msk [vmem:[%s2041_s12 + $0x30] sm:$0xff] %vm1249_vm2, %v1855_v53 }
 0x245   : > { %v1857_v54 = vpop.eup %1856 }
 0x246   : > { %1281 = vst.msk [vmem:[%s2041_s12 + $0x38] sm:$0xff] %vm1249_vm2, %v1857_v54 }
 0x247 PF: > { %s16_s24 = sadd.s32 1, %s1912_s24   ;;  %s2302_s9 = sld [smem:[#allocation6_spill]] }
 0x248   : > { %p13_p2 = scmp.ge.s32.totalorder %s16_s24, 22   ;;  %s2303_s10 = sld [smem:[#allocation7_spill]] }
 0x249   : > { %s2304_s18 = smov %s1892_s19  ;;  %s2305_s19 = smov %s1996_s29 }
 0x24a   : > { %s2306_s20 = smov %s1904_s22  ;;  %s2307_s21 = smov %s1908_s23 }
 0x24b   :  { %15 = sbr.rel (!%p13_p2) target bundleno = 6 (0x6), region = 136 }
 0x24d   : > { %s2308_s22 = smov %s2302_s9 }
 0x24e   : > { %s2309_s23 = smov %s2303_s10 }

// kernel: gnet_forward.21
= control target key start
LH: loop header
LB: loop body
LE: loop exit
PB: predicated region body
PF: predicated region fallthrough
CT: control target
= control target key end

     0   :  { %11 = vsyncpa [#allocation6], 0  ;;  %s1324_s0 = inlined_call_operand.vmem [shape: bf16[16,128], index: 0, kind: input, shape index: {}]   ;;  %s1325_s1 = inlined_call_operand.vmem [shape: bf16[2,128,128], index: 1, kind: input, shape index: {}]   ;;  %s1326_s2 = inlined_call_operand.vmem [shape: f32[16,1], index: 2, kind: input, shape index: {}]   ;;  %s1327_s3 = inlined_call_operand.vmem [shape: f32[2,16,128], index: 3, kind: output, shape index: {0}]   ;;  %s1328_s4 = inlined_call_operand.hbm [shape: f32[2,16,1], index: 4, kind: output, shape index: {1}]   ;;  %s1329_s5 = inlined_call_operand.hbm [shape: f32[2,16,1], index: 5, kind: output, shape index: {2}]  }
   0x1   :  { %13 = vsyncpa [#allocation6 + $0x1], 0 }
   0x2   :  { %14 = vsyncpa [#allocation8], 0 }
   0x3   :  { %16 = vsyncpa [#allocation8 + $0x1], 0  ;;  %s1133_s18 = smov 0   ;;  %s1135_s19 = smov 0  }
   0x4   :  { %s1137_s20 = smov 0   ;;  %s1139_s21 = smov 0  }
   0x5   :  { %s1141_s22 = smov 0   ;;  %s1143_s23 = smov 0  }
   0x6 LB: > { %s841_s24 = sadd.s32 4294967295, %s1094_s23   ;;  %s842_s25 = sadd.s32 4294967294, %s1094_s23   ;;  %s1094_s23 = sphi %s1143_s23, %s22_s23   ;;  %s1090_s22 = sphi %s1141_s22, %s1336_s22   ;;  %s1086_s21 = sphi %s1139_s21, %s1335_s21   ;;  %s1082_s20 = sphi %s1137_s20, %s1334_s20   ;;  %s1078_s19 = sphi %s1135_s19, %s1333_s19   ;;  %s1074_s18 = sphi %s1133_s18, %s1332_s18  }
   0x7   : > { %s48_s26 = sadd.s32 1, %s1090_s22  ;;  %s171_s27 = sadd.s32 1, %s1082_s20 }
   0x8   : > { %p50_p0 = scmp.ge.s32.totalorder %s48_s26, 2  ;;  %p181_p1 = scmp.ne.s32.totalorder %s1082_s20, %s1078_s19 }
   0x9   : > { %p182_p2 = scmp.eq.s32.totalorder %s841_s24, 1  ;;  %p187_p3 = scmp.ne.s32.totalorder %s1078_s19, %s1074_s18 }
   0xa   : > { %s1338_s26 = smov (%p50_p0, %s48_s26), 0  ;;  %p188_p5 = scmp.eq.s32.totalorder %s842_s25, 1 }
   0xb   : > { %p1173_p4 = por %p182_p2, %p181_p1  ;;  %s166_s29 = ssub.s32 %s1090_s22, %s1338_s26 }
   0xc   : > { %p847_p6 = scmp.ge.s32.totalorder %s1094_s23, 1  ;;  %p169_p7 = scmp.eq.s32.totalorder %s166_s29, 0 }
   0xd   : > { %p1180_p8 = por %p188_p5, %p187_p3  ;;  %p271_p9 = scmp.lt.s32.totalorder %s1094_s23, 3 }
   0xe   : > { %s1186_s6 = scalar_select %p169_p7, %s1082_s20, %s171_s27  }
   0xf   : > { %p272_p10 = pnand %p847_p6, %p271_p9 }
  0x10   : > { %p346_p11 = scmp.lt.s32.totalorder (!%p272_p10), %s1086_s21, 1  ;;  %v1096_v0 = vmov (!%p272_p10), 0.0   ;;  %vm1097_vm0 = vmmov (!%p272_p10), 0   ;;  %v979_v9 = vld [vmem:[%s1324_s0] sm:$0xff] (!%p272_p10)   ;;  %v1098_v10 = vmov (!%p272_p10), 0   ;;  %vm391_vm1 = vcmask (!%p272_p10), 7168  }
  0x11   : > { %275 = sbr.rel (%p272_p10) target bundleno = 472 (0x1d8), region = 32  ;;  %884 = vmatprep.subr.bf16.mxu0 (!%p272_p10), %v1096_v0  ;;  %900 = vmatprep.mubr.msk.bf16.mxu0 (!%p272_p10), %vm1097_vm0, %v1096_v0  ;;  %392 = vst.msk [vmem:[#allocation3] sm:$0xff] (!%p272_p10), %vm391_vm1, %v1096_v0  ;;  %393 = vst.msk [vmem:[#allocation3 + $0x8] sm:$0xff] (!%p272_p10), %vm391_vm1, %v1096_v0  ;;  %v544_v17 = vld [vmem:[%s1326_s2 + $0x8] sm:$0xff] (!%p272_p10)  ;;  %v543_v18 = vld [vmem:[%s1326_s2] sm:$0xff] (!%p272_p10)  ;;  %s1212_s24 = sand.u32 (!%p272_p10), 1, %s1078_s19  }
  0x12   : > { %970 = vset.pattern.permute.xlu1 (!%p272_p10), %v1098_v10  ;;  %969 = vset.pattern.permute.xlu0 (!%p272_p10), %v1098_v10  ;;  %394 = vst.msk [vmem:[#allocation4] sm:$0xff] (!%p272_p10), %vm391_vm1, %v1096_v0  ;;  %395 = vst.msk [vmem:[#allocation4 + $0x8] sm:$0xff] (!%p272_p10), %vm391_vm1, %v1096_v0  ;;  %s848_s27 = sshll.u32 (!%p272_p10), %s1212_s24, 4  ;;  %s599_s15 = scalar_lea.sflag (!%p272_p10), [#allocation6], %s1212_s24 }
  0x13   : > { %s328_s10 = scalar_lea.vmem (!%p272_p10), [#allocation5], %s848_s27  ;;  %s1099_s17 = smov (!%p272_p10), [#allocation5]  }
  0x18   : > { %s1190_s7 = scalar_select %p346_p11, %s1086_s21, 1  ;;  %v520_v19 = vld [vmem:[#allocation3] sm:$0xff]  ;;  %v521_v24 = vld [vmem:[#allocation3 + $0x8] sm:$0xff] }
  0x19   : > { %v531_v21 = vld [vmem:[#allocation4] sm:$0xff]  ;;  %v532_v27 = vld [vmem:[#allocation4 + $0x8] sm:$0xff] }
  0x1a   : > { %s871_s8 = sshll.u32 %s1190_s7, 6  ;;  %s872_s25 = sshll.u32 %s1190_s7, 4 }
  0x1b   : > { %s356_s11 = scalar_lea.vmem %s1325_s1, %s871_s8  ;;  %s375_s9 = scalar_lea.vmem %s1327_s3, %s872_s25 }
  0x1c   : > { %v971_v1 = vld [vmem:[%s356_s11] sm:$0xff]   ;;  %v972_v2 = vld [vmem:[%s356_s11 + $0x8] sm:$0xff]   ;;  %v973_v3 = vld [vmem:[%s356_s11 + $0x10] sm:$0xff]   ;;  %s873_s7 = sshll.u32 %s1086_s21, 8  ;;  %s988_s25 = sshll.u32 %s1099_s17, 4  ;;  %s989_s25 = int_to_ptr.vmem [resolvable:$false] %s988_s25 }
  0x1d   : > { %885 = vmatpush3.bf16.msra.mxu0 %v971_v1  ;;  %v974_v4 = vld [vmem:[%s356_s11 + $0x18] sm:$0xff]   ;;  %v975_v5 = vld [vmem:[%s356_s11 + $0x20] sm:$0xff]   ;;  %v976_v6 = vld [vmem:[%s356_s11 + $0x28] sm:$0xff]   ;;  %s1230_s14 = scalar_lea.hbm %s1328_s4, %s873_s7  ;;  %s990_s29 = scalar_lea.vmem %s989_s25, 512 }
  0x1e   : > { %886 = vmatprep.subr.bf16.mxu0 %v1096_v0  ;;  %v977_v7 = vld [vmem:[%s356_s11 + $0x30] sm:$0xff]   ;;  %v978_v8 = vld [vmem:[%s356_s11 + $0x38] sm:$0xff]   ;;  %s623_s11 = sshll.u32 %s328_s10, 4  ;;  %s1232_s11 = int_to_ptr.vmem [resolvable:$true] %s623_s11 }
  0x1f   : > { %s984_s16 = scalar_lea.vmem %s1232_s11, 256  ;;  %p991_p1 = scmp.lt.s32.totalorder %s1232_s11, %s989_s25 }
  0x20   : > { %p985_p12 = scmp.ne.s32.totalorder %s1232_s11, %s984_s16  ;;  %p992_p2 = scmp.lt.s32.totalorder %s990_s29, %s984_s16 }
  0x21   : > { %887 = vmatpush3.bf16.msra.mxu0 %v972_v2 }
  0x22   : > { %888 = vmatprep.subr.bf16.mxu0 %v1096_v0  ;;  %p986_p13 = pnand %p985_p12, %p1173_p4  ;;  %p993_p3 = por %p992_p2, %p991_p1 }
  0x24   : > { %p987_p0 = pneg %p986_p13 }
  0x25   : > { %889 = vmatpush3.bf16.msra.mxu0 %v973_v3 }
  0x26   : > { %890 = vmatprep.subr.bf16.mxu0 %v1096_v0  ;;  %p994_p5 = pnand %p993_p3, %p987_p0 }
  0x29   : > { %891 = vmatpush3.bf16.msra.mxu0 %v974_v4 }
  0x2a   : > { %892 = vmatprep.subr.bf16.mxu0 %v1096_v0 }
  0x2d   : > { %893 = vmatpush3.bf16.msra.mxu0 %v975_v5 }
  0x2e   : > { %894 = vmatprep.subr.bf16.mxu0 %v1096_v0 }
  0x31   : > { %895 = vmatpush3.bf16.msra.mxu0 %v976_v6 }
  0x32   : > { %896 = vmatprep.subr.bf16.mxu0 %v1096_v0 }
  0x35   : > { %897 = vmatpush3.bf16.msra.mxu0 %v977_v7 }
  0x36   : > { %898 = vmatprep.subr.bf16.mxu0 %v1096_v0 }
  0x39   : > { %899 = vmatpush3.bf16.msra.mxu0 %v978_v8 }
  0x3c   : > { %901 = vmatmul.mubr.bf16.vlgmr.msra.gmra.mrb[0].mxu0 %v979_v9 }
 0x10f   : > { %v504_v11 = vpop.f32.mrb[0].mxu0 }
 0x110   : > { %522 = vadd.xlane.f32.xlu0 %v504_v11  ;;  %v902_v12 = vpop.f32.mrb[1].mxu0  ;;  %v533_v13 = vmul.f32 %v504_v11, %v504_v11 }
 0x111   : > { %v507_v14 = vpop.f32.mrb[2].mxu0 }
 0x112   : > { %535 = vadd.xlane.f32.xlu1 %v533_v13  ;;  %v903_v15 = vpop.f32.mrb[3].mxu0  ;;  %v534_v16 = vmul.f32 %v507_v14, %v507_v14 }
 0x114   : > { %524 = vadd.xlane.f32.xlu0 %v507_v14 }
 0x116   : > { %537 = vadd.xlane.f32.xlu1 %v534_v16 }
 0x127   : > { %552 = vperm.xlu1 %970, %v544_v17  }
 0x12a   : > { %547 = vperm.xlu0 %969, %v543_v18  }
 0x19d   : > { %v523_v20 = vpop.xlane.xlu0 %522 }
 0x19e   : > { %v526_v22 = vadd.f32 %v523_v20, %v520_v19 }
 0x19f   : > { %v536_v23 = vpop.xlane.xlu1 %535 }
 0x1a0   : > { %529 = vst.msk [vmem:[#allocation3] sm:$0xff] %vm391_vm1, %v526_v22  ;;  %v539_v25 = vadd.f32 %v536_v23, %v531_v21 }
 0x1a1   : > { %v525_v26 = vpop.xlane.xlu0 %524 }
 0x1a2   : > { %541 = vst.msk [vmem:[#allocation4] sm:$0xff] %vm391_vm1, %v539_v25  ;;  %v527_v28 = vadd.f32 %v525_v26, %v521_v24 }
 0x1a3   : > { %v538_v29 = vpop.xlane.xlu1 %537 }
 0x1a4   : > { %530 = vst.msk [vmem:[#allocation3 + $0x8] sm:$0xff] %vm391_vm1, %v527_v28  ;;  %v540_v30 = vadd.f32 %v538_v29, %v532_v27 }
 0x1a6   : > { %542 = vst.msk [vmem:[#allocation4 + $0x8] sm:$0xff] %vm391_vm1, %v540_v30 }
 0x1a7   : > { %v553_v31 = vpop.permute.xlu1 %552  ;;  %v561_v32 = vld [vmem:[#allocation3] sm:$0xff] }
 0x1a8   : > { %v556_v33 = vadd.f32 %v553_v31, %v507_v14  ;;  %v563_v34 = vmul.f32 0.015625, %v561_v32 }
 0x1a9   : > { %v548_v35 = vpop.permute.xlu0 %547  ;;  %v565_v36 = vld [vmem:[#allocation4] sm:$0xff] }
 0x1aa   : > { %558 = vst [vmem:[%s375_s9 + $0x8] sm:$0xff] %v556_v33  ;;  %v555_v37 = vadd.f32 %v548_v35, %v504_v11  ;;  %v567_v38 = vmul.f32 0.015625, %v565_v36  ;;  %v569_v39 = vmul.f32 %v563_v34, %v563_v34  ;;  %v575_v40 = vadd.f32 %v563_v34, %v543_v18 }
 0x1ab   : > { %v562_v41 = vld [vmem:[#allocation3 + $0x8] sm:$0xff] }
 0x1ac   : > { %557 = vst [vmem:[%s375_s9] sm:$0xff] %v555_v37  ;;  %v564_v42 = vmul.f32 0.015625, %v562_v41  ;;  %v571_v43 = vsub.f32 %v567_v38, %v569_v39  ;;  %578 = vst.msk [vmem:[%s328_s10] sm:$0xff] %vm391_vm1, %v575_v40 }
 0x1ad   : > { %v566_v44 = vld [vmem:[#allocation4 + $0x8] sm:$0xff] }
 0x1ae   : > { %v568_v45 = vmul.f32 0.015625, %v566_v44  ;;  %v570_v46 = vmul.f32 %v564_v42, %v564_v42  ;;  %v576_v47 = vadd.f32 %v564_v42, %v544_v17  ;;  %v580_v48 = vadd.f32 1e-05, %v571_v43 }
 0x1b0   : > { %v572_v49 = vsub.f32 %v568_v45, %v570_v46  ;;  %579 = vst.msk [vmem:[%s328_s10 + $0x8] sm:$0xff] %vm391_vm1, %v576_v47  ;;  %980 = vrsqrt.f32 %v580_v48 }
 0x1b1   : > { %997 = shalt.err (!%p994_p5)
}
 0x1b2   : > { %s998_s8 = scalar_lea.hbm %s1230_s14, 256  ;;  %s1002_s12 = scalar_lea.hbm %s1328_s4, 512 }
 0x1b3   : > { %p999_p6 = scmp.ne.s32.totalorder %s1230_s14, %s998_s8  ;;  %p1003_p10 = scmp.lt.u32.totalorder %s1230_s14, %s1328_s4 }
 0x1b4   : > { %p1004_p11 = scmp.lt.u32.totalorder %s1002_s12, %s998_s8  ;;  %p1006_p13 = scmp.lt.u32.totalorder %s998_s8, %s1230_s14 }
 0x1b5   : > { %p1000_p7 = pnand %p999_p6, %p1173_p4 }
 0x1b6   : > { %p1005_p12 = por %p1004_p11, %p1003_p10 }
 0x1b7   : > { %p1001_p9 = pneg %p1000_p7 }
 0x1b8   : > { %p1007_p0 = por %p1006_p13, %p1005_p12 }
 0x1ba   : > { %p1008_p1 = pnand %p1007_p0, %p1001_p9 }
 0x1bc   : > { %1011 = shalt.err (!%p1008_p1)
}
 0x1bd   : > { %s1100_s16 = smov 128   ;;  %s1101_s25 = smov 8   ;;  %v581_v50 = vadd.f32 1e-05, %v572_v49  ;;  %v981_v51 = vpop.eup %980 }
 0x1be   : > { %904 = dma.vmem_to_hbm [thread:$0]  (%p1173_p4), %s1232_s11, 256, %s1230_s14, %s599_s15, %s1100_s16, %s1100_s16, %s1101_s25  }
 0x1bf   : > { %982 = vrsqrt.f32 %v581_v50  ;;  %s335_s29 = scalar_lea.vmem [#allocation7], %s848_s27  ;;  %s1270_s12 = scalar_lea.hbm %s1329_s5, %s873_s7 }
 0x1c0   : > { %s641_s8 = sshll.u32 %s335_s29, 4  ;;  %584 = vst.msk [vmem:[%s335_s29] sm:$0xff] %vm391_vm1, %v981_v51  ;;  %s604_s11 = scalar_lea.sflag [#allocation8], %s1212_s24  ;;  %s1272_s8 = int_to_ptr.vmem [resolvable:$true] %s641_s8 }
 0x1c1   : > { %s1012_s14 = scalar_lea.vmem %s1272_s8, 256  ;;  %s1102_s21 = smov [#allocation7]  }
 0x1c2   : > { %p1013_p2 = scmp.ne.s32.totalorder %s1272_s8, %s1012_s14  ;;  %s1016_s27 = sshll.u32 %s1102_s21, 4  ;;  %s1017_s27 = int_to_ptr.vmem [resolvable:$false] %s1016_s27 }
 0x1c3   : > { %s1018_s15 = scalar_lea.vmem %s1017_s27, 512  ;;  %p1019_p6 = scmp.lt.s32.totalorder %s1272_s8, %s1017_s27 }
 0x1c4   : > { %p1014_p3 = pnand %p1013_p2, %p1173_p4  ;;  %p1020_p7 = scmp.lt.s32.totalorder %s1018_s15, %s1012_s14 }
 0x1c6   : > { %p1015_p5 = pneg %p1014_p3  ;;  %p1021_p9 = por %p1020_p7, %p1019_p6 }
 0x1c8   : > { %p1022_p10 = pnand %p1021_p9, %p1015_p5 }
 0x1c9   : > { %v983_v52 = vpop.eup %982 }
 0x1ca   : > { %585 = vst.msk [vmem:[%s335_s29 + $0x8] sm:$0xff] %vm391_vm1, %v983_v52 }
 0x1cb   : > { %1025 = shalt.err (!%p1022_p10)
}
 0x1cc   : > { %s1026_s7 = scalar_lea.hbm %s1270_s12, 256  ;;  %s1030_s29 = scalar_lea.hbm %s1329_s5, 512 }
 0x1cd   : > { %p1027_p11 = scmp.ne.s32.totalorder %s1270_s12, %s1026_s7  ;;  %p1031_p0 = scmp.lt.u32.totalorder %s1270_s12, %s1329_s5 }
 0x1ce   : > { %p1032_p1 = scmp.lt.u32.totalorder %s1030_s29, %s1026_s7  ;;  %p1034_p3 = scmp.lt.u32.totalorder %s1026_s7, %s1270_s12 }
 0x1cf   : > { %p1028_p12 = pnand %p1027_p11, %p1173_p4 }
 0x1d0   : > { %p1033_p2 = por %p1032_p1, %p1031_p0 }
 0x1d1   : > { %p1029_p13 = pneg %p1028_p12 }
 0x1d2   : > { %p1035_p5 = por %p1034_p3, %p1033_p2 }
 0x1d4   : > { %p1036_p6 = pnand %p1035_p5, %p1029_p13 }
 0x1d6   : > { %1039 = shalt.err (!%p1036_p6)
}
 0x1d7   : > { %905 = dma.vmem_to_hbm [thread:$0]  (%p1173_p4), %s1272_s8, 256, %s1270_s12, %s604_s11, %s1100_s16, %s1100_s16, %s1101_s25  }
 0x1d8 PF: > { %p915_p7 = scmp.ge.s32.totalorder %s1094_s23, 2  ;;  %s671_s14 = sand.u32 1, %s1074_s18  }
 0x1d9   : > { %s672_s21 = scalar_lea.sflag [#allocation6], %s671_s14 }
 0x1da   : > { %p909_p9 = pnand %p915_p7, %p1180_p8 }
 0x1dc   : > { %1065 = dma.done.wait (!%p909_p9), %s672_s21, 256  }
 0x1dd   : > { %1067 = vsyncadd (!%p909_p9), %s672_s21, 4294967040  ;;  %s681_s28 = scalar_lea.sflag [#allocation8], %s671_s14 }
 0x1de   : > { %1069 = dma.done.wait (!%p909_p9), %s681_s28, 256  }
 0x1df   : > { %1071 = vsyncadd (!%p909_p9), %s681_s28, 4294967040  ;;  %s22_s23 = sadd.s32 1, %s1094_s23   ;;  %s1332_s18 = smov %s1078_s19 }
 0x1e0   : > { %p19_p10 = scmp.ge.s32.totalorder %s22_s23, 4   ;;  %s1333_s19 = smov %s1082_s20 }
 0x1e1   : > { %s1334_s20 = smov %s1186_s6  ;;  %s1335_s21 = smov %s1090_s22 }
 0x1e2   : > { %s1336_s22 = smov %s1338_s26  ;;  %21 = sbr.rel (!%p19_p10) target bundleno = 6 (0x6), region = 118 }
 0x1e9   :  { %686 = vsyncpa [#allocation6], 1 }
 0x1ea   :  { %688 = vsyncpa [#allocation6 + $0x1], 1 }
 0x1eb   :  { %689 = vsyncpa [#allocation8], 1 }
 0x1ec   :  { %691 = vsyncpa [#allocation8 + $0x1], 1 }

</bundles_post_ra>
